<compile_context>
chip_gen: v6e
topology: v6e:2x2x1
jax: 0.10.0
libtpu: 0.0.40
codegen_flags: <defaults>
</compile_context>

<pallas_src>
import functools

import jax
import jax.numpy as jnp
from jax.experimental import pallas as pl
from jax.experimental.pallas import tpu as pltpu


# ----------------------------------------------------------------------------
# Pallas kernel: one full Block (conv -> BN -> ReLU -> conv -> BN)
# ----------------------------------------------------------------------------
def _block_kernel(x_ref, w1_ref, g1_ref, be1_ref, w2_ref, g2_ref, be2_ref,
                  o_ref, a_ref, *, nhw, width, hw, ho1, wo1, ho2, wo2,
                  halo, inv_cnt1, inv_cnt2, eps):
    """Fused Block on a flattened (N*H*W, C) canvas kept in VMEM.

    x_ref  : (Mp, Cin_p)     bf16 input canvas (rows/channels zero-padded)
    w1_ref : (9*Cin_p, C)    bf16 conv1 weights, tap-major rows
    w2_ref : (9*C, C)        bf16 conv2 weights, tap-major rows
    g*/be* : (1, C)          f32 BN gamma / beta
    o_ref  : (nhw, C)        f32 conv2+BN2 output canvas
    a_ref  : (Mp, C)         bf16 VMEM scratch for the intermediate activation
    """
    c_out = o_ref.shape[1]

    # ---- valid-row masks, computed in-kernel (no HBM mask inputs) ----------
    # Decompose the flattened canvas row r into (y, x) of its image using
    # float multiply + floor (avoids integer vector div/mod, which may not
    # lower for non-power-of-2 widths).  Values stay exact small integers.
    r = jax.lax.broadcasted_iota(jnp.int32, (nhw, 1), 0).astype(jnp.float32)
    q1 = jnp.floor((r + 0.5) * (1.0 / float(hw)))
    pos = r - q1 * float(hw)                      # y*W + x within the image
    q2 = jnp.floor((pos + 0.5) * (1.0 / float(width)))
    xx = pos - q2 * float(width)                  # x coordinate
    yy = q2                                       # y coordinate
    msk1 = (yy < float(ho1)) & (xx < float(wo1))  # valid after conv1
    msk2 = (yy < float(ho2)) & (xx < float(wo2))  # valid after conv2

    def _im2col(ref):
        # Fold the 9 conv taps into the MXU contraction dim: concatenate the
        # nine row-shifted canvas slices along lanes -> (nhw, 9*C_in).
        return jnp.concatenate(
            [ref[pl.ds(dy * width + dx, nhw), :]
             for dy in range(3) for dx in range(3)], axis=-1)

    # ---- conv1: one MXU matmul, K = 9*Cin_p (bias cancelled by BN) ---------
    acc1 = jnp.dot(_im2col(x_ref), w1_ref[...],
                   preferred_element_type=jnp.float32)

    # ---- BN1 (training-mode batch stats, one-pass variance in f32) + ReLU --
    # NOTE(synk): one-pass E[y^2]-mean^2 is fine at toy scale; switch to a
    # shifted / two-pass variance once activations and tile counts grow.
    a1m = jnp.where(msk1, acc1, 0.0)
    mean1 = jnp.sum(a1m, axis=0, keepdims=True) * inv_cnt1
    var1 = jnp.sum(a1m * a1m, axis=0, keepdims=True) * inv_cnt1 - mean1 * mean1
    y1 = (acc1 - mean1) * jax.lax.rsqrt(var1 + eps) * g1_ref[...] + be1_ref[...]
    y1 = jnp.maximum(y1, 0.0)
    # Invalid rows of y1 are finite garbage; conv2's *valid* outputs never
    # read them (3x3 valid-conv halo stays inside the conv1-valid region),
    # so no extra masking pass is needed here.

    # ---- intermediate canvas in VMEM (bf16); zero ONLY the halo tail rows --
    a_ref[pl.ds(nhw, halo), :] = jnp.zeros((halo, c_out), dtype=a_ref.dtype)
    a_ref[pl.ds(0, nhw), :] = y1.astype(a_ref.dtype)

    # ---- conv2: one MXU matmul, K = 9*C ------------------------------------
    acc2 = jnp.dot(_im2col(a_ref), w2_ref[...],
                   preferred_element_type=jnp.float32)

    # ---- BN2 (no ReLU) ------------------------------------------------------
    a2m = jnp.where(msk2, acc2, 0.0)
    mean2 = jnp.sum(a2m, axis=0, keepdims=True) * inv_cnt2
    var2 = jnp.sum(a2m * a2m, axis=0, keepdims=True) * inv_cnt2 - mean2 * mean2
    y2 = (acc2 - mean2) * jax.lax.rsqrt(var2 + eps) * g2_ref[...] + be2_ref[...]
    o_ref[...] = y2.astype(o_ref.dtype)


# ----------------------------------------------------------------------------
# Wrappers (thin XLA glue)
# ----------------------------------------------------------------------------
def _full_spec(shape):
    nd = len(shape)
    return pl.BlockSpec(shape, lambda i: (0,) * nd)


def _block_forward(x_nhwc, p, *, eps=1e-5):
    """One Block on an NHWC input; returns the NHWC feature (valid region)."""
    n, h, w, cin = x_nhwc.shape
    ho1, wo1 = h - 2, w - 2            # after conv1
    ho2, wo2 = h - 4, w - 4            # after conv2
    nhw = n * h * w
    mp = -(-(nhw + 2 * w + 2) // 8) * 8   # padded canvas rows (>= nhw + 2W+2)

    w1 = p["w1"]                       # (9*cin_p, c_out) bf16
    cin_p = w1.shape[0] // 9
    c_out = w1.shape[1]

    # bf16 canvas for the MXU; padded rows/channels are zeros.
    x_flat = x_nhwc.reshape(nhw, cin).astype(jnp.bfloat16)
    x_flat = jnp.pad(x_flat, ((0, mp - nhw), (0, cin_p - cin)))

    kernel = functools.partial(
        _block_kernel, nhw=nhw, width=w, hw=h * w,
        ho1=ho1, wo1=wo1, ho2=ho2, wo2=wo2, halo=mp - nhw,
        inv_cnt1=1.0 / float(n * ho1 * wo1),
        inv_cnt2=1.0 / float(n * ho2 * wo2), eps=eps)

    # NOTE: grid=(1,) whole-array blocks (shapes here are tiny, < 1 MiB);
    # default double-buffering of the canvas is accepted at this size.
    # TODO(synk): lane-dense output layout (fold spatial rows into lanes) for
    # small-C stages, and a pooled second output fused into the epilogue.
    o = pl.pallas_call(
        kernel,
        out_shape=jax.ShapeDtypeStruct((nhw, c_out), jnp.float32),
        grid=(1,),
        in_specs=[
            _full_spec((mp, cin_p)),
            _full_spec(tuple(w1.shape)),
            _full_spec((1, c_out)),
            _full_spec((1, c_out)),
            _full_spec(tuple(p["w2"].shape)),
            _full_spec((1, c_out)),
            _full_spec((1, c_out)),
        ],
        out_specs=_full_spec((nhw, c_out)),
        scratch_shapes=[pltpu.VMEM((mp, c_out), jnp.bfloat16)],
        compiler_params=pltpu.CompilerParams(
            dimension_semantics=("arbitrary",),
            vmem_limit_bytes=64 * 1024 * 1024),
    )(x_flat, w1, p["g1"], p["be1"], p["w2"], p["g2"], p["be2"])

    # Extract the valid (Ho2, Wo2) window of each image from the canvas.
    return o.reshape(n, h, w, c_out)[:, :ho2, :wo2, :]


def _maxpool2(x):
    """nn.MaxPool2d(2) on NHWC input (floor mode) — pure XLA strided maxes."""
    n, h, w, c = x.shape
    hp, wp = h // 2, w // 2
    x = x[:, :2 * hp, :2 * wp, :]
    a = jnp.maximum(x[:, 0::2, 0::2, :], x[:, 0::2, 1::2, :])
    b = jnp.maximum(x[:, 1::2, 0::2, :], x[:, 1::2, 1::2, :])
    return jnp.maximum(a, b)


def encoder_forward(x_nchw, params):
    """Encoder.forward: list of per-stage features (NCHW, like PyTorch)."""
    x = jnp.transpose(x_nchw, (0, 2, 3, 1))              # NCHW -> NHWC
    ftrs = []
    for i, p in enumerate(params):
        feat = _block_forward(x, p)                      # NHWC feature (pre-pool)
        ftrs.append(jnp.transpose(feat, (0, 3, 1, 2)))   # back to NCHW
        if i + 1 < len(params):                          # last pool result unused
            x = _maxpool2(feat)
    return ftrs


# ----------------------------------------------------------------------------
# Deterministic parameter construction
# ----------------------------------------------------------------------------
def init_params(key, chs):
    params = []
    for i in range(len(chs) - 1):
        cin, cout = chs[i], chs[i + 1]
        cin_p = -(-cin // 8) * 8                 # pad MXU K sub-group to mult of 8
        key, k1, k2 = jax.random.split(key, 3)
        # PyTorch conv weight layout (Cout, Cin, 3, 3) -> tap-major (9*Cin, Cout).
        w1 = 0.1 * jax.random.normal(k1, (cout, cin, 3, 3), jnp.float32)
        w1 = jnp.transpose(w1, (2, 3, 1, 0))                       # (ky,kx,cin,cout)
        w1 = jnp.pad(w1, ((0, 0), (0, 0), (0, cin_p - cin), (0, 0)))
        w1 = w1.reshape(9 * cin_p, cout).astype(jnp.bfloat16)
        w2 = 0.1 * jax.random.normal(k2, (cout, cout, 3, 3), jnp.float32)
        w2 = jnp.transpose(w2, (2, 3, 1, 0)).reshape(9 * cout, cout)
        w2 = w2.astype(jnp.bfloat16)
        # NOTE: conv biases are omitted — training-mode BatchNorm subtracts the
        # batch mean immediately after each conv, so they cancel exactly.
        params.append(dict(
            w1=w1,
            g1=jnp.ones((1, cout), jnp.float32),     # BN gamma init = 1
            be1=jnp.zeros((1, cout), jnp.float32),   # BN beta  init = 0
            w2=w2,
            g2=jnp.ones((1, cout), jnp.float32),
            be2=jnp.zeros((1, cout), jnp.float32),
        ))
    return params


# ----------------------------------------------------------------------------
if __name__ == "__main__":
    # Small shapes consistent with the module: chs=(3, 8, 16), 16x16 input.
    chs = (3, 8, 16)
    key = jax.random.PRNGKey(0)
    key, xkey = jax.random.split(key)
    x = jax.random.normal(xkey, (2, chs[0], 16, 16), jnp.float32)   # NCHW

    params = init_params(key, chs)
    ftrs = jax.jit(encoder_forward)(x, params)
    for f in ftrs:
        jax.block_until_ready(f)
    assert ftrs[0].shape == (2, 8, 12, 12), ftrs[0].shape
    assert ftrs[1].shape == (2, 16, 2, 2), ftrs[1].shape
    print("KERNEL_OK")
</pallas_src>

<mosaic_0001>
module attributes {stable_mosaic.version = 11 : i64} {
  func.func @_block_kernel(%arg0: i32, %arg1: memref<552x8xbf16, #tpu.memory_space<vmem>>, %arg2: memref<72x8xbf16, #tpu.memory_space<vmem>>, %arg3: memref<1x8xf32, #tpu.memory_space<vmem>>, %arg4: memref<1x8xf32, #tpu.memory_space<vmem>>, %arg5: memref<72x8xbf16, #tpu.memory_space<vmem>>, %arg6: memref<1x8xf32, #tpu.memory_space<vmem>>, %arg7: memref<1x8xf32, #tpu.memory_space<vmem>>, %arg8: memref<512x8xf32, #tpu.memory_space<vmem>>, %arg9: memref<552x8xbf16, #tpu.memory_space<vmem>>) attributes {dimension_semantics = [#tpu.dimension_semantics<arbitrary>], iteration_bounds = array<i64: 1>, scalar_prefetch = 0 : i64, scratch_operands = 1 : i64, tpu.core_type = #tpu.core_type<tc>, window_params = [{pipeline_mode = #tpu.pipeline_mode<synchronous>, transform_indices = @transform_0, window_bounds = array<i64: 552, 8>}, {pipeline_mode = #tpu.pipeline_mode<synchronous>, transform_indices = @transform_1, window_bounds = array<i64: 72, 8>}, {pipeline_mode = #tpu.pipeline_mode<synchronous>, transform_indices = @transform_2, window_bounds = array<i64: 1, 8>}, {pipeline_mode = #tpu.pipeline_mode<synchronous>, transform_indices = @transform_3, window_bounds = array<i64: 1, 8>}, {pipeline_mode = #tpu.pipeline_mode<synchronous>, transform_indices = @transform_4, window_bounds = array<i64: 72, 8>}, {pipeline_mode = #tpu.pipeline_mode<synchronous>, transform_indices = @transform_5, window_bounds = array<i64: 1, 8>}, {pipeline_mode = #tpu.pipeline_mode<synchronous>, transform_indices = @transform_6, window_bounds = array<i64: 1, 8>}, {pipeline_mode = #tpu.pipeline_mode<synchronous>, transform_indices = @transform_7, window_bounds = array<i64: 512, 8>}]} {
    %0 = tpu.iota {dimensions = array<i32: 0>} : vector<512x1xi32>
    %1 = arith.sitofp %0 : vector<512x1xi32> to vector<512x1xf32>
    %cst = arith.constant 5.000000e-01 : f32
    %2 = vector.broadcast %cst : f32 to vector<512x1xf32>
    %3 = arith.addf %1, %2 : vector<512x1xf32>
    %cst_0 = arith.constant 3.906250e-03 : f32
    %4 = vector.broadcast %cst_0 : f32 to vector<512x1xf32>
    %5 = arith.mulf %3, %4 : vector<512x1xf32>
    %6 = math.floor %5 : vector<512x1xf32>
    %cst_1 = arith.constant 2.560000e+02 : f32
    %7 = vector.broadcast %cst_1 : f32 to vector<512x1xf32>
    %8 = arith.mulf %6, %7 : vector<512x1xf32>
    %9 = arith.subf %1, %8 : vector<512x1xf32>
    %cst_2 = arith.constant 5.000000e-01 : f32
    %10 = vector.broadcast %cst_2 : f32 to vector<512x1xf32>
    %11 = arith.addf %9, %10 : vector<512x1xf32>
    %cst_3 = arith.constant 6.250000e-02 : f32
    %12 = vector.broadcast %cst_3 : f32 to vector<512x1xf32>
    %13 = arith.mulf %11, %12 : vector<512x1xf32>
    %14 = math.floor %13 : vector<512x1xf32>
    %cst_4 = arith.constant 1.600000e+01 : f32
    %15 = vector.broadcast %cst_4 : f32 to vector<512x1xf32>
    %16 = arith.mulf %14, %15 : vector<512x1xf32>
    %17 = arith.subf %9, %16 : vector<512x1xf32>
    %cst_5 = arith.constant 1.400000e+01 : f32
    %18 = vector.broadcast %cst_5 : f32 to vector<512x1xf32>
    %19 = arith.cmpf olt, %14, %18 : vector<512x1xf32>
    %cst_6 = arith.constant 1.400000e+01 : f32
    %20 = vector.broadcast %cst_6 : f32 to vector<512x1xf32>
    %21 = arith.cmpf olt, %17, %20 : vector<512x1xf32>
    %22 = arith.andi %19, %21 : vector<512x1xi1>
    %cst_7 = arith.constant 1.200000e+01 : f32
    %23 = vector.broadcast %cst_7 : f32 to vector<512x1xf32>
    %24 = arith.cmpf olt, %14, %23 : vector<512x1xf32>
    %cst_8 = arith.constant 1.200000e+01 : f32
    %25 = vector.broadcast %cst_8 : f32 to vector<512x1xf32>
    %26 = arith.cmpf olt, %17, %25 : vector<512x1xf32>
    %27 = arith.andi %24, %26 : vector<512x1xi1>
    %c0 = arith.constant 0 : index
    %c0_9 = arith.constant 0 : index
    %28 = vector.load %arg1[%c0, %c0_9] : memref<552x8xbf16, #tpu.memory_space<vmem>>, vector<512x8xbf16>
    %c1 = arith.constant 1 : index
    %c0_10 = arith.constant 0 : index
    %29 = vector.load %arg1[%c1, %c0_10] : memref<552x8xbf16, #tpu.memory_space<vmem>>, vector<512x8xbf16>
    %c2 = arith.constant 2 : index
    %c0_11 = arith.constant 0 : index
    %30 = vector.load %arg1[%c2, %c0_11] : memref<552x8xbf16, #tpu.memory_space<vmem>>, vector<512x8xbf16>
    %c16 = arith.constant 16 : index
    %c0_12 = arith.constant 0 : index
    %31 = vector.load %arg1[%c16, %c0_12] : memref<552x8xbf16, #tpu.memory_space<vmem>>, vector<512x8xbf16>
    %c17 = arith.constant 17 : index
    %c0_13 = arith.constant 0 : index
    %32 = vector.load %arg1[%c17, %c0_13] : memref<552x8xbf16, #tpu.memory_space<vmem>>, vector<512x8xbf16>
    %c18 = arith.constant 18 : index
    %c0_14 = arith.constant 0 : index
    %33 = vector.load %arg1[%c18, %c0_14] : memref<552x8xbf16, #tpu.memory_space<vmem>>, vector<512x8xbf16>
    %c32 = arith.constant 32 : index
    %c0_15 = arith.constant 0 : index
    %34 = vector.load %arg1[%c32, %c0_15] : memref<552x8xbf16, #tpu.memory_space<vmem>>, vector<512x8xbf16>
    %c33 = arith.constant 33 : index
    %c0_16 = arith.constant 0 : index
    %35 = vector.load %arg1[%c33, %c0_16] : memref<552x8xbf16, #tpu.memory_space<vmem>>, vector<512x8xbf16>
    %c34 = arith.constant 34 : index
    %c0_17 = arith.constant 0 : index
    %36 = vector.load %arg1[%c34, %c0_17] : memref<552x8xbf16, #tpu.memory_space<vmem>>, vector<512x8xbf16>
    %37 = tpu.concatenate %28, %29, %30, %31, %32, %33, %34, %35, %36 in 1 : vector<512x8xbf16>, vector<512x8xbf16>, vector<512x8xbf16>, vector<512x8xbf16>, vector<512x8xbf16>, vector<512x8xbf16>, vector<512x8xbf16>, vector<512x8xbf16>, vector<512x8xbf16> -> vector<512x72xbf16>
    %c0_18 = arith.constant 0 : index
    %c0_19 = arith.constant 0 : index
    %38 = vector.load %arg2[%c0_18, %c0_19] : memref<72x8xbf16, #tpu.memory_space<vmem>>, vector<72x8xbf16>
    %cst_20 = arith.constant dense<0.000000e+00> : vector<512x8xf32>
    %39 = tpu.matmul %37, %38, %cst_20 {dimension_numbers = #tpu.dot_dimension_numbers<[1], [0], [0], [1], [0, 0, 1, 1], [], []>} : vector<512x72xbf16>, vector<72x8xbf16>, vector<512x8xf32> -> vector<512x8xf32>
    %cst_21 = arith.constant 0.000000e+00 : f32
    %40 = vector.shape_cast %22 : vector<512x1xi1> to vector<512x1xi1>
    %41 = vector.broadcast %40 : vector<512x1xi1> to vector<512x8xi1>
    %42 = vector.broadcast %cst_21 : f32 to vector<512x8xf32>
    %43 = arith.select %41, %39, %42 : vector<512x8xi1>, vector<512x8xf32>
    %cst_22 = arith.constant dense<0.000000e+00> : vector<8xf32>
    %44 = vector.multi_reduction <add>, %43, %cst_22 [0] : vector<512x8xf32> to vector<8xf32>
    %45 = vector.shape_cast %44 : vector<8xf32> to vector<1x8xf32>
    %cst_23 = arith.constant 0.00255102036 : f32
    %46 = vector.broadcast %cst_23 : f32 to vector<1x8xf32>
    %47 = arith.mulf %45, %46 : vector<1x8xf32>
    %48 = arith.mulf %43, %43 : vector<512x8xf32>
    %cst_24 = arith.constant dense<0.000000e+00> : vector<8xf32>
    %49 = vector.multi_reduction <add>, %48, %cst_24 [0] : vector<512x8xf32> to vector<8xf32>
    %50 = vector.shape_cast %49 : vector<8xf32> to vector<1x8xf32>
    %cst_25 = arith.constant 0.00255102036 : f32
    %51 = vector.broadcast %cst_25 : f32 to vector<1x8xf32>
    %52 = arith.mulf %50, %51 : vector<1x8xf32>
    %53 = arith.mulf %47, %47 : vector<1x8xf32>
    %54 = arith.subf %52, %53 : vector<1x8xf32>
    %55 = vector.broadcast %47 : vector<1x8xf32> to vector<512x8xf32>
    %56 = arith.subf %39, %55 : vector<512x8xf32>
    %cst_26 = arith.constant 9.99999974E-6 : f32
    %57 = vector.broadcast %cst_26 : f32 to vector<1x8xf32>
    %58 = arith.addf %54, %57 : vector<1x8xf32>
    %59 = math.rsqrt %58 : vector<1x8xf32>
    %60 = vector.broadcast %59 : vector<1x8xf32> to vector<512x8xf32>
    %61 = arith.mulf %56, %60 : vector<512x8xf32>
    %c0_27 = arith.constant 0 : index
    %c0_28 = arith.constant 0 : index
    %62 = vector.load %arg3[%c0_27, %c0_28] : memref<1x8xf32, #tpu.memory_space<vmem>>, vector<1x8xf32>
    %63 = vector.broadcast %62 : vector<1x8xf32> to vector<512x8xf32>
    %64 = arith.mulf %61, %63 : vector<512x8xf32>
    %c0_29 = arith.constant 0 : index
    %c0_30 = arith.constant 0 : index
    %65 = vector.load %arg4[%c0_29, %c0_30] : memref<1x8xf32, #tpu.memory_space<vmem>>, vector<1x8xf32>
    %66 = vector.broadcast %65 : vector<1x8xf32> to vector<512x8xf32>
    %67 = arith.addf %64, %66 : vector<512x8xf32>
    %cst_31 = arith.constant 0.000000e+00 : f32
    %68 = vector.broadcast %cst_31 : f32 to vector<512x8xf32>
    %69 = arith.maximumf %67, %68 : vector<512x8xf32>
    %cst_32 = arith.constant 0.000000e+00 : bf16
    %70 = vector.broadcast %cst_32 : bf16 to vector<40x8xbf16>
    %c512 = arith.constant 512 : index
    %c0_33 = arith.constant 0 : index
    %71 = vector.load %arg9[%c512, %c0_33] : memref<552x8xbf16, #tpu.memory_space<vmem>>, vector<40x8xbf16>
    tpu.vector_store %arg9[%c512, %c0_33], %70 {strides = array<i32>} : memref<552x8xbf16, #tpu.memory_space<vmem>>, vector<40x8xbf16>,
    %72 = arith.truncf %69 : vector<512x8xf32> to vector<512x8xbf16>
    %c0_34 = arith.constant 0 : index
    %c0_35 = arith.constant 0 : index
    %73 = vector.load %arg9[%c0_34, %c0_35] : memref<552x8xbf16, #tpu.memory_space<vmem>>, vector<512x8xbf16>
    tpu.vector_store %arg9[%c0_34, %c0_35], %72 {strides = array<i32>} : memref<552x8xbf16, #tpu.memory_space<vmem>>, vector<512x8xbf16>,
    %c0_36 = arith.constant 0 : index
    %c0_37 = arith.constant 0 : index
    %74 = vector.load %arg9[%c0_36, %c0_37] : memref<552x8xbf16, #tpu.memory_space<vmem>>, vector<512x8xbf16>
    %c1_38 = arith.constant 1 : index
    %c0_39 = arith.constant 0 : index
    %75 = vector.load %arg9[%c1_38, %c0_39] : memref<552x8xbf16, #tpu.memory_space<vmem>>, vector<512x8xbf16>
    %c2_40 = arith.constant 2 : index
    %c0_41 = arith.constant 0 : index
    %76 = vector.load %arg9[%c2_40, %c0_41] : memref<552x8xbf16, #tpu.memory_space<vmem>>, vector<512x8xbf16>
    %c16_42 = arith.constant 16 : index
    %c0_43 = arith.constant 0 : index
    %77 = vector.load %arg9[%c16_42, %c0_43] : memref<552x8xbf16, #tpu.memory_space<vmem>>, vector<512x8xbf16>
    %c17_44 = arith.constant 17 : index
    %c0_45 = arith.constant 0 : index
    %78 = vector.load %arg9[%c17_44, %c0_45] : memref<552x8xbf16, #tpu.memory_space<vmem>>, vector<512x8xbf16>
    %c18_46 = arith.constant 18 : index
    %c0_47 = arith.constant 0 : index
    %79 = vector.load %arg9[%c18_46, %c0_47] : memref<552x8xbf16, #tpu.memory_space<vmem>>, vector<512x8xbf16>
    %c32_48 = arith.constant 32 : index
    %c0_49 = arith.constant 0 : index
    %80 = vector.load %arg9[%c32_48, %c0_49] : memref<552x8xbf16, #tpu.memory_space<vmem>>, vector<512x8xbf16>
    %c33_50 = arith.constant 33 : index
    %c0_51 = arith.constant 0 : index
    %81 = vector.load %arg9[%c33_50, %c0_51] : memref<552x8xbf16, #tpu.memory_space<vmem>>, vector<512x8xbf16>
    %c34_52 = arith.constant 34 : index
    %c0_53 = arith.constant 0 : index
    %82 = vector.load %arg9[%c34_52, %c0_53] : memref<552x8xbf16, #tpu.memory_space<vmem>>, vector<512x8xbf16>
    %83 = tpu.concatenate %74, %75, %76, %77, %78, %79, %80, %81, %82 in 1 : vector<512x8xbf16>, vector<512x8xbf16>, vector<512x8xbf16>, vector<512x8xbf16>, vector<512x8xbf16>, vector<512x8xbf16>, vector<512x8xbf16>, vector<512x8xbf16>, vector<512x8xbf16> -> vector<512x72xbf16>
    %c0_54 = arith.constant 0 : index
    %c0_55 = arith.constant 0 : index
    %84 = vector.load %arg5[%c0_54, %c0_55] : memref<72x8xbf16, #tpu.memory_space<vmem>>, vector<72x8xbf16>
    %cst_56 = arith.constant dense<0.000000e+00> : vector<512x8xf32>
    %85 = tpu.matmul %83, %84, %cst_56 {dimension_numbers = #tpu.dot_dimension_numbers<[1], [0], [0], [1], [0, 0, 1, 1], [], []>} : vector<512x72xbf16>, vector<72x8xbf16>, vector<512x8xf32> -> vector<512x8xf32>
    %cst_57 = arith.constant 0.000000e+00 : f32
    %86 = vector.shape_cast %27 : vector<512x1xi1> to vector<512x1xi1>
    %87 = vector.broadcast %86 : vector<512x1xi1> to vector<512x8xi1>
    %88 = vector.broadcast %cst_57 : f32 to vector<512x8xf32>
    %89 = arith.select %87, %85, %88 : vector<512x8xi1>, vector<512x8xf32>
    %cst_58 = arith.constant dense<0.000000e+00> : vector<8xf32>
    %90 = vector.multi_reduction <add>, %89, %cst_58 [0] : vector<512x8xf32> to vector<8xf32>
    %91 = vector.shape_cast %90 : vector<8xf32> to vector<1x8xf32>
    %cst_59 = arith.constant 0.00347222225 : f32
    %92 = vector.broadcast %cst_59 : f32 to vector<1x8xf32>
    %93 = arith.mulf %91, %92 : vector<1x8xf32>
    %94 = arith.mulf %89, %89 : vector<512x8xf32>
    %cst_60 = arith.constant dense<0.000000e+00> : vector<8xf32>
    %95 = vector.multi_reduction <add>, %94, %cst_60 [0] : vector<512x8xf32> to vector<8xf32>
    %96 = vector.shape_cast %95 : vector<8xf32> to vector<1x8xf32>
    %cst_61 = arith.constant 0.00347222225 : f32
    %97 = vector.broadcast %cst_61 : f32 to vector<1x8xf32>
    %98 = arith.mulf %96, %97 : vector<1x8xf32>
    %99 = arith.mulf %93, %93 : vector<1x8xf32>
    %100 = arith.subf %98, %99 : vector<1x8xf32>
    %101 = vector.broadcast %93 : vector<1x8xf32> to vector<512x8xf32>
    %102 = arith.subf %85, %101 : vector<512x8xf32>
    %cst_62 = arith.constant 9.99999974E-6 : f32
    %103 = vector.broadcast %cst_62 : f32 to vector<1x8xf32>
    %104 = arith.addf %100, %103 : vector<1x8xf32>
    %105 = math.rsqrt %104 : vector<1x8xf32>
    %106 = vector.broadcast %105 : vector<1x8xf32> to vector<512x8xf32>
    %107 = arith.mulf %102, %106 : vector<512x8xf32>
    %c0_63 = arith.constant 0 : index
    %c0_64 = arith.constant 0 : index
    %108 = vector.load %arg6[%c0_63, %c0_64] : memref<1x8xf32, #tpu.memory_space<vmem>>, vector<1x8xf32>
    %109 = vector.broadcast %108 : vector<1x8xf32> to vector<512x8xf32>
    %110 = arith.mulf %107, %109 : vector<512x8xf32>
    %c0_65 = arith.constant 0 : index
    %c0_66 = arith.constant 0 : index
    %111 = vector.load %arg7[%c0_65, %c0_66] : memref<1x8xf32, #tpu.memory_space<vmem>>, vector<1x8xf32>
    %112 = vector.broadcast %111 : vector<1x8xf32> to vector<512x8xf32>
    %113 = arith.addf %110, %112 : vector<512x8xf32>
    %c0_67 = arith.constant 0 : index
    %c0_68 = arith.constant 0 : index
    %114 = vector.load %arg8[%c0_67, %c0_68] : memref<512x8xf32, #tpu.memory_space<vmem>>, vector<512x8xf32>
    tpu.vector_store %arg8[%c0_67, %c0_68], %113 {strides = array<i32>} : memref<512x8xf32, #tpu.memory_space<vmem>>, vector<512x8xf32>,
    return
  }
  func.func @transform_0(%arg0: i32) -> (i32, i32) {
    %c0_i32 = arith.constant 0 : i32
    %c0_i32_0 = arith.constant 0 : i32
    %c0_i32_1 = arith.constant 0 : i32
    return %c0_i32, %c0_i32_0 : i32, i32
  }
  func.func @transform_1(%arg0: i32) -> (i32, i32) {
    %c0_i32 = arith.constant 0 : i32
    %c0_i32_0 = arith.constant 0 : i32
    %c0_i32_1 = arith.constant 0 : i32
    return %c0_i32, %c0_i32_0 : i32, i32
  }
  func.func @transform_2(%arg0: i32) -> (i32, i32) {
    %c0_i32 = arith.constant 0 : i32
    %c0_i32_0 = arith.constant 0 : i32
    %c0_i32_1 = arith.constant 0 : i32
    return %c0_i32, %c0_i32_0 : i32, i32
  }
  func.func @transform_3(%arg0: i32) -> (i32, i32) {
    %c0_i32 = arith.constant 0 : i32
    %c0_i32_0 = arith.constant 0 : i32
    %c0_i32_1 = arith.constant 0 : i32
    return %c0_i32, %c0_i32_0 : i32, i32
  }
  func.func @transform_4(%arg0: i32) -> (i32, i32) {
    %c0_i32 = arith.constant 0 : i32
    %c0_i32_0 = arith.constant 0 : i32
    %c0_i32_1 = arith.constant 0 : i32
    return %c0_i32, %c0_i32_0 : i32, i32
  }
  func.func @transform_5(%arg0: i32) -> (i32, i32) {
    %c0_i32 = arith.constant 0 : i32
    %c0_i32_0 = arith.constant 0 : i32
    %c0_i32_1 = arith.constant 0 : i32
    return %c0_i32, %c0_i32_0 : i32, i32
  }
  func.func @transform_6(%arg0: i32) -> (i32, i32) {
    %c0_i32 = arith.constant 0 : i32
    %c0_i32_0 = arith.constant 0 : i32
    %c0_i32_1 = arith.constant 0 : i32
    return %c0_i32, %c0_i32_0 : i32, i32
  }
  func.func @transform_7(%arg0: i32) -> (i32, i32) {
    %c0_i32 = arith.constant 0 : i32
    %c0_i32_0 = arith.constant 0 : i32
    %c0_i32_1 = arith.constant 0 : i32
    return %c0_i32, %c0_i32_0 : i32, i32
  }
}

module attributes {stable_mosaic.version = 11 : i64} {
  func.func @_block_kernel(%arg0: i32, %arg1: memref<88x8xbf16, #tpu.memory_space<vmem>>, %arg2: memref<72x16xbf16, #tpu.memory_space<vmem>>, %arg3: memref<1x16xf32, #tpu.memory_space<vmem>>, %arg4: memref<1x16xf32, #tpu.memory_space<vmem>>, %arg5: memref<144x16xbf16, #tpu.memory_space<vmem>>, %arg6: memref<1x16xf32, #tpu.memory_space<vmem>>, %arg7: memref<1x16xf32, #tpu.memory_space<vmem>>, %arg8: memref<72x16xf32, #tpu.memory_space<vmem>>, %arg9: memref<88x16xbf16, #tpu.memory_space<vmem>>) attributes {dimension_semantics = [#tpu.dimension_semantics<arbitrary>], iteration_bounds = array<i64: 1>, scalar_prefetch = 0 : i64, scratch_operands = 1 : i64, tpu.core_type = #tpu.core_type<tc>, window_params = [{pipeline_mode = #tpu.pipeline_mode<synchronous>, transform_indices = @transform_0, window_bounds = array<i64: 88, 8>}, {pipeline_mode = #tpu.pipeline_mode<synchronous>, transform_indices = @transform_1, window_bounds = array<i64: 72, 16>}, {pipeline_mode = #tpu.pipeline_mode<synchronous>, transform_indices = @transform_2, window_bounds = array<i64: 1, 16>}, {pipeline_mode = #tpu.pipeline_mode<synchronous>, transform_indices = @transform_3, window_bounds = array<i64: 1, 16>}, {pipeline_mode = #tpu.pipeline_mode<synchronous>, transform_indices = @transform_4, window_bounds = array<i64: 144, 16>}, {pipeline_mode = #tpu.pipeline_mode<synchronous>, transform_indices = @transform_5, window_bounds = array<i64: 1, 16>}, {pipeline_mode = #tpu.pipeline_mode<synchronous>, transform_indices = @transform_6, window_bounds = array<i64: 1, 16>}, {pipeline_mode = #tpu.pipeline_mode<synchronous>, transform_indices = @transform_7, window_bounds = array<i64: 72, 16>}]} {
    %0 = tpu.iota {dimensions = array<i32: 0>} : vector<72x1xi32>
    %1 = arith.sitofp %0 : vector<72x1xi32> to vector<72x1xf32>
    %cst = arith.constant 5.000000e-01 : f32
    %2 = vector.broadcast %cst : f32 to vector<72x1xf32>
    %3 = arith.addf %1, %2 : vector<72x1xf32>
    %cst_0 = arith.constant 0.027777778 : f32
    %4 = vector.broadcast %cst_0 : f32 to vector<72x1xf32>
    %5 = arith.mulf %3, %4 : vector<72x1xf32>
    %6 = math.floor %5 : vector<72x1xf32>
    %cst_1 = arith.constant 3.600000e+01 : f32
    %7 = vector.broadcast %cst_1 : f32 to vector<72x1xf32>
    %8 = arith.mulf %6, %7 : vector<72x1xf32>
    %9 = arith.subf %1, %8 : vector<72x1xf32>
    %cst_2 = arith.constant 5.000000e-01 : f32
    %10 = vector.broadcast %cst_2 : f32 to vector<72x1xf32>
    %11 = arith.addf %9, %10 : vector<72x1xf32>
    %cst_3 = arith.constant 0.166666672 : f32
    %12 = vector.broadcast %cst_3 : f32 to vector<72x1xf32>
    %13 = arith.mulf %11, %12 : vector<72x1xf32>
    %14 = math.floor %13 : vector<72x1xf32>
    %cst_4 = arith.constant 6.000000e+00 : f32
    %15 = vector.broadcast %cst_4 : f32 to vector<72x1xf32>
    %16 = arith.mulf %14, %15 : vector<72x1xf32>
    %17 = arith.subf %9, %16 : vector<72x1xf32>
    %cst_5 = arith.constant 4.000000e+00 : f32
    %18 = vector.broadcast %cst_5 : f32 to vector<72x1xf32>
    %19 = arith.cmpf olt, %14, %18 : vector<72x1xf32>
    %cst_6 = arith.constant 4.000000e+00 : f32
    %20 = vector.broadcast %cst_6 : f32 to vector<72x1xf32>
    %21 = arith.cmpf olt, %17, %20 : vector<72x1xf32>
    %22 = arith.andi %19, %21 : vector<72x1xi1>
    %cst_7 = arith.constant 2.000000e+00 : f32
    %23 = vector.broadcast %cst_7 : f32 to vector<72x1xf32>
    %24 = arith.cmpf olt, %14, %23 : vector<72x1xf32>
    %cst_8 = arith.constant 2.000000e+00 : f32
    %25 = vector.broadcast %cst_8 : f32 to vector<72x1xf32>
    %26 = arith.cmpf olt, %17, %25 : vector<72x1xf32>
    %27 = arith.andi %24, %26 : vector<72x1xi1>
    %c0 = arith.constant 0 : index
    %c0_9 = arith.constant 0 : index
    %28 = vector.load %arg1[%c0, %c0_9] : memref<88x8xbf16, #tpu.memory_space<vmem>>, vector<72x8xbf16>
    %c1 = arith.constant 1 : index
    %c0_10 = arith.constant 0 : index
    %29 = vector.load %arg1[%c1, %c0_10] : memref<88x8xbf16, #tpu.memory_space<vmem>>, vector<72x8xbf16>
    %c2 = arith.constant 2 : index
    %c0_11 = arith.constant 0 : index
    %30 = vector.load %arg1[%c2, %c0_11] : memref<88x8xbf16, #tpu.memory_space<vmem>>, vector<72x8xbf16>
    %c6 = arith.constant 6 : index
    %c0_12 = arith.constant 0 : index
    %31 = vector.load %arg1[%c6, %c0_12] : memref<88x8xbf16, #tpu.memory_space<vmem>>, vector<72x8xbf16>
    %c7 = arith.constant 7 : index
    %c0_13 = arith.constant 0 : index
    %32 = vector.load %arg1[%c7, %c0_13] : memref<88x8xbf16, #tpu.memory_space<vmem>>, vector<72x8xbf16>
    %c8 = arith.constant 8 : index
    %c0_14 = arith.constant 0 : index
    %33 = vector.load %arg1[%c8, %c0_14] : memref<88x8xbf16, #tpu.memory_space<vmem>>, vector<72x8xbf16>
    %c12 = arith.constant 12 : index
    %c0_15 = arith.constant 0 : index
    %34 = vector.load %arg1[%c12, %c0_15] : memref<88x8xbf16, #tpu.memory_space<vmem>>, vector<72x8xbf16>
    %c13 = arith.constant 13 : index
    %c0_16 = arith.constant 0 : index
    %35 = vector.load %arg1[%c13, %c0_16] : memref<88x8xbf16, #tpu.memory_space<vmem>>, vector<72x8xbf16>
    %c14 = arith.constant 14 : index
    %c0_17 = arith.constant 0 : index
    %36 = vector.load %arg1[%c14, %c0_17] : memref<88x8xbf16, #tpu.memory_space<vmem>>, vector<72x8xbf16>
    %37 = tpu.concatenate %28, %29, %30, %31, %32, %33, %34, %35, %36 in 1 : vector<72x8xbf16>, vector<72x8xbf16>, vector<72x8xbf16>, vector<72x8xbf16>, vector<72x8xbf16>, vector<72x8xbf16>, vector<72x8xbf16>, vector<72x8xbf16>, vector<72x8xbf16> -> vector<72x72xbf16>
    %c0_18 = arith.constant 0 : index
    %c0_19 = arith.constant 0 : index
    %38 = vector.load %arg2[%c0_18, %c0_19] : memref<72x16xbf16, #tpu.memory_space<vmem>>, vector<72x16xbf16>
    %cst_20 = arith.constant dense<0.000000e+00> : vector<72x16xf32>
    %39 = tpu.matmul %37, %38, %cst_20 {dimension_numbers = #tpu.dot_dimension_numbers<[1], [0], [0], [1], [0, 0, 1, 1], [], []>} : vector<72x72xbf16>, vector<72x16xbf16>, vector<72x16xf32> -> vector<72x16xf32>
    %cst_21 = arith.constant 0.000000e+00 : f32
    %40 = vector.shape_cast %22 : vector<72x1xi1> to vector<72x1xi1>
    %41 = vector.broadcast %40 : vector<72x1xi1> to vector<72x16xi1>
    %42 = vector.broadcast %cst_21 : f32 to vector<72x16xf32>
    %43 = arith.select %41, %39, %42 : vector<72x16xi1>, vector<72x16xf32>
    %cst_22 = arith.constant dense<0.000000e+00> : vector<16xf32>
    %44 = vector.multi_reduction <add>, %43, %cst_22 [0] : vector<72x16xf32> to vector<16xf32>
    %45 = vector.shape_cast %44 : vector<16xf32> to vector<1x16xf32>
    %cst_23 = arith.constant 3.125000e-02 : f32
    %46 = vector.broadcast %cst_23 : f32 to vector<1x16xf32>
    %47 = arith.mulf %45, %46 : vector<1x16xf32>
    %48 = arith.mulf %43, %43 : vector<72x16xf32>
    %cst_24 = arith.constant dense<0.000000e+00> : vector<16xf32>
    %49 = vector.multi_reduction <add>, %48, %cst_24 [0] : vector<72x16xf32> to vector<16xf32>
    %50 = vector.shape_cast %49 : vector<16xf32> to vector<1x16xf32>
    %cst_25 = arith.constant 3.125000e-02 : f32
    %51 = vector.broadcast %cst_25 : f32 to vector<1x16xf32>
    %52 = arith.mulf %50, %51 : vector<1x16xf32>
    %53 = arith.mulf %47, %47 : vector<1x16xf32>
    %54 = arith.subf %52, %53 : vector<1x16xf32>
    %55 = vector.broadcast %47 : vector<1x16xf32> to vector<72x16xf32>
    %56 = arith.subf %39, %55 : vector<72x16xf32>
    %cst_26 = arith.constant 9.99999974E-6 : f32
    %57 = vector.broadcast %cst_26 : f32 to vector<1x16xf32>
    %58 = arith.addf %54, %57 : vector<1x16xf32>
    %59 = math.rsqrt %58 : vector<1x16xf32>
    %60 = vector.broadcast %59 : vector<1x16xf32> to vector<72x16xf32>
    %61 = arith.mulf %56, %60 : vector<72x16xf32>
    %c0_27 = arith.constant 0 : index
    %c0_28 = arith.constant 0 : index
    %62 = vector.load %arg3[%c0_27, %c0_28] : memref<1x16xf32, #tpu.memory_space<vmem>>, vector<1x16xf32>
    %63 = vector.broadcast %62 : vector<1x16xf32> to vector<72x16xf32>
    %64 = arith.mulf %61, %63 : vector<72x16xf32>
    %c0_29 = arith.constant 0 : index
    %c0_30 = arith.constant 0 : index
    %65 = vector.load %arg4[%c0_29, %c0_30] : memref<1x16xf32, #tpu.memory_space<vmem>>, vector<1x16xf32>
    %66 = vector.broadcast %65 : vector<1x16xf32> to vector<72x16xf32>
    %67 = arith.addf %64, %66 : vector<72x16xf32>
    %cst_31 = arith.constant 0.000000e+00 : f32
    %68 = vector.broadcast %cst_31 : f32 to vector<72x16xf32>
    %69 = arith.maximumf %67, %68 : vector<72x16xf32>
    %cst_32 = arith.constant 0.000000e+00 : bf16
    %70 = vector.broadcast %cst_32 : bf16 to vector<16x16xbf16>
    %c72 = arith.constant 72 : index
    %c0_33 = arith.constant 0 : index
    %71 = vector.load %arg9[%c72, %c0_33] : memref<88x16xbf16, #tpu.memory_space<vmem>>, vector<16x16xbf16>
    tpu.vector_store %arg9[%c72, %c0_33], %70 {strides = array<i32>} : memref<88x16xbf16, #tpu.memory_space<vmem>>, vector<16x16xbf16>,
    %72 = arith.truncf %69 : vector<72x16xf32> to vector<72x16xbf16>
    %c0_34 = arith.constant 0 : index
    %c0_35 = arith.constant 0 : index
    %73 = vector.load %arg9[%c0_34, %c0_35] : memref<88x16xbf16, #tpu.memory_space<vmem>>, vector<72x16xbf16>
    tpu.vector_store %arg9[%c0_34, %c0_35], %72 {strides = array<i32>} : memref<88x16xbf16, #tpu.memory_space<vmem>>, vector<72x16xbf16>,
    %c0_36 = arith.constant 0 : index
    %c0_37 = arith.constant 0 : index
    %74 = vector.load %arg9[%c0_36, %c0_37] : memref<88x16xbf16, #tpu.memory_space<vmem>>, vector<72x16xbf16>
    %c1_38 = arith.constant 1 : index
    %c0_39 = arith.constant 0 : index
    %75 = vector.load %arg9[%c1_38, %c0_39] : memref<88x16xbf16, #tpu.memory_space<vmem>>, vector<72x16xbf16>
    %c2_40 = arith.constant 2 : index
    %c0_41 = arith.constant 0 : index
    %76 = vector.load %arg9[%c2_40, %c0_41] : memref<88x16xbf16, #tpu.memory_space<vmem>>, vector<72x16xbf16>
    %c6_42 = arith.constant 6 : index
    %c0_43 = arith.constant 0 : index
    %77 = vector.load %arg9[%c6_42, %c0_43] : memref<88x16xbf16, #tpu.memory_space<vmem>>, vector<72x16xbf16>
    %c7_44 = arith.constant 7 : index
    %c0_45 = arith.constant 0 : index
    %78 = vector.load %arg9[%c7_44, %c0_45] : memref<88x16xbf16, #tpu.memory_space<vmem>>, vector<72x16xbf16>
    %c8_46 = arith.constant 8 : index
    %c0_47 = arith.constant 0 : index
    %79 = vector.load %arg9[%c8_46, %c0_47] : memref<88x16xbf16, #tpu.memory_space<vmem>>, vector<72x16xbf16>
    %c12_48 = arith.constant 12 : index
    %c0_49 = arith.constant 0 : index
    %80 = vector.load %arg9[%c12_48, %c0_49] : memref<88x16xbf16, #tpu.memory_space<vmem>>, vector<72x16xbf16>
    %c13_50 = arith.constant 13 : index
    %c0_51 = arith.constant 0 : index
    %81 = vector.load %arg9[%c13_50, %c0_51] : memref<88x16xbf16, #tpu.memory_space<vmem>>, vector<72x16xbf16>
    %c14_52 = arith.constant 14 : index
    %c0_53 = arith.constant 0 : index
    %82 = vector.load %arg9[%c14_52, %c0_53] : memref<88x16xbf16, #tpu.memory_space<vmem>>, vector<72x16xbf16>
    %83 = tpu.concatenate %74, %75, %76, %77, %78, %79, %80, %81, %82 in 1 : vector<72x16xbf16>, vector<72x16xbf16>, vector<72x16xbf16>, vector<72x16xbf16>, vector<72x16xbf16>, vector<72x16xbf16>, vector<72x16xbf16>, vector<72x16xbf16>, vector<72x16xbf16> -> vector<72x144xbf16>
    %c0_54 = arith.constant 0 : index
    %c0_55 = arith.constant 0 : index
    %84 = vector.load %arg5[%c0_54, %c0_55] : memref<144x16xbf16, #tpu.memory_space<vmem>>, vector<144x16xbf16>
    %cst_56 = arith.constant dense<0.000000e+00> : vector<72x16xf32>
    %85 = tpu.matmul %83, %84, %cst_56 {dimension_numbers = #tpu.dot_dimension_numbers<[1], [0], [0], [1], [0, 0, 1, 1], [], []>} : vector<72x144xbf16>, vector<144x16xbf16>, vector<72x16xf32> -> vector<72x16xf32>
    %cst_57 = arith.constant 0.000000e+00 : f32
    %86 = vector.shape_cast %27 : vector<72x1xi1> to vector<72x1xi1>
    %87 = vector.broadcast %86 : vector<72x1xi1> to vector<72x16xi1>
    %88 = vector.broadcast %cst_57 : f32 to vector<72x16xf32>
    %89 = arith.select %87, %85, %88 : vector<72x16xi1>, vector<72x16xf32>
    %cst_58 = arith.constant dense<0.000000e+00> : vector<16xf32>
    %90 = vector.multi_reduction <add>, %89, %cst_58 [0] : vector<72x16xf32> to vector<16xf32>
    %91 = vector.shape_cast %90 : vector<16xf32> to vector<1x16xf32>
    %cst_59 = arith.constant 1.250000e-01 : f32
    %92 = vector.broadcast %cst_59 : f32 to vector<1x16xf32>
    %93 = arith.mulf %91, %92 : vector<1x16xf32>
    %94 = arith.mulf %89, %89 : vector<72x16xf32>
    %cst_60 = arith.constant dense<0.000000e+00> : vector<16xf32>
    %95 = vector.multi_reduction <add>, %94, %cst_60 [0] : vector<72x16xf32> to vector<16xf32>
    %96 = vector.shape_cast %95 : vector<16xf32> to vector<1x16xf32>
    %cst_61 = arith.constant 1.250000e-01 : f32
    %97 = vector.broadcast %cst_61 : f32 to vector<1x16xf32>
    %98 = arith.mulf %96, %97 : vector<1x16xf32>
    %99 = arith.mulf %93, %93 : vector<1x16xf32>
    %100 = arith.subf %98, %99 : vector<1x16xf32>
    %101 = vector.broadcast %93 : vector<1x16xf32> to vector<72x16xf32>
    %102 = arith.subf %85, %101 : vector<72x16xf32>
    %cst_62 = arith.constant 9.99999974E-6 : f32
    %103 = vector.broadcast %cst_62 : f32 to vector<1x16xf32>
    %104 = arith.addf %100, %103 : vector<1x16xf32>
    %105 = math.rsqrt %104 : vector<1x16xf32>
    %106 = vector.broadcast %105 : vector<1x16xf32> to vector<72x16xf32>
    %107 = arith.mulf %102, %106 : vector<72x16xf32>
    %c0_63 = arith.constant 0 : index
    %c0_64 = arith.constant 0 : index
    %108 = vector.load %arg6[%c0_63, %c0_64] : memref<1x16xf32, #tpu.memory_space<vmem>>, vector<1x16xf32>
    %109 = vector.broadcast %108 : vector<1x16xf32> to vector<72x16xf32>
    %110 = arith.mulf %107, %109 : vector<72x16xf32>
    %c0_65 = arith.constant 0 : index
    %c0_66 = arith.constant 0 : index
    %111 = vector.load %arg7[%c0_65, %c0_66] : memref<1x16xf32, #tpu.memory_space<vmem>>, vector<1x16xf32>
    %112 = vector.broadcast %111 : vector<1x16xf32> to vector<72x16xf32>
    %113 = arith.addf %110, %112 : vector<72x16xf32>
    %c0_67 = arith.constant 0 : index
    %c0_68 = arith.constant 0 : index
    %114 = vector.load %arg8[%c0_67, %c0_68] : memref<72x16xf32, #tpu.memory_space<vmem>>, vector<72x16xf32>
    tpu.vector_store %arg8[%c0_67, %c0_68], %113 {strides = array<i32>} : memref<72x16xf32, #tpu.memory_space<vmem>>, vector<72x16xf32>,
    return
  }
  func.func @transform_0(%arg0: i32) -> (i32, i32) {
    %c0_i32 = arith.constant 0 : i32
    %c0_i32_0 = arith.constant 0 : i32
    %c0_i32_1 = arith.constant 0 : i32
    return %c0_i32, %c0_i32_0 : i32, i32
  }
  func.func @transform_1(%arg0: i32) -> (i32, i32) {
    %c0_i32 = arith.constant 0 : i32
    %c0_i32_0 = arith.constant 0 : i32
    %c0_i32_1 = arith.constant 0 : i32
    return %c0_i32, %c0_i32_0 : i32, i32
  }
  func.func @transform_2(%arg0: i32) -> (i32, i32) {
    %c0_i32 = arith.constant 0 : i32
    %c0_i32_0 = arith.constant 0 : i32
    %c0_i32_1 = arith.constant 0 : i32
    return %c0_i32, %c0_i32_0 : i32, i32
  }
  func.func @transform_3(%arg0: i32) -> (i32, i32) {
    %c0_i32 = arith.constant 0 : i32
    %c0_i32_0 = arith.constant 0 : i32
    %c0_i32_1 = arith.constant 0 : i32
    return %c0_i32, %c0_i32_0 : i32, i32
  }
  func.func @transform_4(%arg0: i32) -> (i32, i32) {
    %c0_i32 = arith.constant 0 : i32
    %c0_i32_0 = arith.constant 0 : i32
    %c0_i32_1 = arith.constant 0 : i32
    return %c0_i32, %c0_i32_0 : i32, i32
  }
  func.func @transform_5(%arg0: i32) -> (i32, i32) {
    %c0_i32 = arith.constant 0 : i32
    %c0_i32_0 = arith.constant 0 : i32
    %c0_i32_1 = arith.constant 0 : i32
    return %c0_i32, %c0_i32_0 : i32, i32
  }
  func.func @transform_6(%arg0: i32) -> (i32, i32) {
    %c0_i32 = arith.constant 0 : i32
    %c0_i32_0 = arith.constant 0 : i32
    %c0_i32_1 = arith.constant 0 : i32
    return %c0_i32, %c0_i32_0 : i32, i32
  }
  func.func @transform_7(%arg0: i32) -> (i32, i32) {
    %c0_i32 = arith.constant 0 : i32
    %c0_i32_0 = arith.constant 0 : i32
    %c0_i32_1 = arith.constant 0 : i32
    return %c0_i32, %c0_i32_0 : i32, i32
  }
}

</mosaic_0001>

<bundles_post_ra>
// kernel: encoder_forward.3
= control target key start
LH: loop header
LB: loop body
LE: loop exit
PB: predicated region body
PF: predicated region fallthrough
CT: control target
= control target key end

     0   :  { %vm2687_vm0 = vcmask 1046528   ;;  %v1785_v3 = vmov 0.0   ;;  %vm313_vm1 = vcmask 1044480   ;;  %vm2686_vm2 = vcmask 1045504   ;;  %s1786_s17 = smov 16   ;;  %s1787_s18 = smov 24   ;;  %s2672_s0 = inlined_call_operand.vmem [shape: bf16[88,8], index: 0, kind: input, shape index: {}]   ;;  %s2673_s1 = inlined_call_operand.vmem [shape: bf16[72,16], index: 1, kind: input, shape index: {}]   ;;  %s2674_s2 = inlined_call_operand.vmem [shape: f32[1,16], index: 2, kind: input, shape index: {}]   ;;  %s2675_s3 = inlined_call_operand.vmem [shape: f32[1,16], index: 3, kind: input, shape index: {}]   ;;  %s2676_s4 = inlined_call_operand.vmem [shape: bf16[144,16], index: 4, kind: input, shape index: {}]   ;;  %s2677_s5 = inlined_call_operand.vmem [shape: f32[1,16], index: 5, kind: input, shape index: {}]   ;;  %s2678_s6 = inlined_call_operand.vmem [shape: f32[1,16], index: 6, kind: input, shape index: {}]   ;;  %s2679_s7 = inlined_call_operand.vmem [shape: f32[72,16], index: 7, kind: output, shape index: {}]  }
   0x1   :  { %v191_v0 = vld [vmem:[%s2672_s0 + $0x4] sm:$0xf]  ;;  %v1845_v1 = vld [vmem:[%s2672_s0 + $0x8] sm:$0xf]  ;;  %v193_v2 = vld [vmem:[%s2672_s0 + $0xc] sm:$0xf]  ;;  %1679 = vmatprep.subr.bf16.mxu0 %v1785_v3 }
   0x2   :  { %v200_v4 = vld [vmem:[%s2672_s0] sm:$0xe]  ;;  %v1855_v5 = vcombine.low %v1845_v1, %v193_v2  ;;  %v1595_v9 = vcombine.low %v191_v0, %v1845_v1  ;;  %v194_v10 = vld [vmem:[%s2672_s0 + $0x10] sm:$0xf]  ;;  %v204_v11 = vld [vmem:[%s2672_s0 + $0x4] sm:$0xc] }
   0x3   :  { %v201_v6 = vld [vmem:[%s2672_s0] sm:$0x8]  ;;  %v1591_v7 = vcombine.low %v200_v4, %v191_v0  ;;  %v1872_v15 = vcombine.low %v193_v2, %v194_v10  ;;  %v1600_v16 = vcombine.low %v204_v11, %v1845_v1  ;;  %vm2684_vm3 = vsmask.f32 7424  ;;  %v207_v35 = vld [vmem:[%s2672_s0 + $0x4] sm:$0x8] }
   0x4   :  { %v1592_v8 = vcombine.low %v201_v6, %v191_v0  ;;  %v190_v12 = vld [vmem:[%s2672_s0] sm:$0xf]  ;;  %v289_v13 = vrot.slane %v1855_v5, 1  ;;  %v315_v14 = vrot.slane %v1855_v5, 3  ;;  %v243_v22 = vshll.u32 %v1855_v5, 16  ;;  %s1788_s23 = smov 40  }
   0x5   :  { %v288_v17 = vrot.slane %v1591_v7, 1  ;;  %v1875_v19 = vcombine.low %v190_v12, %v191_v0  ;;  %v398_v20 = vrot.slane %v1600_v16, 2  ;;  %v399_v21 = vrot.slane %v1872_v15, 2  ;;  %v195_v43 = vld [vmem:[%s2672_s0 + $0x14] sm:$0xf]  ;;  %s1789_s24 = smov 48  }
   0x6   :  { %v314_v18 = vrot.slane %v1592_v8, 3  ;;  %v247_v23 = vshrl.u32 %v1855_v5, 16  ;;  %v245_v29 = vrot.slane %v243_v22, 1  ;;  %vm2685_vm4 = vsmask.f32 4352  ;;  %s1790_s27 = smov 8  }
   0x7   :  { %v290_v24 = vsel %vm2687_vm0, %v288_v17, %v289_v13  ;;  %v236_v26 = vshrl.u32 %v1875_v19, 16  ;;  %v238_v27 = vshll.u32 %v1875_v19, 16  ;;  %v400_v28 = vsel %vm2686_vm2, %v398_v20, %v399_v21  ;;  %v196_v52 = vld [vmem:[%s2672_s0 + $0x18] sm:$0xf]  ;;  %s1791_s28 = smov 32   ;;  %s1792_s29 = smov 56  }
   0x8   :  { %v316_v25 = vsel %vm313_vm1, %v314_v18, %v315_v14  ;;  %297 = vrot.lane.b32.xlu0 %v290_v24, %s1786_s17  ;;  %v338_v30 = vshrl.u32 %v1592_v8, 16  ;;  %v341_v32 = vshll.u32 %v1592_v8, 16  ;;  %v345_v33 = vrot.slane %v247_v23, 3  ;;  %s1793_s30 = smov 64   ;;  %s1797_s26 = smov 96  }
   0x9   :  { %323 = vrot.lane.b32.xlu1 %v316_v25, %s1787_s18  ;;  %v240_v31 = vrot.slane %v238_v27, 1  ;;  %v346_v34 = vrot.slane %v243_v22, 4  ;;  %vm2683_vm5 = vsmask.f32 5376  ;;  %v422_v37 = vshrl.u32 %v1600_v16, 16 }
   0xa   :  { %v340_v36 = vrot.slane %v338_v30, 3  ;;  %v425_v38 = vshll.u32 %v1600_v16, 16  ;;  %v343_v40 = vrot.slane %v341_v32, 4  ;;  %v430_v42 = vshrl.u32 %v1872_v15, 16  ;;  %v197_v16 = vld [vmem:[%s2672_s0 + $0x1c] sm:$0xf] }
   0xb   :  { %v241_v39 = vor.u32 %v240_v31, %v236_v26  ;;  %v347_v41 = vor.u32 %v346_v34, %v345_v33  ;;  %v424_v44 = vrot.slane %v422_v37, 2  ;;  %v433_v46 = vshll.u32 %v1872_v15, 16  ;;  %v1759_v32 = vld [vmem:[%s2673_s1 + $0x20] ss:$0 sps:$4 sm:$0xff]  }
   0xc   :  { %381 = vrot.lane.b32.xlu0 %v1595_v9, %s1788_s23  ;;  %v427_v45 = vrot.slane %v425_v38, 3  ;;  %v1603_v47 = vcombine.low %v207_v35, %v1845_v1  ;;  %v344_v49 = vor.u32 %v343_v40, %v340_v36  ;;  %v432_v50 = vrot.slane %v430_v42, 2 }
   0xd   :  { %407 = vrot.lane.b32.xlu1 %v400_v28, %s1789_s24  ;;  %v246_v48 = vsel %vm2684_vm3, %v241_v39, %v245_v29  ;;  %v479_v51 = vrot.slane %v1872_v15, 3  ;;  %v435_v54 = vrot.slane %v433_v46, 3  ;;  %v1909_v56 = vcombine.low %v194_v10, %v195_v43  ;;  %v1955_v28 = vld [vmem:[%s2672_s0 + $0x20] sm:$0xf] }
   0xe   :  { %v428_v53 = vor.u32 %v427_v45, %v424_v44  ;;  %v478_v55 = vrot.slane %v1603_v47, 3  ;;  %v348_v57 = vsel %vm2685_vm4, %v344_v49, %v347_v41  ;;  %v1915_v60 = vcombine.low %v195_v43, %v196_v52  ;;  %v199_v43 = vld [vmem:[%s2672_s0 + $0x24] sm:$0x1]  ;;  %v1760_v44 = vld [vmem:[%s2673_s1 + $0x18] sm:$0xff]  }
   0xf   :  { %v436_v58 = vor.u32 %v435_v54, %v432_v50  ;;  %v251_v59 = vshll.u32 %v1909_v56, 16  ;;  %v249_v62 = vor.u32 %v247_v23, %v245_v29  ;;  %v291_v63 = vrot.slane %v1909_v56, 1  ;;  %v1990_v45 = vld [vmem:[%s2672_s0 + $0x24] sm:$0xf] }
  0x10   :  { %274 = vrot.lane.b32.xlu0 %v246_v48, %s1790_s27  ;;  %v480_v61 = vsel %vm313_vm1, %v478_v55, %v479_v51  ;;  %v255_v0 = vshrl.u32 %v1909_v56, 16  ;;  %v317_v7 = vrot.slane %v1909_v56, 3  ;;  %v439_v8 = vshrl.u32 %v1915_v60, 16 }
  0x11   :  { %366 = vrot.lane.b32.xlu1 %v348_v57, %s1791_s28  ;;  %v437_v1 = vsel %vm2683_vm5, %v428_v53, %v436_v58  ;;  %v253_v2 = vrot.slane %v251_v59, 1  ;;  %v350_v4 = vrot.slane %v251_v59, 4  ;;  %v292_v10 = vsel %vm2687_vm0, %v289_v13, %v291_v63  ;;  %v1761_v53 = vld [vmem:[%s2673_s1 + $0x10] sm:$0xff]   ;;  %v202_v57 = vld [vmem:[%s2672_s0 + $0x24] sm:$0x7] }
  0x12   :  { %v349_v6 = vrot.slane %v255_v0, 3  ;;  %v442_v12 = vshll.u32 %v1915_v60, 16  ;;  %v401_v17 = vrot.slane %v1915_v60, 2  ;;  %v1936_v18 = vcombine.low %v196_v52, %v197_v16 }
  0x13   :  { %v254_v9 = vsel %vm2684_vm3, %v249_v62, %v253_v2  ;;  %v318_v20 = vsel %vm313_vm1, %v315_v14, %v317_v7  ;;  %v441_v22 = vrot.slane %v439_v8, 2  ;;  %v481_v24 = vrot.slane %v1915_v60, 3 }
  0x14   :  { %465 = vrot.lane.b32.xlu0 %v437_v1, %s1792_s29  ;;  %v351_v11 = vor.u32 %v350_v4, %v349_v6  ;;  %v444_v23 = vrot.slane %v442_v12, 3  ;;  %v402_v25 = vsel %vm2686_vm2, %v399_v21, %v401_v17  ;;  %v259_v27 = vshll.u32 %v1936_v18, 16  ;;  %v205_v12 = vld [vmem:[%s2672_s0 + $0x28] sm:$0x3] }
  0x15   :  { %487 = vrot.lane.b32.xlu1 %v480_v61, %s1793_s30  ;;  %v263_v14 = vshrl.u32 %v1936_v18, 16  ;;  %v482_v29 = vsel %vm313_vm1, %v479_v51, %v481_v24  ;;  %v257_v30 = vor.u32 %v255_v0, %v253_v2  ;;  %v293_v21 = vrot.slane %v1936_v18, 1  ;;  %v1762_v0 = vld [vmem:[%s2673_s1 + $0x8] sm:$0xff]  }
  0x16   :  { %v352_v13 = vsel %vm2685_vm4, %v347_v41, %v351_v11  ;;  %v1948_v26 = vor.u32 %v444_v23, %v441_v22  ;;  %v1963_v31 = vcombine.low %v197_v16, %v1955_v28  ;;  %v261_v34 = vrot.slane %v259_v27, 1 }
  0x17   :  { %v353_v35 = vrot.slane %v263_v14, 3  ;;  %vm633_vm6 = vcmask 1043456   ;;  %v294_v36 = vsel %vm2687_vm0, %v291_v63, %v293_v21  ;;  %v319_v37 = vrot.slane %v1936_v18, 3  ;;  %v206_v63 = vld [vmem:[%s2672_s0 + $0x28] sm:$0x7] }
  0x18   :  { %276 = vrot.lane.b32.xlu0 %v254_v9, %s1790_s27  ;;  %v446_v33 = vsel %vm2683_vm5, %v436_v58, %v1948_v26  ;;  %v635_v38 = vsel %vm633_vm6, %v1759_v32, 0  ;;  %v262_v39 = vsel %vm2684_vm3, %v257_v30, %v261_v34  ;;  %v448_v41 = vshrl.u32 %v1963_v31, 16 }
  0x19   :  { %299 = vrot.lane.b32.xlu1 %v292_v10, %s1786_s17  ;;  %v451_v42 = vshll.u32 %v1963_v31, 16  ;;  %1680 = vmatpush3.bf16.msra.mxu0 %v635_v38  ;;  %vm1794_vm7 = vmmov 0   ;;  %v320_v46 = vsel %vm313_vm1, %v317_v7, %v319_v37  ;;  %v403_v47 = vrot.slane %v1963_v31, 2 }
  0x1a   :  { %1681 = vmatprep.subr.bf16.mxu0 %v1785_v3  ;;  %1689 = vmatprep.mubr.msk.bf16.mxu0 %vm1794_vm7, %v1785_v3  ;;  %v2002_v48 = vcombine.low %v1955_v28, %v199_v43  ;;  %v450_v50 = vrot.slane %v448_v41, 2  ;;  %v1594_v52 = vcombine.low %v1955_v28, %v1990_v45  ;;  %v483_v54 = vrot.slane %v1963_v31, 3 }
  0x1b   :  { %v453_v51 = vrot.slane %v451_v42, 3  ;;  %v404_v55 = vsel %vm2686_vm2, %v401_v17, %v403_v47  ;;  %v265_v2 = vor.u32 %v263_v14, %v261_v34  ;;  %v1593_v6 = vcombine.low %v1955_v28, %v202_v57 }
  0x1c   :  { %325 = vrot.lane.b32.xlu0 %v318_v20, %s1787_s18  ;;  %v267_v59 = vshll.u32 %v2002_v48, 16  ;;  %v358_v61 = vshrl.u32 %v1594_v52, 16  ;;  %v361_v62 = vshll.u32 %v1594_v52, 16  ;;  %v484_v1 = vsel %vm313_vm1, %v481_v24, %v483_v54 }
  0x1d   :  { %368 = vrot.lane.b32.xlu1 %v352_v13, %s1791_s28  ;;  %1682 = vmatpush3.bf16.msra.mxu0 %v1760_v44  ;;  %v454_v58 = vor.u32 %v453_v51, %v450_v50  ;;  %v295_v4 = vrot.slane %v2002_v48, 1  ;;  %v1602_v7 = vcombine.low %v1990_v45, %v206_v63  ;;  %v321_v17 = vrot.slane %v1593_v6, 3 }
  0x1e   :  { %1683 = vmatprep.subr.bf16.mxu0 %v1785_v3  ;;  %v269_v9 = vrot.slane %v267_v59, 1  ;;  %v360_v10 = vrot.slane %v358_v61, 3  ;;  %v1601_v20 = vcombine.low %v1990_v45, %v205_v12  ;;  %vm497_vm8 = vcmask 64512  }
  0x1f   :  { %v455_v8 = vsel %vm2683_vm5, %v1948_v26, %v454_v58  ;;  %v296_v16 = vsel %vm2687_vm0, %v293_v21, %v295_v4  ;;  %v457_v23 = vshrl.u32 %v1602_v7, 16  ;;  %v460_v24 = vshll.u32 %v1602_v7, 16 }
  0x20   :  { %383 = vrot.lane.b32.xlu0 %v1872_v15, %s1788_s23  ;;  %v354_v15 = vrot.slane %v259_v27, 4  ;;  %v270_v13 = vsel %vm2684_vm3, %v265_v2, %v269_v9  ;;  %v322_v26 = vsel %vm313_vm1, %v319_v37, %v321_v17  ;;  %v485_v32 = vrot.slane %v1602_v7, 3 }
  0x21   :  { %409 = vrot.lane.b32.xlu1 %v402_v25, %s1789_s24  ;;  %1684 = vmatpush3.bf16.msra.mxu0 %v1761_v53  ;;  %v405_v25 = vrot.slane %v1601_v20, 2  ;;  %v459_v14 = vrot.slane %v457_v23, 2  ;;  %vm509_vm9 = vcmask 130048   ;;  %vm520_vm10 = vcmask 195584  }
  0x22   :  { %v1977_v40 = vor.u32 %v354_v15, %v353_v35  ;;  %1685 = vmatprep.subr.bf16.mxu0 %v1785_v3  ;;  %v486_v35 = vsel %vm313_vm1, %v483_v54, %v485_v32  ;;  %vm2682_vm11 = vcmask 261120   ;;  %vm542_vm12 = vcmask 326656  }
  0x23   :  { %v406_v30 = vsel %vm2686_vm2, %v403_v47, %v405_v25  ;;  %vm2681_vm13 = vcmask 392192   ;;  %vm564_vm14 = vcmask 457728   ;;  %vm2680_vm15 = vcmask 523264  }
  0x24   :  { %467 = vrot.lane.b32.xlu0 %v446_v33, %s1792_s29  ;;  %v356_v49 = vsel %vm2685_vm4, %v351_v11, %v1977_v40  ;;  %v363_v11 = vrot.slane %v361_v62, 4  ;;  %v271_v33 = vshrl.u32 %v2002_v48, 16  ;;  %vm622_vm6 = vcmask 588800  }
  0x25   :  { %489 = vrot.lane.b32.xlu1 %v482_v29, %s1793_s30  ;;  %1686 = vmatpush3.bf16.msra.mxu0 %v1762_v0  ;;  %v462_v29 = vrot.slane %v460_v24, 3 }
  0x26   :  { %1687 = vmatprep.subr.bf16.mxu0 %v1785_v3  ;;  %v364_v22 = vor.u32 %v363_v11, %v360_v10  ;;  %v273_v15 = vor.u32 %v271_v33, %v269_v9 }
  0x27   :  { %v463_v21 = vor.u32 %v462_v29, %v459_v14 }
  0x28   :  { %278 = vrot.lane.b32.xlu0 %v262_v39, %s1790_s27  ;;  %v365_v27 = vsel %vm2685_vm4, %v1977_v40, %v364_v22 }
  0x29   :  { %301 = vrot.lane.b32.xlu1 %v294_v36, %s1786_s17  ;;  %v464_v34 = vsel %vm2683_vm5, %v454_v58, %v463_v21 }
  0x2c   :  { %327 = vrot.lane.b32.xlu0 %v320_v46, %s1787_s18 }
  0x2d   :  { %370 = vrot.lane.b32.xlu1 %v356_v49, %s1791_s28 }
  0x30   :  { %385 = vrot.lane.b32.xlu0 %v1915_v60, %s1788_s23  ;;  %v1763_v60 = vld [vmem:[%s2673_s1] sm:$0xff]  }
  0x31   :  { %411 = vrot.lane.b32.xlu1 %v404_v55, %s1789_s24  ;;  %1688 = vmatpush3.bf16.msra.mxu0 %v1763_v60 }
  0x34   :  { %469 = vrot.lane.b32.xlu0 %v455_v8, %s1792_s29 }
  0x35   :  { %491 = vrot.lane.b32.xlu1 %v484_v1, %s1793_s30 }
  0x38   :  { %280 = vrot.lane.b32.xlu0 %v270_v13, %s1790_s27 }
  0x39   :  { %303 = vrot.lane.b32.xlu1 %v296_v16, %s1786_s17 }
  0x3c   :  { %329 = vrot.lane.b32.xlu0 %v322_v26, %s1787_s18 }
  0x3d   :  { %372 = vrot.lane.b32.xlu1 %v365_v27, %s1791_s28 }
  0x40   :  { %387 = vrot.lane.b32.xlu0 %v1963_v31, %s1788_s23  ;;  %v1599_v31 = vcombine.low %v1990_v45, %v1990_v45 }
  0x41   :  { %413 = vrot.lane.b32.xlu1 %v406_v30, %s1789_s24 }
  0x44   :  { %471 = vrot.lane.b32.xlu0 %v464_v34, %s1792_s29 }
  0x45   :  { %493 = vrot.lane.b32.xlu1 %v486_v35, %s1793_s30 }
  0x48   :  { %282 = vrot.lane.b32.xlu0 %v273_v15, %s1790_s27  ;;  %s1796_s27 = smov 80  }
  0x49   :  { %305 = vrot.lane.b32.xlu1 %v295_v4, %s1786_s17 }
  0x4c   :  { %331 = vrot.lane.b32.xlu0 %v321_v17, %s1787_s18 }
  0x4d   :  { %374 = vrot.lane.b32.xlu1 %v364_v22, %s1791_s28 }
  0x50   :  { %389 = vrot.lane.b32.xlu0 %v1599_v31, %s1788_s23 }
  0x51   :  { %415 = vrot.lane.b32.xlu1 %v405_v25, %s1789_s24 }
  0x54   :  { %473 = vrot.lane.b32.xlu0 %v463_v21, %s1792_s29 }
  0x55   :  { %495 = vrot.lane.b32.xlu1 %v485_v32, %s1793_s30 }
  0x7a   :  { %v298_v36 = vpop.permute.xlu0 %297 }
  0x7b   :  { %v324_v37 = vpop.permute.xlu1 %323 }
  0x7e   :  { %v382_v38 = vpop.permute.xlu0 %381 }
  0x7f   :  { %v408_v39 = vpop.permute.xlu1 %407 }
  0x82   :  { %v275_v40 = vpop.permute.xlu0 %274 }
  0x83   :  { %v367_v41 = vpop.permute.xlu1 %366  ;;  %v499_v42 = vsel %vm497_vm8, %v1875_v19, %v275_v40 }
  0x84   :  { %v511_v43 = vsel %vm509_vm9, %v499_v42, %v298_v36 }
  0x85   :  { %v522_v44 = vsel %vm520_vm10, %v511_v43, %v324_v37 }
  0x86   :  { %v533_v45 = vsel %vm2682_vm11, %v522_v44, %v367_v41  ;;  %v466_v46 = vpop.permute.xlu0 %465 }
  0x87   :  { %v488_v47 = vpop.permute.xlu1 %487  ;;  %v544_v48 = vsel %vm542_vm12, %v533_v45, %v382_v38 }
  0x88   :  { %v555_v49 = vsel %vm2681_vm13, %v544_v48, %v408_v39 }
  0x89   :  { %v566_v19 = vsel %vm564_vm14, %v555_v49, %v466_v46 }
  0x8a   :  { %v577_v50 = vsel %vm2680_vm15, %v566_v19, %v488_v47  ;;  %v277_v51 = vpop.permute.xlu0 %276 }
  0x8b   :  { %v300_v52 = vpop.permute.xlu1 %299  ;;  %v501_v53 = vsel %vm497_vm8, %v1855_v5, %v277_v51  ;;  %1690 = vmatmul.mubr.msk.bf16.vlgmr.msra.gmra.mxu0 %vm622_vm6, %v577_v50 }
  0x8c   :  { %1693 = vmatprep.mubr.msk.bf16.mxu0 %vm1794_vm7, %v1785_v3  ;;  %v513_v54 = vsel %vm509_vm9, %v501_v53, %v300_v52  ;;  %v27_v52 = vlaneseq }
  0x8e   :  { %v326_v55 = vpop.permute.xlu0 %325  ;;  %v28_v53 = vshrl.u32 %v27_v52, 7 }
  0x8f   :  { %v369_v57 = vpop.permute.xlu1 %368  ;;  %v524_v58 = vsel %vm520_vm10, %v513_v54, %v326_v55 }
  0x90   :  { %v535_v59 = vsel %vm2682_vm11, %v524_v58, %v369_v57  ;;  %v29_v54 = vadd.s32 8, %v28_v53  ;;  %v30_v55 = vadd.s32 16, %v28_v53  ;;  %v1795_v57 = vmov 0  }
  0x91   :  { %1709 = vmatprep.subr.bf16.mxu1 %v1795_v57  ;;  %1362 = vmatprep.subr.bf16.mxu0 %v1795_v57 }
  0x92   :  { %v384_v61 = vpop.permute.xlu0 %383  ;;  %v38_v58 = vcvt.s32.f32 %v29_v54 }
  0x93   :  { %v410_v62 = vpop.permute.xlu1 %409  ;;  %v546_v63 = vsel %vm542_vm12, %v535_v59, %v384_v61  ;;  %v31_v59 = vadd.s32 24, %v28_v53  ;;  %v37_v61 = vcvt.s32.f32 %v28_v53 }
  0x94   :  { %v557_v0 = vsel %vm2681_vm13, %v546_v63, %v410_v62  ;;  %v39_v62 = vcvt.s32.f32 %v30_v55  ;;  %v32_v63 = vadd.s32 32, %v28_v53 }
  0x96   :  { %v468_v5 = vpop.permute.xlu0 %467 }
  0x97   :  { %v490_v1 = vpop.permute.xlu1 %489  ;;  %v568_v2 = vsel %vm564_vm14, %v557_v0, %v468_v5  ;;  %v33_v0 = vadd.s32 40, %v28_v53  ;;  %v47_v5 = vadd.f32 0.5, %v38_v58 }
  0x98   :  { %v579_v4 = vsel %vm2680_vm15, %v568_v2, %v490_v1  ;;  %v40_v1 = vcvt.s32.f32 %v31_v59  ;;  %v46_v2 = vadd.f32 0.5, %v37_v61 }
  0x99   :  { %1694 = vmatmul.mubr.msk.bf16.gmra.mxu0 %vm622_vm6, %v579_v4  ;;  %v48_v4 = vadd.f32 0.5, %v39_v62 }
  0x9a   :  { %v279_v6 = vpop.permute.xlu0 %278  ;;  %1697 = vmatprep.mubr.msk.bf16.mxu0 %vm1794_vm7, %v1785_v3 }
  0x9b   :  { %v302_v7 = vpop.permute.xlu1 %301  ;;  %v503_v8 = vsel %vm497_vm8, %v1909_v56, %v279_v6  ;;  %v41_v6 = vcvt.s32.f32 %v32_v63 }
  0x9c   :  { %v515_v9 = vsel %vm509_vm9, %v503_v8, %v302_v7  ;;  %v34_v7 = vadd.s32 48, %v28_v53 }
  0x9e   :  { %v328_v10 = vpop.permute.xlu0 %327 }
  0x9f   :  { %v371_v11 = vpop.permute.xlu1 %370  ;;  %v526_v12 = vsel %vm520_vm10, %v515_v9, %v328_v10  ;;  %v42_v9 = vcvt.s32.f32 %v33_v0  ;;  %v56_v10 = vmul.f32 0.027777778, %v47_v5 }
  0xa0   :  { %v537_v60 = vsel %vm2682_vm11, %v526_v12, %v371_v11  ;;  %v49_v11 = vadd.f32 0.5, %v40_v1  ;;  %v35_v12 = vadd.s32 56, %v28_v53 }
  0xa2   :  { %v386_v16 = vpop.permute.xlu0 %385 }
  0xa3   :  { %v412_v17 = vpop.permute.xlu1 %411  ;;  %v548_v20 = vsel %vm542_vm12, %v537_v60, %v386_v16  ;;  %v55_v60 = vmul.f32 0.027777778, %v46_v2 }
  0xa4   :  { %v559_v13 = vsel %vm2681_vm13, %v548_v20, %v412_v17  ;;  %v57_v17 = vmul.f32 0.027777778, %v48_v4  ;;  %v50_v20 = vadd.f32 0.5, %v41_v6 }
  0xa6   :  { %v470_v22 = vpop.permute.xlu0 %469 }
  0xa7   :  { %v492_v23 = vpop.permute.xlu1 %491  ;;  %v570_v24 = vsel %vm564_vm14, %v559_v13, %v470_v22  ;;  %v43_v13 = vcvt.s32.f32 %v34_v7 }
  0xa8   :  { %v581_v56 = vsel %vm2680_vm15, %v570_v24, %v492_v23  ;;  %v51_v23 = vadd.f32 0.5, %v42_v9  ;;  %v65_v24 = vfloor.f32 %v56_v10 }
  0xa9   :  { %1698 = vmatmul.mubr.msk.bf16.gmra.mxu0 %vm622_vm6, %v581_v56  ;;  %v58_v56 = vmul.f32 0.027777778, %v49_v11 }
  0xaa   :  { %v281_v25 = vpop.permute.xlu0 %280  ;;  %1701 = vmatprep.mubr.msk.bf16.mxu0 %vm1794_vm7, %v1785_v3 }
  0xab   :  { %v304_v26 = vpop.permute.xlu1 %303  ;;  %v505_v27 = vsel %vm497_vm8, %v1936_v18, %v281_v25  ;;  %v1589_v18 = vcombine.low %v1955_v28, %v1955_v28  ;;  %v44_v25 = vcvt.s32.f32 %v35_v12 }
  0xac   :  { %v517_v14 = vsel %vm509_vm9, %v505_v27, %v304_v26  ;;  %v64_v26 = vfloor.f32 %v55_v60 }
  0xae   :  { %v330_v29 = vpop.permute.xlu0 %329 }
  0xaf   :  { %v373_v30 = vpop.permute.xlu1 %372  ;;  %v528_v21 = vsel %vm520_vm10, %v517_v14, %v330_v29  ;;  %v66_v14 = vfloor.f32 %v57_v17  ;;  %v59_v29 = vmul.f32 0.027777778, %v50_v20 }
  0xb0   :  { %v539_v32 = vsel %vm2682_vm11, %v528_v21, %v373_v30  ;;  %v52_v30 = vadd.f32 0.5, %v43_v13  ;;  %v60_v21 = vmul.f32 0.027777778, %v51_v23 }
  0xb2   :  { %v388_v33 = vpop.permute.xlu0 %387 }
  0xb3   :  { %v414_v34 = vpop.permute.xlu1 %413  ;;  %v550_v35 = vsel %vm542_vm12, %v539_v32, %v388_v33  ;;  %v74_v32 = vmul.f32 36.0, %v65_v24  ;;  %v67_v33 = vfloor.f32 %v58_v56 }
  0xb4   :  { %v561_v15 = vsel %vm2681_vm13, %v550_v35, %v414_v34  ;;  %v53_v34 = vadd.f32 0.5, %v44_v25  ;;  %v36_v35 = vadd.s32 64, %v28_v53 }
  0xb6   :  { %v472_v31 = vpop.permute.xlu0 %471 }
  0xb7   :  { %v494_v36 = vpop.permute.xlu1 %493  ;;  %v572_v37 = vsel %vm564_vm14, %v561_v15, %v472_v31  ;;  %v73_v15 = vmul.f32 36.0, %v64_v26  ;;  %v75_v31 = vmul.f32 36.0, %v66_v14 }
  0xb8   :  { %v583_v38 = vsel %vm2680_vm15, %v572_v37, %v494_v36  ;;  %v68_v36 = vfloor.f32 %v59_v29  ;;  %v61_v37 = vmul.f32 0.027777778, %v52_v30 }
  0xb9   :  { %1702 = vmatmul.mubr.msk.bf16.gmra.mxu0 %vm622_vm6, %v583_v38  ;;  %v83_v38 = vsub.f32 %v38_v58, %v74_v32 }
  0xba   :  { %v283_v39 = vpop.permute.xlu0 %282  ;;  %1705 = vmatprep.mubr.msk.bf16.mxu0 %vm1794_vm7, %v1785_v3  ;;  %vm856_vm7 = vcmask 125952  }
  0xbb   :  { %v306_v40 = vpop.permute.xlu1 %305  ;;  %v508_v41 = vsel %vm497_vm8, %v1589_v18, %v283_v39  ;;  %857 = vst.msk [vmem:[#allocation2 + $0x24] sm:$0xf] %vm856_vm7, %v1795_v57  ;;  %858 = vst.msk [vmem:[#allocation2 + $0x28] sm:$0xf] %vm856_vm7, %v1795_v57  ;;  %v69_v18 = vfloor.f32 %v60_v21  ;;  %v76_v39 = vmul.f32 36.0, %v67_v33 }
  0xbc   :  { %v519_v42 = vsel %vm509_vm9, %v508_v41, %v306_v40  ;;  %v62_v40 = vmul.f32 0.027777778, %v53_v34  ;;  %v45_v41 = vcvt.s32.f32 %v36_v35 }
  0xbe   :  { %v332_v43 = vpop.permute.xlu0 %331 }
  0xbf   :  { %v375_v44 = vpop.permute.xlu1 %374  ;;  %v530_v45 = vsel %vm520_vm10, %v519_v42, %v332_v43  ;;  %v82_v42 = vsub.f32 %v37_v61, %v73_v15 }
  0xc0   :  { %v541_v46 = vsel %vm2682_vm11, %v530_v45, %v375_v44  ;;  %v84_v44 = vsub.f32 %v39_v62, %v75_v31  ;;  %v77_v45 = vmul.f32 36.0, %v68_v36 }
  0xc2   :  { %v390_v28 = vpop.permute.xlu0 %389  ;;  %v93_v52 = vadd.f32 0.5, %v84_v44  ;;  %v86_v53 = vsub.f32 %v41_v6, %v77_v45 }
  0xc3   :  { %v416_v47 = vpop.permute.xlu1 %415  ;;  %v552_v48 = vsel %vm542_vm12, %v541_v46, %v390_v28  ;;  %v70_v46 = vfloor.f32 %v61_v37 }
  0xc4   :  { %v563_v49 = vsel %vm2681_vm13, %v552_v48, %v416_v47  ;;  %v78_v47 = vmul.f32 36.0, %v69_v18  ;;  %v92_v48 = vadd.f32 0.5, %v83_v38  ;;  %v102_v5 = vmul.f32 0.16666667, %v93_v52 }
  0xc5   :  { %v79_v54 = vmul.f32 36.0, %v70_v46  ;;  %v95_v2 = vadd.f32 0.5, %v86_v53 }
  0xc6   :  { %v474_v19 = vpop.permute.xlu0 %473  ;;  %v87_v58 = vsub.f32 %v42_v9, %v78_v47  ;;  %v101_v59 = vmul.f32 0.16666667, %v92_v48  ;;  %v2155_v6 = vfloor.f32 %v102_v5 }
  0xc7   :  { %v496_v50 = vpop.permute.xlu1 %495  ;;  %v574_v3 = vsel %vm564_vm14, %v563_v49, %v474_v19  ;;  %v85_v49 = vsub.f32 %v40_v1, %v76_v39  ;;  %v71_v19 = vfloor.f32 %v62_v40  ;;  %v88_v4 = vsub.f32 %v43_v13, %v79_v54 }
  0xc8   :  { %v585_v51 = vsel %vm2680_vm15, %v574_v3, %v496_v50  ;;  %v54_v50 = vadd.f32 0.5, %v45_v41  ;;  %v91_v3 = vadd.f32 0.5, %v82_v42  ;;  %v96_v7 = vadd.f32 0.5, %v87_v58 }
  0xc9   :  { %1706 = vmatmul.mubr.msk.bf16.gmra.mxu0 %vm622_vm6, %v585_v51  ;;  %v94_v61 = vadd.f32 0.5, %v85_v49  ;;  %v80_v63 = vmul.f32 36.0, %v71_v19  ;;  %v2151_v1 = vfloor.f32 %v101_v59  ;;  %v97_v9 = vadd.f32 0.5, %v88_v4 }
  0xca   :  { %v63_v62 = vmul.f32 0.027777778, %v54_v50  ;;  %v100_v0 = vmul.f32 0.16666667, %v91_v3  ;;  %v105_v17 = vmul.f32 0.16666667, %v96_v7 }
  0xcb   :  { %v103_v10 = vmul.f32 0.16666667, %v94_v61  ;;  %v89_v11 = vsub.f32 %v44_v25, %v80_v63  ;;  %v119_v20 = vmul.f32 6.0, %v2151_v1  ;;  %v120_v25 = vmul.f32 6.0, %v2155_v6 }
  0xcc   :  { %v72_v12 = vfloor.f32 %v63_v62  ;;  %v2153_v60 = vfloor.f32 %v100_v0  ;;  %v106_v14 = vmul.f32 0.16666667, %v97_v9  ;;  %v2166_v30 = vfloor.f32 %v105_v17 }
  0xcd   :  { %v2158_v23 = vfloor.f32 %v103_v10  ;;  %v98_v24 = vadd.f32 0.5, %v89_v11  ;;  %v2168_v21 = vsub.f32 %v83_v38, %v119_v20  ;;  %v2177_v31 = vsub.f32 %v84_v44, %v120_v25 }
  0xce   :  { %v81_v56 = vmul.f32 36.0, %v72_v12  ;;  %v118_v13 = vmul.f32 6.0, %v2153_v60  ;;  %v2180_v37 = vfloor.f32 %v106_v14  ;;  %vm137_vm8 = vcmp.lt.f32.partialorder %v2151_v1, 4.0 }
  0xcf   :  { %v121_v32 = vmul.f32 6.0, %v2158_v23  ;;  %v107_v33 = vmul.f32 0.16666667, %v98_v24  ;;  %v123_v18 = vmul.f32 6.0, %v2166_v30  ;;  %vm146_vm10 = vcmp.lt.f32.partialorder %v2168_v21, 4.0 }
  0xd0   :  { %v2171_v34 = vsub.f32 %v45_v41, %v81_v56  ;;  %v2173_v35 = vsub.f32 %v82_v42, %v118_v13  ;;  %vm136_vm12 = vcmp.lt.f32.partialorder %v2153_v60, 4.0  ;;  %vm138_vm6 = vcmp.lt.f32.partialorder %v2155_v6, 4.0  ;;  %vm155_vm13 = vmand %vm137_vm8, %vm146_vm10 }
  0xd1   :  { %v2185_v39 = vsub.f32 %v85_v49, %v121_v32  ;;  %v2187_v40 = vfloor.f32 %v107_v33  ;;  %vm147_vm15 = vcmp.lt.f32.partialorder %v2177_v31, 4.0  ;;  %v124_v44 = vmul.f32 6.0, %v2180_v37 }
  0xd2   :  { %v99_v41 = vadd.f32 0.5, %v2171_v34  ;;  %vm145_vm14 = vcmp.lt.f32.partialorder %v2173_v35, 4.0  ;;  %v2197_v45 = vsub.f32 %v87_v58, %v123_v18  ;;  %vm139_vm5 = vcmp.lt.f32.partialorder %v2158_v23, 4.0  ;;  %vm156_vm4 = vmand %vm138_vm6, %vm147_vm15 }
  0xd3   :  { %vm154_vm11 = vmand %vm136_vm12, %vm145_vm14  ;;  %vm148_vm3 = vcmp.lt.f32.partialorder %v2185_v39, 4.0  ;;  %v125_v46 = vmul.f32 6.0, %v2187_v40  ;;  %v2205_v48 = vsub.f32 %v88_v4, %v124_v44  ;;  %vm141_vm10 = vcmp.lt.f32.partialorder %v2166_v30, 4.0 }
  0xd4   :  { %vm157_vm8 = vmand %vm139_vm5, %vm148_vm3  ;;  %vm150_vm12 = vcmp.lt.f32.partialorder %v2197_v45, 4.0  ;;  %vm142_vm3 = vcmp.lt.f32.partialorder %v2180_v37, 4.0 }
  0xd5   :  { %v2211_v50 = vsub.f32 %v89_v11, %v125_v46  ;;  %vm151_vm5 = vcmp.lt.f32.partialorder %v2205_v48, 4.0 }
 0x14b   :  { %v2143_v8 = vpop.f32.mrf.mxu0 }
 0x14c   :  { %v727_v49 = vsel %vm154_vm11, %v2143_v8, 0.0  ;;  %vm160_vm11 = vmand %vm142_vm3, %vm151_vm5 }
 0x14d   :  { %v1691_v16 = vpop.f32.mrf.mxu0  ;;  %v736_v0 = vsel %vm509_vm9, %v727_v49, 0.0 }
 0x14e   :  { %v104_v16 = vmul.f32 0.16666667, %v95_v2 }
 0x14f   :  { %v2145_v22 = vpop.f32.mrf.mxu0 }
 0x150   :  { %v728_v47 = vsel %vm155_vm13, %v2145_v22, 0.0 }
 0x151   :  { %v1692_v27 = vpop.f32.mrf.mxu0  ;;  %v761_v52 = vmul.f32 %v728_v47, %v728_v47  ;;  %v737_v58 = vsel %vm509_vm9, %v728_v47, 0.0 }
 0x152   :  { %v2164_v27 = vfloor.f32 %v104_v16  ;;  %v738_v10 = vadd.f32 %v737_v58, %v736_v0 }
 0x153   :  { %v770_v5 = vsel %vm509_vm9, %v761_v52, 0.0 }
 0x154   :  { %v122_v36 = vmul.f32 6.0, %v2164_v27  ;;  %vm140_vm2 = vcmp.lt.f32.partialorder %v2164_v27, 4.0 }
 0x156   :  { %v2194_v42 = vsub.f32 %v86_v53, %v122_v36 }
 0x158   :  { %vm149_vm0 = vcmp.lt.f32.partialorder %v2194_v42, 4.0 }
 0x159   :  { %v2147_v43 = vpop.f32.mrf.mxu0  ;;  %vm158_vm13 = vmand %vm140_vm2, %vm149_vm0  ;;  %vm143_vm0 = vcmp.lt.f32.partialorder %v2187_v40, 4.0  ;;  %vm152_vm2 = vcmp.lt.f32.partialorder %v2211_v50, 4.0 }
 0x15a   :  { %v729_v19 = vsel %vm156_vm4, %v2147_v43, 0.0  ;;  %vm159_vm4 = vmand %vm141_vm10, %vm150_vm12  ;;  %vm2689_vm10 = vcmask 1045504  }
 0x15b   :  { %v1695_v28 = vpop.f32.mrf.mxu0  ;;  %v762_v59 = vmul.f32 %v729_v19, %v729_v19  ;;  %v739_v2 = vsel %vm509_vm9, %v729_v19, 0.0  ;;  %vm161_vm15 = vmand %vm143_vm0, %vm152_vm2  ;;  %vm2697_vm2 = vsmask.f32 7424 }
 0x15c   :  { %v108_v28 = vmul.f32 0.16666667, %v99_v41  ;;  %v740_v56 = vadd.f32 %v739_v2, %v738_v10  ;;  %vm2692_vm3 = vmmov %vm2689_vm10 }
 0x15d   :  { %v2149_v51 = vpop.f32.mrf.mxu0  ;;  %v772_v16 = vsel %vm509_vm9, %v762_v59, 0.0  ;;  %vm2693_vm5 = vmmov %vm2692_vm3 }
 0x15e   :  { %v2213_v3 = vfloor.f32 %v108_v28  ;;  %v730_v54 = vsel %vm157_vm8, %v2149_v51, 0.0  ;;  %vm2695_vm0 = vmmov %vm2692_vm3 }
 0x15f   :  { %v1696_v55 = vpop.f32.mrf.mxu0  ;;  %v763_v4 = vmul.f32 %v730_v54, %v730_v54  ;;  %v741_v9 = vsel %vm509_vm9, %v730_v54, 0.0 }
 0x160   :  { %v760_v55 = vmul.f32 %v727_v49, %v727_v49  ;;  %v126_v62 = vmul.f32 6.0, %v2213_v3  ;;  %v742_v36 = vadd.f32 %v741_v9, %v740_v56  ;;  %vm144_vm14 = vcmp.lt.f32.partialorder %v2213_v3, 4.0 }
 0x161   :  { %v774_v14 = vsel %vm509_vm9, %v763_v4, 0.0 }
 0x162   :  { %v769_v12 = vsel %vm509_vm9, %v760_v55, 0.0  ;;  %v2242_v25 = vsub.f32 %v2171_v34, %v126_v62 }
 0x163   :  { %v771_v24 = vadd.f32 %v770_v5, %v769_v12 }
 0x164   :  { %vm153_vm6 = vcmp.lt.f32.partialorder %v2242_v25, 4.0 }
 0x165   :  { %v773_v33 = vadd.f32 %v772_v16, %v771_v24  ;;  %vm162_vm8 = vmand %vm144_vm14, %vm153_vm6 }
 0x166   :  { %vm2700_vm14 = vmmov %vm2697_vm2 }
 0x167   :  { %v775_v46 = vadd.f32 %v774_v14, %v773_v33 }
 0x169   :  { %v2161_v26 = vpop.f32.mrf.mxu0 }
 0x16a   :  { %v731_v63 = vsel %vm158_vm13, %v2161_v26, 0.0 }
 0x16b   :  { %v1699_v29 = vpop.f32.mrf.mxu0  ;;  %v764_v17 = vmul.f32 %v731_v63, %v731_v63 }
 0x16c   :  { %v743_v29 = vsel %vm509_vm9, %v731_v63, 0.0 }
 0x16d   :  { %v2175_v15 = vpop.f32.mrf.mxu0  ;;  %v744_v28 = vadd.f32 %v743_v29, %v742_v36 }
 0x16e   :  { %v732_v11 = vsel %vm159_vm4, %v2175_v15, 0.0 }
 0x16f   :  { %v1700_v38 = vpop.f32.mrf.mxu0  ;;  %v765_v32 = vmul.f32 %v732_v11, %v732_v11  ;;  %v745_v41 = vsel %vm509_vm9, %v732_v11, 0.0 }
 0x170   :  { %v776_v38 = vsel %vm509_vm9, %v764_v17, 0.0  ;;  %v746_v52 = vadd.f32 %v745_v41, %v744_v28 }
 0x171   :  { %v778_v34 = vsel %vm509_vm9, %v765_v32, 0.0  ;;  %v777_v19 = vadd.f32 %v776_v38, %v775_v46 }
 0x173   :  { %v779_v58 = vadd.f32 %v778_v34, %v777_v19 }
 0x179   :  { %v2215_v53 = vpop.f32.mrf.mxu0 }
 0x17a   :  { %v733_v13 = vsel %vm160_vm11, %v2215_v53, 0.0  ;;  %vm2698_vm11 = vsmask.f32 5376 }
 0x17b   :  { %v1703_v61 = vpop.f32.mrf.mxu0  ;;  %v766_v44 = vmul.f32 %v733_v13, %v733_v13  ;;  %v747_v47 = vsel %vm509_vm9, %v733_v13, 0.0 }
 0x17c   :  { %v748_v59 = vadd.f32 %v747_v47, %v746_v52 }
 0x17d   :  { %v2232_v7 = vpop.f32.mrf.mxu0  ;;  %v780_v54 = vsel %vm509_vm9, %v766_v44, 0.0 }
 0x17e   :  { %v734_v18 = vsel %vm161_vm15, %v2232_v7, 0.0  ;;  %v781_v62 = vadd.f32 %v780_v54, %v779_v58  ;;  %vm2699_vm15 = vmmov %vm2697_vm2 }
 0x17f   :  { %v1704_v20 = vpop.f32.mrf.mxu0  ;;  %v767_v49 = vmul.f32 %v734_v18, %v734_v18  ;;  %v749_v55 = vsel %vm509_vm9, %v734_v18, 0.0 }
 0x180   :  { %v750_v0 = vadd.f32 %v749_v55, %v748_v59 }
 0x181   :  { %v782_v61 = vsel %vm509_vm9, %v767_v49, 0.0 }
 0x182   :  { %v783_v11 = vadd.f32 %v782_v61, %v781_v62 }
 0x189   :  { %v703_v63 = vpop.f32.mrf.mxu0 }
 0x18a   :  { %v735_v5 = vsel %vm162_vm8, %v703_v63, 0.0 }
 0x18b   :  { %v751_v2 = vsel %vm509_vm9, %v735_v5, 0.0  ;;  %v768_v4 = vmul.f32 %v735_v5, %v735_v5  ;;  %v1707_v10 = vpop.f32.mrf.mxu0 }
 0x18c   :  { %v752_v12 = vadd.f32 %v751_v2, %v750_v0 }
 0x18d   :  { %v784_v16 = vsel %vm509_vm9, %v768_v4, 0.0  ;;  %v706_v9 = vpop.f32.mrf.mxu0 }
 0x18e   :  { %v753_v17 = vrot.slane %v752_v12, 4  ;;  %v785_v20 = vadd.f32 %v784_v16, %v783_v11 }
 0x18f   :  { %v1708_v24 = vpop.f32.mrf.mxu0 }
 0x190   :  { %v754_v56 = vadd.f32 %v753_v17, %v752_v12  ;;  %v786_v13 = vrot.slane %v785_v20, 4 }
 0x192   :  { %v755_v14 = vrot.slane %v754_v56, 2  ;;  %v787_v29 = vadd.f32 %v786_v13, %v785_v20 }
 0x194   :  { %v756_v32 = vadd.f32 %v755_v14, %v754_v56  ;;  %v788_v33 = vrot.slane %v787_v29, 2 }
 0x196   :  { %v757_v36 = vrot.slane %v756_v32, 1  ;;  %v789_v18 = vadd.f32 %v788_v33, %v787_v29 }
 0x198   :  { %v758_v38 = vadd.f32 %v757_v36, %v756_v32  ;;  %v790_v41 = vrot.slane %v789_v18, 1 }
 0x19a   :  { %v759_v44 = vmul.f32 0.03125, %v758_v38  ;;  %v791_v46 = vadd.f32 %v790_v41, %v789_v18 }
 0x19c   :  { %v792_v28 = vmul.f32 0.03125, %v791_v46  ;;  %v793_v34 = vmul.f32 %v759_v44, %v759_v44  ;;  %v795_v19 = vsub.f32 %v2143_v8, %v759_v44  ;;  %v796_v52 = vsub.f32 %v2145_v22, %v759_v44  ;;  %v1614_v8 = vld [vmem:[%s2674_s2] ss:$0 sm:$0xff] }
 0x19d   :  { %v797_v54 = vsub.f32 %v2147_v43, %v759_v44  ;;  %v798_v55 = vsub.f32 %v2149_v51, %v759_v44  ;;  %v799_v58 = vsub.f32 %v2161_v26, %v759_v44  ;;  %v800_v61 = vsub.f32 %v2175_v15, %v759_v44  ;;  %v1615_v15 = vld [vmem:[%s2675_s3] ss:$0 sm:$0xff] }
 0x19e   :  { %v794_v47 = vsub.f32 %v792_v28, %v793_v34  ;;  %v801_v62 = vsub.f32 %v2215_v53, %v759_v44  ;;  %v802_v0 = vsub.f32 %v2232_v7, %v759_v44  ;;  %v803_v5 = vsub.f32 %v703_v63, %v759_v44 }
 0x1a0   :  { %v804_v49 = vadd.f32 1e-05, %v794_v47 }
 0x1a2   :  { %1781 = vrsqrt.f32 %v804_v49 }
 0x1af   :  { %v1782_v59 = vpop.eup %1781 }
 0x1b0   :  { %v806_v2 = vmul.f32 %v1782_v59, %v795_v19  ;;  %v807_v22 = vmul.f32 %v1782_v59, %v796_v52  ;;  %v808_v4 = vmul.f32 %v1782_v59, %v797_v54  ;;  %v809_v43 = vmul.f32 %v1782_v59, %v798_v55 }
 0x1b1   :  { %v810_v10 = vmul.f32 %v1782_v59, %v799_v58  ;;  %v811_v51 = vmul.f32 %v1782_v59, %v800_v61  ;;  %v812_v11 = vmul.f32 %v1782_v59, %v801_v62  ;;  %v813_v26 = vmul.f32 %v1782_v59, %v802_v0 }
 0x1b2   :  { %v814_v53 = vmul.f32 %v1782_v59, %v803_v5  ;;  %v822_v12 = vmul.f32 %v1614_v8, %v806_v2  ;;  %v823_v7 = vmul.f32 %v1614_v8, %v807_v22  ;;  %v824_v63 = vmul.f32 %v1614_v8, %v808_v4 }
 0x1b3   :  { %v825_v16 = vmul.f32 %v1614_v8, %v809_v43  ;;  %v826_v9 = vmul.f32 %v1614_v8, %v810_v10  ;;  %v827_v17 = vmul.f32 %v1614_v8, %v811_v51  ;;  %v828_v20 = vmul.f32 %v1614_v8, %v812_v11 }
 0x1b4   :  { %v829_v24 = vmul.f32 %v1614_v8, %v813_v26  ;;  %v830_v56 = vmul.f32 %v1614_v8, %v814_v53  ;;  %v839_v13 = vadd.f32 %v1615_v15, %v823_v7  ;;  %v840_v14 = vadd.f32 %v1615_v15, %v824_v63 }
 0x1b5   :  { %v843_v29 = vadd.f32 %v1615_v15, %v827_v17  ;;  %v844_v32 = vadd.f32 %v1615_v15, %v828_v20  ;;  %v841_v33 = vadd.f32 %v1615_v15, %v825_v16  ;;  %v842_v36 = vadd.f32 %v1615_v15, %v826_v9  ;;  %v1772_v17 = vld [vmem:[%s2676_s4 + $0x38] sm:$0xff]  }
 0x1b6   :  { %v846_v18 = vadd.f32 %v1615_v15, %v830_v56  ;;  %v848_v38 = vmax.f32 %v839_v13, 0.0  ;;  %v849_v41 = vmax.f32 %v840_v14, 0.0  ;;  %v845_v44 = vadd.f32 %v1615_v15, %v829_v24  ;;  %1718 = vmatpush1.bf16.msra.mxu1 %v1772_v17  ;;  %1363 = vmatpush1.bf16.msra.mxu0 %v1772_v17 }
 0x1b7   :  { %v852_v46 = vmax.f32 %v843_v29, 0.0  ;;  %v853_v28 = vmax.f32 %v844_v32, 0.0  ;;  %v850_v34 = vmax.f32 %v841_v33, 0.0  ;;  %v851_v47 = vmax.f32 %v842_v36, 0.0  ;;  %1710 = vmatprep.subr.bf16.mxu1 %v1795_v57  ;;  %v1773_v32 = vld [vmem:[%s2676_s4 + $0x30] sm:$0xff]   ;;  %1364 = vmatprep.subr.bf16.mxu0 %v1795_v57 }
 0x1b8   :  { %v855_v49 = vmax.f32 %v846_v18, 0.0  ;;  %v1661_v19 = vpack.c.bf16 %v848_v38, %v848_v38  ;;  %v1662_v52 = vpack.c.bf16 %v849_v41, %v849_v41  ;;  %v854_v54 = vmax.f32 %v845_v44, 0.0 }
 0x1b9   :  { %v1665_v55 = vpack.c.bf16 %v852_v46, %v852_v46  ;;  %v1666_v58 = vpack.c.bf16 %v853_v28, %v853_v28  ;;  %v1663_v59 = vpack.c.bf16 %v850_v34, %v850_v34  ;;  %v1664_v61 = vpack.c.bf16 %v851_v47, %v851_v47  ;;  %v1774_v34 = vld [vmem:[%s2676_s4 + $0x28] sm:$0xff]  }
 0x1ba   :  { %v1668_v62 = vpack.c.bf16 %v855_v49, %v855_v49  ;;  %897 = vst.msk [vmem:[#allocation2 + $0x4] sm:$0xf] %vm856_vm7, %v1661_v19  ;;  %898 = vst.msk [vmem:[#allocation2 + $0x8] sm:$0xf] %vm856_vm7, %v1662_v52  ;;  %v1667_v0 = vpack.c.bf16 %v854_v54, %v854_v54  ;;  %v838_v5 = vadd.f32 %v1615_v15, %v822_v12  ;;  %1719 = vmatpush1.bf16.msra.mxu1 %v1773_v32 }
 0x1bb   :  { %901 = vst.msk [vmem:[#allocation2 + $0x14] sm:$0xf] %vm856_vm7, %v1665_v55  ;;  %902 = vst.msk [vmem:[#allocation2 + $0x18] sm:$0xf] %vm856_vm7, %v1666_v58  ;;  %1365 = vmatpush1.bf16.msra.mxu0 %v1773_v32  ;;  %1711 = vmatprep.subr.bf16.mxu1 %v1795_v57 }
 0x1bc   :  { %899 = vst.msk [vmem:[#allocation2 + $0xc] sm:$0xf] %vm856_vm7, %v1663_v59  ;;  %900 = vst.msk [vmem:[#allocation2 + $0x10] sm:$0xf] %vm856_vm7, %v1664_v61  ;;  %v847_v8 = vmax.f32 %v838_v5, 0.0  ;;  %1366 = vmatprep.subr.bf16.mxu0 %v1795_v57  ;;  %v1775_v61 = vld [vmem:[%s2676_s4 + $0x20] sm:$0xff]  }
 0x1bd   :  { %904 = vst.msk [vmem:[#allocation2 + $0x20] sm:$0xf] %vm856_vm7, %v1668_v62  ;;  %903 = vst.msk [vmem:[#allocation2 + $0x1c] sm:$0xf] %vm856_vm7, %v1667_v0  ;;  %v914_v0 = vld [vmem:[#allocation2 + $0x24] sm:$0x1] }
 0x1be   :  { %v1660_v2 = vpack.c.bf16 %v847_v8, %v847_v8  ;;  %1720 = vmatpush1.bf16.msra.mxu1 %v1774_v34 }
 0x1bf   :  { %1367 = vmatpush1.bf16.msra.mxu0 %v1774_v34  ;;  %1712 = vmatprep.subr.bf16.mxu1 %v1795_v57 }
 0x1c0   :  { %896 = vst.msk [vmem:[#allocation2] sm:$0xf] %vm856_vm7, %v1660_v2  ;;  %vm2688_vm7 = vcmask 1046528   ;;  %1368 = vmatprep.subr.bf16.mxu0 %v1795_v57 }
 0x1c1   :  { %v2281_v22 = vld [vmem:[#allocation2 + $0x8] sm:$0xf]  ;;  %v922_v4 = vld [vmem:[#allocation2 + $0x4] sm:$0x8]  ;;  %vm2690_vm12 = vmmov %vm2688_vm7 }
 0x1c2   :  { %v910_v43 = vld [vmem:[#allocation2 + $0x14] sm:$0xf]  ;;  %v911_v10 = vld [vmem:[#allocation2 + $0x18] sm:$0xf]  ;;  %v1643_v11 = vcombine.low %v922_v4, %v2281_v22  ;;  %v2286_v12 = vld [vmem:[#allocation2 + $0x4] sm:$0xf]  ;;  %1721 = vmatpush1.bf16.msra.mxu1 %v1775_v61 }
 0x1c3   :  { %v908_v51 = vld [vmem:[#allocation2 + $0xc] sm:$0xf]  ;;  %v2284_v26 = vcombine.low %v910_v43, %v911_v10  ;;  %v909_v15 = vld [vmem:[#allocation2 + $0x10] sm:$0xf]  ;;  %v1635_v14 = vcombine.low %v2286_v12, %v2281_v22  ;;  %v919_v59 = vld [vmem:[#allocation2 + $0x4] sm:$0xc]  ;;  %1369 = vmatpush1.bf16.msra.mxu0 %v1775_v61  ;;  %1713 = vmatprep.subr.bf16.mxu1 %v1795_v57 }
 0x1c4   :  { %v912_v53 = vld [vmem:[#allocation2 + $0x1c] sm:$0xf]  ;;  %v2288_v7 = vcombine.low %v908_v51, %v909_v15  ;;  %v2291_v63 = vcombine.low %v2281_v22, %v908_v51  ;;  %v1187_v16 = vrot.slane %v1643_v11, 3  ;;  %v2293_v9 = vld [vmem:[#allocation2 + $0x20] sm:$0xf]  ;;  %v2300_v20 = vcombine.low %v909_v15, %v910_v43  ;;  %1370 = vmatprep.subr.bf16.mxu0 %v1795_v57  ;;  %vm2691_vm13 = vmmov %vm2688_vm7 }
 0x1c5   :  { %1096 = vrot.lane.b32.xlu1 %v2284_v26, %s1796_s27  ;;  %v1190_v24 = vrot.slane %v2284_v26, 3  ;;  %v2307_v13 = vcombine.low %v912_v53, %v2293_v9  ;;  %v2333_v47 = vcombine.low %v911_v10, %v912_v53  ;;  %v1111_v19 = vrot.slane %v2284_v26, 2  ;;  %v2362_v43 = vld [vmem:[#allocation2 + $0x24] sm:$0xf]  ;;  %v920_v51 = vld [vmem:[#allocation2 + $0x28] sm:$0x3]  ;;  %vm2694_vm4 = vmmov %vm2688_vm7 }
 0x1c6   :  { %1094 = vrot.lane.b32.xlu0 %v2288_v7, %s1796_s27  ;;  %v1188_v56 = vrot.slane %v2288_v7, 3  ;;  %v1002_v18 = vrot.slane %v2291_v63, 1  ;;  %v1027_v38 = vrot.slane %v2291_v63, 3  ;;  %v1004_v41 = vrot.slane %v2300_v20, 1  ;;  %v921_v11 = vld [vmem:[#allocation2 + $0x28] sm:$0x7] }
 0x1c7   :  { %v915_v29 = vld [vmem:[#allocation2] sm:$0xe]  ;;  %v1029_v44 = vrot.slane %v2300_v20, 3  ;;  %v1109_v49 = vrot.slane %v2288_v7, 2  ;;  %v1006_v62 = vrot.slane %v2333_v47, 1  ;;  %v2358_v4 = vcombine.low %v919_v59, %v2281_v22  ;;  %v1776_v15 = vld [vmem:[%s2676_s4 + $0x18] sm:$0xff]  }
 0x1c8   :  { %v1189_v33 = vsel %vm313_vm1, %v1187_v16, %v1188_v56  ;;  %v1191_v36 = vsel %vm313_vm1, %v1188_v56, %v1190_v24  ;;  %v1631_v46 = vcombine.low %v915_v29, %v2286_v12  ;;  %v916_v28 = vld [vmem:[#allocation2] sm:$0x8]  ;;  %v1005_v52 = vsel %vm2688_vm7, %v1002_v18, %v1004_v41  ;;  %1722 = vmatpush1.bf16.msra.mxu1 %v1776_v15  ;;  %vm2703_vm7 = vmmov %vm2697_vm2 }
 0x1c9   :  { %1653 = vmatprep.mubr.msk.bf16.mxu0 %vm509_vm9, %v1189_v33  ;;  %1654 = vmatprep.mubr.msk.bf16.mxu1 %vm509_vm9, %v1191_v36  ;;  %v1030_v54 = vsel %vm313_vm1, %v1027_v38, %v1029_v44  ;;  %v2344_v58 = vcombine.low %v916_v28, %v2286_v12  ;;  %v1112_v5 = vsel %vm2689_vm10, %v1109_v49, %v1111_v19  ;;  %v1031_v16 = vrot.slane %v2333_v47, 3  ;;  %v905_v33 = vld [vmem:[#allocation2] sm:$0xf]  ;;  %vm2704_vm10 = vmmov %vm2698_vm11 }
 0x1ca   :  { %1098 = vrot.lane.b32.xlu1 %v2307_v13, %s1796_s27  ;;  %1092 = vrot.lane.b32.xlu0 %v1635_v14, %s1796_s27  ;;  %v1001_v55 = vrot.slane %v1631_v46, 1  ;;  %v2365_v10 = vcombine.low %v2293_v9, %v914_v0  ;;  %v1007_v22 = vsel %vm2691_vm13, %v1004_v41, %v1006_v62  ;;  %v1108_v17 = vrot.slane %v2358_v4, 2  ;;  %v917_v14 = vld [vmem:[#allocation2 + $0x24] sm:$0x7]  ;;  %v1777_v41 = vld [vmem:[%s2676_s4 + $0x10] sm:$0xff]   ;;  %vm2706_vm13 = vmmov %vm2704_vm10 }
 0x1cb   :  { %v1026_v2 = vrot.slane %v2344_v58, 3  ;;  %v1113_v56 = vrot.slane %v2307_v13, 2  ;;  %v1641_v29 = vcombine.low %v2362_v43, %v920_v51  ;;  %v2381_v32 = vcombine.low %v2362_v43, %v921_v11  ;;  %1371 = vmatpush1.bf16.msra.mxu0 %v1776_v15  ;;  %1714 = vmatprep.subr.bf16.mxu1 %v1795_v57 }
 0x1cc   :  { %v1003_v8 = vsel %vm2690_vm12, %v1001_v55, %v1002_v18  ;;  %v1008_v36 = vrot.slane %v2365_v10, 1  ;;  %v957_v18 = vshll.u32 %v2291_v63, 16  ;;  %v965_v46 = vshll.u32 %v2300_v20, 16  ;;  %1372 = vmatprep.subr.bf16.mxu0 %v1795_v57  ;;  %1723 = vmatpush1.bf16.msra.mxu1 %v1777_v41  ;;  %vm2705_vm12 = vmmov %vm2704_vm10 }
 0x1cd   :  { %v1028_v53 = vsel %vm313_vm1, %v1026_v2, %v1027_v38  ;;  %v961_v38 = vshrl.u32 %v2291_v63, 16  ;;  %v969_v28 = vshrl.u32 %v2300_v20, 16  ;;  %v1032_v34 = vsel %vm313_vm1, %v1029_v44, %v1031_v16  ;;  %1715 = vmatprep.subr.bf16.mxu1 %v1795_v57 }
 0x1ce   :  { %1012 = vrot.lane.b32.xlu1 %v1005_v52, %s1791_s28  ;;  %1037 = vrot.lane.b32.xlu0 %v1030_v54, %s1789_s24  ;;  %v1110_v52 = vsel %vm2692_vm3, %v1108_v17, %v1109_v49  ;;  %v1633_v54 = vcombine.low %v2293_v9, %v917_v14  ;;  %v2399_v55 = vcombine.low %v905_v33, %v2286_v12  ;;  %v2404_v61 = vrot.slane %v1641_v29, 2  ;;  %v1778_v12 = vld [vmem:[%s2676_s4 + $0x8] sm:$0xff]   ;;  %v1779_v33 = vld [vmem:[%s2676_s4] sm:$0xff]  }
 0x1cf   :  { %v1114_v59 = vsel %vm2693_vm5, %v1111_v19, %v1113_v56  ;;  %v1194_v0 = vrot.slane %v2381_v32, 3  ;;  %v1009_v44 = vsel %vm2694_vm4, %v1006_v62, %v1008_v36  ;;  %v1056_v49 = vrot.slane %v961_v38, 3  ;;  %1373 = vmatpush1.bf16.msra.mxu0 %v1777_v41 }
 0x1d0   :  { %v1060_v19 = vrot.slane %v969_v28, 3  ;;  %v1061_v2 = vrot.slane %v965_v46, 4  ;;  %v1139_v51 = vshrl.u32 %v2288_v7, 16  ;;  %v1142_v11 = vshll.u32 %v2288_v7, 16  ;;  %1374 = vmatprep.subr.bf16.mxu0 %v1795_v57  ;;  %1724 = vmatpush1.bf16.msra.mxu1 %v1778_v12 }
 0x1d1   :  { %v2420_v62 = vrot.slane %v1633_v54, 3  ;;  %v1148_v15 = vshrl.u32 %v2284_v26, 16  ;;  %v1116_v17 = vsel %vm2695_vm0, %v1113_v56, %v2404_v61  ;;  %v959_v29 = vrot.slane %v957_v18, 1  ;;  %1716 = vmatprep.subr.bf16.mxu1 %v1795_v57 }
 0x1d2   :  { %1119 = vrot.lane.b32.xlu1 %v1112_v5, %s1797_s26  ;;  %1010 = vrot.lane.b32.xlu0 %v1003_v8, %s1791_s28  ;;  %v1057_v5 = vrot.slane %v957_v18, 4  ;;  %v981_v8 = vshll.u32 %v2365_v10, 16  ;;  %v1144_v54 = vrot.slane %v1142_v11, 3  ;;  %v1049_v11 = vshrl.u32 %v2344_v58, 16 }
 0x1d3   :  { %1375 = vmatpush1.bf16.msra.mxu0 %v1778_v12  ;;  %v1034_v18 = vsel %vm313_vm1, %v1031_v16, %v2420_v62  ;;  %v1780_v12 = vld [vmem:[%s2676_s4 + $0x40] sm:$0xff]   ;;  %s1798_s4 = smov 112   ;;  %vm2708_vm5 = vcmask 261120   ;;  %vm1237_vm4 = vcmask 654336   ;;  %vm2709_vm0 = vcmask 392192  }
 0x1d4   :  { %v2429_v7 = vor.u32 %v1057_v5, %v1056_v49  ;;  %v2431_v14 = vrot.slane %v981_v8, 1  ;;  %1376 = vmatprep.subr.bf16.mxu0 %v1795_v57  ;;  %v963_v49 = vor.u32 %v961_v38, %v959_v29  ;;  %v967_v5 = vrot.slane %v965_v46, 1  ;;  %1725 = vmatpush1.bf16.msra.mxu1 %v1779_v33 }
 0x1d5   :  { %v973_v8 = vshll.u32 %v2333_v47, 16  ;;  %1717 = vmatprep.subr.bf16.mxu1 %v1795_v57 }
 0x1d6   :  { %1014 = vrot.lane.b32.xlu1 %v1007_v22, %s1791_s28  ;;  %1035 = vrot.lane.b32.xlu0 %v1028_v53, %s1789_s24  ;;  %v1151_v22 = vshll.u32 %v2284_v26, 16  ;;  %v1192_v53 = vrot.slane %v2307_v13, 3 }
 0x1d7   :  { %1377 = vmatpush1.bf16.msra.mxu0 %v1779_v33  ;;  %v950_v33 = vshrl.u32 %v2399_v55, 16 }
 0x1d8   :  { %v2439_v41 = vsel %vm313_vm1, %v1190_v24, %v1192_v53  ;;  %v2446_v56 = vsel %vm313_vm1, %v1192_v53, %v1194_v0  ;;  %v1153_v26 = vrot.slane %v1151_v22, 3  ;;  %v952_v24 = vshll.u32 %v2399_v55, 16  ;;  %1392 = vmatprep.subr.bf16.mxu0 %v1795_v57  ;;  %1726 = vmatpush2.bf16.msra.mxu1 %v1780_v12 }
 0x1d9   :  { %vm2696_vm1 = vsmask.f32 4352  ;;  %v968_v22 = vsel %vm2697_vm2, %v963_v49, %v967_v5  ;;  %v971_v53 = vor.u32 %v969_v28, %v967_v5  ;;  %vm2710_vm2 = vcmask 523264  }
 0x1da   :  { %1039 = vrot.lane.b32.xlu1 %v1032_v34, %s1789_s24  ;;  %1117 = vrot.lane.b32.xlu0 %v1110_v52, %s1797_s26  ;;  %v1062_v34 = vor.u32 %v1061_v2, %v1060_v19  ;;  %v1141_v52 = vrot.slane %v1139_v51, 2  ;;  %v977_v51 = vshrl.u32 %v2333_v47, 16  ;;  %v954_v46 = vrot.slane %v952_v24, 1  ;;  %vm2701_vm6 = vmmov %vm2696_vm1 }
 0x1db   :  { %1393 = vmatpush2.bf16.msra.mxu0 %v1780_v12  ;;  %vm2702_vm8 = vmmov %vm2696_vm1 }
 0x1dc   :  { %v1063_v16 = vsel %vm2696_vm1, %v2429_v7, %v1062_v34  ;;  %v1145_v2 = vor.u32 %v1144_v54, %v1141_v52  ;;  %v1064_v57 = vrot.slane %v977_v51, 3  ;;  %v1065_v52 = vrot.slane %v973_v8, 4  ;;  %vm2707_vm3 = vmmov %vm2696_vm1 }
 0x1dd   :  { %v1131_v54 = vshrl.u32 %v2358_v4, 16  ;;  %vm1248_vm1 = vcmask 785408  }
 0x1de   :  { %1121 = vrot.lane.b32.xlu1 %v1114_v59, %s1797_s26  ;;  %1016 = vrot.lane.b32.xlu0 %v1009_v44, %s1791_s28  ;;  %v1150_v59 = vrot.slane %v1148_v15, 2  ;;  %v985_v44 = vshrl.u32 %v2365_v10, 16  ;;  %v1052_v15 = vshll.u32 %v2344_v58, 16  ;;  %v1134_v58 = vshll.u32 %v2358_v4, 16 }
 0x1df   :  { %v1133_v49 = vrot.slane %v1131_v54, 2 }
 0x1e0   :  { %v987_v19 = vor.u32 %v985_v44, %v2431_v14  ;;  %v1154_v38 = vor.u32 %v1153_v26, %v1150_v59  ;;  %v955_v59 = vor.u32 %v954_v46, %v950_v33  ;;  %v1051_v26 = vrot.slane %v1049_v11, 3 }
 0x1e1   :  { %v1054_v24 = vrot.slane %v1052_v15, 4  ;;  %v1066_v44 = vor.u32 %v1065_v52, %v1064_v57  ;;  %v1136_v5 = vrot.slane %v1134_v58, 3  ;;  %v1166_v46 = vshrl.u32 %v2381_v32, 16 }
 0x1e2   :  { %1041 = vrot.lane.b32.xlu1 %v1034_v18, %s1789_s24  ;;  %1123 = vrot.lane.b32.xlu0 %v1116_v17, %s1797_s26  ;;  %v975_v17 = vrot.slane %v973_v8, 1  ;;  %v1155_v18 = vsel %vm2698_vm11, %v1145_v2, %v1154_v38  ;;  %v1157_v8 = vshrl.u32 %v2307_v13, 16  ;;  %v960_v12 = vsel %vm2700_vm14, %v955_v59, %v959_v29  ;;  %vm2712_vm14 = vmmov %vm2708_vm5 }
 0x1e3   :  { %v1055_v4 = vor.u32 %v1054_v24, %v1051_v26  ;;  %v1169_v11 = vshll.u32 %v2381_v32, 16  ;;  %v1067_v15 = vsel %vm2701_vm6, %v1062_v34, %v1066_v44  ;;  %v1168_v58 = vrot.slane %v1166_v46, 2  ;;  %vm2713_vm6 = vmmov %vm2709_vm0 }
 0x1e4   :  { %v976_v28 = vsel %vm2699_vm15, %v971_v53, %v975_v17  ;;  %v1137_v53 = vor.u32 %v1136_v5, %v1133_v49  ;;  %v1159_v33 = vrot.slane %v1157_v8, 2  ;;  %vm1259_vm11 = vcmask 916480   ;;  %vm2711_vm15 = vmmov %vm2708_vm5 }
 0x1e5   :  { %v1059_v29 = vsel %vm2702_vm8, %v1055_v4, %v2429_v7  ;;  %vm2714_vm8 = vmmov %vm2709_vm0 }
 0x1e6   :  { %1079 = vrot.lane.b32.xlu1 %v1063_v16, %s1793_s30  ;;  %996 = vrot.lane.b32.xlu0 %v987_v19, %s1786_s17  ;;  %v1160_v16 = vshll.u32 %v2307_v13, 16  ;;  %v1634_v19 = vcombine.low %v2293_v9, %v2362_v43  ;;  %v1146_v34 = vsel %vm2704_vm10, %v1137_v53, %v1145_v2  ;;  %vm2716_vm10 = vmmov %vm2710_vm2 }
 0x1e8   :  { %v1162_v13 = vrot.slane %v1160_v16, 3  ;;  %v1069_v57 = vshrl.u32 %v1634_v19, 16  ;;  %v1072_v52 = vshll.u32 %v1634_v19, 16 }
 0x1ea   :  { %1176 = vrot.lane.b32.xlu1 %v1155_v18, %s1798_s4  ;;  %990 = vrot.lane.b32.xlu0 %v968_v22, %s1786_s17  ;;  %v979_v22 = vor.u32 %v977_v51, %v975_v17  ;;  %v1171_v18 = vrot.slane %v1169_v11, 3  ;;  %v1163_v51 = vor.u32 %v1162_v13, %v1159_v33  ;;  %v1071_v17 = vrot.slane %v1069_v57, 3 }
 0x1eb   :  { %v1074_v59 = vrot.slane %v1072_v52, 4 }
 0x1ec   :  { %v984_v54 = vsel %vm2703_vm7, %v979_v22, %v2431_v14  ;;  %v1164_v7 = vsel %vm2705_vm12, %v1154_v38, %v1163_v51  ;;  %v1172_v26 = vor.u32 %v1171_v18, %v1168_v58  ;;  %v1639_v38 = vcombine.low %v2362_v43, %v2362_v43  ;;  %vm2715_vm7 = vmmov %vm2710_vm2 }
 0x1ed   :  { %v1075_v24 = vor.u32 %v1074_v59, %v1071_v17  ;;  %vm2717_vm12 = vmmov %vm2708_vm5 }
 0x1ee   :  { %992 = vrot.lane.b32.xlu1 %v976_v28, %s1786_s17  ;;  %988 = vrot.lane.b32.xlu0 %v960_v12, %s1786_s17  ;;  %v1173_v14 = vsel %vm2706_vm13, %v1163_v51, %v1172_v26  ;;  %vm2718_vm13 = vmmov %vm2709_vm0 }
 0x1ef   :  { %v1076_v2 = vsel %vm2707_vm3, %v1066_v44, %v1075_v24  ;;  %vm2719_vm3 = vmmov %vm2710_vm2 }
 0x1f2   :  { %1081 = vrot.lane.b32.xlu1 %v1067_v15, %s1793_s30  ;;  %1077 = vrot.lane.b32.xlu0 %v1059_v29, %s1793_s30 }
 0x1f6   :  { %994 = vrot.lane.b32.xlu1 %v984_v54, %s1786_s17  ;;  %1174 = vrot.lane.b32.xlu0 %v1146_v34, %s1798_s4 }
 0x1fa   :  { %1018 = vrot.lane.b32.xlu1 %v1008_v36, %s1791_s28  ;;  %1178 = vrot.lane.b32.xlu0 %v1164_v7, %s1798_s4 }
 0x1fe   :  { %1180 = vrot.lane.b32.xlu1 %v1173_v14, %s1798_s4  ;;  %1083 = vrot.lane.b32.xlu0 %v1076_v2, %s1793_s30 }
 0x202   :  { %1085 = vrot.lane.b32.xlu1 %v1075_v24, %s1793_s30  ;;  %1043 = vrot.lane.b32.xlu0 %v2420_v62, %s1789_s24 }
 0x206   :  { %1100 = vrot.lane.b32.xlu0 %v1639_v38, %s1796_s27  ;;  %1125 = vrot.lane.b32.xlu1 %v2404_v61, %s1797_s26 }
 0x20a   :  { %1182 = vrot.lane.b32.xlu0 %v1172_v26, %s1798_s4 }
 0x237   :  { %v1097_v10 = vpop.permute.xlu1 %1096 }
 0x238   :  { %v1095_v36 = vpop.permute.xlu0 %1094 }
 0x23c   :  { %v2515_v28 = vpop.permute.xlu1 %1098  ;;  %v1093_v44 = vpop.permute.xlu0 %1092 }
 0x240   :  { %v1013_v49 = vpop.permute.xlu1 %1012  ;;  %v1038_v5 = vpop.permute.xlu0 %1037 }
 0x244   :  { %v1120_v8 = vpop.permute.xlu1 %1119  ;;  %v1011_v12 = vpop.permute.xlu0 %1010 }
 0x248   :  { %v1015_v62 = vpop.permute.xlu1 %1014  ;;  %v1036_v4 = vpop.permute.xlu0 %1035 }
 0x24c   :  { %v1040_v16 = vpop.permute.xlu1 %1039  ;;  %v1118_v43 = vpop.permute.xlu0 %1117 }
 0x250   :  { %v1122_v19 = vpop.permute.xlu1 %1121  ;;  %v1017_v46 = vpop.permute.xlu0 %1016 }
 0x254   :  { %v1042_v11 = vpop.permute.xlu1 %1041  ;;  %v1124_v15 = vpop.permute.xlu0 %1123 }
 0x258   :  { %v1080_v61 = vpop.permute.xlu1 %1079  ;;  %v997_v22 = vpop.permute.xlu0 %996 }
 0x25c   :  { %v1177_v53 = vpop.permute.xlu1 %1176  ;;  %v991_v33 = vpop.permute.xlu0 %990 }
 0x25d   :  { %v1199_v29 = vsel %vm509_vm9, %v2291_v63, %v991_v33 }
 0x25e   :  { %v1210_v13 = vsel %vm2708_vm5, %v1199_v29, %v1013_v49 }
 0x25f   :  { %v1220_v57 = vsel %vm2709_vm0, %v1210_v13, %v1038_v5 }
 0x260   :  { %v993_v52 = vpop.permute.xlu1 %992  ;;  %v989_v54 = vpop.permute.xlu0 %988  ;;  %v1230_v58 = vsel %vm2710_vm2, %v1220_v57, %v1080_v61 }
 0x261   :  { %v1201_v18 = vsel %vm509_vm9, %v2300_v20, %v993_v52  ;;  %v1197_v34 = vsel %vm509_vm9, %v2399_v55, %v989_v54  ;;  %v1241_v51 = vsel %vm1237_vm4, %v1230_v58, %v1095_v36 }
 0x262   :  { %v1212_v63 = vsel %vm2711_vm15, %v1201_v18, %v1015_v62  ;;  %v1208_v17 = vsel %vm2712_vm14, %v1197_v34, %v1011_v12  ;;  %v1252_v59 = vsel %vm1248_vm1, %v1241_v51, %v1120_v8  ;;  %vm163_vm15 = vcmp.lt.f32.partialorder %v2153_v60, 2.0 }
 0x263   :  { %v1222_v7 = vsel %vm2713_vm6, %v1212_v63, %v1040_v16  ;;  %v1264_v26 = vsel %vm1259_vm11, %v1252_v59, %v1177_v53  ;;  %v1218_v24 = vsel %vm2714_vm8, %v1208_v17, %v1036_v4  ;;  %vm172_vm14 = vcmp.lt.f32.partialorder %v2173_v35, 2.0 }
 0x264   :  { %v1082_v14 = vpop.permute.xlu1 %1081  ;;  %1403 = vmatmul.mubr.bf16.vlgmr.msra.gmra.mxu1 %v1264_v26  ;;  %v1078_v20 = vpop.permute.xlu0 %1077  ;;  %vm165_vm6 = vcmp.lt.f32.partialorder %v2155_v6, 2.0  ;;  %vm174_vm8 = vcmp.lt.f32.partialorder %v2177_v31, 2.0 }
 0x265   :  { %v1228_v2 = vsel %vm2715_vm7, %v1218_v24, %v1078_v20  ;;  %1655 = vmatprep.mubr.msk.bf16.mxu1 %vm509_vm9, %v2439_v41  ;;  %v1232_v55 = vsel %vm2716_vm10, %v1222_v7, %v1082_v14  ;;  %vm175_vm7 = vcmp.lt.f32.partialorder %v2185_v39, 2.0  ;;  %vm173_vm10 = vcmp.lt.f32.partialorder %v2168_v21, 2.0 }
 0x266   :  { %v1239_v38 = vsel %vm1237_vm4, %v1228_v2, %v1093_v44  ;;  %v1243_v8 = vsel %vm1237_vm4, %v1232_v55, %v1097_v10 }
 0x267   :  { %v1250_v36 = vsel %vm1248_vm1, %v1239_v38, %v1118_v43  ;;  %v1254_v41 = vsel %vm1248_vm1, %v1243_v8, %v1122_v19 }
 0x268   :  { %v995_v49 = vpop.permute.xlu1 %994  ;;  %v1175_v5 = vpop.permute.xlu0 %1174 }
 0x269   :  { %v1261_v12 = vsel %vm1259_vm11, %v1250_v36, %v1175_v5  ;;  %v1203_v62 = vsel %vm509_vm9, %v2333_v47, %v995_v49  ;;  %v1629_v47 = vcombine.low %v2293_v9, %v2293_v9 }
 0x26a   :  { %1395 = vmatmul.mubr.bf16.vlgmr.msra.gmra.mxu0 %v1261_v12  ;;  %v1214_v61 = vsel %vm2717_vm12, %v1203_v62, %v1017_v46  ;;  %vm183_vm12 = vmand %vm165_vm6, %vm174_vm8  ;;  %vm169_vm8 = vcmp.lt.f32.partialorder %v2180_v37, 2.0 }
 0x26b   :  { %v1224_v10 = vsel %vm2718_vm13, %v1214_v61, %v1042_v11  ;;  %v1206_v46 = vsel %vm509_vm9, %v1629_v47, %v997_v22 }
 0x26c   :  { %v1019_v4 = vpop.permute.xlu1 %1018  ;;  %v1179_v16 = vpop.permute.xlu0 %1178 }
 0x26d   :  { %v1267_v44 = vsel %vm1259_vm11, %v1254_v41, %v1179_v16  ;;  %v1216_v13 = vsel %vm2708_vm5, %v1206_v46, %v1019_v4  ;;  %vm176_vm5 = vcmp.lt.f32.partialorder %v2194_v42, 2.0 }
 0x26e   :  { %1411 = vmatmul.mubr.bf16.gmra.mxu1 %v1267_v44 }
 0x26f   :  { %1656 = vmatprep.mubr.msk.bf16.mxu1 %vm509_vm9, %v2446_v56 }
 0x270   :  { %v1181_v43 = vpop.permute.xlu1 %1180  ;;  %v1084_v53 = vpop.permute.xlu0 %1083 }
 0x271   :  { %v1234_v33 = vsel %vm2719_vm3, %v1224_v10, %v1084_v53  ;;  %vm167_vm3 = vcmp.lt.f32.partialorder %v2164_v27, 2.0 }
 0x272   :  { %v1245_v19 = vsel %vm1237_vm4, %v1234_v33, %v2515_v28 }
 0x273   :  { %v1256_v29 = vsel %vm1248_vm1, %v1245_v19, %v1124_v15 }
 0x274   :  { %v1086_v57 = vpop.permute.xlu1 %1085  ;;  %v1044_v56 = vpop.permute.xlu0 %1043  ;;  %v1270_v52 = vsel %vm1259_vm11, %v1256_v29, %v1181_v43 }
 0x275   :  { %v1226_v11 = vsel %vm2709_vm0, %v1216_v13, %v1044_v56 }
 0x276   :  { %1419 = vmatmul.mubr.bf16.gmra.mxu1 %v1270_v52  ;;  %v1236_v9 = vsel %vm2710_vm2, %v1226_v11, %v1086_v57  ;;  %vm168_vm2 = vcmp.lt.f32.partialorder %v2166_v30, 2.0 }
 0x277   :  { %1657 = vmatprep.mubr.msk.bf16.mxu1 %vm509_vm9, %v1194_v0 }
 0x278   :  { %v1101_v28 = vpop.permute.xlu0 %1100  ;;  %v1126_v54 = vpop.permute.xlu1 %1125 }
 0x279   :  { %v1247_v22 = vsel %vm1237_vm4, %v1236_v9, %v1101_v28  ;;  %vm166_vm4 = vcmp.lt.f32.partialorder %v2158_v23, 2.0 }
 0x27a   :  { %v1258_v15 = vsel %vm1248_vm1, %v1247_v22, %v1126_v54  ;;  %vm181_vm1 = vmand %vm163_vm15, %vm172_vm14  ;;  %vm177_vm15 = vcmp.lt.f32.partialorder %v2197_v45, 2.0 }
 0x27b   :  { %vm184_vm13 = vmand %vm166_vm4, %vm175_vm7  ;;  %vm178_vm4 = vcmp.lt.f32.partialorder %v2205_v48, 2.0 }
 0x27c   :  { %v1183_v58 = vpop.permute.xlu0 %1182  ;;  %vm185_vm14 = vmand %vm167_vm3, %vm176_vm5 }
 0x27d   :  { %v1273_v18 = vsel %vm1259_vm11, %v1258_v15, %v1183_v58  ;;  %vm164_vm11 = vcmp.lt.f32.partialorder %v2151_v1, 2.0  ;;  %vm186_vm6 = vmand %vm168_vm2, %vm177_vm15 }
 0x27e   :  { %1427 = vmatmul.mubr.bf16.gmra.mxu1 %v1273_v18  ;;  %vm182_vm0 = vmand %vm164_vm11, %vm173_vm10  ;;  %vm179_vm11 = vcmp.lt.f32.partialorder %v2211_v50, 2.0 }
 0x27f   :  { %vm187_vm7 = vmand %vm169_vm8, %vm178_vm4 }
 0x324   :  { %v2566_v34 = vpop.f32.mrf.mxu1 }
 0x325   :  { %v1454_v31 = vsel %vm183_vm12, %v2566_v34, 0.0  ;;  %vm171_vm12 = vcmp.lt.f32.partialorder %v2213_v3, 2.0 }
 0x326   :  { %v1406_v32 = vpop.f32.mrf.mxu1  ;;  %v1487_v63 = vmul.f32 %v1454_v31, %v1454_v31  ;;  %v1464_v24 = vsel %vm509_vm9, %v1454_v31, 0.0 }
 0x328   :  { %v2574_v0 = vpop.f32.mrf.mxu1  ;;  %v1497_v5 = vsel %vm509_vm9, %v1487_v63, 0.0 }
 0x329   :  { %v1455_v51 = vsel %vm184_vm13, %v2574_v0, 0.0  ;;  %vm180_vm13 = vcmp.lt.f32.partialorder %v2242_v25, 2.0 }
 0x32a   :  { %v2578_v60 = vpop.f32.mrf.mxu0  ;;  %v1409_v35 = vpop.f32.mrf.mxu1  ;;  %v1488_v14 = vmul.f32 %v1455_v51, %v1455_v51  ;;  %v1466_v8 = vsel %vm509_vm9, %v1455_v51, 0.0  ;;  %vm189_vm3 = vmand %vm171_vm12, %vm180_vm13 }
 0x32b   :  { %v1452_v6 = vsel %vm181_vm1, %v2578_v60, 0.0  ;;  %vm170_vm1 = vcmp.lt.f32.partialorder %v2187_v40, 2.0 }
 0x32c   :  { %v1398_v23 = vpop.f32.mrf.mxu0  ;;  %v1485_v1 = vmul.f32 %v1452_v6, %v1452_v6  ;;  %v1461_v42 = vsel %vm509_vm9, %v1452_v6, 0.0  ;;  %v1499_v4 = vsel %vm509_vm9, %v1488_v14, 0.0  ;;  %vm188_vm10 = vmand %vm170_vm1, %vm179_vm11 }
 0x32e   :  { %v2586_v21 = vpop.f32.mrf.mxu0  ;;  %v2588_v39 = vpop.f32.mrf.mxu1  ;;  %v1494_v20 = vsel %vm509_vm9, %v1485_v1, 0.0 }
 0x32f   :  { %v1453_v27 = vsel %vm182_vm0, %v2586_v21, 0.0  ;;  %v1456_v26 = vsel %vm185_vm14, %v2588_v39, 0.0 }
 0x330   :  { %v1462_v17 = vsel %vm509_vm9, %v1453_v27, 0.0  ;;  %v1486_v59 = vmul.f32 %v1453_v27, %v1453_v27  ;;  %v1401_v7 = vpop.f32.mrf.mxu0  ;;  %v1414_v30 = vpop.f32.mrf.mxu1  ;;  %v1489_v37 = vmul.f32 %v1456_v26, %v1456_v26  ;;  %v1468_v16 = vsel %vm509_vm9, %v1456_v26, 0.0 }
 0x331   :  { %v1463_v45 = vadd.f32 %v1462_v17, %v1461_v42 }
 0x332   :  { %v1495_v2 = vsel %vm509_vm9, %v1486_v59, 0.0  ;;  %v2600_v55 = vpop.f32.mrf.mxu1  ;;  %v1501_v53 = vsel %vm509_vm9, %v1489_v37, 0.0 }
 0x333   :  { %v1465_v38 = vadd.f32 %v1464_v24, %v1463_v45  ;;  %v1496_v36 = vadd.f32 %v1495_v2, %v1494_v20  ;;  %v1457_v49 = vsel %vm186_vm6, %v2600_v55, 0.0 }
 0x334   :  { %v1417_v12 = vpop.f32.mrf.mxu1  ;;  %v1490_v41 = vmul.f32 %v1457_v49, %v1457_v49  ;;  %v1470_v47 = vsel %vm509_vm9, %v1457_v49, 0.0 }
 0x335   :  { %v1498_v48 = vadd.f32 %v1497_v5, %v1496_v36  ;;  %v1467_v62 = vadd.f32 %v1466_v8, %v1465_v38 }
 0x336   :  { %v2609_v61 = vpop.f32.mrf.mxu1  ;;  %v1503_v46 = vsel %vm509_vm9, %v1490_v41, 0.0 }
 0x337   :  { %v1469_v44 = vadd.f32 %v1468_v16, %v1467_v62  ;;  %v1500_v43 = vadd.f32 %v1499_v4, %v1498_v48  ;;  %v1458_v10 = vsel %vm187_vm7, %v2609_v61, 0.0 }
 0x338   :  { %v1491_v33 = vmul.f32 %v1458_v10, %v1458_v10  ;;  %v1422_v19 = vpop.f32.mrf.mxu1  ;;  %v1472_v29 = vsel %vm509_vm9, %v1458_v10, 0.0 }
 0x339   :  { %v1502_v40 = vadd.f32 %v1501_v53, %v1500_v43  ;;  %v1471_v50 = vadd.f32 %v1470_v47, %v1469_v44  ;;  %v1658_v53 = vld [vmem:[%s2677_s5] ss:$0 sm:$0xff] }
 0x33a   :  { %v1423_v13 = vpop.f32.mrf.mxu1  ;;  %v1505_v11 = vsel %vm509_vm9, %v1491_v33, 0.0 }
 0x33b   :  { %v1504_v57 = vadd.f32 %v1503_v46, %v1502_v40  ;;  %v1473_v56 = vadd.f32 %v1472_v29, %v1471_v50  ;;  %v1459_v52 = vsel %vm188_vm10, %v1423_v13, 0.0 }
 0x33c   :  { %v1474_v9 = vsel %vm509_vm9, %v1459_v52, 0.0  ;;  %v1492_v28 = vmul.f32 %v1459_v52, %v1459_v52  ;;  %v1425_v22 = vpop.f32.mrf.mxu1 }
 0x33d   :  { %v1506_v54 = vadd.f32 %v1505_v11, %v1504_v57  ;;  %v1475_v25 = vadd.f32 %v1474_v9, %v1473_v56 }
 0x33e   :  { %v1507_v3 = vsel %vm509_vm9, %v1492_v28, 0.0  ;;  %v1428_v15 = vpop.f32.mrf.mxu1 }
 0x33f   :  { %v1460_v58 = vsel %vm189_vm3, %v1428_v15, 0.0  ;;  %v1508_v6 = vadd.f32 %v1507_v3, %v1506_v54 }
 0x340   :  { %v1476_v18 = vsel %vm509_vm9, %v1460_v58, 0.0  ;;  %v1493_v32 = vmul.f32 %v1460_v58, %v1460_v58  ;;  %v1430_v35 = vpop.f32.mrf.mxu1 }
 0x341   :  { %v1477_v23 = vadd.f32 %v1476_v18, %v1475_v25 }
 0x342   :  { %v1509_v31 = vsel %vm509_vm9, %v1493_v32, 0.0  ;;  %v1431_v1 = vpop.f32.mrf.mxu1 }
 0x343   :  { %v1478_v51 = vrot.slane %v1477_v23, 4  ;;  %v1510_v27 = vadd.f32 %v1509_v31, %v1508_v6 }
 0x344   :  { %v1432_v63 = vpop.f32.mrf.mxu1 }
 0x345   :  { %v1479_v42 = vadd.f32 %v1478_v51, %v1477_v23  ;;  %v1511_v17 = vrot.slane %v1510_v27, 4 }
 0x347   :  { %v1480_v59 = vrot.slane %v1479_v42, 2  ;;  %v1512_v7 = vadd.f32 %v1511_v17, %v1510_v27 }
 0x349   :  { %v1481_v30 = vadd.f32 %v1480_v59, %v1479_v42  ;;  %v1513_v45 = vrot.slane %v1512_v7, 2 }
 0x34b   :  { %v1482_v26 = vrot.slane %v1481_v30, 1  ;;  %v1514_v24 = vadd.f32 %v1513_v45, %v1512_v7 }
 0x34d   :  { %v1483_v14 = vadd.f32 %v1482_v26, %v1481_v30  ;;  %v1515_v20 = vrot.slane %v1514_v24, 1 }
 0x34f   :  { %v1484_v2 = vmul.f32 0.125, %v1483_v14  ;;  %v1516_v38 = vadd.f32 %v1515_v20, %v1514_v24 }
 0x351   :  { %v1517_v36 = vmul.f32 0.125, %v1516_v38  ;;  %v1518_v49 = vmul.f32 %v1484_v2, %v1484_v2  ;;  %v1520_v37 = vsub.f32 %v2578_v60, %v1484_v2  ;;  %v1521_v12 = vsub.f32 %v2586_v21, %v1484_v2 }
 0x352   :  { %v1522_v48 = vsub.f32 %v2566_v34, %v1484_v2  ;;  %v1523_v62 = vsub.f32 %v2574_v0, %v1484_v2  ;;  %v1524_v4 = vsub.f32 %v2588_v39, %v1484_v2  ;;  %v1525_v41 = vsub.f32 %v2600_v55, %v1484_v2  ;;  %v1659_v39 = vld [vmem:[%s2678_s6] ss:$0 sm:$0xff] }
 0x353   :  { %v1519_v5 = vsub.f32 %v1517_v36, %v1518_v49  ;;  %v1526_v44 = vsub.f32 %v2609_v61, %v1484_v2  ;;  %v1527_v43 = vsub.f32 %v1423_v13, %v1484_v2  ;;  %v1528_v10 = vsub.f32 %v1428_v15, %v1484_v2 }
 0x355   :  { %v1529_v8 = vadd.f32 1e-05, %v1519_v5 }
 0x357   :  { %1783 = vrsqrt.f32 %v1529_v8 }
 0x364   :  { %v1784_v16 = vpop.eup %1783 }
 0x365   :  { %v1531_v60 = vmul.f32 %v1784_v16, %v1520_v37  ;;  %v1532_v47 = vmul.f32 %v1784_v16, %v1521_v12  ;;  %v1533_v21 = vmul.f32 %v1784_v16, %v1522_v48  ;;  %v1534_v33 = vmul.f32 %v1784_v16, %v1523_v62 }
 0x366   :  { %v1535_v34 = vmul.f32 %v1784_v16, %v1524_v4  ;;  %v1536_v19 = vmul.f32 %v1784_v16, %v1525_v41  ;;  %v1537_v0 = vmul.f32 %v1784_v16, %v1526_v44  ;;  %v1538_v40 = vmul.f32 %v1784_v16, %v1527_v43 }
 0x367   :  { %v1539_v55 = vmul.f32 %v1784_v16, %v1528_v10  ;;  %v1547_v61 = vmul.f32 %v1658_v53, %v1531_v60  ;;  %v1548_v50 = vmul.f32 %v1658_v53, %v1532_v47  ;;  %v1549_v46 = vmul.f32 %v1658_v53, %v1533_v21 }
 0x368   :  { %v1550_v29 = vmul.f32 %v1658_v53, %v1534_v33  ;;  %v1551_v13 = vmul.f32 %v1658_v53, %v1535_v34  ;;  %v1552_v57 = vmul.f32 %v1658_v53, %v1536_v19  ;;  %v1553_v56 = vmul.f32 %v1658_v53, %v1537_v0 }
 0x369   :  { %v1554_v52 = vmul.f32 %v1658_v53, %v1538_v40  ;;  %v1555_v11 = vmul.f32 %v1658_v53, %v1539_v55  ;;  %v1563_v9 = vadd.f32 %v1659_v39, %v1547_v61  ;;  %v1564_v28 = vadd.f32 %v1659_v39, %v1548_v50 }
 0x36a   :  { %v1565_v22 = vadd.f32 %v1659_v39, %v1549_v46  ;;  %v1566_v54 = vadd.f32 %v1659_v39, %v1550_v29  ;;  %v1567_v3 = vadd.f32 %v1659_v39, %v1551_v13  ;;  %v1568_v15 = vadd.f32 %v1659_v39, %v1552_v57 }
 0x36b   :  { %v1569_v25 = vadd.f32 %v1659_v39, %v1553_v56  ;;  %v1570_v58 = vadd.f32 %v1659_v39, %v1554_v52  ;;  %v1571_v18 = vadd.f32 %v1659_v39, %v1555_v11  ;;  %1572 = vst.msk [vmem:[%s2679_s7] sm:$0xff] %vm509_vm9, %v1563_v9  ;;  %1573 = vst.msk [vmem:[%s2679_s7 + $0x8] sm:$0xff] %vm509_vm9, %v1564_v28 }
 0x36c   :  { %1574 = vst.msk [vmem:[%s2679_s7 + $0x10] sm:$0xff] %vm509_vm9, %v1565_v22  ;;  %1575 = vst.msk [vmem:[%s2679_s7 + $0x18] sm:$0xff] %vm509_vm9, %v1566_v54 }
 0x36d   :  { %1576 = vst.msk [vmem:[%s2679_s7 + $0x20] sm:$0xff] %vm509_vm9, %v1567_v3  ;;  %1577 = vst.msk [vmem:[%s2679_s7 + $0x28] sm:$0xff] %vm509_vm9, %v1568_v15 }
 0x36e   :  { %1578 = vst.msk [vmem:[%s2679_s7 + $0x30] sm:$0xff] %vm509_vm9, %v1569_v25  ;;  %1579 = vst.msk [vmem:[%s2679_s7 + $0x38] sm:$0xff] %vm509_vm9, %v1570_v58 }
 0x36f   :  { %1580 = vst.msk [vmem:[%s2679_s7 + $0x40] sm:$0xff] %vm509_vm9, %v1571_v18 }

// kernel: encoder_forward.2
= control target key start
LH: loop header
LB: loop body
LE: loop exit
PB: predicated region body
PF: predicated region fallthrough
CT: control target
= control target key end

     0   :  { %vm15898_vm0 = vsmask.f32 7424  ;;  %s7999_s21 = smov 8   ;;  %vm15897_vm1 = vcmask 1046528   ;;  %s8000_s13 = smov 16   ;;  %vm15896_vm2 = vcmask 1043456   ;;  %s15800_s0 = inlined_call_operand.vmem [shape: bf16[552,8], index: 0, kind: input, shape index: {}]   ;;  %s15801_s1 = inlined_call_operand.vmem [shape: bf16[72,8], index: 1, kind: input, shape index: {}]   ;;  %s15802_s2 = inlined_call_operand.vmem [shape: f32[1,8], index: 2, kind: input, shape index: {}]   ;;  %s15803_s3 = inlined_call_operand.vmem [shape: f32[1,8], index: 3, kind: input, shape index: {}]   ;;  %s15804_s4 = inlined_call_operand.vmem [shape: bf16[72,8], index: 4, kind: input, shape index: {}]   ;;  %s15805_s5 = inlined_call_operand.vmem [shape: f32[1,8], index: 5, kind: input, shape index: {}]   ;;  %s15806_s6 = inlined_call_operand.vmem [shape: f32[1,8], index: 6, kind: input, shape index: {}]   ;;  %s15807_s7 = inlined_call_operand.vmem [shape: f32[512,8], index: 7, kind: output, shape index: {}]  }
   0x1   :  { %v1184_v0 = vld [vmem:[%s15800_s0 + $0x10] sm:$0xf]  ;;  %v8054_v1 = vld [vmem:[%s15800_s0 + $0x14] sm:$0xf]  ;;  %v8062_v3 = vld [vmem:[%s15800_s0 + $0x18] sm:$0xff]   ;;  %s8001_s16 = smov 24  }
   0x2   :  { %v8057_v2 = vcombine.low %v1184_v0, %v8054_v1  ;;  %v1180_v4 = vld [vmem:[%s15800_s0] sm:$0xf]  ;;  %v8070_v5 = vld [vmem:[%s15800_s0 + $0x4] sm:$0xf]  ;;  %v1182_v6 = vld [vmem:[%s15800_s0 + $0x8] sm:$0xf] }
   0x3   :  { %v8078_v7 = vld [vmem:[%s15800_s0 + $0xc] sm:$0xf]  ;;  %v1442_v10 = vshll.u32 %v8062_v3, 16  ;;  %v8084_v11 = vcombine.low %v1180_v4, %v8070_v5  ;;  %v8089_v12 = vld [vmem:[%s15800_s0 + $0x20] sm:$0xff]   ;;  %v1446_v14 = vshrl.u32 %v8062_v3, 16  ;;  %v8108_v23 = vld [vmem:[%s15800_s0 + $0x30] sm:$0xff]  }
   0x4   :  { %v1434_v8 = vshll.u32 %v8057_v2, 16  ;;  %v1438_v9 = vshrl.u32 %v8057_v2, 16  ;;  %v8092_v13 = vcombine.low %v1182_v6, %v8078_v7  ;;  %v8098_v15 = vld [vmem:[%s15800_s0 + $0x28] sm:$0xff]   ;;  %v1450_v21 = vshll.u32 %v8089_v12, 16  ;;  %v8122_v38 = vld [vmem:[%s15800_s0 + $0x38] sm:$0xff]   ;;  %v8127_v39 = vld [vmem:[%s15800_s0 + $0x40] sm:$0xff]  }
   0x5   :  { %16267 = vst [vmem:[#allocation3_spill] sm:$0xff] %v8084_v11  ;;  %v1444_v17 = vrot.slane %v1442_v10, 1  ;;  %v1419_v18 = vshrl.u32 %v8084_v11, 16  ;;  %v1421_v19 = vshll.u32 %v8084_v11, 16  ;;  %v1458_v27 = vshll.u32 %v8098_v15, 16  ;;  %v8140_v46 = vld [vmem:[%s15800_s0 + $0x48] sm:$0xff]  }
   0x6   :  { %v1436_v16 = vrot.slane %v1434_v8, 1  ;;  %v1426_v20 = vshll.u32 %v8092_v13, 16  ;;  %v1430_v22 = vshrl.u32 %v8092_v13, 16  ;;  %v1452_v29 = vrot.slane %v1450_v21, 1  ;;  %v8145_v47 = vld [vmem:[%s15800_s0 + $0x50] sm:$0xff]   ;;  %v8150_v48 = vld [vmem:[%s15800_s0 + $0x58] sm:$0xff]  }
   0x7   :  { %v1423_v25 = vrot.slane %v1421_v19, 1  ;;  %v1448_v26 = vor.u32 %v1446_v14, %v1444_v17  ;;  %v1462_v30 = vshrl.u32 %v8098_v15, 16  ;;  %v1466_v31 = vshll.u32 %v8108_v23, 16  ;;  %v8159_v52 = vld [vmem:[%s15800_s0 + $0x60] sm:$0xff]   ;;  %v8176_v63 = vld [vmem:[%s15800_s0 + $0x68] sm:$0xff]   ;;  %v8379_v11 = vld [vmem:[%s15800_s0 + $0xf0] sm:$0xff]  }
   0x8   :  { %v1440_v24 = vor.u32 %v1438_v9, %v1436_v16  ;;  %v1428_v28 = vrot.slane %v1426_v20, 1  ;;  %v1460_v34 = vrot.slane %v1458_v27, 1  ;;  %v1454_v35 = vshrl.u32 %v8089_v12, 16  ;;  %v8188_v9 = vld [vmem:[%s15800_s0 + $0x70] sm:$0xff]   ;;  %v8199_v20 = vld [vmem:[%s15800_s0 + $0x78] sm:$0xff]   ;;  %v8212_v27 = vld [vmem:[%s15800_s0 + $0x80] sm:$0xff]  }
   0x9   :  { %v1424_v33 = vor.u32 %v1423_v25, %v1419_v18  ;;  %v1468_v37 = vrot.slane %v1466_v31, 1  ;;  %v8131_v41 = vsel %vm15898_vm0, %v1448_v26, %v1452_v29  ;;  %v1474_v43 = vshll.u32 %v8122_v38, 16  ;;  %s8002_s22 = smov 32   ;;  %s8003_s25 = smov 40  }
   0xa   :  { %v8114_v32 = vsel %vm15898_vm0, %v1440_v24, %v1444_v17  ;;  %v1432_v36 = vor.u32 %v1430_v22, %v1428_v28  ;;  %v1464_v42 = vor.u32 %v1462_v30, %v1460_v34  ;;  %v1478_v44 = vshrl.u32 %v8122_v38, 16  ;;  %s8004_s28 = smov 48   ;;  %s8006_s29 = smov 64  }
   0xb   :  { %1682 = vrot.lane.b32.xlu1 %v8114_v32, %s7999_s21  ;;  %v1429_v40 = vsel %vm15898_vm0, %v1424_v33, %v1428_v28  ;;  %v1482_v45 = vshll.u32 %v8127_v39, 16  ;;  %v1456_v50 = vor.u32 %v1454_v35, %v1452_v29  ;;  %v1470_v51 = vshrl.u32 %v8108_v23, 16  ;;  %v8221_v33 = vld [vmem:[%s15800_s0 + $0x88] sm:$0xff]  }
   0xc   :  { %1678 = vrot.lane.b32.xlu0 %v1429_v40, %s7999_s21  ;;  %v8153_v49 = vsel %vm15898_vm0, %v1432_v36, %v1436_v16  ;;  %v8164_v53 = vsel %vm15898_vm0, %v1464_v42, %v1468_v37  ;;  %v1476_v54 = vrot.slane %v1474_v43, 1  ;;  %v1490_v55 = vshll.u32 %v8140_v46, 16  ;;  %v8233_v42 = vld [vmem:[%s15800_s0 + $0x90] sm:$0xff]  }
   0xd   :  { %v1486_v56 = vshrl.u32 %v8127_v39, 16  ;;  %v1484_v57 = vrot.slane %v1482_v45, 1  ;;  %v1494_v58 = vshrl.u32 %v8140_v46, 16  ;;  %v1498_v59 = vshll.u32 %v8145_v47, 16  ;;  %v8241_v45 = vld [vmem:[%s15800_s0 + $0x98] sm:$0xff]  }
   0xe   :  { %v1506_v60 = vshll.u32 %v8150_v48, 16  ;;  %v1480_v61 = vor.u32 %v1478_v44, %v1476_v54  ;;  %v1492_v62 = vrot.slane %v1490_v55, 1  ;;  %v8179_v0 = vsel %vm15898_vm0, %v1456_v50, %v1460_v34 }
   0xf   :  { %1684 = vrot.lane.b32.xlu1 %v8131_v41, %s7999_s21  ;;  %v1472_v4 = vor.u32 %v1470_v51, %v1468_v37  ;;  %v1510_v6 = vshrl.u32 %v8150_v48, 16  ;;  %v1514_v8 = vshll.u32 %v8159_v52, 16  ;;  %v1522_v10 = vshll.u32 %v8176_v63, 16 }
  0x10   :  { %1680 = vrot.lane.b32.xlu0 %v8153_v49, %s7999_s21  ;;  %v8192_v14 = vsel %vm15898_vm0, %v1480_v61, %v1484_v57  ;;  %v1496_v16 = vor.u32 %v1494_v58, %v1492_v62  ;;  %v1500_v17 = vrot.slane %v1498_v59, 1  ;;  %v1508_v18 = vrot.slane %v1506_v60, 1  ;;  %v8262_v60 = vld [vmem:[%s15800_s0 + $0xa0] sm:$0xff]  }
  0x11   :  { %v1488_v19 = vor.u32 %v1486_v56, %v1484_v57  ;;  %v8202_v21 = vsel %vm15898_vm0, %v1472_v4, %v1476_v54  ;;  %v1502_v22 = vshrl.u32 %v8145_v47, 16  ;;  %v1530_v24 = vshll.u32 %v8188_v9, 16 }
  0x12   :  { %v1524_v25 = vrot.slane %v1522_v10, 1  ;;  %v1526_v26 = vshrl.u32 %v8176_v63, 16  ;;  %v8215_v28 = vsel %vm15898_vm0, %v1496_v16, %v1500_v17  ;;  %v1512_v29 = vor.u32 %v1510_v6, %v1508_v18  ;;  %v8269_v10 = vld [vmem:[%s15800_s0 + $0xa8] sm:$0xff]  }
  0x13   :  { %1688 = vrot.lane.b32.xlu1 %v8164_v53, %s7999_s21  ;;  %16268 = vst [vmem:[#allocation4_spill] sm:$0xff] %v8215_v28  ;;  %v1516_v30 = vrot.slane %v1514_v8, 1  ;;  %v1538_v31 = vshll.u32 %v8199_v20, 16  ;;  %v8226_v34 = vsel %vm15898_vm0, %v1488_v19, %v1492_v62  ;;  %v1504_v35 = vor.u32 %v1502_v22, %v1500_v17 }
  0x14   :  { %1686 = vrot.lane.b32.xlu0 %v8179_v0, %s7999_s21  ;;  %16269 = vst [vmem:[#allocation5_spill] sm:$0xff] %v8226_v34  ;;  %v1532_v36 = vrot.slane %v1530_v24, 1  ;;  %v1518_v37 = vshrl.u32 %v8159_v52, 16  ;;  %v1542_v40 = vshrl.u32 %v8199_v20, 16  ;;  %v1528_v43 = vor.u32 %v1526_v26, %v1524_v25  ;;  %v8284_v26 = vld [vmem:[%s15800_s0 + $0xb0] sm:$0xff]  }
  0x15   :  { %v1546_v44 = vshll.u32 %v8212_v27, 16  ;;  %v8244_v50 = vsel %vm15898_vm0, %v1512_v29, %v1516_v30  ;;  %v1540_v51 = vrot.slane %v1538_v31, 1  ;;  %v1554_v54 = vshll.u32 %v8221_v33, 16 }
  0x16   :  { %16270 = vst [vmem:[#allocation6_spill] sm:$0xff] %v8244_v50  ;;  %v8250_v55 = vsel %vm15898_vm0, %v1504_v35, %v1508_v18  ;;  %v1520_v56 = vor.u32 %v1518_v37, %v1516_v30  ;;  %v1534_v57 = vshrl.u32 %v8188_v9, 16  ;;  %v1558_v58 = vshrl.u32 %v8221_v33, 16  ;;  %v8293_v35 = vld [vmem:[%s15800_s0 + $0xb8] sm:$0xff]  }
  0x17   :  { %1692 = vrot.lane.b32.xlu1 %v8192_v14, %s7999_s21  ;;  %16271 = vst [vmem:[#allocation7_spill] sm:$0xff] %v8250_v55  ;;  %v8257_v59 = vsel %vm15898_vm0, %v1528_v43, %v1532_v36  ;;  %v1570_v61 = vshll.u32 %v8241_v45, 16  ;;  %v1544_v62 = vor.u32 %v1542_v40, %v1540_v51  ;;  %v1548_v4 = vrot.slane %v1546_v44, 1  ;;  %v8304_v43 = vld [vmem:[%s15800_s0 + $0xc0] sm:$0xff]  }
  0x18   :  { %1690 = vrot.lane.b32.xlu0 %v8202_v21, %s7999_s21  ;;  %16272 = vst [vmem:[#allocation8_spill] sm:$0xff] %v8257_v59  ;;  %v1556_v6 = vrot.slane %v1554_v54, 1  ;;  %v1562_v8 = vshll.u32 %v8233_v42, 16  ;;  %v8274_v16 = vsel %vm15898_vm0, %v1520_v56, %v1524_v25  ;;  %v1536_v17 = vor.u32 %v1534_v57, %v1532_v36 }
  0x19   :  { %16273 = vst [vmem:[#allocation9_spill] sm:$0xff] %v8274_v16  ;;  %v1550_v18 = vshrl.u32 %v8212_v27, 16  ;;  %v1572_v19 = vrot.slane %v1570_v61, 1  ;;  %v1574_v22 = vshrl.u32 %v8241_v45, 16  ;;  %v1578_v24 = vshll.u32 %v8262_v60, 16 }
  0x1a   :  { %v8287_v29 = vsel %vm15898_vm0, %v1544_v62, %v1548_v4  ;;  %v1560_v25 = vor.u32 %v1558_v58, %v1556_v6  ;;  %v1564_v30 = vrot.slane %v1562_v8, 1  ;;  %v1586_v31 = vshll.u32 %v8269_v10, 16 }
  0x1b   :  { %1696 = vrot.lane.b32.xlu1 %v8215_v28, %s7999_s21  ;;  %16274 = vst [vmem:[#allocation10_spill] sm:$0xff] %v8287_v29  ;;  %v8298_v36 = vsel %vm15898_vm0, %v1536_v17, %v1540_v51  ;;  %v1552_v37 = vor.u32 %v1550_v18, %v1548_v4  ;;  %v1566_v40 = vshrl.u32 %v8233_v42, 16  ;;  %v1576_v44 = vor.u32 %v1574_v22, %v1572_v19  ;;  %v8313_v51 = vld [vmem:[%s15800_s0 + $0xc8] sm:$0xff]  }
  0x1c   :  { %1694 = vrot.lane.b32.xlu0 %v8226_v34, %s7999_s21  ;;  %16275 = vst [vmem:[#allocation11_spill] sm:$0xff] %v8298_v36  ;;  %v1580_v54 = vrot.slane %v1578_v24, 1  ;;  %v1590_v56 = vshrl.u32 %v8269_v10, 16  ;;  %v1594_v57 = vshll.u32 %v8284_v26, 16  ;;  %v8316_v58 = vsel %vm15898_vm0, %v1560_v25, %v1564_v30  ;;  %v8334_v24 = vld [vmem:[%s15800_s0 + $0xd0] sm:$0xff]  }
  0x1d   :  { %16276 = vst [vmem:[#allocation12_spill] sm:$0xff] %v8316_v58  ;;  %v1588_v61 = vrot.slane %v1586_v31, 1  ;;  %v1602_v62 = vshll.u32 %v8293_v35, 16  ;;  %v1582_v4 = vshrl.u32 %v8262_v60, 16  ;;  %v8323_v8 = vsel %vm15898_vm0, %v1552_v37, %v1556_v6  ;;  %v8341_v37 = vld [vmem:[%s15800_s0 + $0xd8] sm:$0xff]  }
  0x1e   :  { %16277 = vst [vmem:[#allocation13_spill] sm:$0xff] %v8323_v8  ;;  %v1568_v17 = vor.u32 %v1566_v40, %v1564_v30  ;;  %v1610_v18 = vshll.u32 %v8304_v43, 16  ;;  %v8329_v22 = vsel %vm15898_vm0, %v1576_v44, %v1580_v54  ;;  %v1618_v25 = vshll.u32 %v8313_v51, 16 }
  0x1f   :  { %1700 = vrot.lane.b32.xlu1 %v8244_v50, %s7999_s21  ;;  %16278 = vst [vmem:[#allocation14_spill] sm:$0xff] %v8329_v22  ;;  %v1592_v31 = vor.u32 %v1590_v56, %v1588_v61  ;;  %v1604_v6 = vrot.slane %v1602_v62, 1  ;;  %v1606_v30 = vshrl.u32 %v8293_v35, 16  ;;  %v1584_v40 = vor.u32 %v1582_v4, %v1580_v54 }
  0x20   :  { %1698 = vrot.lane.b32.xlu0 %v8250_v55, %s7999_s21  ;;  %v8346_v44 = vsel %vm15898_vm0, %v1568_v17, %v1572_v19  ;;  %v1622_v56 = vshrl.u32 %v8313_v51, 16  ;;  %v1620_v62 = vrot.slane %v1618_v25, 1  ;;  %v1634_v4 = vshll.u32 %v8341_v37, 16  ;;  %v8365_v17 = vld [vmem:[%s15800_s0 + $0xe8] sm:$0xff]  }
  0x21   :  { %16279 = vst [vmem:[#allocation15_spill] sm:$0xff] %v8346_v44  ;;  %v1608_v19 = vor.u32 %v1606_v30, %v1604_v6  ;;  %v1654_v28 = vshrl.u32 %v8365_v17, 16  ;;  %vm2319_vm3 = vcmask 64512   ;;  %vm15895_vm4 = vcmask 130048  }
  0x22   :  { %vm2449_vm5 = vcmask 195584   ;;  %vm2514_vm6 = vcmask 261120   ;;  %vm2579_vm7 = vcmask 326656   ;;  %vm16047_vm8 = vcmask 392192  }
  0x23   :  { %1704 = vrot.lane.b32.xlu1 %v8257_v59, %s7999_s21  ;;  %vm16043_vm9 = vcmask 457728   ;;  %vm15953_vm10 = vcmask 523264   ;;  %vm15899_vm11 = vcmask 588800  }
  0x24   :  { %1702 = vrot.lane.b32.xlu0 %v8274_v16, %s7999_s21  ;;  %v1658_v16 = vshll.u32 %v8379_v11, 16 }
  0x27   :  { %1708 = vrot.lane.b32.xlu1 %v8287_v29, %s7999_s21  ;;  %v1596_v29 = vrot.slane %v1594_v57, 1  ;;  %v8353_v57 = vld [vmem:[%s15800_s0 + $0xe0] sm:$0xff]  }
  0x28   :  { %1706 = vrot.lane.b32.xlu0 %v8298_v36, %s7999_s21  ;;  %v1598_v36 = vshrl.u32 %v8284_v26, 16  ;;  %v1642_v59 = vshll.u32 %v8353_v57, 16 }
  0x29   :  { %v8359_v54 = vsel %vm15898_vm0, %v1592_v31, %v1596_v29  ;;  %v1624_v31 = vor.u32 %v1622_v56, %v1620_v62 }
  0x2a   :  { %16280 = vst [vmem:[#allocation16_spill] sm:$0xff] %v8359_v54  ;;  %v1600_v25 = vor.u32 %v1598_v36, %v1596_v29  ;;  %v1638_v29 = vshrl.u32 %v8341_v37, 16  ;;  %v1650_v36 = vshll.u32 %v8365_v17, 16 }
  0x2b   :  { %1712 = vrot.lane.b32.xlu1 %v8316_v58, %s7999_s21  ;;  %v1612_v58 = vrot.slane %v1610_v18, 1  ;;  %v8370_v18 = vsel %vm15898_vm0, %v1584_v40, %v1588_v61  ;;  %v1636_v61 = vrot.slane %v1634_v4, 1  ;;  %v8389_v40 = vld [vmem:[%s15800_s0 + $0xf8] sm:$0xff]  }
  0x2c   :  { %1710 = vrot.lane.b32.xlu0 %v8323_v8, %s7999_s21  ;;  %v1626_v8 = vshll.u32 %v8334_v24, 16  ;;  %16281 = vst [vmem:[#allocation17_spill] sm:$0xff] %v8370_v18  ;;  %v1652_v55 = vrot.slane %v1650_v36, 1 }
  0x2d   :  { %v1640_v50 = vor.u32 %v1638_v29, %v1636_v61  ;;  %v1670_v29 = vshrl.u32 %v8389_v40, 16 }
  0x2e   :  { %v1628_v30 = vrot.slane %v1626_v8, 1  ;;  %v8394_v8 = vsel %vm15898_vm0, %v1600_v25, %v1604_v6  ;;  %v8407_v6 = vld [vmem:[%s15800_s0 + $0x100] ss:$0 sps:$4 sm:$0x11]   ;;  %v1646_v25 = vshrl.u32 %v8353_v57, 16 }
  0x2f   :  { %1716 = vrot.lane.b32.xlu1 %v8329_v22, %s7999_s21  ;;  %v1614_v22 = vshrl.u32 %v8304_v43, 16  ;;  %16283 = vst [vmem:[#allocation19_spill] sm:$0xff] %v8394_v8  ;;  %v1674_v34 = vshll.u32 %v8407_v6, 16 }
  0x30   :  { %1714 = vrot.lane.b32.xlu0 %v8346_v44, %s7999_s21  ;;  %v8382_v44 = vsel %vm15898_vm0, %v1608_v19, %v1612_v58  ;;  %v1630_v19 = vshrl.u32 %v8334_v24, 16  ;;  %v8400_v4 = vsel %vm15898_vm0, %v1624_v31, %v1628_v30  ;;  %v1660_v31 = vrot.slane %v1658_v16, 1 }
  0x31   :  { %16282 = vst [vmem:[#allocation18_spill] sm:$0xff] %v8382_v44  ;;  %v1616_v56 = vor.u32 %v1614_v22, %v1612_v58  ;;  %16284 = vst [vmem:[#allocation20_spill] sm:$0xff] %v8400_v4  ;;  %v1666_v58 = vshll.u32 %v8389_v40, 16 }
  0x33   :  { %1720 = vrot.lane.b32.xlu1 %v8359_v54, %s7999_s21  ;;  %v1644_v54 = vrot.slane %v1642_v59, 1  ;;  %v8413_v22 = vsel %vm15898_vm0, %v1616_v56, %v1620_v62  ;;  %v1632_v59 = vor.u32 %v1630_v19, %v1628_v30  ;;  %v1249_v62 = vld [vmem:[%s15800_s0 + $0x8] sm:$0xe]  ;;  %v1253_v30 = vld [vmem:[%s15800_s0 + $0x10] sm:$0xe] }
  0x34   :  { %1718 = vrot.lane.b32.xlu0 %v8370_v18, %s7999_s21  ;;  %16285 = vst [vmem:[#allocation21_spill] sm:$0xff] %v8413_v22  ;;  %v1668_v18 = vrot.slane %v1666_v58, 1  ;;  %v1245_v56 = vld [vmem:[%s15800_s0] sm:$0xe]  ;;  %v7364_v19 = vcombine.low %v1249_v62, %v8078_v7  ;;  %v7367_v58 = vcombine.low %v1253_v30, %v8054_v1  ;;  %v1747_v62 = vrot.slane %v8092_v13, 1 }
  0x35   :  { %v8420_v36 = vsel %vm15898_vm0, %v1640_v50, %v1644_v54  ;;  %v8432_v16 = vsel %vm15898_vm0, %v1632_v59, %v1636_v61  ;;  %v1648_v50 = vor.u32 %v1646_v25, %v1644_v54  ;;  %v1676_v61 = vrot.slane %v1674_v34, 1 }
  0x36   :  { %16286 = vst [vmem:[#allocation22_spill] sm:$0xff] %v8420_v36  ;;  %v1749_v54 = vrot.slane %v8057_v2, 1  ;;  %v1751_v59 = vrot.slane %v8062_v3, 1  ;;  %v2027_v25 = vrot.slane %v7364_v19, 1  ;;  %v7361_v1 = vcombine.low %v1245_v56, %v8070_v5 }
  0x37   :  { %1724 = vrot.lane.b32.xlu1 %v8382_v44, %s7999_s21  ;;  %v1656_v44 = vor.u32 %v1654_v28, %v1652_v55  ;;  %v1662_v28 = vshrl.u32 %v8379_v11, 16  ;;  %v1753_v30 = vrot.slane %v8089_v12, 1 }
  0x38   :  { %1722 = vrot.lane.b32.xlu0 %v8394_v8, %s7999_s21  ;;  %v8452_v8 = vsel %vm15898_vm0, %v1648_v50, %v1652_v55  ;;  %v8458_v34 = vsel %vm15897_vm1, %v2027_v25, %v1749_v54  ;;  %v1746_v5 = vrot.slane %v7361_v1, 1  ;;  %v8485_v56 = vsel %vm15897_vm1, %v1749_v54, %v1751_v59 }
  0x39   :  { %16289 = vst [vmem:[#allocation25_spill] sm:$0xff] %v8452_v8  ;;  %v1664_v7 = vor.u32 %v1662_v28, %v1660_v31  ;;  %v8479_v50 = vsel %vm15897_vm1, %v1751_v59, %v1753_v30  ;;  %v1757_v28 = vrot.slane %v8108_v23, 1 }
  0x3b   :  { %1728 = vrot.lane.b32.xlu1 %v8400_v4, %s7999_s21  ;;  %v8443_v4 = vsel %vm15898_vm0, %v1656_v44, %v1660_v31  ;;  %v8469_v55 = vsel %vm15898_vm0, %v1664_v7, %v1668_v18  ;;  %v1750_v31 = vsel %vm15897_vm1, %v1747_v62, %v1749_v54  ;;  %v1765_v7 = vrot.slane %v8145_v47, 1 }
  0x3c   :  { %1726 = vrot.lane.b32.xlu0 %v8413_v22, %s7999_s21  ;;  %16287 = vst [vmem:[#allocation23_spill] sm:$0xff] %v8443_v4  ;;  %v8445_v22 = vor.u32 %v1670_v29, %v1668_v18  ;;  %16290 = vst [vmem:[#allocation26_spill] sm:$0xff] %v8469_v55  ;;  %v1755_v18 = vrot.slane %v8098_v15, 1 }
  0x3e   :  { %16288 = vst [vmem:[#allocation24_spill] sm:$0xff] %v8445_v22  ;;  %v1677_v29 = vsel %vm15898_vm0, %v8445_v22, %v1676_v61  ;;  %v8490_v19 = vsel %vm15897_vm1, %v1755_v18, %v1757_v28  ;;  %v1761_v61 = vrot.slane %v8127_v39, 1  ;;  %v8497_v25 = vsel %vm15897_vm1, %v1753_v30, %v1755_v18 }
  0x3f   :  { %1732 = vrot.lane.b32.xlu1 %v8420_v36, %s7999_s21  ;;  %v2249_v36 = vrot.slane %v7367_v58, 1  ;;  %v1759_v58 = vrot.slane %v8122_v38, 1  ;;  %v1773_v18 = vrot.slane %v8188_v9, 1  ;;  %v1781_v22 = vrot.slane %v8233_v42, 1 }
  0x40   :  { %1730 = vrot.lane.b32.xlu0 %v8432_v16, %s7999_s21 }
  0x41   :  { %v8461_v44 = vsel %vm15897_vm1, %v2249_v36, %v1751_v59  ;;  %v1748_v36 = vsel %vm15897_vm1, %v1746_v5, %v1747_v62  ;;  %v8502_v54 = vsel %vm15897_vm1, %v1759_v58, %v1761_v61  ;;  %v1763_v59 = vrot.slane %v8140_v46, 1 }
  0x42   :  { %v8509_v1 = vsel %vm15897_vm1, %v1757_v28, %v1759_v58  ;;  %v1767_v62 = vrot.slane %v8150_v48, 1  ;;  %v1769_v5 = vrot.slane %v8159_v52, 1 }
  0x43   :  { %1736 = vrot.lane.b32.xlu1 %v8443_v4, %s7999_s21 }
  0x44   :  { %1734 = vrot.lane.b32.xlu0 %v8452_v8, %s7999_s21  ;;  %v8526_v30 = vsel %vm15897_vm1, %v1767_v62, %v1769_v5  ;;  %v8533_v28 = vsel %vm15897_vm1, %v1765_v7, %v1767_v62  ;;  %v1779_v62 = vrot.slane %v8221_v33, 1 }
  0x47   :  { %1740 = vrot.lane.b32.xlu1 %v1677_v29, %s7999_s21  ;;  %v8514_v29 = vsel %vm15897_vm1, %v1763_v59, %v1765_v7 }
  0x48   :  { %1738 = vrot.lane.b32.xlu0 %v8469_v55, %s7999_s21 }
  0x4b   :  { %1813 = vrot.lane.b32.xlu1 %v1750_v31, %s8000_s13  ;;  %v8521_v31 = vsel %vm15897_vm1, %v1761_v61, %v1763_v59  ;;  %v1775_v61 = vrot.slane %v8199_v20, 1  ;;  %v1777_v59 = vrot.slane %v8212_v27, 1  ;;  %v8562_v27 = vsel %vm15897_vm1, %v1779_v62, %v1781_v22 }
  0x4c   :  { %1811 = vrot.lane.b32.xlu0 %v1748_v36, %s8000_s13  ;;  %v1771_v36 = vrot.slane %v8176_v63, 1 }
  0x4d   :  { %v8550_v7 = vsel %vm15897_vm1, %v1775_v61, %v1777_v59  ;;  %v8557_v20 = vsel %vm15897_vm1, %v1773_v18, %v1775_v61  ;;  %v8569_v33 = vsel %vm15897_vm1, %v1777_v59, %v1779_v62  ;;  %v1789_v61 = vrot.slane %v8284_v26, 1 }
  0x4e   :  { %v8538_v58 = vsel %vm15897_vm1, %v1771_v36, %v1773_v18  ;;  %v8545_v9 = vsel %vm15897_vm1, %v1769_v5, %v1771_v36  ;;  %v1783_v5 = vrot.slane %v8241_v45, 1  ;;  %v1785_v36 = vrot.slane %v8262_v60, 1 }
  0x4f   :  { %1817 = vrot.lane.b32.xlu1 %v8479_v50, %s8000_s13  ;;  %v1787_v18 = vrot.slane %v8269_v10, 1  ;;  %v1791_v59 = vrot.slane %v8293_v35, 1  ;;  %v1793_v62 = vrot.slane %v8304_v43, 1 }
  0x50   :  { %1815 = vrot.lane.b32.xlu0 %v8485_v56, %s8000_s13  ;;  %v8574_v42 = vsel %vm15897_vm1, %v1783_v5, %v1785_v36  ;;  %v8581_v45 = vsel %vm15897_vm1, %v1781_v22, %v1783_v5  ;;  %v1795_v22 = vrot.slane %v8313_v51, 1  ;;  %v1797_v5 = vrot.slane %v8334_v24, 1 }
  0x51   :  { %v8586_v60 = vsel %vm15897_vm1, %v1787_v18, %v1789_v61  ;;  %v8593_v10 = vsel %vm15897_vm1, %v1785_v36, %v1787_v18  ;;  %v8598_v26 = vsel %vm15897_vm1, %v1791_v59, %v1793_v62  ;;  %v8605_v35 = vsel %vm15897_vm1, %v1789_v61, %v1791_v59 }
  0x52   :  { %v8610_v43 = vsel %vm15897_vm1, %v1795_v22, %v1797_v5  ;;  %v1799_v36 = vrot.slane %v8341_v37, 1  ;;  %v1801_v18 = vrot.slane %v8353_v57, 1  ;;  %v8617_v51 = vsel %vm15897_vm1, %v1793_v62, %v1795_v22 }
  0x53   :  { %1821 = vrot.lane.b32.xlu1 %v8490_v19, %s8000_s13  ;;  %v1803_v61 = vrot.slane %v8365_v17, 1  ;;  %v1805_v59 = vrot.slane %v8379_v11, 1  ;;  %v8641_v17 = vrot.slane %v8389_v40, 1  ;;  %v1809_v11 = vrot.slane %v8407_v6, 1 }
  0x54   :  { %1819 = vrot.lane.b32.xlu0 %v8497_v25, %s8000_s13  ;;  %v8622_v24 = vsel %vm15897_vm1, %v1799_v36, %v1801_v18  ;;  %v8631_v57 = vsel %vm15897_vm1, %v1797_v5, %v1799_v36 }
  0x55   :  { %16291 = vst [vmem:[#allocation27_spill] sm:$0xff] %v8622_v24  ;;  %16292 = vst [vmem:[#allocation28_spill] sm:$0xff] %v8631_v57  ;;  %v8638_v22 = vsel %vm15897_vm1, %v1803_v61, %v1805_v59  ;;  %v8649_v5 = vsel %vm15897_vm1, %v1801_v18, %v1803_v61  ;;  %v1810_v4 = vsel %vm15897_vm1, %v8641_v17, %v1809_v11  ;;  %v7883_v18 = vld [vmem:[%s15801_s1 + $0x20] ss:$0 sps:$4 sm:$0xff]  }
  0x56   :  { %16293 = vst [vmem:[#allocation29_spill] sm:$0xff] %v8638_v22  ;;  %16294 = vst [vmem:[#allocation30_spill] sm:$0xff] %v8641_v17  ;;  %v8663_v6 = vsel %vm15897_vm1, %v1805_v59, %v8641_v17  ;;  %7836 = vmatprep.subr.msk.bf16.mxu0 %vm15896_vm2, %v7883_v18  ;;  %v2942_v11 = vsel %vm15896_vm2, %v7883_v18, 0  ;;  %v7885_v18 = vld [vmem:[%s15801_s1 + $0x10] sm:$0xff]  }
  0x57   :  { %1825 = vrot.lane.b32.xlu1 %v8502_v54, %s8000_s13  ;;  %16295 = vst [vmem:[#allocation31_spill] sm:$0xff] %v8649_v5  ;;  %16296 = vst [vmem:[#allocation32_spill] sm:$0xff] %v8663_v6  ;;  %7689 = vmatpush3.bf16.msra.mxu0 %v2942_v11 }
  0x58   :  { %1823 = vrot.lane.b32.xlu0 %v8509_v1, %s8000_s13 }
  0x5b   :  { %1829 = vrot.lane.b32.xlu1 %v8514_v29, %s8000_s13 }
  0x5c   :  { %1827 = vrot.lane.b32.xlu0 %v8521_v31, %s8000_s13 }
  0x5f   :  { %1833 = vrot.lane.b32.xlu1 %v8526_v30, %s8000_s13 }
  0x60   :  { %1831 = vrot.lane.b32.xlu0 %v8533_v28, %s8000_s13 }
  0x63   :  { %1837 = vrot.lane.b32.xlu1 %v8538_v58, %s8000_s13 }
  0x64   :  { %1835 = vrot.lane.b32.xlu0 %v8545_v9, %s8000_s13 }
  0x67   :  { %1841 = vrot.lane.b32.xlu1 %v8550_v7, %s8000_s13 }
  0x68   :  { %1839 = vrot.lane.b32.xlu0 %v8557_v20, %s8000_s13 }
  0x6b   :  { %1845 = vrot.lane.b32.xlu1 %v8562_v27, %s8000_s13 }
  0x6c   :  { %1843 = vrot.lane.b32.xlu0 %v8569_v33, %s8000_s13 }
  0x6f   :  { %1849 = vrot.lane.b32.xlu1 %v8574_v42, %s8000_s13 }
  0x70   :  { %1847 = vrot.lane.b32.xlu0 %v8581_v45, %s8000_s13 }
  0x73   :  { %1853 = vrot.lane.b32.xlu1 %v8586_v60, %s8000_s13 }
  0x74   :  { %1851 = vrot.lane.b32.xlu0 %v8593_v10, %s8000_s13 }
  0x77   :  { %1857 = vrot.lane.b32.xlu1 %v8598_v26, %s8000_s13 }
  0x78   :  { %1855 = vrot.lane.b32.xlu0 %v8605_v35, %s8000_s13 }
  0x7b   :  { %1861 = vrot.lane.b32.xlu1 %v8610_v43, %s8000_s13 }
  0x7c   :  { %1859 = vrot.lane.b32.xlu0 %v8617_v51, %s8000_s13 }
  0x7d   :  { %v8628_v37 = vpop.permute.xlu1 %1682 }
  0x7e   :  { %v8633_v62 = vpop.permute.xlu0 %1678 }
  0x7f   :  { %1865 = vrot.lane.b32.xlu1 %v8622_v24, %s8000_s13 }
  0x80   :  { %1863 = vrot.lane.b32.xlu0 %v8631_v57, %s8000_s13 }
  0x81   :  { %v8646_v55 = vpop.permute.xlu1 %1684 }
  0x82   :  { %v8651_v36 = vpop.permute.xlu0 %1680 }
  0x83   :  { %1869 = vrot.lane.b32.xlu1 %v8638_v22, %s8000_s13 }
  0x84   :  { %1867 = vrot.lane.b32.xlu0 %v8649_v5, %s8000_s13 }
  0x85   :  { %v8659_v40 = vpop.permute.xlu1 %1688 }
  0x86   :  { %v8665_v8 = vpop.permute.xlu0 %1686 }
  0x87   :  { %1873 = vrot.lane.b32.xlu1 %v1810_v4, %s8000_s13  ;;  %v7884_v4 = vld [vmem:[%s15801_s1 + $0x18] sm:$0xff]  }
  0x88   :  { %1871 = vrot.lane.b32.xlu0 %v8663_v6, %s8000_s13  ;;  %7690 = vmatprep.subr.bf16.mxu0 %v7884_v4 }
  0x89   :  { %v8673_v61 = vpop.permute.xlu1 %1692  ;;  %7691 = vmatpush3.bf16.msra.mxu0 %v7884_v4  ;;  %v7886_v4 = vld [vmem:[%s15801_s1 + $0x8] sm:$0xff]  }
  0x8a   :  { %v8677_v59 = vpop.permute.xlu0 %1690  ;;  %7692 = vmatprep.subr.bf16.mxu0 %v7885_v18 }
  0x8b   :  { %1882 = vrot.lane.b32.xlu1 %v8057_v2, %s8001_s16 }
  0x8c   :  { %1880 = vrot.lane.b32.xlu0 %v8092_v13, %s8001_s16 }
  0x8d   :  { %v8686_v17 = vpop.permute.xlu1 %1696  ;;  %7693 = vmatpush3.bf16.msra.mxu0 %v7885_v18 }
  0x8e   :  { %v8688_v6 = vpop.permute.xlu0 %1694  ;;  %7694 = vmatprep.subr.bf16.mxu0 %v7886_v4 }
  0x8f   :  { %1886 = vrot.lane.b32.xlu1 %v8089_v12, %s8001_s16 }
  0x90   :  { %1884 = vrot.lane.b32.xlu0 %v8062_v3, %s8001_s16 }
  0x91   :  { %v8697_v11 = vpop.permute.xlu1 %1700  ;;  %7695 = vmatpush3.bf16.msra.mxu0 %v7886_v4 }
  0x92   :  { %v8699_v22 = vpop.permute.xlu0 %1698 }
  0x93   :  { %1960 = vrot.lane.b32.xlu1 %v8153_v49, %s8002_s22  ;;  %v7887_v49 = vld [vmem:[%s15801_s1] sm:$0xff]   ;;  %s8005_s1 = smov 56  }
  0x94   :  { %1888 = vrot.lane.b32.xlu0 %v8098_v15, %s8001_s16  ;;  %7696 = vmatprep.subr.bf16.mxu0 %v7887_v49 }
  0x95   :  { %v8708_v5 = vpop.permute.xlu1 %1704  ;;  %7697 = vmatpush3.bf16.msra.mxu0 %v7887_v49 }
  0x96   :  { %v8710_v24 = vpop.permute.xlu0 %1702 }
  0x97   :  { %2033 = vrot.lane.b32.xlu1 %v8458_v34, %s8003_s25 }
  0x98   :  { %1962 = vrot.lane.b32.xlu0 %v8114_v32, %s8002_s22 }
  0x99   :  { %v8719_v18 = vpop.permute.xlu1 %1708 }
  0x9a   :  { %16297 = vst [vmem:[#allocation33_spill] sm:$0xff] %v8719_v18  ;;  %v8721_v57 = vpop.permute.xlu0 %1706 }
  0x9b   :  { %16298 = vst [vmem:[#allocation34_spill] sm:$0xff] %v8721_v57  ;;  %2102 = vrot.lane.b32.xlu1 %v8057_v2, %s8004_s28 }
  0x9c   :  { %2035 = vrot.lane.b32.xlu0 %v8485_v56, %s8003_s25 }
  0x9d   :  { %v8727_v34 = vpop.permute.xlu1 %1712 }
  0x9e   :  { %16299 = vst [vmem:[#allocation35_spill] sm:$0xff] %v8727_v34  ;;  %v8729_v4 = vpop.permute.xlu0 %1710 }
  0x9f   :  { %16300 = vst [vmem:[#allocation36_spill] sm:$0xff] %v8729_v4  ;;  %2182 = vrot.lane.b32.xlu1 %v8114_v32, %s8005_s1 }
  0xa0   :  { %2104 = vrot.lane.b32.xlu0 %v8062_v3, %s8004_s28 }
  0xa1   :  { %v8735_v49 = vpop.permute.xlu1 %1716 }
  0xa2   :  { %16301 = vst [vmem:[#allocation37_spill] sm:$0xff] %v8735_v49  ;;  %v8737_v57 = vpop.permute.xlu0 %1714 }
  0xa3   :  { %16302 = vst [vmem:[#allocation38_spill] sm:$0xff] %v8737_v57  ;;  %2255 = vrot.lane.b32.xlu1 %v8461_v44, %s8006_s29 }
  0xa4   :  { %2184 = vrot.lane.b32.xlu0 %v8131_v41, %s8005_s1 }
  0xa5   :  { %v8743_v56 = vpop.permute.xlu1 %1720 }
  0xa6   :  { %16303 = vst [vmem:[#allocation39_spill] sm:$0xff] %v8743_v56  ;;  %v8745_v4 = vpop.permute.xlu0 %1718 }
  0xa7   :  { %16304 = vst [vmem:[#allocation40_spill] sm:$0xff] %v8745_v4  ;;  %1964 = vrot.lane.b32.xlu1 %v8131_v41, %s8002_s22  ;;  %v16315_v4 = vld [vmem:[#allocation5_spill] sm:$0xff] }
  0xa8   :  { %2257 = vrot.lane.b32.xlu0 %v8479_v50, %s8006_s29 }
  0xa9   :  { %v8751_v3 = vpop.permute.xlu1 %1724 }
  0xaa   :  { %16305 = vst [vmem:[#allocation41_spill] sm:$0xff] %v8751_v3  ;;  %v8753_v32 = vpop.permute.xlu0 %1722 }
  0xab   :  { %16306 = vst [vmem:[#allocation42_spill] sm:$0xff] %v8753_v32  ;;  %2037 = vrot.lane.b32.xlu1 %v8479_v50, %s8003_s25 }
  0xac   :  { %1966 = vrot.lane.b32.xlu0 %v8179_v0, %s8002_s22 }
  0xad   :  { %v8759_v44 = vpop.permute.xlu1 %1728 }
  0xae   :  { %16307 = vst [vmem:[#allocation43_spill] sm:$0xff] %v8759_v44  ;;  %v8761_v56 = vpop.permute.xlu0 %1726 }
  0xaf   :  { %16308 = vst [vmem:[#allocation44_spill] sm:$0xff] %v8761_v56  ;;  %2106 = vrot.lane.b32.xlu1 %v8089_v12, %s8004_s28 }
  0xb0   :  { %2039 = vrot.lane.b32.xlu0 %v8497_v25, %s8003_s25 }
  0xb1   :  { %v8767_v41 = vpop.permute.xlu1 %1732 }
  0xb2   :  { %16309 = vst [vmem:[#allocation45_spill] sm:$0xff] %v8767_v41  ;;  %v8769_v3 = vpop.permute.xlu0 %1730 }
  0xb3   :  { %16310 = vst [vmem:[#allocation46_spill] sm:$0xff] %v8769_v3  ;;  %2186 = vrot.lane.b32.xlu1 %v8179_v0, %s8005_s1 }
  0xb4   :  { %2108 = vrot.lane.b32.xlu0 %v8098_v15, %s8004_s28 }
  0xb5   :  { %v8775_v50 = vpop.permute.xlu1 %1736 }
  0xb6   :  { %16311 = vst [vmem:[#allocation47_spill] sm:$0xff] %v8775_v50  ;;  %v8777_v44 = vpop.permute.xlu0 %1734 }
  0xb7   :  { %16312 = vst [vmem:[#allocation48_spill] sm:$0xff] %v8777_v44  ;;  %2259 = vrot.lane.b32.xlu1 %v8497_v25, %s8006_s29 }
  0xb8   :  { %2188 = vrot.lane.b32.xlu0 %v8164_v53, %s8005_s1 }
  0xb9   :  { %v8783_v12 = vpop.permute.xlu1 %1740 }
  0xba   :  { %16313 = vst [vmem:[#allocation49_spill] sm:$0xff] %v8783_v12  ;;  %v8785_v41 = vpop.permute.xlu0 %1738 }
  0xbb   :  { %16314 = vst [vmem:[#allocation50_spill] sm:$0xff] %v8785_v41  ;;  %1890 = vrot.lane.b32.xlu1 %v8108_v23, %s8001_s16 }
  0xbc   :  { %2261 = vrot.lane.b32.xlu0 %v8490_v19, %s8006_s29 }
  0xbd   :  { %v8791_v15 = vpop.permute.xlu1 %1813 }
  0xbe   :  { %v8793_v0 = vpop.permute.xlu0 %1811 }
  0xbf   :  { %1970 = vrot.lane.b32.xlu1 %v8202_v21, %s8002_s22 }
  0xc0   :  { %1968 = vrot.lane.b32.xlu0 %v8164_v53, %s8002_s22 }
  0xc1   :  { %v8799_v25 = vpop.permute.xlu1 %1817 }
  0xc2   :  { %v8801_v12 = vpop.permute.xlu0 %1815 }
  0xc3   :  { %2043 = vrot.lane.b32.xlu1 %v8509_v1, %s8003_s25 }
  0xc4   :  { %2041 = vrot.lane.b32.xlu0 %v8490_v19, %s8003_s25 }
  0xc5   :  { %v8807_v41 = vpop.permute.xlu1 %1821 }
  0xc6   :  { %v8809_v44 = vpop.permute.xlu0 %1819 }
  0xc7   :  { %2112 = vrot.lane.b32.xlu1 %v8122_v38, %s8004_s28 }
  0xc8   :  { %2110 = vrot.lane.b32.xlu0 %v8108_v23, %s8004_s28 }
  0xc9   :  { %v8815_v53 = vpop.permute.xlu1 %1825 }
  0xca   :  { %v8817_v50 = vpop.permute.xlu0 %1823 }
  0xcb   :  { %2192 = vrot.lane.b32.xlu1 %v8192_v14, %s8005_s1 }
  0xcc   :  { %2190 = vrot.lane.b32.xlu0 %v8202_v21, %s8005_s1 }
  0xcd   :  { %v8823_v19 = vpop.permute.xlu1 %1829 }
  0xce   :  { %v8825_v3 = vpop.permute.xlu0 %1827 }
  0xcf   :  { %2265 = vrot.lane.b32.xlu1 %v8502_v54, %s8006_s29 }
  0xd0   :  { %2263 = vrot.lane.b32.xlu0 %v8509_v1, %s8006_s29 }
  0xd1   :  { %v8831_v23 = vpop.permute.xlu1 %1833 }
  0xd2   :  { %v8833_v56 = vpop.permute.xlu0 %1831 }
  0xd3   :  { %1894 = vrot.lane.b32.xlu1 %v8127_v39, %s8001_s16 }
  0xd4   :  { %1892 = vrot.lane.b32.xlu0 %v8122_v38, %s8001_s16 }
  0xd5   :  { %v8839_v21 = vpop.permute.xlu1 %1837 }
  0xd6   :  { %v8841_v32 = vpop.permute.xlu0 %1835 }
  0xd7   :  { %1974 = vrot.lane.b32.xlu1 %v16315_v4, %s8002_s22 }
  0xd8   :  { %1972 = vrot.lane.b32.xlu0 %v8192_v14, %s8002_s22 }
  0xd9   :  { %v8847_v1 = vpop.permute.xlu1 %1841 }
  0xda   :  { %16316 = vst [vmem:[#allocation5_spill] sm:$0xff] %v8847_v1  ;;  %v8849_v57 = vpop.permute.xlu0 %1839 }
  0xdb   :  { %16317 = vst [vmem:[#allocation51_spill] sm:$0xff] %v8849_v57  ;;  %2047 = vrot.lane.b32.xlu1 %v8521_v31, %s8003_s25  ;;  %v16322_v57 = vld [vmem:[#allocation4_spill] sm:$0xff] }
  0xdc   :  { %2045 = vrot.lane.b32.xlu0 %v8502_v54, %s8003_s25 }
  0xdd   :  { %v8855_v38 = vpop.permute.xlu1 %1845 }
  0xde   :  { %16318 = vst [vmem:[#allocation52_spill] sm:$0xff] %v8855_v38  ;;  %v8857_v49 = vpop.permute.xlu0 %1843 }
  0xdf   :  { %16319 = vst [vmem:[#allocation53_spill] sm:$0xff] %v8857_v49  ;;  %2116 = vrot.lane.b32.xlu1 %v8140_v46, %s8004_s28 }
  0xe0   :  { %2114 = vrot.lane.b32.xlu0 %v8127_v39, %s8004_s28 }
  0xe1   :  { %v8863_v14 = vpop.permute.xlu1 %1849 }
  0xe2   :  { %16320 = vst [vmem:[#allocation54_spill] sm:$0xff] %v8863_v14  ;;  %v8865_v34 = vpop.permute.xlu0 %1847 }
  0xe3   :  { %16321 = vst [vmem:[#allocation55_spill] sm:$0xff] %v8865_v34  ;;  %2196 = vrot.lane.b32.xlu1 %v16322_v57, %s8005_s1 }
  0xe4   :  { %2194 = vrot.lane.b32.xlu0 %v16315_v4, %s8005_s1 }
  0xe5   :  { %v8871_v54 = vpop.permute.xlu1 %1853 }
  0xe6   :  { %16323 = vst [vmem:[#allocation4_spill] sm:$0xff] %v8871_v54  ;;  %v8873_v38 = vpop.permute.xlu0 %1851 }
  0xe7   :  { %16324 = vst [vmem:[#allocation56_spill] sm:$0xff] %v8873_v38  ;;  %2269 = vrot.lane.b32.xlu1 %v8514_v29, %s8006_s29  ;;  %v16329_v38 = vld [vmem:[#allocation7_spill] sm:$0xff] }
  0xe8   :  { %2267 = vrot.lane.b32.xlu0 %v8521_v31, %s8006_s29 }
  0xe9   :  { %v8879_v39 = vpop.permute.xlu1 %1857 }
  0xea   :  { %16325 = vst [vmem:[#allocation57_spill] sm:$0xff] %v8879_v39  ;;  %v8881_v14 = vpop.permute.xlu0 %1855 }
  0xeb   :  { %16326 = vst [vmem:[#allocation58_spill] sm:$0xff] %v8881_v14  ;;  %1898 = vrot.lane.b32.xlu1 %v8145_v47, %s8001_s16 }
  0xec   :  { %1896 = vrot.lane.b32.xlu0 %v8140_v46, %s8001_s16 }
  0xed   :  { %v8887_v4 = vpop.permute.xlu1 %1861 }
  0xee   :  { %16327 = vst [vmem:[#allocation59_spill] sm:$0xff] %v8887_v4  ;;  %v8889_v54 = vpop.permute.xlu0 %1859 }
  0xef   :  { %16328 = vst [vmem:[#allocation60_spill] sm:$0xff] %v8889_v54  ;;  %1978 = vrot.lane.b32.xlu1 %v16329_v38, %s8002_s22 }
  0xf0   :  { %1976 = vrot.lane.b32.xlu0 %v16322_v57, %s8002_s22 }
  0xf1   :  { %v8895_v31 = vpop.permute.xlu1 %1865 }
  0xf2   :  { %16330 = vst [vmem:[#allocation7_spill] sm:$0xff] %v8895_v31  ;;  %v8897_v39 = vpop.permute.xlu0 %1863 }
  0xf3   :  { %16331 = vst [vmem:[#allocation61_spill] sm:$0xff] %v8897_v39  ;;  %2051 = vrot.lane.b32.xlu1 %v8533_v28, %s8003_s25  ;;  %v16336_v39 = vld [vmem:[#allocation6_spill] sm:$0xff] }
  0xf4   :  { %2049 = vrot.lane.b32.xlu0 %v8514_v29, %s8003_s25 }
  0xf5   :  { %v8903_v46 = vpop.permute.xlu1 %1869 }
  0xf6   :  { %16332 = vst [vmem:[#allocation62_spill] sm:$0xff] %v8903_v46  ;;  %v8905_v4 = vpop.permute.xlu0 %1867 }
  0xf7   :  { %16333 = vst [vmem:[#allocation63_spill] sm:$0xff] %v8905_v4  ;;  %2120 = vrot.lane.b32.xlu1 %v8150_v48, %s8004_s28 }
  0xf8   :  { %2118 = vrot.lane.b32.xlu0 %v8145_v47, %s8004_s28 }
  0xf9   :  { %v8911_v57 = vpop.permute.xlu1 %1873 }
  0xfa   :  { %16334 = vst [vmem:[#allocation64_spill] sm:$0xff] %v8911_v57  ;;  %v8913_v31 = vpop.permute.xlu0 %1871  ;;  %v16337_v57 = vld [vmem:[#allocation9_spill] sm:$0xff] }
  0xfb   :  { %16335 = vst [vmem:[#allocation65_spill] sm:$0xff] %v8913_v31  ;;  %2200 = vrot.lane.b32.xlu1 %v16336_v39, %s8005_s1 }
  0xfc   :  { %2198 = vrot.lane.b32.xlu0 %v16329_v38, %s8005_s1 }
  0xfd   :  { %v1883_v29 = vpop.permute.xlu1 %1882 }
  0xfe   :  { %v1881_v46 = vpop.permute.xlu0 %1880 }
  0xff   :  { %2273 = vrot.lane.b32.xlu1 %v8526_v30, %s8006_s29 }
 0x100   :  { %2271 = vrot.lane.b32.xlu0 %v8533_v28, %s8006_s29 }
 0x101   :  { %v8923_v4 = vpop.permute.xlu1 %1886 }
 0x102   :  { %v8925_v47 = vpop.permute.xlu0 %1884 }
 0x103   :  { %1902 = vrot.lane.b32.xlu1 %v8159_v52, %s8001_s16  ;;  %v16338_v52 = vld [vmem:[#allocation3_spill] sm:$0xff] }
 0x104   :  { %1900 = vrot.lane.b32.xlu0 %v8150_v48, %s8001_s16  ;;  %v2321_v14 = vsel %vm2319_vm3, %v16338_v52, %v8633_v62 }
 0x105   :  { %v1961_v31 = vpop.permute.xlu1 %1960 }
 0x106   :  { %v8931_v38 = vpop.permute.xlu0 %1888 }
 0x107   :  { %1982 = vrot.lane.b32.xlu1 %v16337_v57, %s8002_s22 }
 0x108   :  { %1980 = vrot.lane.b32.xlu0 %v16336_v39, %s8002_s22  ;;  %v2386_v39 = vsel %vm15895_vm4, %v2321_v14, %v8793_v0  ;;  %v16339_v0 = vld [vmem:[#allocation8_spill] sm:$0xff] }
 0x109   :  { %v2034_v28 = vpop.permute.xlu1 %2033  ;;  %v2451_v49 = vsel %vm2449_vm5, %v2386_v39, %v1881_v46  ;;  %v2323_v46 = vsel %vm2319_vm3, %v8092_v13, %v8651_v36 }
 0x10a   :  { %v1963_v54 = vpop.permute.xlu0 %1962  ;;  %v2516_v52 = vsel %vm2514_vm6, %v2451_v49, %v1961_v31  ;;  %v2388_v31 = vsel %vm15895_vm4, %v2323_v46, %v8791_v15 }
 0x10b   :  { %2055 = vrot.lane.b32.xlu1 %v8545_v9, %s8003_s25 }
 0x10c   :  { %2053 = vrot.lane.b32.xlu0 %v8526_v30, %s8003_s25  ;;  %v8952_v30 = vld [vmem:[%s15800_s0 + $0x60] sm:$0xff]  }
 0x10d   :  { %v2103_v48 = vpop.permute.xlu1 %2102 }
 0x10e   :  { %v2036_v34 = vpop.permute.xlu0 %2035 }
 0x10f   :  { %2124 = vrot.lane.b32.xlu1 %v8176_v63, %s8004_s28  ;;  %v2581_v63 = vsel %vm2579_vm7, %v2516_v52, %v2034_v28  ;;  %v2453_v52 = vsel %vm2449_vm5, %v2388_v31, %v1883_v29  ;;  %v8983_v29 = vld [vmem:[%s15800_s0 + $0x70] sm:$0xff]  }
 0x110   :  { %2122 = vrot.lane.b32.xlu0 %v8952_v30, %s8004_s28  ;;  %v2646_v14 = vsel %vm16047_vm8, %v2581_v63, %v2103_v48  ;;  %v2518_v13 = vsel %vm2514_vm6, %v2453_v52, %v1963_v54 }
 0x111   :  { %v2183_v62 = vpop.permute.xlu1 %2182  ;;  %v2583_v36 = vsel %vm2579_vm7, %v2518_v13, %v2036_v34 }
 0x112   :  { %v2105_v1 = vpop.permute.xlu0 %2104  ;;  %v2711_v39 = vsel %vm16043_vm9, %v2646_v14, %v2183_v62  ;;  %v2325_v14 = vsel %vm2319_vm3, %v8057_v2, %v8628_v37  ;;  %v9016_v2 = vld [vmem:[%s15800_s0 + $0x78] sm:$0xff]  }
 0x113   :  { %2204 = vrot.lane.b32.xlu1 %v16339_v0, %s8005_s1  ;;  %v2648_v15 = vsel %vm16047_vm8, %v2583_v36, %v2105_v1  ;;  %v16340_v1 = vld [vmem:[#allocation11_spill] sm:$0xff] }
 0x114   :  { %2202 = vrot.lane.b32.xlu0 %v16337_v57, %s8005_s1 }
 0x115   :  { %v2256_v49 = vpop.permute.xlu1 %2255 }
 0x116   :  { %v2776_v28 = vsel %vm15953_vm10, %v2711_v39, %v2256_v49  ;;  %v2185_v18 = vpop.permute.xlu0 %2184  ;;  %v2390_v39 = vsel %vm15895_vm4, %v2325_v14, %v8801_v12 }
 0x117   :  { %2277 = vrot.lane.b32.xlu1 %v8538_v58, %s8006_s29  ;;  %7698 = vmatprep.mubr.msk.bf16.mxu0 %vm15899_vm11, %v2776_v28  ;;  %v2713_v48 = vsel %vm16043_vm9, %v2648_v15, %v2185_v18  ;;  %v2455_v49 = vsel %vm2449_vm5, %v2390_v39, %v8925_v47 }
 0x118   :  { %2275 = vrot.lane.b32.xlu0 %v8545_v9, %s8006_s29  ;;  %v8991_v9 = vld [vmem:[%s15800_s0 + $0x68] sm:$0xff]  }
 0x119   :  { %v1965_v57 = vpop.permute.xlu1 %1964 }
 0x11a   :  { %v2258_v62 = vpop.permute.xlu0 %2257 }
 0x11b   :  { %1906 = vrot.lane.b32.xlu1 %v8983_v29, %s8001_s16  ;;  %v2778_v54 = vsel %vm15953_vm10, %v2713_v48, %v2258_v62  ;;  %v16341_v62 = vld [vmem:[#allocation10_spill] sm:$0xff] }
 0x11c   :  { %1904 = vrot.lane.b32.xlu0 %v8991_v9, %s8001_s16  ;;  %7699 = vmatmul.mubr.msk.bf16.vlgmr.msra.gmra.mxu0 %vm15899_vm11, %v2778_v54 }
 0x11d   :  { %v2038_v18 = vpop.permute.xlu1 %2037 }
 0x11e   :  { %v1967_v34 = vpop.permute.xlu0 %1966 }
 0x11f   :  { %1986 = vrot.lane.b32.xlu1 %v16340_v1, %s8002_s22 }
 0x120   :  { %1984 = vrot.lane.b32.xlu0 %v16339_v0, %s8002_s22  ;;  %v2520_v0 = vsel %vm2514_vm6, %v2455_v49, %v1965_v57 }
 0x121   :  { %v2107_v63 = vpop.permute.xlu1 %2106  ;;  %v2585_v28 = vsel %vm2579_vm7, %v2520_v0, %v2038_v18 }
 0x122   :  { %v2040_v46 = vpop.permute.xlu0 %2039  ;;  %v2650_v37 = vsel %vm16047_vm8, %v2585_v28, %v2107_v63  ;;  %v7944_v28 = vld [vmem:[%s15800_s0 + $0x28] sm:$0xff]  }
 0x123   :  { %2059 = vrot.lane.b32.xlu1 %v8557_v20, %s8003_s25 }
 0x124   :  { %2057 = vrot.lane.b32.xlu0 %v8538_v58, %s8003_s25  ;;  %v7942_v58 = vld [vmem:[%s15800_s0 + $0x18] sm:$0xff]  }
 0x125   :  { %v2187_v31 = vpop.permute.xlu1 %2186  ;;  %v2327_v12 = vsel %vm2319_vm3, %v7942_v58, %v8646_v55 }
 0x126   :  { %v2109_v52 = vpop.permute.xlu0 %2108  ;;  %v2715_v47 = vsel %vm16043_vm9, %v2650_v37, %v2187_v31  ;;  %v2392_v36 = vsel %vm15895_vm4, %v2327_v12, %v8799_v25  ;;  %v16342_v31 = vld [vmem:[#allocation13_spill] sm:$0xff] }
 0x127   :  { %2128 = vrot.lane.b32.xlu1 %v9016_v2, %s8004_s28  ;;  %v2457_v15 = vsel %vm2449_vm5, %v2392_v36, %v8923_v4  ;;  %v7945_v37 = vld [vmem:[%s15800_s0 + $0x20] sm:$0xff]  }
 0x128   :  { %2126 = vrot.lane.b32.xlu0 %v8983_v29, %s8004_s28  ;;  %v2522_v55 = vsel %vm2514_vm6, %v2457_v15, %v1967_v34  ;;  %v2329_v58 = vsel %vm2319_vm3, %v7945_v37, %v8665_v8  ;;  %v9087_v8 = vld [vmem:[%s15800_s0 + $0x88] sm:$0xff]  }
 0x129   :  { %v2260_v13 = vpop.permute.xlu1 %2259  ;;  %v2587_v54 = vsel %vm2579_vm7, %v2522_v55, %v2040_v46 }
 0x12a   :  { %v2780_v57 = vsel %vm15953_vm10, %v2715_v47, %v2260_v13  ;;  %v2189_v48 = vpop.permute.xlu0 %2188  ;;  %v2652_v25 = vsel %vm16047_vm8, %v2587_v54, %v2109_v52  ;;  %v2331_v52 = vsel %vm2319_vm3, %v7944_v28, %v8659_v40  ;;  %v2394_v13 = vsel %vm15895_vm4, %v2329_v58, %v8809_v44  ;;  %v7949_v58 = vld [vmem:[%s15800_s0 + $0x30] sm:$0xff]  }
 0x12b   :  { %2208 = vrot.lane.b32.xlu1 %v16341_v62, %s8005_s1  ;;  %7702 = vmatprep.mubr.msk.bf16.mxu0 %vm15899_vm11, %v2780_v57  ;;  %v2717_v63 = vsel %vm16043_vm9, %v2652_v25, %v2189_v48  ;;  %v2396_v12 = vsel %vm15895_vm4, %v2331_v52, %v8807_v41  ;;  %v2459_v40 = vsel %vm2449_vm5, %v2394_v13, %v8931_v38  ;;  %v7948_v52 = vld [vmem:[%s15800_s0 + $0x38] sm:$0xff]  }
 0x12c   :  { %2206 = vrot.lane.b32.xlu0 %v16340_v1, %s8005_s1  ;;  %v9052_v1 = vld [vmem:[%s15800_s0 + $0x80] sm:$0xff]   ;;  %v2335_v37 = vsel %vm2319_vm3, %v7948_v52, %v8673_v61 }
 0x12d   :  { %v1891_v18 = vpop.permute.xlu1 %1890 }
 0x12e   :  { %v2262_v14 = vpop.permute.xlu0 %2261  ;;  %v2461_v36 = vsel %vm2449_vm5, %v2396_v12, %v1891_v18  ;;  %v2333_v12 = vsel %vm2319_vm3, %v7949_v58, %v8677_v59  ;;  %v9149_v59 = vld [vmem:[%s15800_s0 + $0x98] sm:$0xff]  }
 0x12f   :  { %2281 = vrot.lane.b32.xlu1 %v8550_v7, %s8006_s29  ;;  %v2782_v4 = vsel %vm15953_vm10, %v2717_v63, %v2262_v14  ;;  %v16343_v63 = vld [vmem:[#allocation12_spill] sm:$0xff] }
 0x130   :  { %2279 = vrot.lane.b32.xlu0 %v8557_v20, %s8006_s29  ;;  %7703 = vmatmul.mubr.msk.bf16.gmra.mxu0 %vm15899_vm11, %v2782_v4 }
 0x131   :  { %v1971_v34 = vpop.permute.xlu1 %1970 }
 0x132   :  { %v1969_v46 = vpop.permute.xlu0 %1968  ;;  %v2526_v57 = vsel %vm2514_vm6, %v2461_v36, %v1971_v34  ;;  %v2398_v36 = vsel %vm15895_vm4, %v2333_v12, %v8817_v50 }
 0x133   :  { %1910 = vrot.lane.b32.xlu1 %v9052_v1, %s8001_s16 }
 0x134   :  { %1908 = vrot.lane.b32.xlu0 %v9016_v2, %s8001_s16 }
 0x135   :  { %v2044_v39 = vpop.permute.xlu1 %2043 }
 0x136   :  { %v2042_v49 = vpop.permute.xlu0 %2041  ;;  %v2591_v44 = vsel %vm2579_vm7, %v2526_v57, %v2044_v39 }
 0x137   :  { %1990 = vrot.lane.b32.xlu1 %v16342_v31, %s8002_s22 }
 0x138   :  { %1988 = vrot.lane.b32.xlu0 %v16341_v62, %s8002_s22 }
 0x139   :  { %v2113_v20 = vpop.permute.xlu1 %2112 }
 0x13a   :  { %v2111_v0 = vpop.permute.xlu0 %2110  ;;  %v2656_v48 = vsel %vm16047_vm8, %v2591_v44, %v2113_v20 }
 0x13b   :  { %2063 = vrot.lane.b32.xlu1 %v8569_v33, %s8003_s25 }
 0x13c   :  { %2061 = vrot.lane.b32.xlu0 %v8550_v7, %s8003_s25  ;;  %v2524_v7 = vsel %vm2514_vm6, %v2459_v40, %v1969_v46 }
 0x13d   :  { %v2193_v47 = vpop.permute.xlu1 %2192  ;;  %v2589_v41 = vsel %vm2579_vm7, %v2524_v7, %v2042_v49  ;;  %v9115_v49 = vld [vmem:[%s15800_s0 + $0x90] sm:$0xff]  }
 0x13e   :  { %v2191_v15 = vpop.permute.xlu0 %2190  ;;  %v2654_v62 = vsel %vm16047_vm8, %v2589_v41, %v2111_v0  ;;  %v2721_v55 = vsel %vm16043_vm9, %v2656_v48, %v2193_v47  ;;  %v16344_v0 = vld [vmem:[#allocation15_spill] sm:$0xff]  ;;  %v2400_v47 = vsel %vm15895_vm4, %v2335_v37, %v8815_v53 }
 0x13f   :  { %2132 = vrot.lane.b32.xlu1 %v9087_v8, %s8004_s28  ;;  %v2719_v54 = vsel %vm16043_vm9, %v2654_v62, %v2191_v15 }
 0x140   :  { %2130 = vrot.lane.b32.xlu0 %v9052_v1, %s8004_s28 }
 0x141   :  { %v2266_v38 = vpop.permute.xlu1 %2265 }
 0x142   :  { %v2786_v18 = vsel %vm15953_vm10, %v2721_v55, %v2266_v38  ;;  %v2264_v25 = vpop.permute.xlu0 %2263 }
 0x143   :  { %2212 = vrot.lane.b32.xlu1 %v16343_v63, %s8005_s1  ;;  %v2784_v14 = vsel %vm15953_vm10, %v2719_v54, %v2264_v25  ;;  %v16345_v54 = vld [vmem:[#allocation14_spill] sm:$0xff] }
 0x144   :  { %2210 = vrot.lane.b32.xlu0 %v16342_v31, %s8005_s1  ;;  %7706 = vmatprep.mubr.msk.bf16.mxu0 %vm15899_vm11, %v2784_v14 }
 0x145   :  { %v1895_v4 = vpop.permute.xlu1 %1894  ;;  %7707 = vmatmul.mubr.msk.bf16.gmra.mxu0 %vm15899_vm11, %v2786_v18 }
 0x146   :  { %v1893_v34 = vpop.permute.xlu0 %1892  ;;  %v2465_v40 = vsel %vm2449_vm5, %v2400_v47, %v1895_v4 }
 0x147   :  { %2285 = vrot.lane.b32.xlu1 %v8562_v27, %s8006_s29  ;;  %v2463_v61 = vsel %vm2449_vm5, %v2398_v36, %v1893_v34  ;;  %v9177_v34 = vld [vmem:[%s15800_s0 + $0xa0] sm:$0xff]  }
 0x148   :  { %2283 = vrot.lane.b32.xlu0 %v8569_v33, %s8006_s29 }
 0x149   :  { %v1975_v46 = vpop.permute.xlu1 %1974 }
 0x14a   :  { %v1973_v39 = vpop.permute.xlu0 %1972  ;;  %v2530_v57 = vsel %vm2514_vm6, %v2465_v40, %v1975_v46 }
 0x14b   :  { %1914 = vrot.lane.b32.xlu1 %v9115_v49, %s8001_s16 }
 0x14c   :  { %1912 = vrot.lane.b32.xlu0 %v9087_v8, %s8001_s16 }
 0x14d   :  { %v2048_v31 = vpop.permute.xlu1 %2047 }
 0x14e   :  { %v2046_v20 = vpop.permute.xlu0 %2045  ;;  %v2595_v53 = vsel %vm2579_vm7, %v2530_v57, %v2048_v31  ;;  %v16346_v31 = vld [vmem:[#allocation17_spill] sm:$0xff] }
 0x14f   :  { %1994 = vrot.lane.b32.xlu1 %v16344_v0, %s8002_s22 }
 0x150   :  { %1992 = vrot.lane.b32.xlu0 %v16343_v63, %s8002_s22 }
 0x151   :  { %v2117_v33 = vpop.permute.xlu1 %2116 }
 0x152   :  { %v2115_v28 = vpop.permute.xlu0 %2114  ;;  %v2660_v7 = vsel %vm16047_vm8, %v2595_v53, %v2117_v33 }
 0x153   :  { %2067 = vrot.lane.b32.xlu1 %v8581_v45, %s8003_s25 }
 0x154   :  { %2065 = vrot.lane.b32.xlu0 %v8562_v27, %s8003_s25  ;;  %v2528_v27 = vsel %vm2514_vm6, %v2463_v61, %v1973_v39 }
 0x155   :  { %v2197_v13 = vpop.permute.xlu1 %2196  ;;  %v2593_v50 = vsel %vm2579_vm7, %v2528_v27, %v2046_v20 }
 0x156   :  { %v2195_v15 = vpop.permute.xlu0 %2194  ;;  %v2658_v41 = vsel %vm16047_vm8, %v2593_v50, %v2115_v28  ;;  %v2725_v48 = vsel %vm16043_vm9, %v2660_v7, %v2197_v13  ;;  %v7953_v28 = vld [vmem:[%s15800_s0 + $0x40] sm:$0xff]  }
 0x157   :  { %2136 = vrot.lane.b32.xlu1 %v9149_v59, %s8004_s28  ;;  %v2723_v38 = vsel %vm16043_vm9, %v2658_v41, %v2195_v15  ;;  %v2337_v52 = vsel %vm2319_vm3, %v7953_v28, %v8688_v6  ;;  %v9211_v6 = vld [vmem:[%s15800_s0 + $0xa8] sm:$0xff]   ;;  %v16347_v7 = vld [vmem:[#allocation16_spill] sm:$0xff] }
 0x158   :  { %2134 = vrot.lane.b32.xlu0 %v9115_v49, %s8004_s28  ;;  %v2402_v12 = vsel %vm15895_vm4, %v2337_v52, %v8825_v3 }
 0x159   :  { %v2270_v44 = vpop.permute.xlu1 %2269 }
 0x15a   :  { %v2790_v62 = vsel %vm15953_vm10, %v2725_v48, %v2270_v44  ;;  %v2268_v55 = vpop.permute.xlu0 %2267 }
 0x15b   :  { %2216 = vrot.lane.b32.xlu1 %v16345_v54, %s8005_s1  ;;  %v2788_v18 = vsel %vm15953_vm10, %v2723_v38, %v2268_v55  ;;  %v9239_v55 = vld [vmem:[%s15800_s0 + $0xb0] sm:$0xff]  }
 0x15c   :  { %2214 = vrot.lane.b32.xlu0 %v16344_v0, %s8005_s1  ;;  %7710 = vmatprep.mubr.msk.bf16.mxu0 %vm15899_vm11, %v2788_v18  ;;  %v7952_v0 = vld [vmem:[%s15800_s0 + $0x48] sm:$0xff]  }
 0x15d   :  { %v1899_v25 = vpop.permute.xlu1 %1898  ;;  %7711 = vmatmul.mubr.msk.bf16.gmra.mxu0 %vm15899_vm11, %v2790_v62  ;;  %v2339_v33 = vsel %vm2319_vm3, %v7952_v0, %v8686_v17 }
 0x15e   :  { %v1897_v63 = vpop.permute.xlu0 %1896  ;;  %v2404_v37 = vsel %vm15895_vm4, %v2339_v33, %v8823_v19 }
 0x15f   :  { %2289 = vrot.lane.b32.xlu1 %v8574_v42, %s8006_s29  ;;  %v2469_v47 = vsel %vm2449_vm5, %v2404_v37, %v1899_v25  ;;  %v2467_v17 = vsel %vm2449_vm5, %v2402_v12, %v1897_v63  ;;  %v16348_v25 = vld [vmem:[#allocation19_spill] sm:$0xff] }
 0x160   :  { %2287 = vrot.lane.b32.xlu0 %v8581_v45, %s8006_s29 }
 0x161   :  { %v1979_v14 = vpop.permute.xlu1 %1978 }
 0x162   :  { %v1977_v4 = vpop.permute.xlu0 %1976  ;;  %v2534_v13 = vsel %vm2514_vm6, %v2469_v47, %v1979_v14  ;;  %v7956_v14 = vld [vmem:[%s15800_s0 + $0x58] sm:$0xff]  }
 0x163   :  { %1918 = vrot.lane.b32.xlu1 %v9177_v34, %s8001_s16 }
 0x164   :  { %1916 = vrot.lane.b32.xlu0 %v9149_v59, %s8001_s16 }
 0x165   :  { %v2052_v46 = vpop.permute.xlu1 %2051 }
 0x166   :  { %v2050_v39 = vpop.permute.xlu0 %2049  ;;  %v2599_v19 = vsel %vm2579_vm7, %v2534_v13, %v2052_v46  ;;  %v7957_v46 = vld [vmem:[%s15800_s0 + $0x50] sm:$0xff]  }
 0x167   :  { %1998 = vrot.lane.b32.xlu1 %v16346_v31, %s8002_s22 }
 0x168   :  { %1996 = vrot.lane.b32.xlu0 %v16345_v54, %s8002_s22 }
 0x169   :  { %v2121_v45 = vpop.permute.xlu1 %2120 }
 0x16a   :  { %v2119_v20 = vpop.permute.xlu0 %2118  ;;  %v2664_v40 = vsel %vm16047_vm8, %v2599_v19, %v2121_v45 }
 0x16b   :  { %2071 = vrot.lane.b32.xlu1 %v8593_v10, %s8003_s25 }
 0x16c   :  { %2069 = vrot.lane.b32.xlu0 %v8574_v42, %s8003_s25  ;;  %v2532_v42 = vsel %vm2514_vm6, %v2467_v17, %v1977_v4  ;;  %v2343_v4 = vsel %vm2319_vm3, %v7956_v14, %v8697_v11 }
 0x16d   :  { %v2201_v58 = vpop.permute.xlu1 %2200  ;;  %v2597_v3 = vsel %vm2579_vm7, %v2532_v42, %v2050_v39  ;;  %v2341_v39 = vsel %vm2319_vm3, %v7957_v46, %v8699_v22  ;;  %v9273_v22 = vld [vmem:[%s15800_s0 + $0xb8] sm:$0xff]  }
 0x16e   :  { %v2199_v36 = vpop.permute.xlu0 %2198  ;;  %v2662_v57 = vsel %vm16047_vm8, %v2597_v3, %v2119_v20  ;;  %v2729_v15 = vsel %vm16043_vm9, %v2664_v40, %v2201_v58  ;;  %v2406_v20 = vsel %vm15895_vm4, %v2341_v39, %v8833_v56  ;;  %v16351_v46 = vld [vmem:[#allocation20_spill] sm:$0xff] }
 0x16f   :  { %2140 = vrot.lane.b32.xlu1 %v9211_v6, %s8004_s28  ;;  %v2727_v27 = vsel %vm16043_vm9, %v2662_v57, %v2199_v36  ;;  %v16349_v36 = vld [vmem:[#allocation18_spill] sm:$0xff]  ;;  %v9301_v57 = vld [vmem:[%s15800_s0 + $0xc0] sm:$0xff]  }
 0x170   :  { %2138 = vrot.lane.b32.xlu0 %v9177_v34, %s8004_s28 }
 0x171   :  { %v2274_v61 = vpop.permute.xlu1 %2273 }
 0x172   :  { %v2794_v53 = vsel %vm15953_vm10, %v2729_v15, %v2274_v61  ;;  %v2272_v50 = vpop.permute.xlu0 %2271 }
 0x173   :  { %2220 = vrot.lane.b32.xlu1 %v16347_v7, %s8005_s1  ;;  %v2792_v44 = vsel %vm15953_vm10, %v2727_v27, %v2272_v50 }
 0x174   :  { %2218 = vrot.lane.b32.xlu0 %v16346_v31, %s8005_s1  ;;  %7714 = vmatprep.mubr.msk.bf16.mxu0 %vm15899_vm11, %v2792_v44  ;;  %v2408_v31 = vsel %vm15895_vm4, %v2343_v4, %v8831_v23  ;;  %v2345_v44 = vsel %vm2319_vm3, %v8952_v30, %v8710_v24  ;;  %v9331_v24 = vld [vmem:[%s15800_s0 + $0xc8] sm:$0xff]  }
 0x175   :  { %v1903_v41 = vpop.permute.xlu1 %1902  ;;  %7715 = vmatmul.mubr.msk.bf16.gmra.mxu0 %vm15899_vm11, %v2794_v53  ;;  %v16350_v53 = vld [vmem:[#allocation21_spill] sm:$0xff] }
 0x176   :  { %v1901_v48 = vpop.permute.xlu0 %1900  ;;  %v2473_v0 = vsel %vm2449_vm5, %v2408_v31, %v1903_v41 }
 0x177   :  { %2293 = vrot.lane.b32.xlu1 %v8586_v60, %s8006_s29  ;;  %v2471_v11 = vsel %vm2449_vm5, %v2406_v20, %v1901_v48 }
 0x178   :  { %2291 = vrot.lane.b32.xlu0 %v8593_v10, %s8006_s29 }
 0x179   :  { %v1983_v38 = vpop.permute.xlu1 %1982 }
 0x17a   :  { %v1981_v62 = vpop.permute.xlu0 %1980  ;;  %v2538_v33 = vsel %vm2514_vm6, %v2473_v0, %v1983_v38  ;;  %v2410_v38 = vsel %vm15895_vm4, %v2345_v44, %v8841_v32 }
 0x17b   :  { %1922 = vrot.lane.b32.xlu1 %v9239_v55, %s8001_s16 }
 0x17c   :  { %1920 = vrot.lane.b32.xlu0 %v9211_v6, %s8001_s16 }
 0x17d   :  { %v2056_v54 = vpop.permute.xlu1 %2055 }
 0x17e   :  { %v2054_v18 = vpop.permute.xlu0 %2053  ;;  %v2603_v23 = vsel %vm2579_vm7, %v2538_v33, %v2056_v54 }
 0x17f   :  { %2002 = vrot.lane.b32.xlu1 %v16348_v25, %s8002_s22 }
 0x180   :  { %2000 = vrot.lane.b32.xlu0 %v16347_v7, %s8002_s22  ;;  %v2347_v7 = vsel %vm2319_vm3, %v8991_v9, %v8708_v5 }
 0x181   :  { %v2125_v10 = vpop.permute.xlu1 %2124  ;;  %v2412_v41 = vsel %vm15895_vm4, %v2347_v7, %v8839_v21 }
 0x182   :  { %v2123_v63 = vpop.permute.xlu0 %2122  ;;  %v2668_v52 = vsel %vm16047_vm8, %v2603_v23, %v2125_v10  ;;  %v16352_v23 = vld [vmem:[#allocation28_spill] sm:$0xff] }
 0x183   :  { %2075 = vrot.lane.b32.xlu1 %v8605_v35, %s8003_s25 }
 0x184   :  { %2073 = vrot.lane.b32.xlu0 %v8586_v60, %s8003_s25  ;;  %v2536_v60 = vsel %vm2514_vm6, %v2471_v11, %v1981_v62  ;;  %v9359_v11 = vld [vmem:[%s15800_s0 + $0xd0] sm:$0xff]  }
 0x185   :  { %v2205_v45 = vpop.permute.xlu1 %2204  ;;  %v2601_v56 = vsel %vm2579_vm7, %v2536_v60, %v2054_v18 }
 0x186   :  { %v2203_v28 = vpop.permute.xlu0 %2202  ;;  %v2666_v58 = vsel %vm16047_vm8, %v2601_v56, %v2123_v63  ;;  %v2733_v12 = vsel %vm16043_vm9, %v2668_v52, %v2205_v45  ;;  %v16353_v56 = vld [vmem:[#allocation33_spill] sm:$0xff] }
 0x187   :  { %2144 = vrot.lane.b32.xlu1 %v9273_v22, %s8004_s28  ;;  %v2731_v47 = vsel %vm16043_vm9, %v2666_v58, %v2203_v28  ;;  %v2351_v52 = vsel %vm2319_vm3, %v9016_v2, %v16353_v56 }
 0x188   :  { %2142 = vrot.lane.b32.xlu0 %v9239_v55, %s8004_s28 }
 0x189   :  { %v2278_v37 = vpop.permute.xlu1 %2277 }
 0x18a   :  { %v2798_v17 = vsel %vm15953_vm10, %v2733_v12, %v2278_v37  ;;  %v2276_v13 = vpop.permute.xlu0 %2275  ;;  %v16354_v37 = vld [vmem:[#allocation34_spill] sm:$0xff]  ;;  %v16355_v12 = vld [vmem:[#allocation5_spill] sm:$0xff] }
 0x18b   :  { %2224 = vrot.lane.b32.xlu1 %v16349_v36, %s8005_s1  ;;  %v2796_v42 = vsel %vm15953_vm10, %v2731_v47, %v2276_v13  ;;  %v2349_v58 = vsel %vm2319_vm3, %v8983_v29, %v16354_v37  ;;  %v2416_v47 = vsel %vm15895_vm4, %v2351_v52, %v16355_v12  ;;  %v16356_v13 = vld [vmem:[#allocation51_spill] sm:$0xff] }
 0x18c   :  { %2222 = vrot.lane.b32.xlu0 %v16348_v25, %s8005_s1  ;;  %7718 = vmatprep.mubr.msk.bf16.mxu0 %vm15899_vm11, %v2796_v42  ;;  %v9389_v29 = vld [vmem:[%s15800_s0 + $0xd8] sm:$0xff]  }
 0x18d   :  { %v1907_v19 = vpop.permute.xlu1 %1906  ;;  %7719 = vmatmul.mubr.msk.bf16.gmra.mxu0 %vm15899_vm11, %v2798_v17 }
 0x18e   :  { %v1905_v3 = vpop.permute.xlu0 %1904  ;;  %v2477_v62 = vsel %vm2449_vm5, %v2412_v41, %v1907_v19  ;;  %v16357_v41 = vld [vmem:[#allocation22_spill] sm:$0xff] }
 0x18f   :  { %2297 = vrot.lane.b32.xlu1 %v8598_v26, %s8006_s29  ;;  %v2475_v54 = vsel %vm2449_vm5, %v2410_v38, %v1905_v3 }
 0x190   :  { %2295 = vrot.lane.b32.xlu0 %v8605_v35, %s8006_s29 }
 0x191   :  { %v1987_v40 = vpop.permute.xlu1 %1986 }
 0x192   :  { %v1985_v61 = vpop.permute.xlu0 %1984  ;;  %v2542_v5 = vsel %vm2514_vm6, %v2477_v62, %v1987_v40 }
 0x193   :  { %1926 = vrot.lane.b32.xlu1 %v9301_v57, %s8001_s16 }
 0x194   :  { %1924 = vrot.lane.b32.xlu0 %v9273_v22, %s8001_s16 }
 0x195   :  { %v2060_v15 = vpop.permute.xlu1 %2059 }
 0x196   :  { %v2058_v27 = vpop.permute.xlu0 %2057  ;;  %v2607_v21 = vsel %vm2579_vm7, %v2542_v5, %v2060_v15 }
 0x197   :  { %2006 = vrot.lane.b32.xlu1 %v16350_v53, %s8002_s22 }
 0x198   :  { %2004 = vrot.lane.b32.xlu0 %v16349_v36, %s8002_s22  ;;  %v2414_v36 = vsel %vm15895_vm4, %v2349_v58, %v16356_v13  ;;  %v16365_v13 = vld [vmem:[#allocation23_spill] sm:$0xff] }
 0x199   :  { %v2129_v35 = vpop.permute.xlu1 %2128 }
 0x19a   :  { %v2127_v50 = vpop.permute.xlu0 %2126  ;;  %v2672_v30 = vsel %vm16047_vm8, %v2607_v21, %v2129_v35 }
 0x19b   :  { %2079 = vrot.lane.b32.xlu1 %v8617_v51, %s8003_s25 }
 0x19c   :  { %2077 = vrot.lane.b32.xlu0 %v8598_v26, %s8003_s25  ;;  %v2540_v26 = vsel %vm2514_vm6, %v2475_v54, %v1985_v61  ;;  %v16358_v54 = vld [vmem:[#allocation27_spill] sm:$0xff] }
 0x19d   :  { %v2209_v48 = vpop.permute.xlu1 %2208  ;;  %v2605_v32 = vsel %vm2579_vm7, %v2540_v26, %v2058_v27  ;;  %v9417_v26 = vld [vmem:[%s15800_s0 + $0xe0] sm:$0xff]  }
 0x19e   :  { %v2207_v9 = vpop.permute.xlu0 %2206  ;;  %v2670_v25 = vsel %vm16047_vm8, %v2605_v32, %v2127_v50  ;;  %v2737_v10 = vsel %vm16043_vm9, %v2672_v30, %v2209_v48  ;;  %v16359_v32 = vld [vmem:[#allocation25_spill] sm:$0xff] }
 0x19f   :  { %2148 = vrot.lane.b32.xlu1 %v9331_v24, %s8004_s28  ;;  %v2735_v63 = vsel %vm16043_vm9, %v2670_v25, %v2207_v9  ;;  %v16360_v25 = vld [vmem:[#allocation31_spill] sm:$0xff] }
 0x1a0   :  { %2146 = vrot.lane.b32.xlu0 %v9301_v57, %s8004_s28 }
 0x1a1   :  { %v2282_v18 = vpop.permute.xlu1 %2281 }
 0x1a2   :  { %v2802_v14 = vsel %vm15953_vm10, %v2737_v10, %v2282_v18  ;;  %v2280_v4 = vpop.permute.xlu0 %2279  ;;  %v16361_v10 = vld [vmem:[#allocation35_spill] sm:$0xff] }
 0x1a3   :  { %2228 = vrot.lane.b32.xlu1 %v16351_v46, %s8005_s1  ;;  %v2800_v39 = vsel %vm15953_vm10, %v2735_v63, %v2280_v4  ;;  %v2355_v63 = vsel %vm2319_vm3, %v9087_v8, %v16361_v10 }
 0x1a4   :  { %2226 = vrot.lane.b32.xlu0 %v16350_v53, %s8005_s1  ;;  %7722 = vmatprep.mubr.msk.bf16.mxu0 %vm15899_vm11, %v2800_v39 }
 0x1a5   :  { %v1911_v31 = vpop.permute.xlu1 %1910  ;;  %7723 = vmatmul.mubr.msk.bf16.gmra.mxu0 %vm15899_vm11, %v2802_v14  ;;  %v16362_v14 = vld [vmem:[#allocation36_spill] sm:$0xff] }
 0x1a6   :  { %v1909_v45 = vpop.permute.xlu0 %1908  ;;  %v2481_v42 = vsel %vm2449_vm5, %v2416_v47, %v1911_v31  ;;  %v2353_v4 = vsel %vm2319_vm3, %v9052_v1, %v16362_v14  ;;  %v9447_v1 = vld [vmem:[%s15800_s0 + $0xe8] sm:$0xff]   ;;  %v16373_v14 = vld [vmem:[#allocation24_spill] sm:$0xff] }
 0x1a7   :  { %2301 = vrot.lane.b32.xlu1 %v8610_v43, %s8006_s29  ;;  %v2479_v19 = vsel %vm2449_vm5, %v2414_v36, %v1909_v45  ;;  %v16364_v45 = vld [vmem:[#allocation53_spill] sm:$0xff] }
 0x1a8   :  { %2299 = vrot.lane.b32.xlu0 %v8617_v51, %s8006_s29 }
 0x1a9   :  { %v1991_v20 = vpop.permute.xlu1 %1990 }
 0x1aa   :  { %v1989_v0 = vpop.permute.xlu0 %1988  ;;  %v2546_v2 = vsel %vm2514_vm6, %v2481_v42, %v1991_v20  ;;  %v2418_v20 = vsel %vm15895_vm4, %v2353_v4, %v16364_v45 }
 0x1ab   :  { %1930 = vrot.lane.b32.xlu1 %v9359_v11, %s8001_s16 }
 0x1ac   :  { %1928 = vrot.lane.b32.xlu0 %v9331_v24, %s8001_s16 }
 0x1ad   :  { %v2064_v33 = vpop.permute.xlu1 %2063 }
 0x1ae   :  { %v2062_v28 = vpop.permute.xlu0 %2061  ;;  %v2611_v40 = vsel %vm2579_vm7, %v2546_v2, %v2064_v33  ;;  %v16366_v2 = vld [vmem:[#allocation29_spill] sm:$0xff] }
 0x1af   :  { %2010 = vrot.lane.b32.xlu1 %v8432_v16, %s8002_s22 }
 0x1b0   :  { %2008 = vrot.lane.b32.xlu0 %v16351_v46, %s8002_s22  ;;  %v16363_v46 = vld [vmem:[#allocation52_spill] sm:$0xff] }
 0x1b1   :  { %v2133_v51 = vpop.permute.xlu1 %2132  ;;  %v2420_v39 = vsel %vm15895_vm4, %v2355_v63, %v16363_v46 }
 0x1b2   :  { %v2131_v60 = vpop.permute.xlu0 %2130  ;;  %v2676_v15 = vsel %vm16047_vm8, %v2611_v40, %v2133_v51  ;;  %v9475_v40 = vld [vmem:[%s15800_s0 + $0xf0] sm:$0xff]  }
 0x1b3   :  { %2083 = vrot.lane.b32.xlu1 %v16352_v23, %s8003_s25 }
 0x1b4   :  { %2081 = vrot.lane.b32.xlu0 %v8610_v43, %s8003_s25  ;;  %v2544_v43 = vsel %vm2514_vm6, %v2479_v19, %v1989_v0 }
 0x1b5   :  { %v2213_v17 = vpop.permute.xlu1 %2212  ;;  %v2609_v61 = vsel %vm2579_vm7, %v2544_v43, %v2062_v28 }
 0x1b6   :  { %v2211_v3 = vpop.permute.xlu0 %2210  ;;  %v2674_v53 = vsel %vm16047_vm8, %v2609_v61, %v2131_v60  ;;  %v2741_v35 = vsel %vm16043_vm9, %v2676_v15, %v2213_v17  ;;  %v9482_v61 = vld [vmem:[%s15800_s0 + $0x100] sm:$0xff]  }
 0x1b7   :  { %2152 = vrot.lane.b32.xlu1 %v9389_v29, %s8004_s28  ;;  %v2739_v50 = vsel %vm16043_vm9, %v2674_v53, %v2211_v3  ;;  %v16367_v53 = vld [vmem:[#allocation26_spill] sm:$0xff]  ;;  %v9520_v46 = vrot.slane %v9482_v61, 1 }
 0x1b8   :  { %2150 = vrot.lane.b32.xlu0 %v9359_v11, %s8004_s28 }
 0x1b9   :  { %v2286_v27 = vpop.permute.xlu1 %2285 }
 0x1ba   :  { %v2806_v7 = vsel %vm15953_vm10, %v2741_v35, %v2286_v27  ;;  %v2284_v44 = vpop.permute.xlu0 %2283  ;;  %v1948_v35 = vshll.u32 %v9482_v61, 16 }
 0x1bb   :  { %2232 = vrot.lane.b32.xlu1 %v16357_v41, %s8005_s1  ;;  %v2804_v48 = vsel %vm15953_vm10, %v2739_v50, %v2284_v44  ;;  %v16368_v44 = vld [vmem:[#allocation32_spill] sm:$0xff] }
 0x1bc   :  { %2230 = vrot.lane.b32.xlu0 %v8432_v16, %s8005_s1  ;;  %7726 = vmatprep.mubr.msk.bf16.mxu0 %vm15899_vm11, %v2804_v48 }
 0x1bd   :  { %v1915_v38 = vpop.permute.xlu1 %1914  ;;  %7727 = vmatmul.mubr.msk.bf16.gmra.mxu0 %vm15899_vm11, %v2806_v7 }
 0x1be   :  { %v1913_v62 = vpop.permute.xlu0 %1912  ;;  %v2485_v0 = vsel %vm2449_vm5, %v2420_v39, %v1915_v38  ;;  %v1950_v38 = vrot.slane %v1948_v35, 1  ;;  %v7889_v39 = vld [vmem:[%s15800_s0 + $0x108] ss:$0 sps:$4 sm:$0x11]  }
 0x1bf   :  { %2305 = vrot.lane.b32.xlu1 %v16358_v54, %s8006_s29  ;;  %v2483_v33 = vsel %vm2449_vm5, %v2418_v20, %v1913_v62  ;;  %v16370_v62 = vld [vmem:[#allocation38_spill] sm:$0xff] }
 0x1c0   :  { %2303 = vrot.lane.b32.xlu0 %v16352_v23, %s8006_s29  ;;  %v1951_v4 = vsel %vm15898_vm0, %v16373_v14, %v1950_v38 }
 0x1c1   :  { %v1995_v5 = vpop.permute.xlu1 %1994 }
 0x1c2   :  { %v1993_v9 = vpop.permute.xlu0 %1992  ;;  %v2550_v8 = vsel %vm2514_vm6, %v2485_v0, %v1995_v5  ;;  %v16371_v5 = vld [vmem:[#allocation54_spill] sm:$0xff] }
 0x1c3   :  { %1934 = vrot.lane.b32.xlu1 %v9417_v26, %s8001_s16  ;;  %v2548_v51 = vsel %vm2514_vm6, %v2483_v33, %v1993_v9 }
 0x1c4   :  { %1932 = vrot.lane.b32.xlu0 %v9389_v29, %s8001_s16 }
 0x1c5   :  { %v2068_v16 = vpop.permute.xlu1 %2067 }
 0x1c6   :  { %v2066_v21 = vpop.permute.xlu0 %2065  ;;  %v2615_v60 = vsel %vm2579_vm7, %v2550_v8, %v2068_v16 }
 0x1c7   :  { %2014 = vrot.lane.b32.xlu1 %v16359_v32, %s8002_s22  ;;  %v2613_v23 = vsel %vm2579_vm7, %v2548_v51, %v2066_v21  ;;  %v16372_v21 = vld [vmem:[#allocation55_spill] sm:$0xff] }
 0x1c8   :  { %2012 = vrot.lane.b32.xlu0 %v16357_v41, %s8002_s22  ;;  %v16369_v41 = vld [vmem:[#allocation37_spill] sm:$0xff] }
 0x1c9   :  { %v2137_v30 = vpop.permute.xlu1 %2136  ;;  %v2359_v48 = vsel %vm2319_vm3, %v9149_v59, %v16369_v41 }
 0x1ca   :  { %v2135_v18 = vpop.permute.xlu0 %2134  ;;  %v2680_v56 = vsel %vm16047_vm8, %v2615_v60, %v2137_v30  ;;  %v2424_v9 = vsel %vm15895_vm4, %v2359_v48, %v16371_v5 }
 0x1cb   :  { %2087 = vrot.lane.b32.xlu1 %v16360_v25, %s8003_s25  ;;  %v2678_v37 = vsel %vm16047_vm8, %v2613_v23, %v2135_v18  ;;  %v16374_v23 = vld [vmem:[#allocation30_spill] sm:$0xff] }
 0x1cc   :  { %2085 = vrot.lane.b32.xlu0 %v16358_v54, %s8003_s25  ;;  %v2357_v54 = vsel %vm2319_vm3, %v9115_v49, %v16370_v62  ;;  %v9511_v49 = vld [vmem:[%s15800_s0 + $0xf8] sm:$0xff]  }
 0x1cd   :  { %v2217_v31 = vpop.permute.xlu1 %2216 }
 0x1ce   :  { %v2215_v28 = vpop.permute.xlu0 %2214  ;;  %v2745_v58 = vsel %vm16043_vm9, %v2680_v56, %v2217_v31  ;;  %v2030_v56 = vsel %vm15897_vm1, %v16374_v23, %v9520_v46 }
 0x1cf   :  { %2156 = vrot.lane.b32.xlu1 %v9447_v1, %s8004_s28  ;;  %v2743_v12 = vsel %vm16043_vm9, %v2678_v37, %v2215_v28  ;;  %v1956_v37 = vshll.u32 %v7889_v39, 16 }
 0x1d0   :  { %2154 = vrot.lane.b32.xlu0 %v9417_v26, %s8004_s28 }
 0x1d1   :  { %v2290_v52 = vpop.permute.xlu1 %2289 }
 0x1d2   :  { %v2810_v47 = vsel %vm15953_vm10, %v2745_v58, %v2290_v52  ;;  %v2288_v17 = vpop.permute.xlu0 %2287  ;;  %v1952_v52 = vshrl.u32 %v9482_v61, 16 }
 0x1d3   :  { %2236 = vrot.lane.b32.xlu1 %v16365_v13, %s8005_s1  ;;  %v2808_v36 = vsel %vm15953_vm10, %v2743_v12, %v2288_v17 }
 0x1d4   :  { %2234 = vrot.lane.b32.xlu0 %v16359_v32, %s8005_s1  ;;  %7730 = vmatprep.mubr.msk.bf16.mxu0 %vm15899_vm11, %v2808_v36  ;;  %v2422_v32 = vsel %vm15895_vm4, %v2357_v54, %v16372_v21  ;;  %v1954_v17 = vor.u32 %v1952_v52, %v1950_v38  ;;  %v16376_v21 = vld [vmem:[#allocation40_spill] sm:$0xff] }
 0x1d5   :  { %v1919_v42 = vpop.permute.xlu1 %1918  ;;  %7731 = vmatmul.mubr.msk.bf16.gmra.mxu0 %vm15899_vm11, %v2810_v47  ;;  %v9547_v47 = vld [vmem:[%s15800_s0 + $0x108] sm:$0xff]  }
 0x1d6   :  { %v1917_v19 = vpop.permute.xlu0 %1916  ;;  %v2489_v30 = vsel %vm2449_vm5, %v2424_v9, %v1919_v42  ;;  %v27_v42 = vlaneseq  ;;  %v16375_v9 = vld [vmem:[#allocation39_spill] sm:$0xff] }
 0x1d7   :  { %2309 = vrot.lane.b32.xlu1 %v16366_v2, %s8006_s29  ;;  %v2487_v18 = vsel %vm2449_vm5, %v2422_v32, %v1917_v19  ;;  %v2361_v32 = vsel %vm2319_vm3, %v9177_v34, %v16376_v21 }
 0x1d8   :  { %2307 = vrot.lane.b32.xlu0 %v16360_v25, %s8006_s29 }
 0x1d9   :  { %v1999_v3 = vpop.permute.xlu1 %1998 }
 0x1da   :  { %v1997_v43 = vpop.permute.xlu0 %1996  ;;  %v2554_v59 = vsel %vm2514_vm6, %v2489_v30, %v1999_v3  ;;  %v2170_v3 = vshll.u32 %v9547_v47, 16  ;;  %v16377_v30 = vld [vmem:[#allocation4_spill] sm:$0xff] }
 0x1db   :  { %1938 = vrot.lane.b32.xlu1 %v9475_v40, %s8001_s16  ;;  %v2552_v10 = vsel %vm2514_vm6, %v2487_v18, %v1997_v43 }
 0x1dc   :  { %1936 = vrot.lane.b32.xlu0 %v9447_v1, %s8001_s16 }
 0x1dd   :  { %v2072_v15 = vpop.permute.xlu1 %2071 }
 0x1de   :  { %v2070_v27 = vpop.permute.xlu0 %2069  ;;  %v2619_v63 = vsel %vm2579_vm7, %v2554_v59, %v2072_v15  ;;  %v2031_v15 = vrot.slane %v7889_v39, 1 }
 0x1df   :  { %2018 = vrot.lane.b32.xlu1 %v16367_v53, %s8002_s22  ;;  %v2617_v31 = vsel %vm2579_vm7, %v2552_v10, %v2070_v27 }
 0x1e0   :  { %2016 = vrot.lane.b32.xlu0 %v16365_v13, %s8002_s22  ;;  %v1958_v13 = vrot.slane %v1956_v37, 1  ;;  %v2032_v41 = vsel %vm15897_vm1, %v9520_v46, %v2031_v15 }
 0x1e1   :  { %v2141_v50 = vpop.permute.xlu1 %2140 }
 0x1e2   :  { %v2139_v7 = vpop.permute.xlu0 %2138  ;;  %v2684_v45 = vsel %vm16047_vm8, %v2619_v63, %v2141_v50  ;;  %v1959_v43 = vsel %vm15898_vm0, %v1954_v17, %v1958_v13  ;;  %v2172_v50 = vrot.slane %v2170_v3, 1 }
 0x1e3   :  { %2091 = vrot.lane.b32.xlu1 %v16368_v44, %s8003_s25  ;;  %v2682_v0 = vsel %vm16047_vm8, %v2617_v31, %v2139_v7  ;;  %v2174_v7 = vshrl.u32 %v9547_v47, 16 }
 0x1e4   :  { %2089 = vrot.lane.b32.xlu0 %v16366_v2, %s8003_s25  ;;  %v7891_v2 = vld [vmem:[%s15800_s0 + $0x110] ss:$0 sps:$4 sm:$0x11]  }
 0x1e5   :  { %v2221_v16 = vpop.permute.xlu1 %2220  ;;  %v2176_v54 = vor.u32 %v2174_v7, %v2172_v50 }
 0x1e6   :  { %v2219_v25 = vpop.permute.xlu0 %2218  ;;  %v2749_v33 = vsel %vm16043_vm9, %v2684_v45, %v2221_v16  ;;  %v2363_v16 = vsel %vm2319_vm3, %v9211_v6, %v16375_v9 }
 0x1e7   :  { %2160 = vrot.lane.b32.xlu1 %v9511_v49, %s8004_s28  ;;  %v2747_v8 = vsel %vm16043_vm9, %v2682_v0, %v2219_v25  ;;  %v2428_v18 = vsel %vm15895_vm4, %v2363_v16, %v16377_v30  ;;  %v16378_v25 = vld [vmem:[#allocation56_spill] sm:$0xff]  ;;  %v2253_v0 = vrot.slane %v7891_v2, 1 }
 0x1e8   :  { %2158 = vrot.lane.b32.xlu0 %v9475_v40, %s8004_s28  ;;  %v2426_v10 = vsel %vm15895_vm4, %v2361_v32, %v16378_v25  ;;  %v16379_v25 = vld [vmem:[#allocation41_spill] sm:$0xff] }
 0x1e9   :  { %v2294_v20 = vpop.permute.xlu1 %2293 }
 0x1ea   :  { %v2814_v28 = vsel %vm15953_vm10, %v2749_v33, %v2294_v20  ;;  %v2292_v51 = vpop.permute.xlu0 %2291  ;;  %v2251_v20 = vrot.slane %v9547_v47, 1 }
 0x1eb   :  { %2240 = vrot.lane.b32.xlu1 %v1951_v4, %s8005_s1  ;;  %v2812_v60 = vsel %vm15953_vm10, %v2747_v8, %v2292_v51 }
 0x1ec   :  { %2238 = vrot.lane.b32.xlu0 %v16367_v53, %s8005_s1  ;;  %7734 = vmatprep.mubr.msk.bf16.mxu0 %vm15899_vm11, %v2812_v60  ;;  %v9560_v53 = vshrl.u32 %v27_v42, 7  ;;  %v2252_v42 = vsel %vm15897_vm1, %v9520_v46, %v2251_v20 }
 0x1ed   :  { %v1923_v58 = vpop.permute.xlu1 %1922  ;;  %7735 = vmatmul.mubr.msk.bf16.gmra.mxu0 %vm15899_vm11, %v2814_v28 }
 0x1ee   :  { %v1921_v12 = vpop.permute.xlu0 %1920  ;;  %v9568_v38 = vadd.s32 16, %v9560_v53  ;;  %v2493_v14 = vsel %vm2449_vm5, %v2428_v18, %v1923_v58  ;;  %v9600_v52 = vadd.s32 24, %v9560_v53  ;;  %v92_v13 = vcvt.s32.f32 %v9560_v53 }
 0x1ef   :  { %2313 = vrot.lane.b32.xlu1 %v2030_v56, %s8006_s29  ;;  %v9616_v3 = vadd.s32 8, %v9560_v53  ;;  %v9625_v7 = vadd.s32 48, %v9560_v53 }
 0x1f0   :  { %2311 = vrot.lane.b32.xlu0 %v16368_v44, %s8006_s29  ;;  %v2178_v44 = vshll.u32 %v7891_v2, 16  ;;  %v94_v63 = vcvt.s32.f32 %v9568_v38 }
 0x1f1   :  { %v2003_v36 = vpop.permute.xlu1 %2002  ;;  %v93_v46 = vcvt.s32.f32 %v9616_v3  ;;  %v98_v16 = vcvt.s32.f32 %v9625_v7 }
 0x1f2   :  { %v2001_v19 = vpop.permute.xlu0 %2000  ;;  %v2180_v5 = vrot.slane %v2178_v44, 1  ;;  %v2558_v6 = vsel %vm2514_vm6, %v2493_v14, %v2003_v36  ;;  %v158_v51 = vadd.f32 0.5, %v94_v63  ;;  %v16380_v14 = vld [vmem:[#allocation42_spill] sm:$0xff] }
 0x1f3   :  { %1942 = vrot.lane.b32.xlu1 %v9482_v61, %s8001_s16  ;;  %v157_v9 = vadd.f32 0.5, %v93_v46 }
 0x1f4   :  { %1940 = vrot.lane.b32.xlu0 %v9511_v49, %s8001_s16  ;;  %v2181_v34 = vsel %vm15898_vm0, %v2176_v54, %v2180_v5  ;;  %v222_v36 = vmul.f32 0.00390625, %v158_v51 }
 0x1f5   :  { %v2076_v27 = vpop.permute.xlu1 %2075 }
 0x1f6   :  { %v2074_v35 = vpop.permute.xlu0 %2073  ;;  %v2623_v45 = vsel %vm2579_vm7, %v2558_v6, %v2076_v27  ;;  %v286_v27 = vfloor.f32 %v222_v36 }
 0x1f7   :  { %2022 = vrot.lane.b32.xlu1 %v1959_v43, %s8002_s22  ;;  %v156_v43 = vadd.f32 0.5, %v92_v13 }
 0x1f8   :  { %2020 = vrot.lane.b32.xlu0 %v1951_v4, %s8002_s22  ;;  %v2491_v4 = vsel %vm2449_vm5, %v2426_v10, %v1921_v12  ;;  %v350_v38 = vmul.f32 256.0, %v286_v27  ;;  %v2367_v10 = vsel %vm2319_vm3, %v9273_v22, %v16379_v25 }
 0x1f9   :  { %v2145_v48 = vpop.permute.xlu1 %2144  ;;  %v2556_v31 = vsel %vm2514_vm6, %v2491_v4, %v2001_v19  ;;  %v95_v19 = vcvt.s32.f32 %v9600_v52  ;;  %v220_v44 = vmul.f32 0.00390625, %v156_v43  ;;  %v2365_v4 = vsel %vm2319_vm3, %v9239_v55, %v16380_v14 }
 0x1fa   :  { %v2143_v62 = vpop.permute.xlu0 %2142  ;;  %v2621_v33 = vsel %vm2579_vm7, %v2556_v31, %v2074_v35  ;;  %v2688_v8 = vsel %vm16047_vm8, %v2623_v45, %v2145_v48  ;;  %v9637_v18 = vsub.f32 %v94_v63, %v350_v38  ;;  %v16382_v45 = vld [vmem:[#allocation57_spill] sm:$0xff] }
 0x1fb   :  { %2095 = vrot.lane.b32.xlu1 %v2032_v41, %s8003_s25  ;;  %v2686_v60 = vsel %vm16047_vm8, %v2621_v33, %v2143_v62  ;;  %v159_v35 = vadd.f32 0.5, %v95_v19  ;;  %v9628_v41 = vadd.s32 32, %v9560_v53  ;;  %v9631_v62 = vadd.s32 56, %v9560_v53  ;;  %v16383_v33 = vld [vmem:[#allocation58_spill] sm:$0xff] }
 0x1fc   :  { %2093 = vrot.lane.b32.xlu0 %v2030_v56, %s8003_s25  ;;  %v2173_v56 = vsel %vm15898_vm0, %v1954_v17, %v2172_v50  ;;  %v284_v21 = vfloor.f32 %v220_v44  ;;  %v2432_v63 = vsel %vm15895_vm4, %v2367_v10, %v16382_v45  ;;  %v2430_v22 = vsel %vm15895_vm4, %v2365_v4, %v16383_v33 }
 0x1fd   :  { %v2225_v59 = vpop.permute.xlu1 %2224  ;;  %v223_v54 = vmul.f32 0.00390625, %v159_v35  ;;  %v96_v32 = vcvt.s32.f32 %v9628_v41  ;;  %v9694_v4 = vadd.s32 88, %v9560_v53 }
 0x1fe   :  { %v2223_v39 = vpop.permute.xlu0 %2222  ;;  %v2753_v23 = vsel %vm16043_vm9, %v2688_v8, %v2225_v59  ;;  %v99_v59 = vcvt.s32.f32 %v9631_v62  ;;  %v348_v8 = vmul.f32 256.0, %v284_v21 }
 0x1ff   :  { %2164 = vrot.lane.b32.xlu1 %v9547_v47, %s8004_s28  ;;  %v2751_v37 = vsel %vm16043_vm9, %v2686_v60, %v2223_v39  ;;  %v2254_v47 = vsel %vm15897_vm1, %v2251_v20, %v2253_v0  ;;  %v287_v6 = vfloor.f32 %v223_v54  ;;  %v221_v20 = vmul.f32 0.00390625, %v157_v9 }
 0x200   :  { %2162 = vrot.lane.b32.xlu0 %v9482_v61, %s8004_s28  ;;  %v162_v0 = vadd.f32 0.5, %v98_v16  ;;  %v160_v55 = vadd.f32 0.5, %v96_v32  ;;  %v163_v60 = vadd.f32 0.5, %v99_v59 }
 0x201   :  { %v2298_v28 = vpop.permute.xlu1 %2297  ;;  %v285_v36 = vfloor.f32 %v221_v20 }
 0x202   :  { %v2818_v58 = vsel %vm15953_vm10, %v2753_v23, %v2298_v28  ;;  %v2296_v12 = vpop.permute.xlu0 %2295  ;;  %v9660_v28 = vadd.s32 40, %v9560_v53  ;;  %v9666_v23 = vadd.s32 80, %v9560_v53  ;;  %v224_v35 = vmul.f32 0.00390625, %v160_v55 }
 0x203   :  { %2244 = vrot.lane.b32.xlu1 %v2181_v34, %s8005_s1  ;;  %v2816_v61 = vsel %vm15953_vm10, %v2751_v37, %v2296_v12  ;;  %v16381_v34 = vld [vmem:[#allocation43_spill] sm:$0xff]  ;;  %v351_v37 = vmul.f32 256.0, %v287_v6  ;;  %v9671_v12 = vadd.s32 64, %v9560_v53  ;;  %v227_v54 = vmul.f32 0.00390625, %v163_v60 }
 0x204   :  { %2242 = vrot.lane.b32.xlu0 %v2173_v56, %s8005_s1  ;;  %7738 = vmatprep.mubr.msk.bf16.mxu0 %vm15899_vm11, %v2816_v61  ;;  %v9649_v31 = vsel %vm2319_vm3, %v9331_v24, %v16381_v34  ;;  %v478_v24 = vadd.f32 0.5, %v9637_v18  ;;  %v97_v44 = vcvt.s32.f32 %v9660_v28  ;;  %v102_v9 = vcvt.s32.f32 %v9666_v23 }
 0x205   :  { %v1927_v17 = vpop.permute.xlu1 %1926  ;;  %7739 = vmatmul.mubr.msk.bf16.gmra.mxu0 %vm15899_vm11, %v2818_v58  ;;  %v349_v14 = vmul.f32 256.0, %v285_v36  ;;  %v288_v45 = vfloor.f32 %v224_v35  ;;  %v16390_v35 = vld [vmem:[#allocation50_spill] sm:$0xff] }
 0x206   :  { %v1925_v2 = vpop.permute.xlu0 %1924  ;;  %v2497_v56 = vsel %vm2449_vm5, %v2432_v63, %v1927_v17  ;;  %v161_v63 = vadd.f32 0.5, %v97_v44 }
 0x207   :  { %2317 = vrot.lane.b32.xlu1 %v2254_v47, %s8006_s29  ;;  %v2495_v58 = vsel %vm2449_vm5, %v2430_v22, %v1925_v2  ;;  %v291_v22 = vfloor.f32 %v227_v54 }
 0x208   :  { %2315 = vrot.lane.b32.xlu0 %v2252_v42, %s8006_s29  ;;  %v226_v42 = vmul.f32 0.00390625, %v162_v0  ;;  %v16386_v0 = vld [vmem:[#allocation46_spill] sm:$0xff] }
 0x209   :  { %v2007_v15 = vpop.permute.xlu1 %2006  ;;  %v2373_v33 = vsel %vm2319_vm3, %v9359_v11, %v16386_v0  ;;  %v16396_v0 = vld [vmem:[#allocation62_spill] sm:$0xff] }
 0x20a   :  { %v2005_v50 = vpop.permute.xlu0 %2004  ;;  %v2562_v61 = vsel %vm2514_vm6, %v2497_v56, %v2007_v15  ;;  %v290_v34 = vfloor.f32 %v226_v42  ;;  %v352_v42 = vmul.f32 256.0, %v288_v45 }
 0x20b   :  { %v2560_v43 = vsel %vm2514_vm6, %v2495_v58, %v2005_v50  ;;  %v9684_v50 = vsub.f32 %v92_v13, %v348_v8  ;;  %v16387_v8 = vld [vmem:[#allocation47_spill] sm:$0xff] }
 0x20c   :  { %v2379_v55 = vsel %vm2319_vm3, %v9447_v1, %v16387_v8  ;;  %v103_v1 = vcvt.s32.f32 %v9694_v4  ;;  %v354_v36 = vmul.f32 256.0, %v290_v34  ;;  %v9762_v34 = vsub.f32 %v96_v32, %v352_v42 }
 0x20d   :  { %v2080_v48 = vpop.permute.xlu1 %2079  ;;  %v476_v60 = vadd.f32 0.5, %v9684_v50 }
 0x20e   :  { %v2078_v5 = vpop.permute.xlu0 %2077  ;;  %v2627_v27 = vsel %vm2579_vm7, %v2562_v61, %v2080_v48  ;;  %v100_v48 = vcvt.s32.f32 %v9671_v12  ;;  %v9728_v61 = vsub.f32 %v93_v46, %v349_v14  ;;  %v355_v46 = vmul.f32 256.0, %v291_v22 }
 0x20f   :  { %v2625_v17 = vsel %vm2579_vm7, %v2560_v43, %v2078_v5  ;;  %v225_v43 = vmul.f32 0.00390625, %v161_v63  ;;  %v540_v54 = vmul.f32 0.0625, %v476_v60  ;;  %v167_v14 = vadd.f32 0.5, %v103_v1  ;;  %v16395_v63 = vld [vmem:[#allocation61_spill] sm:$0xff] }
 0x210   :  { %v9770_v22 = vsel %vm15895_vm4, %v2379_v55, %v16396_v0  ;;  %v9783_v55 = vadd.s32 112, %v9560_v53 }
 0x211   :  { %v2149_v30 = vpop.permute.xlu1 %2148  ;;  %v289_v45 = vfloor.f32 %v225_v43  ;;  %v9777_v41 = vfloor.f32 %v540_v54  ;;  %v231_v60 = vmul.f32 0.00390625, %v167_v14  ;;  %v16402_v43 = vld [vmem:[#allocation65_spill] sm:$0xff] }
 0x212   :  { %v2147_v39 = vpop.permute.xlu0 %2146  ;;  %v2692_v38 = vsel %vm16047_vm8, %v2627_v27, %v2149_v30  ;;  %v9691_v30 = vsub.f32 %v95_v19, %v351_v37  ;;  %v16385_v19 = vld [vmem:[#allocation45_spill] sm:$0xff]  ;;  %v16388_v37 = vld [vmem:[#allocation48_spill] sm:$0xff] }
 0x213   :  { %v2690_v15 = vsel %vm16047_vm8, %v2625_v17, %v2147_v39  ;;  %v16384_v39 = vld [vmem:[#allocation44_spill] sm:$0xff]  ;;  %v2375_v20 = vsel %vm2319_vm3, %v9389_v29, %v16385_v19  ;;  %v164_v29 = vadd.f32 0.5, %v100_v48  ;;  %v2377_v11 = vsel %vm2319_vm3, %v9417_v26, %v16388_v37  ;;  %v16391_v17 = vld [vmem:[#allocation59_spill] sm:$0xff]  ;;  %16397 = vst [vmem:[#allocation9_spill] sm:$0xff] %v9777_v41 }
 0x214   :  { %v2369_v13 = vsel %vm2319_vm3, %v9301_v57, %v16384_v39  ;;  %v166_v57 = vadd.f32 0.5, %v102_v9  ;;  %v479_v58 = vadd.f32 0.5, %v9691_v30  ;;  %v2381_v26 = vsel %vm2319_vm3, %v9475_v40, %v16390_v35 }
 0x215   :  { %v2229_v51 = vpop.permute.xlu1 %2228  ;;  %v2436_v3 = vsel %vm15895_vm4, %v9649_v31, %v16391_v17  ;;  %v477_v40 = vadd.f32 0.5, %v9728_v61  ;;  %v16394_v31 = vld [vmem:[#allocation7_spill] sm:$0xff]  ;;  %v9758_v39 = vsub.f32 %v98_v16, %v354_v36  ;;  %v9766_v19 = vsel %vm15895_vm4, %v2373_v33, %v16395_v63  ;;  %v16400_v36 = vld [vmem:[#allocation64_spill] sm:$0xff] }
 0x216   :  { %v2227_v47 = vpop.permute.xlu0 %2226  ;;  %v2757_v21 = vsel %vm16043_vm9, %v2692_v38, %v2229_v51  ;;  %v542_v51 = vmul.f32 0.0625, %v478_v24  ;;  %v16389_v24 = vld [vmem:[#allocation49_spill] sm:$0xff]  ;;  %v230_v38 = vmul.f32 0.00390625, %v166_v57  ;;  %v480_v37 = vadd.f32 0.5, %v9762_v34 }
 0x217   :  { %v2755_v25 = vsel %vm16043_vm9, %v2690_v15, %v2227_v47  ;;  %v2383_v47 = vsel %vm2319_vm3, %v9511_v49, %v16389_v24  ;;  %v228_v15 = vmul.f32 0.00390625, %v164_v29  ;;  %v9745_v49 = vadd.s32 72, %v9560_v53  ;;  %v16399_v29 = vld [vmem:[#allocation63_spill] sm:$0xff] }
 0x218   :  { %v294_v7 = vfloor.f32 %v230_v38  ;;  %v541_v33 = vmul.f32 0.0625, %v477_v40  ;;  %v9787_v62 = vsel %vm15895_vm4, %v2377_v11, %v16399_v29  ;;  %v9793_v42 = vsel %vm15895_vm4, %v2383_v47, %v16400_v36 }
 0x219   :  { %v2302_v2 = vpop.permute.xlu1 %2301  ;;  %v292_v32 = vfloor.f32 %v228_v15  ;;  %v101_v57 = vcvt.s32.f32 %v9745_v49  ;;  %16401 = vst [vmem:[#allocation8_spill] sm:$0xff] %v9793_v42  ;;  %v9797_v35 = vsel %vm15895_vm4, %v2381_v26, %v16402_v43  ;;  %v668_v38 = vmul.f32 16.0, %v9777_v41 }
 0x21a   :  { %v2822_v5 = vsel %vm15953_vm10, %v2757_v21, %v2302_v2  ;;  %v2300_v10 = vpop.permute.xlu0 %2299  ;;  %v9742_v2 = vfloor.f32 %v542_v51  ;;  %16403 = vst [vmem:[#allocation11_spill] sm:$0xff] %v9797_v35  ;;  %v295_v40 = vfloor.f32 %v231_v60  ;;  %v106_v26 = vcvt.s32.f32 %v9783_v55 }
 0x21b   :  { %v2820_v6 = vsel %vm15953_vm10, %v2755_v25, %v2300_v10  ;;  %v16393_v25 = vld [vmem:[#allocation60_spill] sm:$0xff]  ;;  %v543_v10 = vmul.f32 0.0625, %v479_v58  ;;  %v353_v58 = vmul.f32 256.0, %v289_v45  ;;  %v356_v54 = vmul.f32 256.0, %v292_v32 }
 0x21c   :  { %7742 = vmatprep.mubr.msk.bf16.mxu0 %vm15899_vm11, %v2820_v6  ;;  %16392 = vst [vmem:[#allocation6_spill] sm:$0xff] %v9742_v2  ;;  %v9754_v6 = vsel %vm15895_vm4, %v2375_v20, %v16394_v31  ;;  %v9774_v20 = vsub.f32 %v99_v59, %v355_v46  ;;  %v670_v16 = vmul.f32 16.0, %v9742_v2  ;;  %v482_v59 = vadd.f32 0.5, %v9758_v39 }
 0x21d   :  { %v9703_v52 = vpop.permute.xlu1 %1930  ;;  %7743 = vmatmul.mubr.msk.bf16.gmra.mxu0 %vm15899_vm11, %v2822_v5  ;;  %v2434_v5 = vsel %vm15895_vm4, %v2369_v13, %v16393_v25  ;;  %v9780_v51 = vfloor.f32 %v543_v10  ;;  %v358_v46 = vmul.f32 256.0, %v294_v7  ;;  %v165_v15 = vadd.f32 0.5, %v101_v57 }
 0x21e   :  { %v9720_v56 = vpop.permute.xlu0 %1928  ;;  %v483_v17 = vadd.f32 0.5, %v9774_v20  ;;  %v9801_v11 = vsub.f32 %v9637_v18, %v670_v16  ;;  %v9807_v10 = vfloor.f32 %v541_v33  ;;  %v546_v14 = vmul.f32 0.0625, %v482_v59 }
 0x21f   :  { %16398 = vst [vmem:[#allocation3_spill] sm:$0xff] %v9780_v51  ;;  %v671_v47 = vmul.f32 16.0, %v9780_v51  ;;  %v544_v31 = vmul.f32 0.0625, %v480_v37  ;;  %v9812_v18 = vsub.f32 %v97_v44, %v353_v58  ;;  %v9815_v45 = vadd.s32 96, %v9560_v53 }
 0x220   :  { %16404 = vst [vmem:[#allocation10_spill] sm:$0xff] %v9801_v11  ;;  %16405 = vst [vmem:[#allocation13_spill] sm:$0xff] %v9807_v10  ;;  %v547_v0 = vmul.f32 0.0625, %v483_v17  ;;  %v9819_v7 = vsub.f32 %v102_v9, %v358_v46  ;;  %v2501_v16 = vsel %vm2449_vm5, %v2436_v3, %v9703_v52  ;;  %v9824_v32 = vadd.s32 120, %v9560_v53 }
 0x221   :  { %v9734_v27 = vpop.permute.xlu1 %2010  ;;  %v9828_v28 = vsub.f32 %v100_v48, %v356_v54  ;;  %v229_v44 = vmul.f32 0.00390625, %v165_v15  ;;  %v2499_v33 = vsel %vm2449_vm5, %v2434_v5, %v9720_v56  ;;  %v359_v9 = vmul.f32 256.0, %v295_v40 }
 0x222   :  { %v2009_v21 = vpop.permute.xlu0 %2008  ;;  %v2566_v60 = vsel %vm2514_vm6, %v2501_v16, %v9734_v27  ;;  %v170_v29 = vadd.f32 0.5, %v106_v26  ;;  %v481_v12 = vadd.f32 0.5, %v9812_v18  ;;  %v15868_v48 = vcvt.s32.f32 %v9815_v45 }
 0x223   :  { %v2564_v52 = vsel %vm2514_vm6, %v2499_v33, %v2009_v21  ;;  %v486_v27 = vadd.f32 0.5, %v9819_v7  ;;  %v15866_v37 = vcvt.s32.f32 %v9824_v32  ;;  %v484_v21 = vadd.f32 0.5, %v9828_v28 }
 0x224   :  { %v234_v54 = vmul.f32 0.00390625, %v170_v29  ;;  %v545_v40 = vmul.f32 0.0625, %v481_v12  ;;  %v9862_v16 = vadd.s32 104, %v9560_v53  ;;  %v669_v4 = vmul.f32 16.0, %v9807_v10 }
 0x225   :  { %v2084_v13 = vpop.permute.xlu1 %2083  ;;  %v548_v33 = vmul.f32 0.0625, %v484_v21  ;;  %v9881_v29 = vsub.f32 %v9691_v30, %v671_v47  ;;  %vm798_vm12 = vcmp.lt.f32.partialorder %v9742_v2, 14.0  ;;  %vm862_vm13 = vcmp.lt.f32.partialorder %v9801_v11, 14.0 }
 0x226   :  { %v2082_v8 = vpop.permute.xlu0 %2081  ;;  %v2631_v3 = vsel %vm2579_vm7, %v2566_v60, %v2084_v13  ;;  %v293_v13 = vfloor.f32 %v229_v44  ;;  %v550_v44 = vmul.f32 0.0625, %v486_v27  ;;  %v9885_v12 = vfloor.f32 %v545_v40 }
 0x227   :  { %v2629_v59 = vsel %vm2579_vm7, %v2564_v52, %v2082_v8  ;;  %v9849_v8 = vfloor.f32 %v546_v14  ;;  %16410 = vst [vmem:[#allocation16_spill] sm:$0xff] %v9881_v29  ;;  %v9892_v27 = vsub.f32 %v9728_v61, %v669_v4  ;;  %v9898_v21 = vfloor.f32 %v548_v33 }
 0x228   :  { %v357_v60 = vmul.f32 256.0, %v293_v13  ;;  %16411 = vst [vmem:[#allocation19_spill] sm:$0xff] %v9885_v12  ;;  %v9895_v47 = vfloor.f32 %v550_v44  ;;  %v673_v40 = vmul.f32 16.0, %v9885_v12  ;;  %v9920_v33 = vadd.s32 136, %v9560_v53 }
 0x229   :  { %v2153_v24 = vpop.permute.xlu1 %2152  ;;  %16406 = vst [vmem:[#allocation12_spill] sm:$0xff] %v9849_v8  ;;  %16412 = vst [vmem:[#allocation18_spill] sm:$0xff] %v9892_v27  ;;  %vm796_vm14 = vcmp.lt.f32.partialorder %v9777_v41, 14.0  ;;  %vm797_vm4 = vcmp.lt.f32.partialorder %v9807_v10, 14.0  ;;  %vm861_vm2 = vcmp.lt.f32.partialorder %v9892_v27, 14.0  ;;  %vm799_vm1 = vcmp.lt.f32.partialorder %v9780_v51, 14.0 }
 0x22a   :  { %v2151_v25 = vpop.permute.xlu0 %2150  ;;  %v2696_v56 = vsel %vm16047_vm8, %v2631_v3, %v2153_v24  ;;  %v9853_v24 = vsub.f32 %v103_v1, %v359_v9  ;;  %v9868_v1 = vfloor.f32 %v544_v31  ;;  %v674_v31 = vmul.f32 16.0, %v9849_v8  ;;  %16413 = vst [vmem:[#allocation21_spill] sm:$0xff] %v9895_v47  ;;  %16414 = vst [vmem:[#allocation20_spill] sm:$0xff] %v9898_v21 }
 0x22b   :  { %v2694_v58 = vsel %vm16047_vm8, %v2629_v59, %v2151_v25  ;;  %v9857_v25 = vsub.f32 %v9684_v50, %v668_v38  ;;  %v171_v50 = vadd.f32 0.5, %v15866_v37  ;;  %v9873_v38 = vfloor.f32 %v547_v0 }
 0x22c   :  { %16408 = vst [vmem:[#allocation14_spill] sm:$0xff] %v9868_v1  ;;  %v487_v52 = vadd.f32 0.5, %v9853_v24  ;;  %v298_v3 = vfloor.f32 %v234_v54  ;;  %v15865_v0 = vcvt.s32.f32 %v9862_v16  ;;  %v672_v30 = vmul.f32 16.0, %v9868_v1 }
 0x22d   :  { %v2233_v63 = vpop.permute.xlu1 %2232  ;;  %16407 = vst [vmem:[#allocation15_spill] sm:$0xff] %v9857_v25  ;;  %16409 = vst [vmem:[#allocation17_spill] sm:$0xff] %v9873_v38  ;;  %v9902_v13 = vsub.f32 %v101_v57, %v357_v60  ;;  %vm860_vm15 = vcmp.lt.f32.partialorder %v9857_v25, 14.0  ;;  %vm863_vm0 = vcmp.lt.f32.partialorder %v9881_v29, 14.0 }
 0x22e   :  { %v2231_v23 = vpop.permute.xlu0 %2230  ;;  %v2761_v36 = vsel %vm16043_vm9, %v2696_v56, %v2233_v63  ;;  %v168_v63 = vadd.f32 0.5, %v15868_v48  ;;  %v9889_v56 = vadd.s32 128, %v9560_v53  ;;  %v551_v61 = vmul.f32 0.0625, %v487_v52 }
 0x22f   :  { %v2759_v43 = vsel %vm16043_vm9, %v2694_v58, %v2231_v23  ;;  %v9876_v23 = vadd.s32 144, %v9560_v53  ;;  %v235_v58 = vmul.f32 0.00390625, %v171_v50  ;;  %v362_v54 = vmul.f32 256.0, %v298_v3 }
 0x230   :  { %v232_v59 = vmul.f32 0.00390625, %v168_v63  ;;  %v169_v4 = vadd.f32 0.5, %v15865_v0  ;;  %v15869_v49 = vcvt.s32.f32 %v9889_v56  ;;  %v9916_v44 = vsub.f32 %v9762_v34, %v672_v30 }
 0x231   :  { %v2306_v5 = vpop.permute.xlu1 %2305  ;;  %v299_v50 = vfloor.f32 %v235_v58  ;;  %v485_v52 = vadd.f32 0.5, %v9902_v13  ;;  %v9929_v0 = vfloor.f32 %v551_v61  ;;  %v9933_v34 = vsub.f32 %v106_v26, %v362_v54 }
 0x232   :  { %v2826_v17 = vsel %vm15953_vm10, %v2761_v36, %v2306_v5  ;;  %v2304_v46 = vpop.permute.xlu0 %2303  ;;  %v675_v36 = vmul.f32 16.0, %v9873_v38  ;;  %v296_v63 = vfloor.f32 %v232_v59  ;;  %16416 = vst [vmem:[#allocation33_spill] sm:$0xff] %v9916_v44  ;;  %v9937_v58 = vadd.s32 176, %v9560_v53 }
 0x233   :  { %v2824_v15 = vsel %vm15953_vm10, %v2759_v43, %v2304_v46  ;;  %v15867_v43 = vcvt.s32.f32 %v9876_v23  ;;  %v9906_v46 = vsub.f32 %v9758_v39, %v674_v31  ;;  %v678_v39 = vmul.f32 16.0, %v9895_v47  ;;  %16418 = vst [vmem:[#allocation5_spill] sm:$0xff] %v9929_v0 }
 0x234   :  { %7746 = vmatprep.mubr.msk.bf16.mxu0 %vm15899_vm11, %v2824_v15  ;;  %v9909_v15 = vadd.s32 152, %v9560_v53  ;;  %v9923_v60 = vsub.f32 %v9774_v20, %v675_v36  ;;  %v676_v31 = vmul.f32 16.0, %v9898_v21  ;;  %v9940_v20 = vsub.f32 %v9812_v18, %v673_v40 }
 0x235   :  { %v9865_v14 = vpop.permute.xlu1 %1934  ;;  %7747 = vmatmul.mubr.msk.bf16.gmra.mxu0 %vm15899_vm11, %v2826_v17  ;;  %16415 = vst [vmem:[#allocation28_spill] sm:$0xff] %v9906_v46  ;;  %v174_v3 = vadd.f32 0.5, %v15867_v43  ;;  %v360_v36 = vmul.f32 256.0, %v296_v63  ;;  %v233_v37 = vmul.f32 0.00390625, %v169_v4  ;;  %v172_v43 = vadd.f32 0.5, %v15869_v49 }
 0x236   :  { %v9878_v9 = vpop.permute.xlu0 %1932  ;;  %16417 = vst [vmem:[#allocation34_spill] sm:$0xff] %v9923_v60  ;;  %16419 = vst [vmem:[#allocation51_spill] sm:$0xff] %v9940_v20  ;;  %v9945_v61 = vsub.f32 %v9819_v7, %v678_v39  ;;  %v363_v55 = vmul.f32 256.0, %v299_v50  ;;  %v9949_v54 = vadd.s32 160, %v9560_v53  ;;  %v9952_v30 = vsub.f32 %v9828_v28, %v676_v31 }
 0x237   :  { %v549_v18 = vmul.f32 0.0625, %v485_v52  ;;  %v238_v40 = vmul.f32 0.00390625, %v174_v3  ;;  %v9955_v4 = vadd.s32 184, %v9560_v53  ;;  %v679_v49 = vmul.f32 16.0, %v9929_v0 }
 0x238   :  { %16420 = vst [vmem:[#allocation22_spill] sm:$0xff] %v9945_v61  ;;  %16421 = vst [vmem:[#allocation27_spill] sm:$0xff] %v9952_v30  ;;  %v490_v7 = vadd.f32 0.5, %v9933_v34  ;;  %v16422_v39 = vcvt.s32.f32 %v9909_v15  ;;  %v16423_v61 = vcvt.s32.f32 %v9815_v45  ;;  %v297_v28 = vfloor.f32 %v233_v37 }
 0x239   :  { %v2015_v5 = vpop.permute.xlu1 %2014  ;;  %v236_v31 = vmul.f32 0.00390625, %v172_v43  ;;  %v9967_v3 = vadd.s32 168, %v9560_v53  ;;  %v16424_v30 = vcvt.s32.f32 %v9824_v32  ;;  %v16425_v26 = vcvt.s32.f32 %v9920_v33 }
 0x23a   :  { %v2013_v17 = vpop.permute.xlu0 %2012  ;;  %v175_v50 = vadd.f32 0.5, %v16422_v39  ;;  %v9964_v47 = vsub.f32 %v16423_v61, %v360_v36  ;;  %v2505_v39 = vsel %vm2449_vm5, %v9754_v6, %v9865_v14  ;;  %v302_v36 = vfloor.f32 %v238_v40 }
 0x23b   :  { %v9971_v0 = vsub.f32 %v16424_v30, %v363_v55  ;;  %v173_v21 = vadd.f32 0.5, %v16425_v26  ;;  %v2503_v37 = vsel %vm2449_vm5, %v9766_v19, %v9878_v9  ;;  %v2570_v43 = vsel %vm2514_vm6, %v2505_v39, %v2015_v5 }
 0x23c   :  { %v15882_v32 = vcvt.s32.f32 %v9955_v4  ;;  %v239_v30 = vmul.f32 0.00390625, %v175_v50  ;;  %v2568_v55 = vsel %vm2514_vm6, %v2503_v37, %v2013_v17  ;;  %v16426_v14 = vcvt.s32.f32 %v9937_v58 }
 0x23d   :  { %v2088_v57 = vpop.permute.xlu1 %2087  ;;  %v300_v60 = vfloor.f32 %v236_v31  ;;  %v15881_v19 = vcvt.s32.f32 %v9967_v3  ;;  %v237_v9 = vmul.f32 0.00390625, %v173_v21  ;;  %v16427_v17 = vcvt.s32.f32 %v9949_v54 }
 0x23e   :  { %v2086_v59 = vpop.permute.xlu0 %2085  ;;  %v2635_v6 = vsel %vm2579_vm7, %v2570_v43, %v2088_v57  ;;  %v178_v26 = vadd.f32 0.5, %v16426_v14  ;;  %v361_v57 = vmul.f32 256.0, %v297_v28 }
 0x23f   :  { %v2633_v40 = vsel %vm2579_vm7, %v2568_v55, %v2086_v59  ;;  %v176_v39 = vadd.f32 0.5, %v16427_v17  ;;  %v366_v59 = vmul.f32 256.0, %v302_v36  ;;  %v554_v36 = vmul.f32 0.0625, %v490_v7 }
 0x240   :  { %v242_v21 = vmul.f32 0.00390625, %v178_v26  ;;  %v301_v14 = vfloor.f32 %v237_v9  ;;  %v16430_v17 = vcvt.s32.f32 %v9862_v16 }
 0x241   :  { %v2157_v48 = vpop.permute.xlu1 %2156  ;;  %v240_v26 = vmul.f32 0.00390625, %v176_v39 }
 0x242   :  { %v2155_v63 = vpop.permute.xlu0 %2154  ;;  %v2700_v45 = vsel %vm16047_vm8, %v2635_v6, %v2157_v48  ;;  %v179_v48 = vadd.f32 0.5, %v15882_v32  ;;  %v10011_v6 = vfloor.f32 %v549_v18  ;;  %v16431_v18 = vcvt.s32.f32 %v9876_v23 }
 0x243   :  { %v2698_v5 = vsel %vm16047_vm8, %v2633_v40, %v2155_v63  ;;  %v10001_v63 = vadd.s32 208, %v9560_v53  ;;  %v491_v40 = vadd.f32 0.5, %v9971_v0  ;;  %v306_v9 = vfloor.f32 %v242_v21 }
 0x244   :  { %16428 = vst [vmem:[#allocation25_spill] sm:$0xff] %v10011_v6  ;;  %v10027_v7 = vsub.f32 %v16431_v18, %v366_v59  ;;  %v677_v16 = vmul.f32 16.0, %v10011_v6  ;;  %v365_v23 = vmul.f32 256.0, %v301_v14  ;;  %v304_v59 = vfloor.f32 %v240_v26 }
 0x245   :  { %v2237_v52 = vpop.permute.xlu1 %2236  ;;  %v15886_v39 = vcvt.s32.f32 %v10001_v63  ;;  %v555_v21 = vmul.f32 0.0625, %v491_v40  ;;  %v16434_v14 = vcvt.s32.f32 %v9909_v15 }
 0x246   :  { %v2235_v61 = vpop.permute.xlu0 %2234  ;;  %v2765_v50 = vsel %vm16043_vm9, %v2700_v45, %v2237_v52  ;;  %v364_v52 = vmul.f32 256.0, %v300_v60  ;;  %v303_v45 = vfloor.f32 %v239_v30  ;;  %v10015_v60 = vsub.f32 %v9853_v24, %v679_v49 }
 0x247   :  { %v2763_v37 = vsel %vm16043_vm9, %v2698_v5, %v2235_v61  ;;  %v10009_v61 = vadd.s32 192, %v9560_v53  ;;  %v488_v30 = vadd.f32 0.5, %v9964_v47  ;;  %v16432_v24 = vcvt.s32.f32 %v9889_v56 }
 0x248   :  { %16429 = vst [vmem:[#allocation31_spill] sm:$0xff] %v10015_v60  ;;  %v10041_v56 = vadd.s32 216, %v9560_v53  ;;  %v10055_v32 = vsub.f32 %v9902_v13, %v677_v16  ;;  %v10064_v15 = vfloor.f32 %v555_v21  ;;  %v16439_v13 = vcvt.s32.f32 %v9937_v58 }
 0x249   :  { %v2310_v38 = vpop.permute.xlu1 %2309  ;;  %v10032_v49 = vsub.f32 %v16432_v24, %v364_v52  ;;  %v182_v24 = vadd.f32 0.5, %v15886_v39  ;;  %v368_v39 = vmul.f32 256.0, %v304_v59  ;;  %v10081_v58 = vadd.s32 200, %v9560_v53 }
 0x24a   :  { %v2830_v31 = vsel %vm15953_vm10, %v2765_v50, %v2310_v38  ;;  %v2308_v43 = vpop.permute.xlu0 %2307  ;;  %v177_v38 = vadd.f32 0.5, %v15881_v19  ;;  %v243_v50 = vmul.f32 0.00390625, %v179_v48  ;;  %v15887_v48 = vcvt.s32.f32 %v10009_v61  ;;  %16435 = vst [vmem:[#allocation36_spill] sm:$0xff] %v10055_v32  ;;  %16438 = vst [vmem:[#allocation53_spill] sm:$0xff] %v10064_v15 }
 0x24b   :  { %v2828_v55 = vsel %vm15953_vm10, %v2763_v37, %v2308_v43  ;;  %v10023_v37 = vsub.f32 %v16430_v17, %v361_v57  ;;  %v10038_v57 = vfloor.f32 %v554_v36  ;;  %v552_v17 = vmul.f32 0.0625, %v488_v30 }
 0x24c   :  { %7750 = vmatprep.mubr.msk.bf16.mxu0 %vm15899_vm11, %v2828_v55  ;;  %v241_v55 = vmul.f32 0.00390625, %v177_v38  ;;  %v307_v18 = vfloor.f32 %v243_v50  ;;  %v370_v38 = vmul.f32 256.0, %v306_v9  ;;  %v492_v36 = vadd.f32 0.5, %v10032_v49 }
 0x24d   :  { %v10004_v28 = vpop.permute.xlu1 %1938  ;;  %7751 = vmatmul.mubr.msk.bf16.gmra.mxu0 %vm15899_vm11, %v2830_v31  ;;  %v367_v31 = vmul.f32 256.0, %v303_v45  ;;  %16433 = vst [vmem:[#allocation35_spill] sm:$0xff] %v10038_v57  ;;  %v489_v52 = vadd.f32 0.5, %v10023_v37  ;;  %v494_v45 = vadd.f32 0.5, %v10027_v7  ;;  %v180_v50 = vadd.f32 0.5, %v15887_v48 }
 0x24e   :  { %v10019_v5 = vpop.permute.xlu0 %1936  ;;  %v305_v30 = vfloor.f32 %v241_v55  ;;  %v682_v60 = vmul.f32 16.0, %v10038_v57  ;;  %v16436_v9 = vcvt.s32.f32 %v9920_v33  ;;  %v10062_v35 = vfloor.f32 %v552_v17 }
 0x24f   :  { %v10050_v26 = vsub.f32 %v16434_v14, %v367_v31  ;;  %v371_v31 = vmul.f32 256.0, %v307_v18  ;;  %v15894_v14 = vcvt.s32.f32 %v10041_v56  ;;  %v553_v42 = vmul.f32 0.0625, %v489_v52 }
 0x250   :  { %v10060_v6 = vsub.f32 %v16436_v9, %v365_v23  ;;  %16437 = vst [vmem:[#allocation52_spill] sm:$0xff] %v10062_v35  ;;  %v558_v48 = vmul.f32 0.0625, %v494_v45  ;;  %v10069_v16 = vsub.f32 %v16439_v13, %v370_v38  ;;  %v246_v57 = vmul.f32 0.00390625, %v182_v24 }
 0x251   :  { %v10034_v43 = vpop.permute.xlu1 %2018  ;;  %v556_v32 = vmul.f32 0.0625, %v492_v36  ;;  %v495_v33 = vadd.f32 0.5, %v10050_v26  ;;  %v369_v23 = vmul.f32 256.0, %v305_v30  ;;  %v244_v17 = vmul.f32 0.00390625, %v180_v50 }
 0x252   :  { %v2017_v19 = vpop.permute.xlu0 %2016  ;;  %v10073_v21 = vsub.f32 %v9933_v34, %v682_v60  ;;  %v493_v18 = vadd.f32 0.5, %v10060_v6  ;;  %v16441_v9 = vcvt.s32.f32 %v9949_v54  ;;  %v680_v45 = vmul.f32 16.0, %v10062_v35 }
 0x253   :  { %v10085_v38 = vmul.f32 16.0, %v10064_v15  ;;  %v16442_v24 = vcvt.s32.f32 %v9955_v4  ;;  %v183_v60 = vadd.f32 0.5, %v15894_v14  ;;  %v10093_v30 = vfloor.f32 %v553_v42  ;;  %v10121_v14 = vpop.f32.mrf.mxu0 }
 0x254   :  { %16440 = vst [vmem:[#allocation23_spill] sm:$0xff] %v10073_v21  ;;  %v10078_v52 = vsub.f32 %v16441_v9, %v368_v39  ;;  %v10095_v54 = vfloor.f32 %v558_v48  ;;  %v498_v39 = vadd.f32 0.5, %v10069_v16  ;;  %v310_v50 = vfloor.f32 %v246_v57  ;;  %16447 = vst [vmem:[#allocation37_spill] sm:$0xff] %v10121_v14 }
 0x255   :  { %v2092_v40 = vpop.permute.xlu1 %2091  ;;  %v10089_v36 = vsub.f32 %v16442_v24, %v371_v31  ;;  %16443 = vst [vmem:[#allocation29_spill] sm:$0xff] %v10093_v30  ;;  %v10098_v13 = vfloor.f32 %v556_v32  ;;  %v559_v9 = vmul.f32 0.0625, %v495_v33  ;;  %v16446_v15 = vcvt.s32.f32 %v9967_v3 }
 0x256   :  { %v2090_v55 = vpop.permute.xlu0 %2089  ;;  %16444 = vst [vmem:[#allocation26_spill] sm:$0xff] %v10095_v54  ;;  %v308_v31 = vfloor.f32 %v244_v17  ;;  %v557_v42 = vmul.f32 0.0625, %v493_v18  ;;  %v2509_v48 = vsel %vm2449_vm5, %v9770_v22, %v10004_v28  ;;  %v496_v57 = vadd.f32 0.5, %v10078_v52 }
 0x257   :  { %16445 = vst [vmem:[#allocation32_spill] sm:$0xff] %v10098_v13  ;;  %v10102_v21 = vsub.f32 %v16446_v15, %v369_v23  ;;  %v15900_v32 = vcvt.s32.f32 %v10081_v58  ;;  %v2507_v3 = vsel %vm2449_vm5, %v9787_v62, %v10019_v5  ;;  %v499_v15 = vadd.f32 0.5, %v10089_v36 }
 0x258   :  { %v2574_v33 = vsel %vm2514_vm6, %v2509_v48, %v10034_v43  ;;  %v247_v17 = vmul.f32 0.00390625, %v183_v60  ;;  %v562_v22 = vmul.f32 0.0625, %v498_v39  ;;  %v2572_v28 = vsel %vm2514_vm6, %v2507_v3, %v2017_v19 }
 0x259   :  { %v2161_v59 = vpop.permute.xlu1 %2160  ;;  %v2639_v18 = vsel %vm2579_vm7, %v2574_v33, %v2092_v40  ;;  %v374_v24 = vmul.f32 256.0, %v310_v50  ;;  %v497_v62 = vadd.f32 0.5, %v10102_v21  ;;  %v2637_v5 = vsel %vm2579_vm7, %v2572_v28, %v2090_v55 }
 0x25a   :  { %v2159_v34 = vpop.permute.xlu0 %2158  ;;  %v2704_v43 = vsel %vm16047_vm8, %v2639_v18, %v2161_v59  ;;  %v372_v60 = vmul.f32 256.0, %v308_v31  ;;  %v560_v39 = vmul.f32 0.0625, %v496_v57  ;;  %v181_v50 = vadd.f32 0.5, %v15900_v32 }
 0x25b   :  { %v2702_v19 = vsel %vm16047_vm8, %v2637_v5, %v2159_v34  ;;  %v563_v3 = vmul.f32 0.0625, %v499_v15  ;;  %v311_v28 = vfloor.f32 %v247_v17  ;;  %v10137_v31 = vsub.f32 %v9964_v47, %v680_v45 }
 0x25c   :  { %v10145_v15 = vadd.s32 240, %v9560_v53  ;;  %v10149_v18 = vfloor.f32 %v559_v9  ;;  %v10151_v17 = vfloor.f32 %v557_v42  ;;  %v561_v5 = vmul.f32 0.0625, %v497_v62 }
 0x25d   :  { %v2241_v4 = vpop.permute.xlu1 %2240  ;;  %16448 = vst [vmem:[#allocation38_spill] sm:$0xff] %v10137_v31  ;;  %v16453_v45 = vcvt.s32.f32 %v10009_v61  ;;  %v245_v9 = vmul.f32 0.00390625, %v181_v50  ;;  %v684_v42 = vmul.f32 16.0, %v10098_v13  ;;  %v10166_v62 = vfloor.f32 %v560_v39 }
 0x25e   :  { %v2239_v23 = vpop.permute.xlu0 %2238  ;;  %v2769_v40 = vsel %vm16043_vm9, %v2704_v43, %v2241_v4  ;;  %v16449_v4 = vcvt.s32.f32 %v10001_v63  ;;  %16451 = vst [vmem:[#allocation55_spill] sm:$0xff] %v10149_v18  ;;  %16452 = vst [vmem:[#allocation24_spill] sm:$0xff] %v10151_v17  ;;  %v681_v63 = vmul.f32 16.0, %v10093_v30  ;;  %v375_v61 = vmul.f32 256.0, %v311_v28 }
 0x25f   :  { %v2767_v33 = vsel %vm16043_vm9, %v2702_v19, %v2239_v23  ;;  %v10147_v23 = vpop.f32.mrf.mxu0  ;;  %v10158_v43 = vsub.f32 %v16453_v45, %v372_v60  ;;  %16455 = vst [vmem:[#allocation39_spill] sm:$0xff] %v10166_v62  ;;  %v10168_v19 = vfloor.f32 %v563_v3  ;;  %v10174_v60 = vsub.f32 %v9971_v0, %v10085_v38 }
 0x260   :  { %v10142_v57 = vsub.f32 %v16449_v4, %v374_v24  ;;  %16450 = vst [vmem:[#allocation54_spill] sm:$0xff] %v10147_v23  ;;  %v686_v24 = vmul.f32 16.0, %v10095_v54  ;;  %v687_v0 = vmul.f32 16.0, %v10149_v18  ;;  %v685_v38 = vmul.f32 16.0, %v10151_v17 }
 0x261   :  { %v2314_v48 = vpop.permute.xlu1 %2313  ;;  %16456 = vst [vmem:[#allocation40_spill] sm:$0xff] %v10168_v19  ;;  %16457 = vst [vmem:[#allocation4_spill] sm:$0xff] %v10174_v60  ;;  %v10189_v50 = vpop.f32.mrf.mxu0  ;;  %v10193_v3 = vfloor.f32 %v561_v5  ;;  %v309_v32 = vfloor.f32 %v245_v9  ;;  %v16468_v25 = vcvt.s32.f32 %v10145_v15 }
 0x262   :  { %v2834_v55 = vsel %vm15953_vm10, %v2769_v40, %v2314_v48  ;;  %v2312_v59 = vpop.permute.xlu0 %2311  ;;  %v10162_v48 = vfloor.f32 %v562_v22  ;;  %16460 = vst [vmem:[#allocation56_spill] sm:$0xff] %v10189_v50  ;;  %v10202_v4 = vsub.f32 %v10027_v7, %v686_v24  ;;  %v10214_v22 = vsub.f32 %v10032_v49, %v684_v42 }
 0x263   :  { %v2832_v34 = vsel %vm15953_vm10, %v2767_v33, %v2312_v59  ;;  %v502_v33 = vadd.f32 0.5, %v10142_v57  ;;  %16461 = vst [vmem:[#allocation41_spill] sm:$0xff] %v10193_v3  ;;  %v500_v59 = vadd.f32 0.5, %v10158_v43  ;;  %v16467_v7 = vcvt.s32.f32 %v10041_v56  ;;  %v10238_v42 = vpop.f32.mrf.mxu0 }
 0x264   :  { %7754 = vmatprep.mubr.msk.bf16.mxu0 %vm15899_vm11, %v2832_v34  ;;  %16454 = vst [vmem:[#allocation30_spill] sm:$0xff] %v10162_v48  ;;  %v10199_v34 = vsub.f32 %v10023_v37, %v681_v63  ;;  %16463 = vst [vmem:[#allocation43_spill] sm:$0xff] %v10202_v4  ;;  %v690_v45 = vmul.f32 16.0, %v10162_v48  ;;  %v688_v37 = vmul.f32 16.0, %v10166_v62  ;;  %v691_v63 = vmul.f32 16.0, %v10168_v19  ;;  %v16491_v62 = vld [vmem:[#allocation34_spill] sm:$0xff] }
 0x265   :  { %v10154_v47 = vpop.permute.xlu1 %1942  ;;  %7755 = vmatmul.mubr.msk.bf16.gmra.mxu0 %vm15899_vm11, %v2834_v55  ;;  %v10179_v55 = vadd.s32 224, %v9560_v53  ;;  %vm10185_vm11 = vmand %vm798_vm12, %vm862_vm13  ;;  %16466 = vst [vmem:[#allocation57_spill] sm:$0xff] %v10214_v22  ;;  %v10220_v24 = vsub.f32 %v16467_v7, %v375_v61  ;;  %v566_v2 = vmul.f32 0.0625, %v502_v33  ;;  %v186_v41 = vadd.f32 0.5, %v16468_v25 }
 0x266   :  { %v10170_v40 = vpop.permute.xlu0 %1940  ;;  %16462 = vst [vmem:[#allocation42_spill] sm:$0xff] %v10199_v34  ;;  %vm10209_vm12 = vmand %vm796_vm14, %vm860_vm15  ;;  %v3363_v11 = vsel %vm10185_vm11, %v10121_v14, 0.0  ;;  %v10241_v61 = vsub.f32 %v10050_v26, %v687_v0  ;;  %v10244_v33 = vsub.f32 %v10060_v6, %v685_v38  ;;  %v689_v25 = vmul.f32 16.0, %v10193_v3 }
 0x267   :  { %vm10234_vm13 = vmand %vm797_vm4, %vm861_vm2  ;;  %16471 = vst [vmem:[#allocation58_spill] sm:$0xff] %v10238_v42  ;;  %v564_v39 = vmul.f32 0.0625, %v500_v59  ;;  %v3361_v49 = vsel %vm10209_vm12, %v10147_v23, 0.0  ;;  %v10251_v27 = vsub.f32 %v10069_v16, %v690_v45  ;;  %v373_v10 = vmul.f32 256.0, %v309_v32  ;;  %v10276_v45 = vpop.f32.mrf.mxu0 }
 0x268   :  { %16472 = vst [vmem:[#allocation44_spill] sm:$0xff] %v10241_v61  ;;  %16473 = vst [vmem:[#allocation45_spill] sm:$0xff] %v10244_v33  ;;  %v10254_v14 = vadd.s32 248, %v9560_v53  ;;  %v3561_v26 = vmul.f32 %v3363_v11, %v3363_v11  ;;  %vm800_vm4 = vcmp.lt.f32.partialorder %v9868_v1, 14.0  ;;  %vm864_vm11 = vcmp.lt.f32.partialorder %v9916_v44, 14.0 }
 0x269   :  { %v10196_v28 = vpop.permute.xlu1 %2022  ;;  %16474 = vst [vmem:[#allocation46_spill] sm:$0xff] %v10251_v27  ;;  %vm10260_vm2 = vmand %vm799_vm1, %vm863_vm0  ;;  %v10267_v16 = vsub.f32 %v10078_v52, %v688_v37  ;;  %v10270_v32 = vsub.f32 %v10089_v36, %v691_v63  ;;  %v503_v0 = vadd.f32 0.5, %v10220_v24  ;;  %v3362_v59 = vsel %vm10234_vm13, %v10238_v42, 0.0 }
 0x26a   :  { %v10222_v9 = vpop.permute.xlu0 %2020  ;;  %16479 = vst [vmem:[#allocation49_spill] sm:$0xff] %v10276_v45  ;;  %v10278_v5 = vfloor.f32 %v566_v2  ;;  %v250_v29 = vmul.f32 0.00390625, %v186_v41  ;;  %v16481_v51 = vcvt.s32.f32 %v10179_v55  ;;  %v10283_v52 = vsel %vm2319_vm3, %v3363_v11, 0.0 }
 0x26b   :  { %16477 = vst [vmem:[#allocation47_spill] sm:$0xff] %v10267_v16  ;;  %16478 = vst [vmem:[#allocation48_spill] sm:$0xff] %v10270_v32  ;;  %v3559_v36 = vmul.f32 %v3361_v49, %v3361_v49  ;;  %v10286_v37 = vsub.f32 %v10102_v21, %v689_v25  ;;  %v10288_v63 = vfloor.f32 %v564_v39  ;;  %v3364_v56 = vsel %vm10260_vm2, %v10189_v50, 0.0 }
 0x26c   :  { %16480 = vst [vmem:[#allocation50_spill] sm:$0xff] %v10278_v5  ;;  %v184_v23 = vadd.f32 0.5, %v16481_v51  ;;  %v16484_v2 = vcvt.s32.f32 %v10081_v58  ;;  %v10299_v11 = vadd.s32 232, %v9560_v53  ;;  %v10302_v42 = vsel %vm2319_vm3, %v3561_v26, 0.0  ;;  %vm928_vm2 = vmand %vm800_vm4, %vm864_vm11 }
 0x26d   :  { %v2096_v7 = vpop.permute.xlu1 %2095  ;;  %16482 = vst [vmem:[#allocation59_spill] sm:$0xff] %v10286_v37  ;;  %16483 = vst [vmem:[#allocation60_spill] sm:$0xff] %v10288_v63  ;;  %v3425_v21 = vsel %vm2319_vm3, %v3361_v49, 0.0  ;;  %v3426_v25 = vsel %vm2319_vm3, %v3362_v59, 0.0  ;;  %v3560_v39 = vmul.f32 %v3362_v59, %v3362_v59  ;;  %vm801_vm0 = vcmp.lt.f32.partialorder %v9885_v12, 14.0  ;;  %v16486_v37 = vld [vmem:[#allocation8_spill] sm:$0xff] }
 0x26e   :  { %v2094_v38 = vpop.permute.xlu0 %2093  ;;  %v10295_v41 = vsub.f32 %v16484_v2, %v373_v10  ;;  %vm865_vm1 = vcmp.lt.f32.partialorder %v9940_v20, 14.0  ;;  %v10308_v10 = vpop.f32.mrf.mxu0  ;;  %v694_v6 = vmul.f32 16.0, %v10278_v5  ;;  %v567_v2 = vmul.f32 0.0625, %v503_v0 }
 0x26f   :  { %16485 = vst [vmem:[#allocation7_spill] sm:$0xff] %v10308_v10  ;;  %v314_v51 = vfloor.f32 %v250_v29  ;;  %v248_v50 = vmul.f32 0.00390625, %v184_v23  ;;  %v3623_v26 = vsel %vm2319_vm3, %v3559_v36, 0.0  ;;  %v10313_v19 = vsel %vm2319_vm3, %v3364_v56, 0.0  ;;  %v16490_v36 = vld [vmem:[#allocation17_spill] sm:$0xff]  ;;  %vm10380_vm11 = vmand %vm801_vm0, %vm865_vm1 }
 0x270   :  { %v3562_v49 = vmul.f32 %v3364_v56, %v3364_v56  ;;  %vm802_vm14 = vcmp.lt.f32.partialorder %v9849_v8, 14.0  ;;  %vm866_vm15 = vcmp.lt.f32.partialorder %v9906_v46, 14.0  ;;  %v692_v59 = vmul.f32 16.0, %v10288_v63  ;;  %v16488_v56 = vld [vmem:[#allocation11_spill] sm:$0xff] }
 0x271   :  { %v2165_v32 = vpop.permute.xlu1 %2164  ;;  %v3427_v48 = vadd.f32 %v3426_v25, %v3425_v21  ;;  %v2513_v0 = vsel %vm2449_vm5, %v16486_v37, %v10154_v47  ;;  %v16487_v29 = vcvt.s32.f32 %v10254_v14  ;;  %v3624_v5 = vsel %vm2319_vm3, %v3560_v39, 0.0  ;;  %v10333_v25 = vpop.f32.mrf.mxu0  ;;  %vm10398_vm0 = vmand %vm802_vm14, %vm866_vm15 }
 0x272   :  { %v2163_v58 = vpop.permute.xlu0 %2162  ;;  %v2511_v3 = vsel %vm2449_vm5, %v16488_v56, %v10170_v40  ;;  %v2578_v63 = vsel %vm2514_vm6, %v2513_v0, %v10196_v28  ;;  %v10331_v21 = vadd.s32 272, %v9560_v53  ;;  %16489 = vst [vmem:[#allocation61_spill] sm:$0xff] %v10333_v25  ;;  %v312_v39 = vfloor.f32 %v248_v50 }
 0x273   :  { %v187_v23 = vadd.f32 0.5, %v16487_v29  ;;  %v2576_v47 = vsel %vm2514_vm6, %v2511_v3, %v10222_v9  ;;  %v2643_v37 = vsel %vm2579_vm7, %v2578_v63, %v2096_v7  ;;  %v378_v29 = vmul.f32 256.0, %v314_v51  ;;  %v10357_v44 = vpop.f32.mrf.mxu0 }
 0x274   :  { %vm803_vm12 = vcmp.lt.f32.partialorder %v16490_v36, 14.0  ;;  %vm867_vm13 = vcmp.lt.f32.partialorder %v16491_v62, 14.0  ;;  %v501_v40 = vadd.f32 0.5, %v10295_v41  ;;  %v2641_v28 = vsel %vm2579_vm7, %v2576_v47, %v2094_v38  ;;  %16493 = vst [vmem:[#allocation62_spill] sm:$0xff] %v10357_v44  ;;  %v16516_v62 = vld [vmem:[#allocation22_spill] sm:$0xff] }
 0x275   :  { %v2245_v27 = vpop.permute.xlu1 %2244  ;;  %v2708_v0 = vsel %vm16047_vm8, %v2643_v37, %v2165_v32  ;;  %v10344_v61 = vadd.s32 256, %v9560_v53  ;;  %v2706_v50 = vsel %vm16047_vm8, %v2641_v28, %v2163_v58  ;;  %v251_v9 = vmul.f32 0.00390625, %v187_v23 }
 0x276   :  { %v2243_v16 = vpop.permute.xlu0 %2242  ;;  %v2773_v3 = vsel %vm16043_vm9, %v2708_v0, %v2245_v27  ;;  %v16492_v7 = vcvt.s32.f32 %v10299_v11  ;;  %v3625_v38 = vadd.f32 %v3624_v5, %v3623_v26  ;;  %v15937_v37 = vcvt.s32.f32 %v10331_v21 }
 0x277   :  { %v2771_v32 = vsel %vm16043_vm9, %v2706_v50, %v2243_v16  ;;  %v10359_v1 = vfloor.f32 %v567_v2  ;;  %v16495_v27 = vcvt.s32.f32 %v10145_v15  ;;  %v376_v28 = vmul.f32 256.0, %v312_v39 }
 0x278   :  { %v185_v63 = vadd.f32 0.5, %v16492_v7  ;;  %v3365_v5 = vsel %vm928_vm2, %v10308_v10, 0.0  ;;  %v10368_v16 = vsub.f32 %v10142_v57, %v694_v6  ;;  %vm16497_vm4 = vcmask 588800  }
 0x279   :  { %v2318_v56 = vpop.permute.xlu1 %2317  ;;  %16494 = vst [vmem:[#allocation63_spill] sm:$0xff] %v10359_v1  ;;  %v10364_v23 = vsub.f32 %v16495_v27, %v378_v29  ;;  %v15936_v26 = vcvt.s32.f32 %v10344_v61  ;;  %v10373_v0 = vadd.s32 280, %v9560_v53  ;;  %v3429_v2 = vadd.f32 %v10283_v52, %v3427_v48  ;;  %v10384_v29 = vpop.f32.mrf.mxu0  ;;  %vm16501_vm2 = vmmov %vm16497_vm4  ;;  %v16509_v27 = vld [vmem:[#allocation25_spill] sm:$0xff] }
 0x27a   :  { %v2838_v51 = vsel %vm15953_vm10, %v2773_v3, %v2318_v56  ;;  %v2316_v47 = vpop.permute.xlu0 %2315  ;;  %16496 = vst [vmem:[#allocation64_spill] sm:$0xff] %v10368_v16  ;;  %16500 = vst [vmem:[#allocation65_spill] sm:$0xff] %v10384_v29  ;;  %v565_v57 = vmul.f32 0.0625, %v501_v40  ;;  %v315_v6 = vfloor.f32 %v251_v9  ;;  %v249_v39 = vmul.f32 0.00390625, %v185_v63  ;;  %v16505_v9 = vld [vmem:[#allocation20_spill] sm:$0xff] }
 0x27b   :  { %v2836_v58 = vsel %vm15953_vm10, %v2771_v32, %v2316_v47  ;;  %v3628_v56 = vsel %vm2319_vm3, %v3562_v49, 0.0  ;;  %v3627_v50 = vadd.f32 %v10302_v42, %v3625_v38  ;;  %v10390_v48 = vsub.f32 %v10158_v43, %v692_v59  ;;  %v16506_v49 = vld [vmem:[#allocation27_spill] sm:$0xff] }
 0x27c   :  { %7758 = vmatprep.mubr.msk.bf16.mxu0 %vm16497_vm4, %v2836_v58  ;;  %v190_v52 = vadd.f32 0.5, %v15937_v37  ;;  %v3563_v3 = vmul.f32 %v3365_v5, %v3365_v5  ;;  %vm804_vm1 = vcmp.lt.f32.partialorder %v16505_v9, 14.0  ;;  %vm868_vm4 = vcmp.lt.f32.partialorder %v16506_v49, 14.0  ;;  %v10420_v58 = vpop.f32.mrf.mxu0 }
 0x27d   :  { %7759 = vmatmul.mubr.msk.bf16.gmra.mxu0 %vm16501_vm2, %v2838_v51  ;;  %16502 = vst [vmem:[#allocation8_spill] sm:$0xff] %v10390_v48  ;;  %v695_v42 = vmul.f32 16.0, %v10359_v1  ;;  %v506_v43 = vadd.f32 0.5, %v10364_v23  ;;  %v16507_v59 = vcvt.s32.f32 %v10179_v55  ;;  %v3366_v63 = vsel %vm10380_vm11, %v10357_v44, 0.0  ;;  %16508 = vst [vmem:[#allocation11_spill] sm:$0xff] %v10420_v58  ;;  %v16510_v55 = vld [vmem:[#allocation36_spill] sm:$0xff] }
 0x27e   :  { %v188_v38 = vadd.f32 0.5, %v15936_v26  ;;  %v10417_v51 = vadd.s32 264, %v9560_v53  ;;  %v3431_v47 = vadd.f32 %v10313_v19, %v3429_v2  ;;  %vm805_vm14 = vcmp.lt.f32.partialorder %v16509_v27, 14.0  ;;  %vm10435_vm11 = vmand %vm803_vm12, %vm867_vm13  ;;  %v10446_v36 = vpop.f32.mrf.mxu0 }
 0x27f   :  { %v10408_v7 = vsub.f32 %v16507_v59, %v376_v28  ;;  %vm869_vm15 = vcmp.lt.f32.partialorder %v16510_v55, 14.0  ;;  %v10424_v28 = vfloor.f32 %v565_v57  ;;  %v379_v15 = vmul.f32 256.0, %v315_v6  ;;  %16517 = vst [vmem:[#allocation67_spill] sm:$0xff] %v10446_v36  ;;  %vm932_vm13 = vmand %vm804_vm1, %vm868_vm4 }
 0x280   :  { %v313_v59 = vfloor.f32 %v249_v39  ;;  %v3367_v26 = vsel %vm10398_vm0, %v10276_v45, 0.0  ;;  %v3432_v37 = vsel %vm2319_vm3, %v3365_v5, 0.0  ;;  %v3629_v32 = vadd.f32 %v3628_v56, %v3627_v50  ;;  %v10464_v16 = vpop.f32.mrf.mxu0  ;;  %vm933_vm10 = vmand %vm805_vm14, %vm869_vm15 }
 0x281   :  { %16511 = vst [vmem:[#allocation66_spill] sm:$0xff] %v10424_v28  ;;  %v254_v46 = vmul.f32 0.00390625, %v190_v52  ;;  %v3630_v19 = vsel %vm2319_vm3, %v3563_v3, 0.0  ;;  %v3434_v57 = vsel %vm2319_vm3, %v3366_v63, 0.0  ;;  %v3564_v6 = vmul.f32 %v3366_v63, %v3366_v63  ;;  %v16515_v3 = vld [vmem:[#allocation21_spill] sm:$0xff]  ;;  %16522 = vst [vmem:[#allocation70_spill] sm:$0xff] %v10464_v16 }
 0x282   :  { %v504_v39 = vadd.f32 0.5, %v10408_v7  ;;  %v570_v40 = vmul.f32 0.0625, %v506_v43  ;;  %v252_v8 = vmul.f32 0.00390625, %v188_v38  ;;  %v16514_v5 = vcvt.s32.f32 %v10373_v0 }
 0x283   :  { %v3433_v52 = vadd.f32 %v3432_v37, %v3431_v47  ;;  %vm806_vm2 = vcmp.lt.f32.partialorder %v16515_v3, 14.0  ;;  %vm870_vm12 = vcmp.lt.f32.partialorder %v16516_v62, 14.0  ;;  %v693_v20 = vmul.f32 16.0, %v10424_v28 }
 0x284   :  { %v191_v56 = vadd.f32 0.5, %v16514_v5  ;;  %v16518_v63 = vcvt.s32.f32 %v10254_v14  ;;  %v377_v43 = vmul.f32 256.0, %v313_v59  ;;  %v3565_v38 = vmul.f32 %v3367_v26, %v3367_v26  ;;  %vm934_vm1 = vmand %vm806_vm2, %vm870_vm12 }
 0x285   :  { %v3368_v5 = vsel %vm10435_vm11, %v10333_v25, 0.0  ;;  %v10457_v37 = vsub.f32 %v10220_v24, %v695_v42  ;;  %v318_v47 = vfloor.f32 %v254_v46  ;;  %v3631_v50 = vadd.f32 %v3630_v19, %v3629_v32 }
 0x286   :  { %v10451_v12 = vsub.f32 %v16518_v63, %v379_v15  ;;  %v3435_v45 = vadd.f32 %v3434_v57, %v3433_v52  ;;  %v3632_v44 = vsel %vm2319_vm3, %v3564_v6, 0.0  ;;  %v568_v10 = vmul.f32 0.0625, %v504_v39 }
 0x287   :  { %16519 = vst [vmem:[#allocation68_spill] sm:$0xff] %v10457_v37  ;;  %v10460_v1 = vfloor.f32 %v570_v40  ;;  %v316_v14 = vfloor.f32 %v252_v8  ;;  %v255_v15 = vmul.f32 0.00390625, %v191_v56  ;;  %v16521_v59 = vcvt.s32.f32 %v10417_v51  ;;  %v10486_v56 = vpop.f32.mrf.mxu0 }
 0x288   :  { %v10467_v2 = vsub.f32 %v10295_v41, %v693_v20  ;;  %v507_v24 = vadd.f32 0.5, %v10451_v12  ;;  %v16524_v46 = vcvt.s32.f32 %v10299_v11  ;;  %v10475_v32 = vadd.s32 304, %v9560_v53  ;;  %v16525_v20 = vld [vmem:[#allocation5_spill] sm:$0xff]  ;;  %v16526_v41 = vld [vmem:[#allocation31_spill] sm:$0xff]  ;;  %16527 = vst [vmem:[#allocation72_spill] sm:$0xff] %v10486_v56 }
 0x289   :  { %16520 = vst [vmem:[#allocation69_spill] sm:$0xff] %v10460_v1  ;;  %v189_v63 = vadd.f32 0.5, %v16521_v59  ;;  %v3436_v8 = vsel %vm2319_vm3, %v3367_v26, 0.0  ;;  %v3566_v19 = vmul.f32 %v3368_v5, %v3368_v5  ;;  %v3633_v57 = vadd.f32 %v3632_v44, %v3631_v50 }
 0x28a   :  { %16523 = vst [vmem:[#allocation71_spill] sm:$0xff] %v10467_v2  ;;  %v10472_v42 = vsub.f32 %v16524_v46, %v377_v43  ;;  %vm807_vm0 = vcmp.lt.f32.partialorder %v16525_v20, 14.0  ;;  %vm871_vm11 = vcmp.lt.f32.partialorder %v16526_v41, 14.0  ;;  %v382_v6 = vmul.f32 256.0, %v318_v47 }
 0x28b   :  { %v3634_v11 = vsel %vm2319_vm3, %v3565_v38, 0.0  ;;  %v3438_v39 = vsel %vm2319_vm3, %v3368_v5, 0.0  ;;  %v3437_v40 = vadd.f32 %v3436_v8, %v3435_v45  ;;  %v10488_v26 = vfloor.f32 %v568_v10  ;;  %vm10552_vm2 = vmand %vm807_vm0, %vm871_vm11 }
 0x28c   :  { %v698_v44 = vmul.f32 16.0, %v10460_v1  ;;  %v380_v50 = vmul.f32 256.0, %v316_v14  ;;  %v319_v52 = vfloor.f32 %v255_v15  ;;  %v253_v43 = vmul.f32 0.00390625, %v189_v63  ;;  %v10507_v63 = vpop.f32.mrf.mxu0 }
 0x28d   :  { %16528 = vst [vmem:[#allocation73_spill] sm:$0xff] %v10488_v26  ;;  %v3369_v47 = vsel %vm932_vm13, %v10420_v58, 0.0  ;;  %v571_v38 = vmul.f32 0.0625, %v507_v24  ;;  %v505_v5 = vadd.f32 0.5, %v10472_v42  ;;  %v15959_v45 = vcvt.s32.f32 %v10475_v32  ;;  %16530 = vst [vmem:[#allocation74_spill] sm:$0xff] %v10507_v63 }
 0x28e   :  { %v3636_v10 = vsel %vm2319_vm3, %v3566_v19, 0.0  ;;  %v3635_v59 = vadd.f32 %v3634_v11, %v3633_v57  ;;  %v16529_v46 = vcvt.s32.f32 %v10331_v21  ;;  %v10504_v55 = vadd.s32 288, %v9560_v53 }
 0x28f   :  { %v3439_v14 = vadd.f32 %v3438_v39, %v3437_v40  ;;  %v3370_v15 = vsel %vm933_vm10, %v10464_v16, 0.0  ;;  %v696_v24 = vmul.f32 16.0, %v10488_v26  ;;  %v10511_v27 = vadd.s32 312, %v9560_v53 }
 0x290   :  { %v10501_v8 = vsub.f32 %v16529_v46, %v382_v6  ;;  %v3567_v21 = vmul.f32 %v3369_v47, %v3369_v47  ;;  %v16531_v19 = vcvt.s32.f32 %v10344_v61  ;;  %v383_v6 = vmul.f32 256.0, %v319_v52 }
 0x291   :  { %v317_v11 = vfloor.f32 %v253_v43  ;;  %v10522_v39 = vsub.f32 %v10364_v23, %v698_v44  ;;  %v10524_v40 = vfloor.f32 %v571_v38  ;;  %v569_v46 = vmul.f32 0.0625, %v505_v5  ;;  %v10534_v44 = vpop.f32.mrf.mxu0 }
 0x292   :  { %v10519_v57 = vsub.f32 %v16531_v19, %v380_v50  ;;  %v194_v49 = vadd.f32 0.5, %v15959_v45  ;;  %v3637_v62 = vadd.f32 %v3636_v10, %v3635_v59  ;;  %v3568_v9 = vmul.f32 %v3370_v15, %v3370_v15  ;;  %16534 = vst [vmem:[#allocation77_spill] sm:$0xff] %v10534_v44 }
 0x293   :  { %16532 = vst [vmem:[#allocation75_spill] sm:$0xff] %v10522_v39  ;;  %16533 = vst [vmem:[#allocation76_spill] sm:$0xff] %v10524_v40  ;;  %vm808_vm10 = vcmp.lt.f32.partialorder %v10062_v35, 14.0  ;;  %vm872_vm4 = vcmp.lt.f32.partialorder %v10137_v31, 14.0  ;;  %v510_v61 = vadd.f32 0.5, %v10501_v8  ;;  %v3371_v52 = vsel %vm934_vm1, %v10384_v29, 0.0  ;;  %v10568_v58 = vpop.f32.mrf.mxu0 }
 0x294   :  { %v3440_v23 = vsel %vm2319_vm3, %v3369_v47, 0.0  ;;  %v10537_v43 = vsub.f32 %v10408_v7, %v696_v24  ;;  %v3638_v5 = vsel %vm2319_vm3, %v3567_v21, 0.0  ;;  %vm809_vm14 = vcmp.lt.f32.partialorder %v10093_v30, 14.0  ;;  %v16539_v24 = vld [vmem:[#allocation35_spill] sm:$0xff]  ;;  %16543 = vst [vmem:[#allocation80_spill] sm:$0xff] %v10568_v58  ;;  %vm10601_vm0 = vmand %vm808_vm10, %vm872_vm4 }
 0x295   :  { %vm873_vm15 = vcmp.lt.f32.partialorder %v10199_v34, 14.0  ;;  %v508_v10 = vadd.f32 0.5, %v10519_v57  ;;  %v16536_v59 = vcvt.s32.f32 %v10373_v0  ;;  %v381_v47 = vmul.f32 256.0, %v317_v11  ;;  %v16540_v21 = vld [vmem:[#allocation23_spill] sm:$0xff] }
 0x296   :  { %16535 = vst [vmem:[#allocation78_spill] sm:$0xff] %v10537_v43  ;;  %vm810_vm12 = vcmp.lt.f32.partialorder %v16539_v24, 14.0  ;;  %vm874_vm13 = vcmp.lt.f32.partialorder %v16540_v21, 14.0  ;;  %v699_v45 = vmul.f32 16.0, %v10524_v40  ;;  %v10559_v38 = vfloor.f32 %v569_v46  ;;  %vm937_vm10 = vmand %vm809_vm14, %vm873_vm15 }
 0x297   :  { %v10546_v19 = vsub.f32 %v16536_v59, %v383_v6  ;;  %v258_v0 = vmul.f32 0.00390625, %v194_v49  ;;  %v10562_v6 = vadd.s32 296, %v9560_v53  ;;  %v3442_v11 = vsel %vm2319_vm3, %v3370_v15, 0.0  ;;  %vm938_vm4 = vmand %vm810_vm12, %vm874_vm13 }
 0x298   :  { %16541 = vst [vmem:[#allocation79_spill] sm:$0xff] %v10559_v38  ;;  %v3640_v59 = vsel %vm2319_vm3, %v3568_v9, 0.0  ;;  %v574_v50 = vmul.f32 0.0625, %v510_v61  ;;  %v16542_v41 = vcvt.s32.f32 %v10504_v55  ;;  %v3569_v3 = vmul.f32 %v3371_v52, %v3371_v52 }
 0x299   :  { %v3441_v29 = vadd.f32 %v3440_v23, %v3439_v14  ;;  %v3639_v16 = vadd.f32 %v3638_v5, %v3637_v62  ;;  %v16544_v46 = vcvt.s32.f32 %v10511_v27  ;;  %v3372_v49 = vsel %vm10552_vm2, %v10446_v36, 0.0  ;;  %v10580_v14 = vpop.f32.mrf.mxu0 }
 0x29a   :  { %v192_v20 = vadd.f32 0.5, %v16542_v41  ;;  %v572_v40 = vmul.f32 0.0625, %v508_v10  ;;  %v511_v15 = vadd.f32 0.5, %v10546_v19  ;;  %v16545_v9 = vcvt.s32.f32 %v10417_v51  ;;  %16546 = vst [vmem:[#allocation81_spill] sm:$0xff] %v10580_v14 }
 0x29b   :  { %v195_v25 = vadd.f32 0.5, %v16544_v46  ;;  %v3443_v41 = vadd.f32 %v3442_v11, %v3441_v29  ;;  %v3641_v39 = vadd.f32 %v3640_v59, %v3639_v16  ;;  %v322_v62 = vfloor.f32 %v258_v0 }
 0x29c   :  { %v10578_v61 = vsub.f32 %v16545_v9, %v381_v47  ;;  %v15976_v23 = vcvt.s32.f32 %v10562_v6  ;;  %v697_v5 = vmul.f32 16.0, %v10559_v38  ;;  %v10584_v46 = vfloor.f32 %v574_v50 }
 0x29d   :  { %v256_v7 = vmul.f32 0.00390625, %v192_v20  ;;  %v10587_v10 = vadd.s32 336, %v9560_v53  ;;  %v3444_v36 = vsel %vm2319_vm3, %v3371_v52, 0.0  ;;  %v3570_v51 = vmul.f32 %v3372_v49, %v3372_v49 }
 0x29e   :  { %16547 = vst [vmem:[#allocation82_spill] sm:$0xff] %v10584_v46  ;;  %v10591_v47 = vsub.f32 %v10451_v12, %v699_v45  ;;  %v259_v16 = vmul.f32 0.00390625, %v195_v25  ;;  %v3642_v29 = vsel %vm2319_vm3, %v3569_v3, 0.0  ;;  %v10594_v0 = vfloor.f32 %v572_v40  ;;  %v16552_v12 = vld [vmem:[#allocation53_spill] sm:$0xff]  ;;  %v10607_v25 = vpop.f32.mrf.mxu0 }
 0x29f   :  { %v575_v11 = vmul.f32 0.0625, %v511_v15  ;;  %v509_v59 = vadd.f32 0.5, %v10578_v61  ;;  %v3445_v50 = vadd.f32 %v3444_v36, %v3443_v41  ;;  %v3643_v9 = vadd.f32 %v3642_v29, %v3641_v39  ;;  %16553 = vst [vmem:[#allocation85_spill] sm:$0xff] %v10607_v25 }
 0x2a0   :  { %16548 = vst [vmem:[#allocation83_spill] sm:$0xff] %v10591_v47  ;;  %16549 = vst [vmem:[#allocation84_spill] sm:$0xff] %v10594_v0  ;;  %vm811_vm11 = vcmp.lt.f32.partialorder %v16552_v12, 14.0  ;;  %vm875_vm1 = vcmp.lt.f32.partialorder %v10174_v60, 14.0  ;;  %v386_v3 = vmul.f32 256.0, %v322_v62  ;;  %v193_v45 = vadd.f32 0.5, %v15976_v23 }
 0x2a1   :  { %v10612_v36 = vsub.f32 %v10472_v42, %v697_v5  ;;  %v702_v39 = vmul.f32 16.0, %v10584_v46  ;;  %v320_v40 = vfloor.f32 %v256_v7  ;;  %v3446_v15 = vsel %vm2319_vm3, %v3372_v49, 0.0  ;;  %vm939_vm13 = vmand %vm811_vm11, %vm875_vm1 }
 0x2a2   :  { %v3644_v41 = vsel %vm2319_vm3, %v3570_v51, 0.0  ;;  %v323_v62 = vfloor.f32 %v259_v16  ;;  %v10623_v29 = vadd.s32 320, %v9560_v53  ;;  %v3373_v42 = vsel %vm10601_vm0, %v10507_v63, 0.0  ;;  %v10635_v16 = vpop.f32.mrf.mxu0 }
 0x2a3   :  { %16554 = vst [vmem:[#allocation86_spill] sm:$0xff] %v10612_v36  ;;  %v700_v49 = vmul.f32 16.0, %v10594_v0  ;;  %v10633_v5 = vfloor.f32 %v575_v11  ;;  %v573_v7 = vmul.f32 0.0625, %v509_v59  ;;  %v3447_v51 = vadd.f32 %v3446_v15, %v3445_v50  ;;  %16556 = vst [vmem:[#allocation88_spill] sm:$0xff] %v10635_v16 }
 0x2a4   :  { %v3645_v23 = vadd.f32 %v3644_v41, %v3643_v9  ;;  %v16557_v52 = vcvt.s32.f32 %v10475_v32  ;;  %v257_v21 = vmul.f32 0.00390625, %v193_v45  ;;  %v3374_v24 = vsel %vm937_vm10, %v10568_v58, 0.0 }
 0x2a5   :  { %16555 = vst [vmem:[#allocation87_spill] sm:$0xff] %v10633_v5  ;;  %v10643_v30 = vsub.f32 %v10501_v8, %v702_v39  ;;  %v384_v20 = vmul.f32 256.0, %v320_v40  ;;  %v16559_v31 = vcvt.s32.f32 %v10587_v10  ;;  %v3375_v59 = vsel %vm938_vm4, %v10486_v56, 0.0  ;;  %v10660_v40 = vpop.f32.mrf.mxu0 }
 0x2a6   :  { %v10639_v34 = vsub.f32 %v16557_v52, %v386_v3  ;;  %v3571_v50 = vmul.f32 %v3373_v42, %v3373_v42  ;;  %vm812_vm14 = vcmp.lt.f32.partialorder %v10098_v13, 14.0  ;;  %vm876_vm15 = vcmp.lt.f32.partialorder %v10214_v22, 14.0  ;;  %16562 = vst [vmem:[#allocation92_spill] sm:$0xff] %v10660_v40 }
 0x2a7   :  { %16558 = vst [vmem:[#allocation89_spill] sm:$0xff] %v10643_v30  ;;  %v198_v11 = vadd.f32 0.5, %v16559_v31  ;;  %v387_v32 = vmul.f32 256.0, %v323_v62  ;;  %v3448_v3 = vsel %vm2319_vm3, %v3373_v42, 0.0  ;;  %v10653_v45 = vsub.f32 %v10519_v57, %v700_v49  ;;  %v10672_v35 = vpop.f32.mrf.mxu0  ;;  %vm10724_vm11 = vmand %vm812_vm14, %vm876_vm15 }
 0x2a8   :  { %v703_v8 = vmul.f32 16.0, %v10633_v5  ;;  %v10656_v39 = vfloor.f32 %v573_v7  ;;  %v3572_v31 = vmul.f32 %v3374_v24, %v3374_v24  ;;  %vm813_vm2 = vcmp.lt.f32.partialorder %v10151_v17, 14.0  ;;  %16564 = vst [vmem:[#allocation93_spill] sm:$0xff] %v10672_v35  ;;  %v16581_v17 = vld [vmem:[#allocation47_spill] sm:$0xff] }
 0x2a9   :  { %16560 = vst [vmem:[#allocation90_spill] sm:$0xff] %v10653_v45  ;;  %vm877_vm12 = vcmp.lt.f32.partialorder %v10244_v33, 14.0  ;;  %v514_v52 = vadd.f32 0.5, %v10639_v34  ;;  %v321_v15 = vfloor.f32 %v257_v21  ;;  %v10664_v41 = vadd.s32 344, %v9560_v53 }
 0x2aa   :  { %16561 = vst [vmem:[#allocation91_spill] sm:$0xff] %v10656_v39  ;;  %v3452_v57 = vsel %vm2319_vm3, %v3375_v59, 0.0  ;;  %v3573_v62 = vmul.f32 %v3375_v59, %v3375_v59  ;;  %v16563_v42 = vcvt.s32.f32 %v10504_v55  ;;  %v262_v7 = vmul.f32 0.00390625, %v198_v11  ;;  %vm941_vm14 = vmand %vm813_vm2, %vm877_vm12 }
 0x2ab   :  { %v3646_v9 = vsel %vm2319_vm3, %v3571_v50, 0.0  ;;  %v16565_v56 = vcvt.s32.f32 %v10511_v27  ;;  %v16566_v21 = vcvt.s32.f32 %v10623_v29  ;;  %v10681_v5 = vadd.s32 328, %v9560_v53 }
 0x2ac   :  { %v10669_v49 = vsub.f32 %v16563_v42, %v384_v20  ;;  %v3449_v59 = vadd.f32 %v3448_v3, %v3447_v51  ;;  %v3450_v55 = vsel %vm2319_vm3, %v3374_v24, 0.0  ;;  %v10689_v20 = vsub.f32 %v10546_v19, %v703_v8  ;;  %v10701_v8 = vpop.f32.mrf.mxu0 }
 0x2ad   :  { %v10676_v58 = vsub.f32 %v16565_v56, %v387_v32  ;;  %v196_v63 = vadd.f32 0.5, %v16566_v21  ;;  %v701_v27 = vmul.f32 16.0, %v10656_v39  ;;  %v3648_v56 = vsel %vm2319_vm3, %v3572_v31, 0.0  ;;  %16568 = vst [vmem:[#allocation95_spill] sm:$0xff] %v10701_v8 }
 0x2ae   :  { %16567 = vst [vmem:[#allocation94_spill] sm:$0xff] %v10689_v20  ;;  %v578_v11 = vmul.f32 0.0625, %v514_v52  ;;  %v385_v50 = vmul.f32 256.0, %v321_v15  ;;  %v3647_v42 = vadd.f32 %v3646_v9, %v3645_v23  ;;  %vm814_vm0 = vcmp.lt.f32.partialorder %v10095_v54, 14.0 }
 0x2af   :  { %vm878_vm10 = vcmp.lt.f32.partialorder %v10202_v4, 14.0  ;;  %v512_v51 = vadd.f32 0.5, %v10669_v49  ;;  %v326_v3 = vfloor.f32 %v262_v7  ;;  %v10698_v24 = vadd.s32 368, %v9560_v53 }
 0x2b0   :  { %v3376_v19 = vsel %vm939_vm13, %v10534_v44, 0.0  ;;  %v515_v31 = vadd.f32 0.5, %v10676_v58  ;;  %v260_v52 = vmul.f32 0.00390625, %v196_v63  ;;  %v3650_v23 = vsel %vm2319_vm3, %v3573_v62, 0.0  ;;  %v16580_v62 = vld [vmem:[#allocation39_spill] sm:$0xff]  ;;  %vm10772_vm12 = vmand %vm814_vm0, %vm878_vm10 }
 0x2b1   :  { %v3451_v9 = vadd.f32 %v3450_v55, %v3449_v59  ;;  %v3649_v21 = vadd.f32 %v3648_v56, %v3647_v42  ;;  %v10707_v32 = vadd.s32 352, %v9560_v53  ;;  %v10710_v7 = vsub.f32 %v10578_v61, %v701_v27  ;;  %v16575_v61 = vld [vmem:[#allocation44_spill] sm:$0xff]  ;;  %v10732_v27 = vpop.f32.mrf.mxu0 }
 0x2b2   :  { %v10712_v60 = vfloor.f32 %v578_v11  ;;  %v16571_v12 = vcvt.s32.f32 %v10562_v6  ;;  %v16572_v63 = vcvt.s32.f32 %v10664_v41  ;;  %v3574_v15 = vmul.f32 %v3376_v19, %v3376_v19  ;;  %16576 = vst [vmem:[#allocation98_spill] sm:$0xff] %v10732_v27 }
 0x2b3   :  { %16569 = vst [vmem:[#allocation96_spill] sm:$0xff] %v10710_v7  ;;  %vm815_vm1 = vcmp.lt.f32.partialorder %v10149_v18, 14.0  ;;  %vm879_vm4 = vcmp.lt.f32.partialorder %v16575_v61, 14.0  ;;  %v576_v59 = vmul.f32 0.0625, %v512_v51  ;;  %v390_v6 = vmul.f32 256.0, %v326_v3  ;;  %v10761_v13 = vpop.f32.mrf.mxu0 }
 0x2b4   :  { %16570 = vst [vmem:[#allocation97_spill] sm:$0xff] %v10712_v60  ;;  %v10716_v44 = vsub.f32 %v16571_v12, %v385_v50  ;;  %v199_v20 = vadd.f32 0.5, %v16572_v63  ;;  %v16004_v12 = vcvt.s32.f32 %v10698_v24  ;;  %v3454_v55 = vsel %vm2319_vm3, %v3376_v19, 0.0  ;;  %16582 = vst [vmem:[#allocation100_spill] sm:$0xff] %v10761_v13 }
 0x2b5   :  { %v579_v56 = vmul.f32 0.0625, %v515_v31  ;;  %v324_v11 = vfloor.f32 %v260_v52  ;;  %v16577_v50 = vcvt.s32.f32 %v10681_v5  ;;  %v3453_v63 = vadd.f32 %v3452_v57, %v3451_v9  ;;  %vm943_vm0 = vmand %vm815_vm1, %vm879_vm4 }
 0x2b6   :  { %v3651_v22 = vadd.f32 %v3650_v23, %v3649_v21  ;;  %v10742_v3 = vadd.s32 376, %v9560_v53  ;;  %v3377_v19 = vsel %vm10724_vm11, %v10607_v25, 0.0  ;;  %v706_v31 = vmul.f32 16.0, %v10712_v60 }
 0x2b7   :  { %v197_v42 = vadd.f32 0.5, %v16577_v50  ;;  %v513_v52 = vadd.f32 0.5, %v10716_v44  ;;  %v263_v57 = vmul.f32 0.00390625, %v199_v20  ;;  %v3652_v23 = vsel %vm2319_vm3, %v3574_v15, 0.0 }
 0x2b8   :  { %v10750_v9 = vfloor.f32 %v576_v59  ;;  %v16579_v21 = vcvt.s32.f32 %v10587_v10  ;;  %v202_v51 = vadd.f32 0.5, %v16004_v12  ;;  %v3378_v33 = vsel %vm941_vm14, %v10660_v40, 0.0 }
 0x2b9   :  { %vm816_vm15 = vcmp.lt.f32.partialorder %v16580_v62, 14.0  ;;  %vm880_vm2 = vcmp.lt.f32.partialorder %v16581_v17, 14.0  ;;  %v10763_v20 = vfloor.f32 %v579_v56  ;;  %v388_v15 = vmul.f32 256.0, %v324_v11  ;;  %v16587_v56 = vld [vmem:[#allocation41_spill] sm:$0xff]  ;;  %v16588_v11 = vld [vmem:[#allocation59_spill] sm:$0xff] }
 0x2ba   :  { %16578 = vst [vmem:[#allocation99_spill] sm:$0xff] %v10750_v9  ;;  %v10754_v50 = vsub.f32 %v16579_v21, %v390_v6  ;;  %v261_v59 = vmul.f32 0.00390625, %v197_v42  ;;  %v3455_v25 = vadd.f32 %v3454_v55, %v3453_v63  ;;  %v3575_v60 = vmul.f32 %v3377_v19, %v3377_v19  ;;  %v10778_v55 = vpop.f32.mrf.mxu0  ;;  %vm10828_vm1 = vmand %vm816_vm15, %vm880_vm2 }
 0x2bb   :  { %16583 = vst [vmem:[#allocation101_spill] sm:$0xff] %v10763_v20  ;;  %v16584_v10 = vcvt.s32.f32 %v10707_v32  ;;  %v3653_v40 = vadd.f32 %v3652_v23, %v3651_v22  ;;  %vm817_vm13 = vcmp.lt.f32.partialorder %v16587_v56, 14.0  ;;  %vm881_vm11 = vcmp.lt.f32.partialorder %v16588_v11, 14.0  ;;  %16589 = vst [vmem:[#allocation102_spill] sm:$0xff] %v10778_v55 }
 0x2bc   :  { %v10781_v42 = vsub.f32 %v10639_v34, %v706_v31  ;;  %v577_v63 = vmul.f32 0.0625, %v513_v52  ;;  %v3456_v21 = vsel %vm2319_vm3, %v3377_v19, 0.0  ;;  %v3576_v4 = vmul.f32 %v3378_v33, %v3378_v33  ;;  %vm945_vm15 = vmand %vm817_vm13, %vm881_vm11 }
 0x2bd   :  { %v200_v6 = vadd.f32 0.5, %v16584_v10  ;;  %v327_v10 = vfloor.f32 %v263_v57  ;;  %v518_v54 = vadd.f32 0.5, %v10754_v50  ;;  %v266_v30 = vmul.f32 0.00390625, %v202_v51 }
 0x2be   :  { %16590 = vst [vmem:[#allocation103_spill] sm:$0xff] %v10781_v42  ;;  %v704_v46 = vmul.f32 16.0, %v10750_v9  ;;  %v707_v22 = vmul.f32 16.0, %v10763_v20  ;;  %v16591_v23 = vcvt.s32.f32 %v10623_v29  ;;  %v325_v39 = vfloor.f32 %v261_v59 }
 0x2bf   :  { %v3379_v34 = vsel %vm10772_vm12, %v10580_v14, 0.0  ;;  %v3654_v31 = vsel %vm2319_vm3, %v3575_v60, 0.0  ;;  %v264_v19 = vmul.f32 0.00390625, %v200_v6  ;;  %v16592_v52 = vcvt.s32.f32 %v10742_v3  ;;  %v16595_v60 = vld [vmem:[#allocation30_spill] sm:$0xff] }
 0x2c0   :  { %v10789_v7 = vsub.f32 %v16591_v23, %v388_v15  ;;  %v3457_v51 = vadd.f32 %v3456_v21, %v3455_v25  ;;  %v3458_v29 = vsel %vm2319_vm3, %v3378_v33, 0.0  ;;  %v10802_v15 = vpop.f32.mrf.mxu0  ;;  %v10804_v59 = vfloor.f32 %v577_v63  ;;  %v16596_v6 = vld [vmem:[#allocation46_spill] sm:$0xff] }
 0x2c1   :  { %v203_v57 = vadd.f32 0.5, %v16592_v52  ;;  %16593 = vst [vmem:[#allocation104_spill] sm:$0xff] %v10802_v15  ;;  %v391_v12 = vmul.f32 256.0, %v327_v10  ;;  %v3656_v23 = vsel %vm2319_vm3, %v3576_v4, 0.0  ;;  %vm818_vm10 = vcmp.lt.f32.partialorder %v16595_v60, 14.0 }
 0x2c2   :  { %16594 = vst [vmem:[#allocation105_spill] sm:$0xff] %v10804_v59  ;;  %vm882_vm14 = vcmp.lt.f32.partialorder %v16596_v6, 14.0  ;;  %v582_v52 = vmul.f32 0.0625, %v518_v54  ;;  %v330_v25 = vfloor.f32 %v266_v30  ;;  %v10810_v21 = vadd.s32 360, %v9560_v53  ;;  %v10814_v9 = vpop.f32.mrf.mxu0 }
 0x2c3   :  { %v3577_v61 = vmul.f32 %v3379_v34, %v3379_v34  ;;  %v3655_v18 = vadd.f32 %v3654_v31, %v3653_v40  ;;  %v516_v33 = vadd.f32 0.5, %v10789_v7  ;;  %v389_v14 = vmul.f32 256.0, %v325_v39  ;;  %16597 = vst [vmem:[#allocation106_spill] sm:$0xff] %v10814_v9  ;;  %v16603_v40 = vld [vmem:[#allocation48_spill] sm:$0xff] }
 0x2c4   :  { %v3380_v63 = vsel %vm943_vm0, %v10635_v16, 0.0  ;;  %v3459_v20 = vadd.f32 %v3458_v29, %v3457_v51  ;;  %v328_v10 = vfloor.f32 %v264_v19  ;;  %v267_v42 = vmul.f32 0.00390625, %v203_v57 }
 0x2c5   :  { %v3657_v4 = vadd.f32 %v3656_v23, %v3655_v18  ;;  %v10817_v45 = vsub.f32 %v10669_v49, %v704_v46  ;;  %v705_v30 = vmul.f32 16.0, %v10804_v59  ;;  %v16599_v54 = vcvt.s32.f32 %v10664_v41  ;;  %v16602_v18 = vld [vmem:[#allocation40_spill] sm:$0xff] }
 0x2c6   :  { %vm819_vm4 = vcmp.lt.f32.partialorder %v16602_v18, 14.0  ;;  %vm883_vm12 = vcmp.lt.f32.partialorder %v16603_v40, 14.0  ;;  %v10835_v46 = vsub.f32 %v10676_v58, %v707_v22  ;;  %v10837_v49 = vfloor.f32 %v582_v52 }
 0x2c7   :  { %16598 = vst [vmem:[#allocation107_spill] sm:$0xff] %v10817_v45  ;;  %v10822_v0 = vsub.f32 %v16599_v54, %v391_v12  ;;  %v394_v41 = vmul.f32 256.0, %v330_v25  ;;  %v16028_v31 = vcvt.s32.f32 %v10810_v21  ;;  %v3460_v19 = vsel %vm2319_vm3, %v3379_v34, 0.0  ;;  %v10853_v25 = vpop.f32.mrf.mxu0 }
 0x2c8   :  { %16604 = vst [vmem:[#allocation108_spill] sm:$0xff] %v10835_v46  ;;  %16605 = vst [vmem:[#allocation109_spill] sm:$0xff] %v10837_v49  ;;  %v3578_v57 = vmul.f32 %v3380_v63, %v3380_v63  ;;  %v580_v51 = vmul.f32 0.0625, %v516_v33  ;;  %v16606_v29 = vcvt.s32.f32 %v10681_v5  ;;  %v3658_v23 = vsel %vm2319_vm3, %v3577_v61, 0.0 }
 0x2c9   :  { %v3461_v54 = vadd.f32 %v3460_v19, %v3459_v20  ;;  %v392_v58 = vmul.f32 256.0, %v328_v10  ;;  %v331_v22 = vfloor.f32 %v267_v42  ;;  %v3659_v52 = vadd.f32 %v3658_v23, %v3657_v4  ;;  %16607 = vst [vmem:[#allocation110_spill] sm:$0xff] %v10853_v25  ;;  %v16609_v20 = vld [vmem:[#allocation60_spill] sm:$0xff]  ;;  %v10871_v39 = vpop.f32.mrf.mxu0 }
 0x2ca   :  { %v10843_v12 = vsub.f32 %v16606_v29, %v389_v14  ;;  %v3381_v34 = vsel %vm10828_vm1, %v10701_v8, 0.0  ;;  %v10856_v14 = vsub.f32 %v10716_v44, %v705_v30  ;;  %v519_v5 = vadd.f32 0.5, %v10822_v0  ;;  %16611 = vst [vmem:[#allocation112_spill] sm:$0xff] %v10871_v39  ;;  %vm946_vm1 = vmand %vm818_vm10, %vm882_vm14  ;;  %v16622_v8 = vld [vmem:[#allocation63_spill] sm:$0xff] }
 0x2cb   :  { %v3462_v61 = vsel %vm2319_vm3, %v3380_v63, 0.0  ;;  %vm820_vm2 = vcmp.lt.f32.partialorder %v16609_v20, 14.0  ;;  %vm884_vm13 = vcmp.lt.f32.partialorder %v10390_v48, 14.0  ;;  %v710_v42 = vmul.f32 16.0, %v10837_v49  ;;  %vm10914_vm10 = vmand %vm819_vm4, %vm883_vm12 }
 0x2cc   :  { %16608 = vst [vmem:[#allocation111_spill] sm:$0xff] %v10856_v14  ;;  %v16610_v33 = vcvt.s32.f32 %v10698_v24  ;;  %v201_v4 = vadd.f32 0.5, %v16028_v31  ;;  %v3660_v44 = vsel %vm2319_vm3, %v3578_v57, 0.0  ;;  %v3382_v30 = vsel %vm945_vm15, %v10761_v13, 0.0 }
 0x2cd   :  { %v10873_v63 = vfloor.f32 %v580_v51  ;;  %v517_v19 = vadd.f32 0.5, %v10843_v12  ;;  %v3463_v29 = vadd.f32 %v3462_v61, %v3461_v54  ;;  %v3579_v23 = vmul.f32 %v3381_v34, %v3381_v34 }
 0x2ce   :  { %v10865_v10 = vsub.f32 %v16610_v33, %v394_v41  ;;  %vm821_vm11 = vcmp.lt.f32.partialorder %v10424_v28, 14.0  ;;  %vm885_vm0 = vcmp.lt.f32.partialorder %v10467_v2, 14.0  ;;  %v16613_v24 = vcvt.s32.f32 %v10707_v32 }
 0x2cf   :  { %16612 = vst [vmem:[#allocation113_spill] sm:$0xff] %v10873_v63  ;;  %v395_v33 = vmul.f32 256.0, %v331_v22  ;;  %v3661_v57 = vadd.f32 %v3660_v44, %v3659_v52  ;;  %v583_v51 = vmul.f32 0.0625, %v519_v5  ;;  %v10887_v31 = vadd.s32 400, %v9560_v53 }
 0x2d0   :  { %v10880_v41 = vsub.f32 %v16613_v24, %v392_v58  ;;  %v10890_v54 = vadd.s32 384, %v9560_v53  ;;  %v3580_v61 = vmul.f32 %v3382_v30, %v3382_v30  ;;  %v10893_v11 = vsub.f32 %v10754_v50, %v710_v42  ;;  %v10897_v24 = vpop.f32.mrf.mxu0 }
 0x2d1   :  { %v522_v32 = vadd.f32 0.5, %v10865_v10  ;;  %v265_v58 = vmul.f32 0.00390625, %v201_v4  ;;  %v3464_v22 = vsel %vm2319_vm3, %v3381_v34, 0.0  ;;  %16615 = vst [vmem:[#allocation115_spill] sm:$0xff] %v10897_v24  ;;  %v708_v52 = vmul.f32 16.0, %v10873_v63 }
 0x2d2   :  { %16614 = vst [vmem:[#allocation114_spill] sm:$0xff] %v10893_v11  ;;  %v581_v5 = vmul.f32 0.0625, %v517_v19  ;;  %v10901_v44 = vadd.s32 408, %v9560_v53  ;;  %v3383_v6 = vsel %vm946_vm1, %v10672_v35, 0.0  ;;  %v3662_v60 = vsel %vm2319_vm3, %v3579_v23, 0.0  ;;  %vm10941_vm1 = vmand %vm820_vm2, %vm884_vm13 }
 0x2d3   :  { %v520_v50 = vadd.f32 0.5, %v10880_v41  ;;  %v16616_v42 = vcvt.s32.f32 %v10742_v3  ;;  %v3466_v4 = vsel %vm2319_vm3, %v3382_v30, 0.0  ;;  %v10919_v19 = vfloor.f32 %v583_v51  ;;  %v10928_v30 = vpop.f32.mrf.mxu0  ;;  %vm949_vm2 = vmand %vm821_vm11, %vm885_vm0 }
 0x2d4   :  { %v16045_v23 = vcvt.s32.f32 %v10887_v31  ;;  %v3465_v62 = vadd.f32 %v3464_v22, %v3463_v29  ;;  %v3664_v3 = vsel %vm2319_vm3, %v3580_v61, 0.0  ;;  %v586_v40 = vmul.f32 0.0625, %v522_v32  ;;  %16623 = vst [vmem:[#allocation117_spill] sm:$0xff] %v10928_v30 }
 0x2d5   :  { %v10908_v56 = vsub.f32 %v16616_v42, %v395_v33  ;;  %16619 = vst [vmem:[#allocation116_spill] sm:$0xff] %v10919_v19  ;;  %v16620_v33 = vld [vmem:[#allocation50_spill] sm:$0xff]  ;;  %v16621_v42 = vld [vmem:[#allocation64_spill] sm:$0xff]  ;;  %v329_v18 = vfloor.f32 %v265_v58  ;;  %v3581_v35 = vmul.f32 %v3383_v6, %v3383_v6  ;;  %v3663_v13 = vadd.f32 %v3662_v60, %v3661_v57 }
 0x2d6   :  { %vm822_vm14 = vcmp.lt.f32.partialorder %v16620_v33, 14.0  ;;  %vm886_vm15 = vcmp.lt.f32.partialorder %v16621_v42, 14.0  ;;  %vm823_vm4 = vcmp.lt.f32.partialorder %v16622_v8, 14.0  ;;  %vm887_vm12 = vcmp.lt.f32.partialorder %v10457_v37, 14.0  ;;  %v16647_v8 = vld [vmem:[#allocation84_spill] sm:$0xff] }
 0x2d7   :  { %v10930_v51 = vfloor.f32 %v581_v5  ;;  %v3384_v61 = vsel %vm10914_vm10, %v10732_v27, 0.0  ;;  %v3467_v22 = vadd.f32 %v3466_v4, %v3465_v62  ;;  %v584_v17 = vmul.f32 0.0625, %v520_v50  ;;  %vm11001_vm11 = vmand %vm822_vm14, %vm886_vm15 }
 0x2d8   :  { %v523_v32 = vadd.f32 0.5, %v10908_v56  ;;  %v3665_v58 = vadd.f32 %v3664_v3, %v3663_v13  ;;  %v711_v57 = vmul.f32 16.0, %v10919_v19  ;;  %v206_v5 = vadd.f32 0.5, %v16045_v23  ;;  %vm951_vm0 = vmand %vm823_vm4, %vm887_vm12 }
 0x2d9   :  { %16624 = vst [vmem:[#allocation118_spill] sm:$0xff] %v10930_v51  ;;  %v16627_v34 = vcvt.s32.f32 %v10890_v54  ;;  %v3468_v50 = vsel %vm2319_vm3, %v3383_v6, 0.0  ;;  %vm824_vm10 = vcmp.lt.f32.partialorder %v10488_v26, 14.0  ;;  %vm888_vm9 = vcmp.lt.f32.partialorder %v10537_v43, 14.0 }
 0x2da   :  { %v10954_v13 = vsub.f32 %v10789_v7, %v708_v52  ;;  %v10956_v4 = vfloor.f32 %v586_v40  ;;  %v393_v3 = vmul.f32 256.0, %v329_v18  ;;  %v3666_v29 = vsel %vm2319_vm3, %v3581_v35, 0.0  ;;  %vm11037_vm15 = vmand %vm824_vm10, %vm888_vm9 }
 0x2db   :  { %v204_v62 = vadd.f32 0.5, %v16627_v34  ;;  %v3582_v48 = vmul.f32 %v3384_v61, %v3384_v61  ;;  %v10963_v34 = vpop.f32.mrf.mxu0  ;;  %v709_v6 = vmul.f32 16.0, %v10930_v51  ;;  %v16631_v23 = vcvt.s32.f32 %v10901_v44 }
 0x2dc   :  { %16628 = vst [vmem:[#allocation119_spill] sm:$0xff] %v10954_v13  ;;  %16629 = vst [vmem:[#allocation120_spill] sm:$0xff] %v10956_v4  ;;  %v3469_v7 = vadd.f32 %v3468_v50, %v3467_v22  ;;  %v3385_v18 = vsel %vm10941_vm1, %v10802_v15, 0.0  ;;  %vm825_vm13 = vcmp.lt.f32.partialorder %v10559_v38, 14.0  ;;  %vm889_vm8 = vcmp.lt.f32.partialorder %v10612_v36, 14.0  ;;  %v16653_v36 = vld [vmem:[#allocation96_spill] sm:$0xff] }
 0x2dd   :  { %16630 = vst [vmem:[#allocation121_spill] sm:$0xff] %v10963_v34  ;;  %v207_v20 = vadd.f32 0.5, %v16631_v23  ;;  %v10973_v35 = vfloor.f32 %v584_v17  ;;  %v587_v40 = vmul.f32 0.0625, %v523_v32  ;;  %v3667_v52 = vadd.f32 %v3666_v29, %v3665_v58  ;;  %v10975_v2 = vpop.f32.mrf.mxu0  ;;  %vm11056_vm9 = vmand %vm825_vm13, %vm889_vm8 }
 0x2de   :  { %16633 = vst [vmem:[#allocation123_spill] sm:$0xff] %v10975_v2  ;;  %v10978_v28 = vsub.f32 %v10822_v0, %v711_v57  ;;  %v270_v27 = vmul.f32 0.00390625, %v206_v5  ;;  %v268_v23 = vmul.f32 0.00390625, %v204_v62  ;;  %v3386_v22 = vsel %vm949_vm2, %v10853_v25, 0.0 }
 0x2df   :  { %16632 = vst [vmem:[#allocation122_spill] sm:$0xff] %v10973_v35  ;;  %v714_v60 = vmul.f32 16.0, %v10956_v4  ;;  %v16635_v50 = vcvt.s32.f32 %v10810_v21  ;;  %v10987_v17 = vadd.s32 392, %v9560_v53  ;;  %v3470_v29 = vsel %vm2319_vm3, %v3384_v61, 0.0 }
 0x2e0   :  { %16634 = vst [vmem:[#allocation124_spill] sm:$0xff] %v10978_v28  ;;  %v3583_v32 = vmul.f32 %v3385_v18, %v3385_v18  ;;  %v10991_v58 = vsub.f32 %v10843_v12, %v709_v6  ;;  %v271_v0 = vmul.f32 0.00390625, %v207_v20  ;;  %v3668_v57 = vsel %vm2319_vm3, %v3582_v48, 0.0 }
 0x2e1   :  { %v10984_v15 = vsub.f32 %v16635_v50, %v393_v3  ;;  %v3471_v5 = vadd.f32 %v3470_v29, %v3469_v7  ;;  %v712_v62 = vmul.f32 16.0, %v10973_v35  ;;  %v10995_v25 = vfloor.f32 %v587_v40  ;;  %v11006_v3 = vpop.f32.mrf.mxu0  ;;  %v16641_v7 = vld [vmem:[#allocation75_spill] sm:$0xff] }
 0x2e2   :  { %16636 = vst [vmem:[#allocation125_spill] sm:$0xff] %v10991_v58  ;;  %v3472_v61 = vsel %vm2319_vm3, %v3385_v18, 0.0  ;;  %v3584_v12 = vmul.f32 %v3386_v22, %v3386_v22  ;;  %16640 = vst [vmem:[#allocation127_spill] sm:$0xff] %v11006_v3  ;;  %v334_v20 = vfloor.f32 %v270_v27  ;;  %v332_v48 = vfloor.f32 %v268_v23 }
 0x2e3   :  { %16637 = vst [vmem:[#allocation126_spill] sm:$0xff] %v10995_v25  ;;  %v3669_v6 = vadd.f32 %v3668_v57, %v3667_v52  ;;  %vm826_vm1 = vcmp.lt.f32.partialorder %v10460_v1, 14.0  ;;  %vm890_vm14 = vcmp.lt.f32.partialorder %v16641_v7, 14.0  ;;  %v11015_v40 = vsub.f32 %v10865_v10, %v714_v60 }
 0x2e4   :  { %v521_v18 = vadd.f32 0.5, %v10984_v15  ;;  %v3670_v27 = vsel %vm2319_vm3, %v3583_v32, 0.0  ;;  %v3474_v52 = vsel %vm2319_vm3, %v3386_v22, 0.0  ;;  %v335_v23 = vfloor.f32 %v271_v0  ;;  %v16646_v0 = vld [vmem:[#allocation76_spill] sm:$0xff]  ;;  %vm11104_vm8 = vmand %vm826_vm1, %vm890_vm14 }
 0x2e5   :  { %16642 = vst [vmem:[#allocation128_spill] sm:$0xff] %v11015_v40  ;;  %v11022_v29 = vadd.s32 432, %v9560_v53  ;;  %v3387_v57 = vsel %vm11001_vm11, %v10778_v55, 0.0  ;;  %v3473_v37 = vadd.f32 %v3472_v61, %v3471_v5  ;;  %v11028_v10 = vsub.f32 %v10880_v41, %v712_v62  ;;  %v11043_v41 = vpop.f32.mrf.mxu0  ;;  %v16652_v55 = vld [vmem:[#allocation91_spill] sm:$0xff] }
 0x2e6   :  { %v715_v60 = vmul.f32 16.0, %v10995_v25  ;;  %v3388_v50 = vsel %vm951_vm0, %v10814_v9, 0.0  ;;  %v3672_v32 = vsel %vm2319_vm3, %v3584_v12, 0.0  ;;  %vm827_vm4 = vcmp.lt.f32.partialorder %v16646_v0, 14.0  ;;  %v16648_v12 = vld [vmem:[#allocation90_spill] sm:$0xff]  ;;  %v16672_v0 = vld [vmem:[#allocation99_spill] sm:$0xff] }
 0x2e7   :  { %16643 = vst [vmem:[#allocation129_spill] sm:$0xff] %v11028_v10  ;;  %vm891_vm12 = vcmp.lt.f32.partialorder %v10591_v47, 14.0  ;;  %v398_v5 = vmul.f32 256.0, %v334_v20  ;;  %v396_v62 = vmul.f32 256.0, %v332_v48  ;;  %v3671_v21 = vadd.f32 %v3670_v27, %v3669_v6  ;;  %v11067_v38 = vpop.f32.mrf.mxu0 }
 0x2e8   :  { %v3475_v61 = vadd.f32 %v3474_v52, %v3473_v37  ;;  %vm828_vm2 = vcmp.lt.f32.partialorder %v16647_v8, 14.0  ;;  %vm892_vm11 = vcmp.lt.f32.partialorder %v16648_v12, 14.0  ;;  %v16649_v43 = vcvt.s32.f32 %v10987_v17  ;;  %16654 = vst [vmem:[#allocation130_spill] sm:$0xff] %v11067_v38  ;;  %vm11128_vm1 = vmand %vm827_vm4, %vm891_vm12 }
 0x2e9   :  { %v11050_v42 = vadd.s32 416, %v9560_v53  ;;  %v3585_v33 = vmul.f32 %v3387_v57, %v3387_v57  ;;  %v585_v37 = vmul.f32 0.0625, %v521_v18  ;;  %v399_v48 = vmul.f32 256.0, %v335_v23  ;;  %vm11140_vm14 = vmand %vm828_vm2, %vm892_vm11 }
 0x2ea   :  { %v205_v26 = vadd.f32 0.5, %v16649_v43  ;;  %v3476_v27 = vsel %vm2319_vm3, %v3387_v57, 0.0  ;;  %v3586_v52 = vmul.f32 %v3388_v50, %v3388_v50  ;;  %v3673_v43 = vadd.f32 %v3672_v32, %v3671_v21 }
 0x2eb   :  { %v3389_v9 = vsel %vm11037_vm15, %v10897_v24, 0.0  ;;  %vm829_vm10 = vcmp.lt.f32.partialorder %v16652_v55, 14.0  ;;  %vm893_vm0 = vcmp.lt.f32.partialorder %v16653_v36, 14.0  ;;  %v11070_v16 = vsub.f32 %v10908_v56, %v715_v60 }
 0x2ec   :  { %v16656_v18 = vcvt.s32.f32 %v10887_v31  ;;  %v16657_v57 = vcvt.s32.f32 %v10890_v54  ;;  %v11081_v22 = vadd.s32 440, %v9560_v53  ;;  %v3477_v21 = vadd.f32 %v3476_v27, %v3475_v61  ;;  %vm11155_vm2 = vmand %vm829_vm10, %vm893_vm0 }
 0x2ed   :  { %16655 = vst [vmem:[#allocation131_spill] sm:$0xff] %v11070_v16  ;;  %v3390_v6 = vsel %vm11056_vm9, %v10963_v34, 0.0  ;;  %v269_v24 = vmul.f32 0.00390625, %v205_v26  ;;  %v16079_v56 = vcvt.s32.f32 %v11050_v42  ;;  %v3674_v60 = vsel %vm2319_vm3, %v3585_v33, 0.0 }
 0x2ee   :  { %v11074_v23 = vsub.f32 %v16656_v18, %v398_v5  ;;  %v11078_v32 = vsub.f32 %v16657_v57, %v396_v62  ;;  %v3587_v31 = vmul.f32 %v3389_v9, %v3389_v9  ;;  %v11088_v5 = vpop.f32.mrf.mxu0  ;;  %v16658_v54 = vcvt.s32.f32 %v10901_v44 }
 0x2ef   :  { %v16659_v18 = vcvt.s32.f32 %v11022_v29  ;;  %v3478_v61 = vsel %vm2319_vm3, %v3388_v50, 0.0  ;;  %v3676_v20 = vsel %vm2319_vm3, %v3586_v52, 0.0  ;;  %v3675_v27 = vadd.f32 %v3674_v60, %v3673_v43  ;;  %v16663_v52 = vld [vmem:[#allocation82_spill] sm:$0xff] }
 0x2f0   :  { %v11092_v62 = vsub.f32 %v16658_v54, %v399_v48  ;;  %v11098_v26 = vfloor.f32 %v585_v37  ;;  %v3480_v44 = vsel %vm2319_vm3, %v3389_v9, 0.0  ;;  %v3588_v48 = vmul.f32 %v3390_v6, %v3390_v6  ;;  %v16664_v37 = vld [vmem:[#allocation89_spill] sm:$0xff]  ;;  %v11118_v34 = vpop.f32.mrf.mxu0 }
 0x2f1   :  { %v210_v57 = vadd.f32 0.5, %v16659_v18  ;;  %v526_v54 = vadd.f32 0.5, %v11074_v23  ;;  %v3479_v18 = vadd.f32 %v3478_v61, %v3477_v21  ;;  %vm830_vm13 = vcmp.lt.f32.partialorder %v16663_v52, 14.0 }
 0x2f2   :  { %16660 = vst [vmem:[#allocation132_spill] sm:$0xff] %v11098_v26  ;;  %vm894_vm15 = vcmp.lt.f32.partialorder %v16664_v37, 14.0  ;;  %v524_v43 = vadd.f32 0.5, %v11078_v32  ;;  %v333_v60 = vfloor.f32 %v269_v24  ;;  %v208_v7 = vadd.f32 0.5, %v16079_v56 }
 0x2f3   :  { %v3678_v1 = vsel %vm2319_vm3, %v3587_v31, 0.0  ;;  %v3482_v9 = vsel %vm2319_vm3, %v3390_v6, 0.0  ;;  %v527_v16 = vadd.f32 0.5, %v11092_v62  ;;  %v274_v50 = vmul.f32 0.00390625, %v210_v57  ;;  %vm958_vm0 = vmand %vm830_vm13, %vm894_vm15 }
 0x2f4   :  { %v3391_v21 = vsel %vm11104_vm8, %v10871_v39, 0.0  ;;  %v3481_v61 = vadd.f32 %v3480_v44, %v3479_v18  ;;  %v3677_v25 = vadd.f32 %v3676_v20, %v3675_v27  ;;  %v11133_v6 = vadd.s32 424, %v9560_v53  ;;  %v16669_v20 = vld [vmem:[#allocation87_spill] sm:$0xff]  ;;  %v16670_v27 = vld [vmem:[#allocation94_spill] sm:$0xff] }
 0x2f5   :  { %v3680_v31 = vsel %vm2319_vm3, %v3588_v48, 0.0  ;;  %vm831_vm9 = vcmp.lt.f32.partialorder %v16669_v20, 14.0  ;;  %vm895_vm4 = vcmp.lt.f32.partialorder %v16670_v27, 14.0  ;;  %v713_v33 = vmul.f32 16.0, %v11098_v26 }
 0x2f6   :  { %v590_v44 = vmul.f32 0.0625, %v526_v54  ;;  %v16671_v18 = vcvt.s32.f32 %v11081_v22  ;;  %v3679_v47 = vadd.f32 %v3678_v1, %v3677_v25  ;;  %v3483_v48 = vadd.f32 %v3482_v9, %v3481_v61  ;;  %v11159_v54 = vpop.f32.mrf.mxu0  ;;  %vm11216_vm13 = vmand %vm831_vm9, %vm895_vm4 }
 0x2f7   :  { %vm832_vm12 = vcmp.lt.f32.partialorder %v16672_v0, 14.0  ;;  %vm896_vm8 = vcmp.lt.f32.partialorder %v10817_v45, 14.0  ;;  %v397_v12 = vmul.f32 256.0, %v333_v60  ;;  %v272_v8 = vmul.f32 0.00390625, %v208_v7  ;;  %16675 = vst [vmem:[#allocation133_spill] sm:$0xff] %v11159_v54 }
 0x2f8   :  { %v211_v56 = vadd.f32 0.5, %v16671_v18  ;;  %v3589_v39 = vmul.f32 %v3391_v21, %v3391_v21  ;;  %v588_v18 = vmul.f32 0.0625, %v524_v43  ;;  %v591_v1 = vmul.f32 0.0625, %v527_v16  ;;  %vm11225_vm15 = vmand %vm832_vm12, %vm896_vm8 }
 0x2f9   :  { %v338_v25 = vfloor.f32 %v274_v50  ;;  %v3392_v9 = vsel %vm11128_vm1, %v10928_v30, 0.0  ;;  %v3681_v60 = vadd.f32 %v3680_v31, %v3679_v47  ;;  %v3393_v7 = vsel %vm11140_vm14, %v11006_v3, 0.0  ;;  %v11184_v30 = vpop.f32.mrf.mxu0 }
 0x2fa   :  { %vm833_vm11 = vcmp.lt.f32.partialorder %v10804_v59, 14.0  ;;  %vm897_vm10 = vcmp.lt.f32.partialorder %v10856_v14, 14.0  ;;  %v3484_v36 = vsel %vm2319_vm3, %v3391_v21, 0.0  ;;  %v11172_v16 = vsub.f32 %v10984_v15, %v713_v33 }
 0x2fb   :  { %v11174_v50 = vfloor.f32 %v590_v44  ;;  %v275_v43 = vmul.f32 0.00390625, %v211_v56  ;;  %v3485_v24 = vadd.f32 %v3484_v36, %v3483_v48  ;;  %v3394_v47 = vsel %vm11155_vm2, %v11067_v38, 0.0  ;;  %vm11248_vm12 = vmand %vm833_vm11, %vm897_vm10 }
 0x2fc   :  { %16676 = vst [vmem:[#allocation134_spill] sm:$0xff] %v11172_v16  ;;  %v16678_v31 = vcvt.s32.f32 %v10987_v17  ;;  %v336_v55 = vfloor.f32 %v272_v8  ;;  %v3682_v61 = vsel %vm2319_vm3, %v3589_v39, 0.0  ;;  %v3590_v3 = vmul.f32 %v3392_v9, %v3392_v9 }
 0x2fd   :  { %16677 = vst [vmem:[#allocation135_spill] sm:$0xff] %v11174_v50  ;;  %v3591_v21 = vmul.f32 %v3393_v7, %v3393_v7  ;;  %v402_v15 = vmul.f32 256.0, %v338_v25  ;;  %v3683_v33 = vadd.f32 %v3682_v61, %v3681_v60  ;;  %v11186_v44 = vfloor.f32 %v588_v18  ;;  %v16682_v25 = vld [vmem:[#allocation97_spill] sm:$0xff] }
 0x2fe   :  { %v11181_v57 = vsub.f32 %v16678_v31, %v397_v12  ;;  %v11188_v36 = vfloor.f32 %v591_v1  ;;  %v16681_v40 = vcvt.s32.f32 %v11133_v6  ;;  %v3486_v17 = vsel %vm2319_vm3, %v3392_v9, 0.0  ;;  %v11198_v12 = vpop.f32.mrf.mxu0  ;;  %v16683_v1 = vld [vmem:[#allocation103_spill] sm:$0xff] }
 0x2ff   :  { %16679 = vst [vmem:[#allocation136_spill] sm:$0xff] %v11186_v44  ;;  %v3488_v8 = vsel %vm2319_vm3, %v3393_v7, 0.0  ;;  %v3592_v39 = vmul.f32 %v3394_v47, %v3394_v47  ;;  %v339_v48 = vfloor.f32 %v275_v43  ;;  %v3487_v18 = vadd.f32 %v3486_v17, %v3485_v24 }
 0x300   :  { %16680 = vst [vmem:[#allocation137_spill] sm:$0xff] %v11188_v36  ;;  %v209_v56 = vadd.f32 0.5, %v16681_v40  ;;  %vm834_vm1 = vcmp.lt.f32.partialorder %v16682_v25, 14.0  ;;  %vm898_vm14 = vcmp.lt.f32.partialorder %v16683_v1, 14.0  ;;  %v718_v60 = vmul.f32 16.0, %v11174_v50 }
 0x301   :  { %v525_v9 = vadd.f32 0.5, %v11181_v57  ;;  %v400_v61 = vmul.f32 256.0, %v336_v55  ;;  %v3684_v31 = vsel %vm2319_vm3, %v3590_v3, 0.0  ;;  %v3686_v40 = vsel %vm2319_vm3, %v3591_v21, 0.0  ;;  %vm11293_vm10 = vmand %vm834_vm1, %vm898_vm14 }
 0x302   :  { %v3490_v7 = vsel %vm2319_vm3, %v3394_v47, 0.0  ;;  %v16684_v37 = vcvt.s32.f32 %v11022_v29  ;;  %v3395_v43 = vsel %vm958_vm0, %v10975_v2, 0.0  ;;  %v3489_v24 = vadd.f32 %v3488_v8, %v3487_v18  ;;  %v11231_v47 = vpop.f32.mrf.mxu0 }
 0x303   :  { %v3685_v17 = vadd.f32 %v3684_v31, %v3683_v33  ;;  %v273_v3 = vmul.f32 0.00390625, %v209_v56  ;;  %v3688_v21 = vsel %vm2319_vm3, %v3592_v39, 0.0  ;;  %vm899_vm0 = vcmp.lt.f32.partialorder %v10835_v46, 14.0  ;;  %16690 = vst [vmem:[#allocation138_spill] sm:$0xff] %v11231_v47 }
 0x304   :  { %v11209_v52 = vsub.f32 %v16684_v37, %v402_v15  ;;  %v16689_v37 = vld [vmem:[#allocation101_spill] sm:$0xff]  ;;  %v716_v15 = vmul.f32 16.0, %v11186_v44  ;;  %v719_v33 = vmul.f32 16.0, %v11188_v36  ;;  %v403_v56 = vmul.f32 256.0, %v339_v48 }
 0x305   :  { %vm835_vm2 = vcmp.lt.f32.partialorder %v16689_v37, 14.0  ;;  %v3687_v8 = vadd.f32 %v3686_v40, %v3685_v17  ;;  %v3491_v39 = vadd.f32 %v3490_v7, %v3489_v24  ;;  %vm836_vm9 = vcmp.lt.f32.partialorder %v10873_v63, 14.0  ;;  %v11265_v17 = vpop.f32.mrf.mxu0 }
 0x306   :  { %vm900_vm4 = vcmp.lt.f32.partialorder %v10954_v13, 14.0  ;;  %v11238_v18 = vsub.f32 %v11074_v23, %v718_v60  ;;  %v16692_v31 = vcvt.s32.f32 %v11050_v42  ;;  %v3593_v0 = vmul.f32 %v3395_v43, %v3395_v43  ;;  %vm11321_vm1 = vmand %vm835_vm2, %vm899_vm0 }
 0x307   :  { %v589_v40 = vmul.f32 0.0625, %v525_v9  ;;  %v530_v7 = vadd.f32 0.5, %v11209_v52  ;;  %v11254_v24 = vadd.s32 448, %v9560_v53  ;;  %v3396_v42 = vsel %vm11216_vm13, %v11043_v41, 0.0  ;;  %v11298_v27 = vpop.f32.mrf.mxu0  ;;  %vm11334_vm14 = vmand %vm836_vm9, %vm900_vm4 }
 0x308   :  { %16691 = vst [vmem:[#allocation139_spill] sm:$0xff] %v11238_v18  ;;  %v11242_v45 = vsub.f32 %v16692_v31, %v400_v61  ;;  %v3689_v23 = vadd.f32 %v3688_v21, %v3687_v8  ;;  %v3397_v60 = vsel %vm11225_vm15, %v11118_v34, 0.0  ;;  %vm837_vm8 = vcmp.lt.f32.partialorder %v10930_v51, 14.0  ;;  %16701 = vst [vmem:[#allocation143_spill] sm:$0xff] %v11298_v27 }
 0x309   :  { %vm901_vm11 = vcmp.lt.f32.partialorder %v10991_v58, 14.0  ;;  %v337_v61 = vfloor.f32 %v273_v3  ;;  %v3492_v9 = vsel %vm2319_vm3, %v3395_v43, 0.0  ;;  %v11268_v31 = vsub.f32 %v11078_v32, %v716_v15  ;;  %v11310_v1 = vpop.f32.mrf.mxu0 }
 0x30a   :  { %v11271_v55 = vsub.f32 %v11092_v62, %v719_v33  ;;  %v16697_v21 = vcvt.s32.f32 %v11081_v22  ;;  %v3493_v29 = vadd.f32 %v3492_v9, %v3491_v39  ;;  %v3398_v14 = vsel %vm11248_vm12, %v11184_v30, 0.0  ;;  %vm11353_vm9 = vmand %vm837_vm8, %vm901_vm11 }
 0x30b   :  { %16695 = vst [vmem:[#allocation140_spill] sm:$0xff] %v11268_v31  ;;  %v528_v3 = vadd.f32 0.5, %v11242_v45  ;;  %v11282_v43 = vadd.s32 464, %v9560_v53  ;;  %v3690_v32 = vsel %vm2319_vm3, %v3593_v0, 0.0  ;;  %v3594_v15 = vmul.f32 %v3396_v42, %v3396_v42 }
 0x30c   :  { %16696 = vst [vmem:[#allocation141_spill] sm:$0xff] %v11271_v55  ;;  %v11275_v8 = vsub.f32 %v16697_v21, %v403_v56  ;;  %v3595_v59 = vmul.f32 %v3397_v60, %v3397_v60  ;;  %v3691_v33 = vadd.f32 %v3690_v32, %v3689_v23  ;;  %v11286_v22 = vfloor.f32 %v589_v40 }
 0x30d   :  { %v594_v56 = vmul.f32 0.0625, %v530_v7  ;;  %v401_v39 = vmul.f32 256.0, %v337_v61  ;;  %v3494_v9 = vsel %vm2319_vm3, %v3396_v42, 0.0  ;;  %v3496_v0 = vsel %vm2319_vm3, %v3397_v60, 0.0 }
 0x30e   :  { %16698 = vst [vmem:[#allocation142_spill] sm:$0xff] %v11286_v22  ;;  %v3596_v21 = vmul.f32 %v3398_v14, %v3398_v14  ;;  %v531_v40 = vadd.f32 0.5, %v11275_v8  ;;  %v3495_v23 = vadd.f32 %v3494_v9, %v3493_v29  ;;  %vm838_vm13 = vcmp.lt.f32.partialorder %v10837_v49, 14.0 }
 0x30f   :  { %vm902_vm15 = vcmp.lt.f32.partialorder %v10893_v11, 14.0  ;;  %v592_v7 = vmul.f32 0.0625, %v528_v3  ;;  %v11305_v61 = vadd.s32 456, %v9560_v53  ;;  %v3692_v32 = vsel %vm2319_vm3, %v3594_v15, 0.0 }
 0x310   :  { %v3694_v60 = vsel %vm2319_vm3, %v3595_v59, 0.0  ;;  %v3498_v62 = vsel %vm2319_vm3, %v3398_v14, 0.0  ;;  %v16702_v29 = vcvt.s32.f32 %v11254_v24  ;;  %v3399_v3 = vsel %vm11293_vm10, %v11088_v5, 0.0  ;;  %vm966_vm11 = vmand %vm838_vm13, %vm902_vm15 }
 0x311   :  { %v3497_v25 = vadd.f32 %v3496_v0, %v3495_v23  ;;  %v3693_v42 = vadd.f32 %v3692_v32, %v3691_v33  ;;  %v16705_v59 = vcvt.s32.f32 %v11133_v6  ;;  %vm839_vm12 = vcmp.lt.f32.partialorder %v10919_v19, 14.0 }
 0x312   :  { %v212_v9 = vadd.f32 0.5, %v16702_v29  ;;  %v3696_v29 = vsel %vm2319_vm3, %v3596_v21, 0.0  ;;  %vm903_vm2 = vcmp.lt.f32.partialorder %v10978_v28, 14.0  ;;  %v717_v48 = vmul.f32 16.0, %v11286_v22 }
 0x313   :  { %v11327_v14 = vsub.f32 %v16705_v59, %v401_v39  ;;  %v595_v0 = vmul.f32 0.0625, %v531_v40  ;;  %v11342_v6 = vadd.s32 472, %v9560_v53  ;;  %v3695_v39 = vadd.f32 %v3694_v60, %v3693_v42  ;;  %v11357_v42 = vpop.f32.mrf.mxu0  ;;  %vm11410_vm13 = vmand %vm839_vm12, %vm903_vm2 }
 0x314   :  { %v3499_v21 = vadd.f32 %v3498_v62, %v3497_v25  ;;  %vm840_vm0 = vcmp.lt.f32.partialorder %v10973_v35, 14.0  ;;  %vm904_vm10 = vcmp.lt.f32.partialorder %v11028_v10, 14.0  ;;  %v16708_v23 = vcvt.s32.f32 %v11282_v43 }
 0x315   :  { %v3597_v13 = vmul.f32 %v3399_v3, %v3399_v3  ;;  %v11359_v25 = vfloor.f32 %v594_v56  ;;  %v11361_v62 = vfloor.f32 %v592_v7  ;;  %v276_v60 = vmul.f32 0.00390625, %v212_v9  ;;  %vm11422_vm15 = vmand %vm840_vm0, %vm904_vm10 }
 0x316   :  { %v214_v32 = vadd.f32 0.5, %v16708_v23  ;;  %v3400_v23 = vsel %vm11321_vm1, %v11159_v54, 0.0  ;;  %v3697_v59 = vadd.f32 %v3696_v29, %v3695_v39  ;;  %v3401_v58 = vsel %vm11334_vm14, %v11231_v47, 0.0  ;;  %v11385_v47 = vpop.f32.mrf.mxu0 }
 0x317   :  { %16711 = vst [vmem:[#allocation144_spill] sm:$0xff] %v11359_v25  ;;  %16712 = vst [vmem:[#allocation145_spill] sm:$0xff] %v11361_v62  ;;  %vm841_vm4 = vcmp.lt.f32.partialorder %v11098_v26, 14.0  ;;  %vm905_vm8 = vcmp.lt.f32.partialorder %v11172_v16, 14.0  ;;  %v529_v51 = vadd.f32 0.5, %v11327_v14  ;;  %v3500_v56 = vsel %vm2319_vm3, %v3399_v3, 0.0 }
 0x318   :  { %v11374_v7 = vsub.f32 %v11181_v57, %v717_v48  ;;  %v11376_v9 = vfloor.f32 %v595_v0  ;;  %v16117_v15 = vcvt.s32.f32 %v11342_v6  ;;  %v3501_v29 = vadd.f32 %v3500_v56, %v3499_v21  ;;  %vm11447_vm10 = vmand %vm841_vm4, %vm905_vm8 }
 0x319   :  { %v3402_v33 = vsel %vm11353_vm9, %v11298_v27, 0.0  ;;  %v278_v39 = vmul.f32 0.00390625, %v214_v32  ;;  %v16715_v63 = vcvt.s32.f32 %v11305_v61  ;;  %v3698_v37 = vsel %vm2319_vm3, %v3597_v13, 0.0 }
 0x31a   :  { %16713 = vst [vmem:[#allocation146_spill] sm:$0xff] %v11374_v7  ;;  %16714 = vst [vmem:[#allocation147_spill] sm:$0xff] %v11376_v9  ;;  %v3598_v20 = vmul.f32 %v3400_v23, %v3400_v23  ;;  %v3599_v3 = vmul.f32 %v3401_v58, %v3401_v58  ;;  %v340_v57 = vfloor.f32 %v276_v60  ;;  %v3699_v48 = vadd.f32 %v3698_v37, %v3697_v59  ;;  %v16716_v37 = vld [vmem:[#allocation128_spill] sm:$0xff] }
 0x31b   :  { %v213_v46 = vadd.f32 0.5, %v16715_v63  ;;  %v722_v0 = vmul.f32 16.0, %v11359_v25  ;;  %v720_v21 = vmul.f32 16.0, %v11361_v62  ;;  %v593_v56 = vmul.f32 0.0625, %v529_v51 }
 0x31c   :  { %v3502_v40 = vsel %vm2319_vm3, %v3400_v23, 0.0  ;;  %v3504_v63 = vsel %vm2319_vm3, %v3401_v58, 0.0  ;;  %v3600_v13 = vmul.f32 %v3402_v33, %v3402_v33  ;;  %v215_v32 = vadd.f32 0.5, %v16117_v15  ;;  %v11403_v58 = vpop.f32.mrf.mxu0 }
 0x31d   :  { %v3503_v60 = vadd.f32 %v3502_v40, %v3501_v29  ;;  %vm842_vm1 = vcmp.lt.f32.partialorder %v10956_v4, 14.0  ;;  %vm906_vm14 = vcmp.lt.f32.partialorder %v16716_v37, 14.0  ;;  %v723_v51 = vmul.f32 16.0, %v11376_v9  ;;  %16717 = vst [vmem:[#allocation148_spill] sm:$0xff] %v11403_v58 }
 0x31e   :  { %v342_v59 = vfloor.f32 %v278_v39  ;;  %v277_v23 = vmul.f32 0.00390625, %v213_v46  ;;  %v3700_v11 = vsel %vm2319_vm3, %v3598_v20, 0.0  ;;  %v3702_v49 = vsel %vm2319_vm3, %v3599_v3, 0.0  ;;  %v16724_v3 = vld [vmem:[#allocation131_spill] sm:$0xff] }
 0x31f   :  { %v3506_v27 = vsel %vm2319_vm3, %v3402_v33, 0.0  ;;  %v404_v54 = vmul.f32 256.0, %v340_v57  ;;  %v3403_v15 = vsel %vm966_vm11, %v11198_v12, 0.0  ;;  %v3505_v29 = vadd.f32 %v3504_v63, %v3503_v60  ;;  %v11428_v57 = vpop.f32.mrf.mxu0  ;;  %vm970_vm11 = vmand %vm842_vm1, %vm906_vm14 }
 0x320   :  { %v3701_v40 = vadd.f32 %v3700_v11, %v3699_v48  ;;  %v11415_v46 = vsub.f32 %v11209_v52, %v722_v0  ;;  %v3704_v20 = vsel %vm2319_vm3, %v3600_v13, 0.0  ;;  %v16723_v11 = vld [vmem:[#allocation126_spill] sm:$0xff]  ;;  %vm907_vm12 = vcmp.lt.f32.partialorder %v16724_v3, 14.0 }
 0x321   :  { %vm843_vm9 = vcmp.lt.f32.partialorder %v16723_v11, 14.0  ;;  %v11431_v48 = vsub.f32 %v11242_v45, %v720_v21  ;;  %v11433_v52 = vfloor.f32 %v593_v56  ;;  %v279_v0 = vmul.f32 0.00390625, %v215_v32 }
 0x322   :  { %16720 = vst [vmem:[#allocation149_spill] sm:$0xff] %v11415_v46  ;;  %v3703_v63 = vadd.f32 %v3702_v49, %v3701_v40  ;;  %v3507_v13 = vadd.f32 %v3506_v27, %v3505_v29  ;;  %vm844_vm2 = vcmp.lt.f32.partialorder %v11186_v44, 14.0  ;;  %vm908_vm0 = vcmp.lt.f32.partialorder %v11268_v31, 14.0  ;;  %vm11513_vm1 = vmand %vm843_vm9, %vm907_vm12 }
 0x323   :  { %16725 = vst [vmem:[#allocation150_spill] sm:$0xff] %v11431_v48  ;;  %16726 = vst [vmem:[#allocation151_spill] sm:$0xff] %v11433_v52  ;;  %v11438_v60 = vsub.f32 %v11275_v8, %v723_v51  ;;  %v11441_v10 = vadd.s32 480, %v9560_v53  ;;  %v3601_v35 = vmul.f32 %v3403_v15, %v3403_v15  ;;  %v406_v49 = vmul.f32 256.0, %v342_v59 }
 0x324   :  { %v16730_v27 = vcvt.s32.f32 %v11254_v24  ;;  %v341_v56 = vfloor.f32 %v277_v23  ;;  %v3404_v8 = vsel %vm11410_vm13, %v11265_v17, 0.0  ;;  %v3705_v32 = vadd.f32 %v3704_v20, %v3703_v63  ;;  %v11467_v24 = vpop.f32.mrf.mxu0  ;;  %vm11524_vm14 = vmand %vm844_vm2, %vm908_vm0 }
 0x325   :  { %16727 = vst [vmem:[#allocation152_spill] sm:$0xff] %v11438_v60  ;;  %v3405_v51 = vsel %vm11422_vm15, %v11357_v42, 0.0  ;;  %vm845_vm4 = vcmp.lt.f32.partialorder %v11286_v22, 14.0  ;;  %vm909_vm8 = vcmp.lt.f32.partialorder %v11374_v7, 14.0  ;;  %v11464_v59 = vadd.s32 496, %v9560_v53  ;;  %16731 = vst [vmem:[#allocation153_spill] sm:$0xff] %v11467_v24 }
 0x326   :  { %v11453_v21 = vsub.f32 %v16730_v27, %v404_v54  ;;  %v3508_v54 = vsel %vm2319_vm3, %v3403_v15, 0.0  ;;  %v721_v23 = vmul.f32 16.0, %v11433_v52  ;;  %v343_v29 = vfloor.f32 %v279_v0  ;;  %vm973_vm0 = vmand %vm845_vm4, %vm909_vm8 }
 0x327   :  { %v11471_v40 = vadd.s32 504, %v9560_v53  ;;  %v3509_v39 = vadd.f32 %v3508_v54, %v3507_v13  ;;  %v3406_v20 = vsel %vm11447_vm10, %v11403_v58, 0.0  ;;  %v16127_v33 = vcvt.s32.f32 %v11441_v10 }
 0x328   :  { %v11478_v63 = vadd.s32 488, %v9560_v53  ;;  %v3706_v15 = vsel %vm2319_vm3, %v3601_v35, 0.0  ;;  %v3602_v27 = vmul.f32 %v3404_v8, %v3404_v8  ;;  %v3603_v16 = vmul.f32 %v3405_v51, %v3405_v51 }
 0x329   :  { %v405_v26 = vmul.f32 256.0, %v341_v56  ;;  %v3707_v28 = vadd.f32 %v3706_v15, %v3705_v32  ;;  %v16732_v0 = vcvt.s32.f32 %v11282_v43  ;;  %v532_v13 = vadd.f32 0.5, %v11453_v21  ;;  %v11493_v56 = vpop.f32.mrf.mxu0 }
 0x32a   :  { %v3510_v54 = vsel %vm2319_vm3, %v3404_v8, 0.0  ;;  %v3512_v53 = vsel %vm2319_vm3, %v3405_v51, 0.0  ;;  %v3604_v35 = vmul.f32 %v3406_v20, %v3406_v20  ;;  %vm846_vm13 = vcmp.lt.f32.partialorder %v11174_v50, 14.0 }
 0x32b   :  { %v11483_v19 = vsub.f32 %v16732_v0, %v406_v49  ;;  %v3511_v49 = vadd.f32 %v3510_v54, %v3509_v39  ;;  %vm910_vm15 = vcmp.lt.f32.partialorder %v11238_v18, 14.0  ;;  %v407_v32 = vmul.f32 256.0, %v343_v29  ;;  %v16805_v18 = vld [vmem:[#allocation143_spill] sm:$0xff] }
 0x32c   :  { %v216_v8 = vadd.f32 0.5, %v16127_v33  ;;  %v16129_v15 = vcvt.s32.f32 %v11478_v63  ;;  %v3708_v0 = vsel %vm2319_vm3, %v3602_v27, 0.0  ;;  %v3710_v51 = vsel %vm2319_vm3, %v3603_v16, 0.0 }
 0x32d   :  { %v3514_v45 = vsel %vm2319_vm3, %v3406_v20, 0.0  ;;  %v16733_v37 = vcvt.s32.f32 %v11305_v61  ;;  %v3407_v39 = vsel %vm970_vm11, %v11310_v1, 0.0  ;;  %v3513_v54 = vadd.f32 %v3512_v53, %v3511_v49  ;;  %vm974_vm11 = vmand %vm846_vm13, %vm910_vm15 }
 0x32e   :  { %v3709_v4 = vadd.f32 %v3708_v0, %v3707_v28  ;;  %v16736_v16 = vcvt.s32.f32 %v11464_v59  ;;  %v3712_v20 = vsel %vm2319_vm3, %v3604_v35, 0.0  ;;  %vm847_vm10 = vcmp.lt.f32.partialorder %v11188_v36, 14.0  ;;  %v11530_v28 = vpop.f32.mrf.mxu0  ;;  %v16804_v36 = vld [vmem:[#allocation138_spill] sm:$0xff] }
 0x32f   :  { %v11506_v43 = vsub.f32 %v16733_v37, %v405_v26  ;;  %vm911_vm9 = vcmp.lt.f32.partialorder %v11271_v55, 14.0  ;;  %v11533_v61 = vsub.f32 %v11327_v14, %v721_v23  ;;  %v596_v37 = vmul.f32 0.0625, %v532_v13 }
 0x330   :  { %v218_v27 = vadd.f32 0.5, %v16736_v16  ;;  %v16740_v53 = vcvt.s32.f32 %v11471_v40  ;;  %v3711_v49 = vadd.f32 %v3710_v51, %v3709_v4  ;;  %v3515_v0 = vadd.f32 %v3514_v45, %v3513_v54  ;;  %v11545_v14 = vpop.f32.mrf.mxu0  ;;  %vm11590_vm13 = vmand %vm847_vm10, %vm911_vm9 }
 0x331   :  { %16739 = vst [vmem:[#allocation154_spill] sm:$0xff] %v11533_v61  ;;  %vm848_vm12 = vcmp.lt.f32.partialorder %v11361_v62, 14.0  ;;  %vm912_vm2 = vcmp.lt.f32.partialorder %v11431_v48, 14.0  ;;  %v280_v16 = vmul.f32 0.00390625, %v216_v8  ;;  %v217_v33 = vadd.f32 0.5, %v16129_v15  ;;  %v16801_v62 = vld [vmem:[#allocation117_spill] sm:$0xff] }
 0x332   :  { %v219_v35 = vadd.f32 0.5, %v16740_v53  ;;  %v3605_v31 = vmul.f32 %v3407_v39, %v3407_v39  ;;  %v534_v23 = vadd.f32 0.5, %v11483_v19  ;;  %v16741_v4 = vcvt.s32.f32 %v11342_v6  ;;  %v11566_v44 = vpop.f32.mrf.mxu0  ;;  %vm11599_vm15 = vmand %vm848_vm12, %vm912_vm2 }
 0x333   :  { %v533_v45 = vadd.f32 0.5, %v11506_v43  ;;  %v3408_v8 = vsel %vm11513_vm1, %v11385_v47, 0.0  ;;  %v3713_v51 = vadd.f32 %v3712_v20, %v3711_v49  ;;  %v3409_v54 = vsel %vm11524_vm14, %v11467_v24, 0.0 }
 0x334   :  { %v11550_v13 = vsub.f32 %v16741_v4, %v407_v32  ;;  %vm849_vm4 = vcmp.lt.f32.partialorder %v11433_v52, 14.0  ;;  %v282_v53 = vmul.f32 0.00390625, %v218_v27  ;;  %v3516_v15 = vsel %vm2319_vm3, %v3407_v39, 0.0  ;;  %v16800_v52 = vld [vmem:[#allocation112_spill] sm:$0xff] }
 0x335   :  { %vm913_vm8 = vcmp.lt.f32.partialorder %v11533_v61, 14.0  ;;  %v11562_v6 = vfloor.f32 %v596_v37  ;;  %v283_v32 = vmul.f32 0.00390625, %v219_v35  ;;  %v3517_v4 = vadd.f32 %v3516_v15, %v3515_v0 }
 0x336   :  { %v3410_v7 = vsel %vm973_vm0, %v11530_v28, 0.0  ;;  %v344_v29 = vfloor.f32 %v280_v16  ;;  %v281_v22 = vmul.f32 0.00390625, %v217_v33  ;;  %v3714_v20 = vsel %vm2319_vm3, %v3605_v31, 0.0  ;;  %vm977_vm9 = vmand %vm849_vm4, %vm913_vm8 }
 0x337   :  { %16742 = vst [vmem:[#allocation155_spill] sm:$0xff] %v11562_v6  ;;  %v3606_v49 = vmul.f32 %v3408_v8, %v3408_v8  ;;  %v3607_v26 = vmul.f32 %v3409_v54, %v3409_v54  ;;  %v597_v3 = vmul.f32 0.0625, %v533_v45  ;;  %v3715_v27 = vadd.f32 %v3714_v20, %v3713_v51 }
 0x338   :  { %v598_v11 = vmul.f32 0.0625, %v534_v23  ;;  %v535_v39 = vadd.f32 0.5, %v11550_v13  ;;  %v346_v24 = vfloor.f32 %v282_v53  ;;  %v3518_v37 = vsel %vm2319_vm3, %v3408_v8, 0.0  ;;  %v11581_v53 = vpop.f32.mrf.mxu0 }
 0x339   :  { %v3520_v33 = vsel %vm2319_vm3, %v3409_v54, 0.0  ;;  %v3608_v31 = vmul.f32 %v3410_v7, %v3410_v7  ;;  %v347_v15 = vfloor.f32 %v283_v32  ;;  %v3519_v35 = vadd.f32 %v3518_v37, %v3517_v4 }
 0x33a   :  { %vm850_vm1 = vcmp.lt.f32.partialorder %v11359_v25, 14.0  ;;  %vm914_vm14 = vcmp.lt.f32.partialorder %v11415_v46, 14.0  ;;  %v724_v0 = vmul.f32 16.0, %v11562_v6  ;;  %v408_v16 = vmul.f32 256.0, %v344_v29  ;;  %v11615_v48 = vpop.f32.mrf.mxu0  ;;  %v16799_v25 = vld [vmem:[#allocation121_spill] sm:$0xff] }
 0x33b   :  { %v345_v23 = vfloor.f32 %v281_v22  ;;  %v3716_v45 = vsel %vm2319_vm3, %v3606_v49, 0.0  ;;  %v3718_v8 = vsel %vm2319_vm3, %v3607_v26, 0.0  ;;  %v3522_v51 = vsel %vm2319_vm3, %v3410_v7, 0.0  ;;  %vm978_vm4 = vmand %vm850_vm1, %vm914_vm14 }
 0x33c   :  { %v11583_v54 = vfloor.f32 %v597_v3  ;;  %v3411_v32 = vsel %vm974_vm11, %v11428_v57, 0.0  ;;  %v3521_v4 = vadd.f32 %v3520_v33, %v3519_v35  ;;  %v3717_v20 = vadd.f32 %v3716_v45, %v3715_v27 }
 0x33d   :  { %v410_v29 = vmul.f32 256.0, %v346_v24  ;;  %v3720_v49 = vsel %vm2319_vm3, %v3608_v31, 0.0  ;;  %vm851_vm0 = vcmp.lt.f32.partialorder %v11376_v9, 14.0  ;;  %v11604_v3 = vfloor.f32 %v598_v11  ;;  %v16798_v9 = vld [vmem:[#allocation115_spill] sm:$0xff] }
 0x33e   :  { %16743 = vst [vmem:[#allocation156_spill] sm:$0xff] %v11583_v54  ;;  %v599_v26 = vmul.f32 0.0625, %v535_v39  ;;  %v411_v27 = vmul.f32 256.0, %v347_v15  ;;  %v3719_v37 = vadd.f32 %v3718_v8, %v3717_v20  ;;  %v3523_v33 = vadd.f32 %v3522_v51, %v3521_v4 }
 0x33f   :  { %16748 = vst [vmem:[#allocation157_spill] sm:$0xff] %v11604_v3  ;;  %v16749_v24 = vcvt.s32.f32 %v11441_v10  ;;  %v409_v31 = vmul.f32 256.0, %v345_v23  ;;  %v3609_v45 = vmul.f32 %v3411_v32, %v3411_v32  ;;  %vm915_vm10 = vcmp.lt.f32.partialorder %v11438_v60, 14.0  ;;  %v16797_v60 = vld [vmem:[#allocation106_spill] sm:$0xff] }
 0x340   :  { %v11618_v11 = vsub.f32 %v11453_v21, %v724_v0  ;;  %v725_v39 = vmul.f32 16.0, %v11583_v54  ;;  %v3412_v10 = vsel %vm11590_vm13, %v11493_v56, 0.0  ;;  %v3721_v15 = vadd.f32 %v3720_v49, %v3719_v37  ;;  %v11633_v0 = vpop.f32.mrf.mxu0  ;;  %vm979_vm1 = vmand %vm851_vm0, %vm915_vm10 }
 0x341   :  { %v11608_v35 = vsub.f32 %v16749_v24, %v408_v16  ;;  %v3413_v16 = vsel %vm11599_vm15, %v11566_v44, 0.0  ;;  %v16751_v23 = vcvt.s32.f32 %v11464_v59  ;;  %v3524_v51 = vsel %vm2319_vm3, %v3411_v32, 0.0 }
 0x342   :  { %16750 = vst [vmem:[#allocation158_spill] sm:$0xff] %v11618_v11  ;;  %v726_v21 = vmul.f32 16.0, %v11604_v3  ;;  %v11635_v4 = vfloor.f32 %v599_v26  ;;  %v16753_v20 = vcvt.s32.f32 %v11471_v40  ;;  %v3525_v49 = vadd.f32 %v3524_v51, %v3523_v33  ;;  %v11648_v61 = vpop.f32.mrf.mxu0 }
 0x343   :  { %v11629_v8 = vsub.f32 %v16751_v23, %v410_v29  ;;  %v3414_v7 = vsel %vm977_vm9, %v11615_v48, 0.0  ;;  %v536_v37 = vadd.f32 0.5, %v11608_v35  ;;  %v16754_v59 = vcvt.s32.f32 %v11478_v63 }
 0x344   :  { %16752 = vst [vmem:[#allocation159_spill] sm:$0xff] %v11635_v4  ;;  %v11639_v22 = vsub.f32 %v16753_v20, %v411_v27  ;;  %v3722_v32 = vsel %vm2319_vm3, %v3609_v45, 0.0  ;;  %v3610_v24 = vmul.f32 %v3412_v10, %v3412_v10  ;;  %v3611_v23 = vmul.f32 %v3413_v16, %v3413_v16 }
 0x345   :  { %v11645_v29 = vsub.f32 %v16754_v59, %v409_v31  ;;  %v11651_v26 = vsub.f32 %v11506_v43, %v725_v39  ;;  %v3723_v40 = vadd.f32 %v3722_v32, %v3721_v15  ;;  %vm852_vm12 = vcmp.lt.f32.partialorder %v11562_v6, 14.0  ;;  %v11668_v59 = vpop.f32.mrf.mxu0  ;;  %v16796_v6 = vld [vmem:[#allocation102_spill] sm:$0xff] }
 0x346   :  { %vm916_vm2 = vcmp.lt.f32.partialorder %v11618_v11, 14.0  ;;  %v538_v27 = vadd.f32 0.5, %v11629_v8  ;;  %v3526_v63 = vsel %vm2319_vm3, %v3412_v10, 0.0  ;;  %v3528_v33 = vsel %vm2319_vm3, %v3413_v16, 0.0  ;;  %16756 = vst [vmem:[#allocation161_spill] sm:$0xff] %v11668_v59 }
 0x347   :  { %16755 = vst [vmem:[#allocation160_spill] sm:$0xff] %v11651_v26  ;;  %v3612_v31 = vmul.f32 %v3414_v7, %v3414_v7  ;;  %v539_v43 = vadd.f32 0.5, %v11639_v22  ;;  %v3527_v45 = vadd.f32 %v3526_v63, %v3525_v49  ;;  %vm853_vm8 = vcmp.lt.f32.partialorder %v11583_v54, 14.0  ;;  %vm980_vm14 = vmand %vm852_vm12, %vm916_vm2 }
 0x348   :  { %v600_v39 = vmul.f32 0.0625, %v536_v37  ;;  %v537_v15 = vadd.f32 0.5, %v11645_v29  ;;  %v3724_v51 = vsel %vm2319_vm3, %v3610_v24, 0.0  ;;  %v3726_v10 = vsel %vm2319_vm3, %v3611_v23, 0.0 }
 0x349   :  { %v3530_v20 = vsel %vm2319_vm3, %v3414_v7, 0.0  ;;  %vm917_vm11 = vcmp.lt.f32.partialorder %v11651_v26, 14.0  ;;  %v3415_v16 = vsel %vm978_vm4, %v11545_v14, 0.0  ;;  %v3529_v32 = vadd.f32 %v3528_v33, %v3527_v45 }
 0x34a   :  { %v3725_v46 = vadd.f32 %v3724_v51, %v3723_v40  ;;  %v602_v49 = vmul.f32 0.0625, %v538_v27  ;;  %v3728_v37 = vsel %vm2319_vm3, %v3612_v31, 0.0  ;;  %v11678_v24 = vsub.f32 %v11483_v19, %v726_v21  ;;  %vm981_vm15 = vmand %vm853_vm8, %vm917_vm11  ;;  %v11692_v19 = vpop.f32.mrf.mxu0 }
 0x34b   :  { %v727_v7 = vmul.f32 16.0, %v11635_v4  ;;  %v603_v23 = vmul.f32 0.0625, %v539_v43  ;;  %v3531_v63 = vadd.f32 %v3530_v20, %v3529_v32  ;;  %v11685_v33 = vfloor.f32 %v600_v39 }
 0x34c   :  { %16757 = vst [vmem:[#allocation162_spill] sm:$0xff] %v11678_v24  ;;  %v3727_v40 = vadd.f32 %v3726_v10, %v3725_v46  ;;  %v601_v45 = vmul.f32 0.0625, %v537_v15  ;;  %v3613_v51 = vmul.f32 %v3415_v16, %v3415_v16  ;;  %vm854_vm13 = vcmp.lt.f32.partialorder %v11604_v3, 14.0 }
 0x34d   :  { %16758 = vst [vmem:[#allocation163_spill] sm:$0xff] %v11685_v33  ;;  %v3416_v21 = vsel %vm979_vm1, %v11581_v53, 0.0  ;;  %v3417_v31 = vsel %vm980_vm14, %v11648_v61, 0.0  ;;  %v11696_v46 = vfloor.f32 %v602_v49  ;;  %v3532_v43 = vsel %vm2319_vm3, %v3415_v16, 0.0 }
 0x34e   :  { %v3729_v27 = vadd.f32 %v3728_v37, %v3727_v40  ;;  %vm918_vm0 = vcmp.lt.f32.partialorder %v11678_v24, 14.0  ;;  %v11701_v39 = vsub.f32 %v11550_v13, %v727_v7  ;;  %v11703_v15 = vfloor.f32 %v603_v23 }
 0x34f   :  { %16759 = vst [vmem:[#allocation164_spill] sm:$0xff] %v11696_v46  ;;  %v3533_v10 = vadd.f32 %v3532_v43, %v3531_v63  ;;  %v3418_v20 = vsel %vm981_vm15, %v11692_v19, 0.0  ;;  %v728_v32 = vmul.f32 16.0, %v11685_v33  ;;  %v11707_v26 = vfloor.f32 %v601_v45  ;;  %vm982_vm9 = vmand %vm854_vm13, %vm918_vm0 }
 0x350   :  { %16760 = vst [vmem:[#allocation165_spill] sm:$0xff] %v11701_v39  ;;  %16761 = vst [vmem:[#allocation166_spill] sm:$0xff] %v11703_v15  ;;  %v3730_v37 = vsel %vm2319_vm3, %v3613_v51, 0.0  ;;  %v3614_v49 = vmul.f32 %v3416_v21, %v3416_v21  ;;  %v3615_v40 = vmul.f32 %v3417_v31, %v3417_v31  ;;  %vm855_vm10 = vcmp.lt.f32.partialorder %v11635_v4, 14.0  ;;  %v16803_v4 = vld [vmem:[#allocation133_spill] sm:$0xff] }
 0x351   :  { %16762 = vst [vmem:[#allocation167_spill] sm:$0xff] %v11707_v26  ;;  %v3731_v54 = vadd.f32 %v3730_v37, %v3729_v27  ;;  %v730_v16 = vmul.f32 16.0, %v11696_v46  ;;  %v3534_v13 = vsel %vm2319_vm3, %v3416_v21, 0.0  ;;  %v3536_v7 = vsel %vm2319_vm3, %v3417_v31, 0.0 }
 0x352   :  { %v3616_v23 = vmul.f32 %v3418_v20, %v3418_v20  ;;  %v731_v63 = vmul.f32 16.0, %v11703_v15  ;;  %v3535_v45 = vadd.f32 %v3534_v13, %v3533_v10  ;;  %vm919_vm12 = vcmp.lt.f32.partialorder %v11701_v39, 14.0  ;;  %v11744_v13 = vpop.f32.mrf.mxu0  ;;  %v16806_v39 = vld [vmem:[#allocation153_spill] sm:$0xff] }
 0x353   :  { %v11719_v51 = vsub.f32 %v11608_v35, %v728_v32  ;;  %v729_v27 = vmul.f32 16.0, %v11707_v26  ;;  %v3732_v43 = vsel %vm2319_vm3, %v3614_v49, 0.0  ;;  %v3734_v21 = vsel %vm2319_vm3, %v3615_v40, 0.0  ;;  %vm983_vm2 = vmand %vm855_vm10, %vm919_vm12  ;;  %16767 = vst [vmem:[#allocation172_spill] sm:$0xff] %v11744_v13 }
 0x354   :  { %v3538_v37 = vsel %vm2319_vm3, %v3418_v20, 0.0  ;;  %v3419_v24 = vsel %vm982_vm9, %v11633_v0, 0.0  ;;  %v3537_v31 = vadd.f32 %v3536_v7, %v3535_v45  ;;  %v3733_v3 = vadd.f32 %v3732_v43, %v3731_v54  ;;  %v11751_v7 = vpop.f32.mrf.mxu0 }
 0x355   :  { %16763 = vst [vmem:[#allocation168_spill] sm:$0xff] %v11719_v51  ;;  %v11727_v11 = vsub.f32 %v11629_v8, %v730_v16  ;;  %v3736_v35 = vsel %vm2319_vm3, %v3616_v23, 0.0  ;;  %vm856_vm4 = vcmp.lt.f32.partialorder %v11685_v33, 14.0  ;;  %v11734_v10 = vsub.f32 %v11639_v22, %v731_v63  ;;  %16768 = vst [vmem:[#allocation173_spill] sm:$0xff] %v11751_v7 }
 0x356   :  { %v3735_v32 = vadd.f32 %v3734_v21, %v3733_v3  ;;  %v3539_v49 = vadd.f32 %v3538_v37, %v3537_v31  ;;  %vm920_vm8 = vcmp.lt.f32.partialorder %v11719_v51, 14.0  ;;  %v11738_v20 = vsub.f32 %v11645_v29, %v729_v27  ;;  %v11756_v43 = vpop.f32.mrf.mxu0 }
 0x357   :  { %16764 = vst [vmem:[#allocation169_spill] sm:$0xff] %v11727_v11  ;;  %16765 = vst [vmem:[#allocation170_spill] sm:$0xff] %v11734_v10  ;;  %v3617_v54 = vmul.f32 %v3419_v24, %v3419_v24  ;;  %v3420_v8 = vsel %vm983_vm2, %v11668_v59, 0.0  ;;  %vm858_vm11 = vcmp.lt.f32.partialorder %v11696_v46, 14.0  ;;  %vm922_vm1 = vcmp.lt.f32.partialorder %v11727_v11, 14.0 }
 0x358   :  { %16766 = vst [vmem:[#allocation171_spill] sm:$0xff] %v11738_v20  ;;  %v3737_v40 = vadd.f32 %v3736_v35, %v3735_v32  ;;  %v3540_v16 = vsel %vm2319_vm3, %v3419_v24, 0.0  ;;  %vm984_vm14 = vmand %vm856_vm4, %vm920_vm8  ;;  %vm859_vm13 = vcmp.lt.f32.partialorder %v11703_v15, 14.0  ;;  %vm923_vm15 = vcmp.lt.f32.partialorder %v11734_v10, 14.0  ;;  %v11761_v32 = vpop.f32.mrf.mxu0 }
 0x359   :  { %v3541_v3 = vadd.f32 %v3540_v16, %v3539_v49  ;;  %vm857_vm0 = vcmp.lt.f32.partialorder %v11707_v26, 14.0  ;;  %vm921_vm10 = vcmp.lt.f32.partialorder %v11738_v20, 14.0  ;;  %v3738_v22 = vsel %vm2319_vm3, %v3617_v54, 0.0  ;;  %vm986_vm9 = vmand %vm858_vm11, %vm922_vm1  ;;  %16769 = vst [vmem:[#allocation174_spill] sm:$0xff] %v11756_v43 }
 0x35a   :  { %v3618_v29 = vmul.f32 %v3420_v8, %v3420_v8  ;;  %v3739_v23 = vadd.f32 %v3738_v22, %v3737_v40  ;;  %v3421_v24 = vsel %vm984_vm14, %v11751_v7, 0.0  ;;  %vm987_vm12 = vmand %vm859_vm13, %vm923_vm15  ;;  %v3542_v63 = vsel %vm2319_vm3, %v3420_v8, 0.0 }
 0x35b   :  { %v3544_v45 = vsel %vm2319_vm3, %v3421_v24, 0.0  ;;  %v3619_v27 = vmul.f32 %v3421_v24, %v3421_v24  ;;  %vm985_vm2 = vmand %vm857_vm0, %vm921_vm10  ;;  %v3423_v21 = vsel %vm986_vm9, %v11744_v13, 0.0  ;;  %v3543_v37 = vadd.f32 %v3542_v63, %v3541_v3 }
 0x35c   :  { %v3740_v31 = vsel %vm2319_vm3, %v3618_v29, 0.0  ;;  %v3424_v40 = vsel %vm987_vm12, %v11756_v43, 0.0  ;;  %v3422_v8 = vsel %vm985_vm2, %v11761_v32, 0.0  ;;  %v3621_v16 = vmul.f32 %v3423_v21, %v3423_v21 }
 0x35d   :  { %v3742_v35 = vsel %vm2319_vm3, %v3619_v27, 0.0  ;;  %v3545_v49 = vadd.f32 %v3544_v45, %v3543_v37  ;;  %v3741_v54 = vadd.f32 %v3740_v31, %v3739_v23  ;;  %v3546_v22 = vsel %vm2319_vm3, %v3422_v8, 0.0 }
 0x35e   :  { %v3620_v24 = vmul.f32 %v3422_v8, %v3422_v8  ;;  %v3548_v3 = vsel %vm2319_vm3, %v3423_v21, 0.0  ;;  %v3622_v63 = vmul.f32 %v3424_v40, %v3424_v40  ;;  %v3746_v45 = vsel %vm2319_vm3, %v3621_v16, 0.0 }
 0x35f   :  { %v3743_v20 = vadd.f32 %v3742_v35, %v3741_v54  ;;  %v3547_v26 = vadd.f32 %v3546_v22, %v3545_v49  ;;  %v3550_v23 = vsel %vm2319_vm3, %v3424_v40, 0.0  ;;  %vm4095_vm4 = vcmask 60416  }
 0x360   :  { %v3744_v29 = vsel %vm2319_vm3, %v3620_v24, 0.0  ;;  %v3748_v15 = vsel %vm2319_vm3, %v3622_v63, 0.0  ;;  %v8007_v13 = vmov 0   ;;  %vm16900_vm8 = vsmask.f32 7424 }
 0x361   :  { %v3549_v27 = vadd.f32 %v3548_v3, %v3547_v26  ;;  %v3745_v10 = vadd.f32 %v3744_v29, %v3743_v20  ;;  %v16771_v29 = vld [vmem:[#allocation58_spill] sm:$0xff]  ;;  %4096 = vst.msk [vmem:[#allocation2 + $0x100] sm:$0xf] %vm4095_vm4, %v8007_v13  ;;  %4097 = vst.msk [vmem:[#allocation2 + $0x104] sm:$0xf] %vm4095_vm4, %v8007_v13 }
 0x362   :  { %4098 = vst.msk [vmem:[#allocation2 + $0x108] sm:$0xf] %vm4095_vm4, %v8007_v13  ;;  %4099 = vst.msk [vmem:[#allocation2 + $0x10c] sm:$0xf] %vm4095_vm4, %v8007_v13 }
 0x363   :  { %v3551_v37 = vadd.f32 %v3550_v23, %v3549_v27  ;;  %v3747_v31 = vadd.f32 %v3746_v45, %v3745_v10  ;;  %v16784_v23 = vld [vmem:[#allocation72_spill] sm:$0xff]  ;;  %4100 = vst.msk [vmem:[#allocation2 + $0x110] sm:$0xf] %vm4095_vm4, %v8007_v13  ;;  %vm16920_vm11 = vmmov %vm16900_vm8 }
 0x364   :  { %v16787_v27 = vld [vmem:[#allocation92_spill] sm:$0xff]  ;;  %vm16942_vm1 = vmmov %vm16900_vm8 }
 0x365   :  { %v3552_v11 = vrot.slane %v3551_v37, 4  ;;  %v3749_v46 = vadd.f32 %v3748_v15, %v3747_v31  ;;  %v16770_v15 = vld [vmem:[#allocation54_spill] sm:$0xff]  ;;  %v16783_v31 = vld [vmem:[#allocation80_spill] sm:$0xff]  ;;  %vm16944_vm14 = vmmov %vm16942_vm1 }
 0x366   :  { %vm16987_vm13 = vmmov %vm16942_vm1 }
 0x367   :  { %v3553_v8 = vadd.f32 %v3552_v11, %v3551_v37  ;;  %v3750_v35 = vrot.slane %v3749_v46, 4  ;;  %v16773_v37 = vld [vmem:[#allocation56_spill] sm:$0xff]  ;;  %vm16988_vm15 = vmmov %vm16942_vm1 }
 0x368   :  { %v11905_v11 = vld [vmem:[%s15802_s2] ss:$0 sm:$0xff]  ;;  %vm16989_vm0 = vmmov %vm16942_vm1 }
 0x369   :  { %v3554_v49 = vrot.slane %v3553_v8, 2  ;;  %v3751_v54 = vadd.f32 %v3750_v35, %v3749_v46  ;;  %v16781_v46 = vld [vmem:[#allocation67_spill] sm:$0xff]  ;;  %v16788_v35 = vld [vmem:[#allocation81_spill] sm:$0xff]  ;;  %vm16990_vm10 = vmmov %vm16989_vm0 }
 0x36a   :  { %vm16991_vm9 = vmmov %vm16989_vm0 }
 0x36b   :  { %v3555_v21 = vadd.f32 %v3554_v49, %v3553_v8  ;;  %v3752_v22 = vrot.slane %v3751_v54, 2  ;;  %v16774_v8 = vld [vmem:[#allocation7_spill] sm:$0xff]  ;;  %v16775_v49 = vld [vmem:[#allocation62_spill] sm:$0xff]  ;;  %vm16992_vm12 = vmmov %vm16989_vm0 }
 0x36c   :  { %vm16993_vm2 = vmmov %vm16989_vm0 }
 0x36d   :  { %v3556_v51 = vrot.slane %v3555_v21, 1  ;;  %v3753_v24 = vadd.f32 %v3752_v22, %v3751_v54  ;;  %v16782_v54 = vld [vmem:[#allocation74_spill] sm:$0xff]  ;;  %v16789_v22 = vld [vmem:[#allocation88_spill] sm:$0xff] }
 0x36f   :  { %v3557_v26 = vadd.f32 %v3556_v51, %v3555_v21  ;;  %v3754_v20 = vrot.slane %v3753_v24, 1  ;;  %v16772_v51 = vld [vmem:[#allocation37_spill] sm:$0xff] }
 0x370   :  { %v16776_v21 = vld [vmem:[#allocation49_spill] sm:$0xff] }
 0x371   :  { %v11771_v3 = vmul.f32 0.0025510204, %v3557_v26  ;;  %v3755_v16 = vadd.f32 %v3754_v20, %v3753_v24  ;;  %v16777_v24 = vld [vmem:[#allocation61_spill] sm:$0xff]  ;;  %v16778_v20 = vld [vmem:[#allocation11_spill] sm:$0xff] }
 0x372   :  { %v16790_v26 = vld [vmem:[#allocation95_spill] sm:$0xff] }
 0x373   :  { %v3756_v40 = vmul.f32 0.0025510204, %v3755_v16  ;;  %v3757_v10 = vmul.f32 %v11771_v3, %v11771_v3  ;;  %v16791_v16 = vld [vmem:[#allocation100_spill] sm:$0xff]  ;;  %v16807_v13 = vsub.f32 %v11761_v32, %v11771_v3  ;;  %v16808_v43 = vsub.f32 %v16772_v51, %v11771_v3 }
 0x374   :  { %v16809_v33 = vsub.f32 %v16773_v37, %v11771_v3  ;;  %v16810_v2 = vsub.f32 %v16774_v8, %v11771_v3  ;;  %v11934_v32 = vld [vmem:[%s15803_s3] ss:$0 sm:$0xff]  ;;  %v16811_v51 = vsub.f32 %v16775_v49, %v11771_v3  ;;  %v16812_v37 = vsub.f32 %v16770_v15, %v11771_v3 }
 0x375   :  { %v3758_v63 = vsub.f32 %v3756_v40, %v3757_v10  ;;  %v16779_v40 = vld [vmem:[#allocation70_spill] sm:$0xff]  ;;  %v16786_v10 = vld [vmem:[#allocation85_spill] sm:$0xff]  ;;  %v16814_v8 = vsub.f32 %v16771_v29, %v11771_v3  ;;  %v16816_v29 = vsub.f32 %v16777_v24, %v11771_v3 }
 0x377   :  { %v3823_v45 = vadd.f32 1e-05, %v3758_v63  ;;  %v16780_v63 = vld [vmem:[#allocation65_spill] sm:$0xff] }
 0x379   :  { %7934 = vrsqrt.f32 %v3823_v45  ;;  %v16785_v45 = vld [vmem:[#allocation77_spill] sm:$0xff] }
 0x386   :  { %v11900_v38 = vpop.eup %7934 }
 0x387   :  { %v3886_v58 = vmul.f32 %v11900_v38, %v16807_v13  ;;  %v3827_v7 = vmul.f32 %v11900_v38, %v16808_v43  ;;  %v3828_v50 = vmul.f32 %v11900_v38, %v16809_v33  ;;  %v3829_v55 = vmul.f32 %v11900_v38, %v16810_v2 }
 0x388   :  { %v3830_v43 = vmul.f32 %v11900_v38, %v16811_v51  ;;  %v11944_v33 = vmul.f32 %v11900_v38, %v16812_v37  ;;  %v11950_v2 = vmul.f32 %v11900_v38, %v16814_v8  ;;  %v16815_v13 = vsub.f32 %v16776_v21, %v11771_v3 }
 0x389   :  { %v3957_v49 = vmul.f32 %v11905_v11, %v3886_v58  ;;  %v3898_v51 = vmul.f32 %v11905_v11, %v3827_v7  ;;  %v3899_v15 = vmul.f32 %v11905_v11, %v3828_v50  ;;  %v3900_v37 = vmul.f32 %v11905_v11, %v3829_v55 }
 0x38a   :  { %16813 = vst [vmem:[#allocation54_spill] sm:$0xff] %v11944_v33  ;;  %v11956_v59 = vmul.f32 %v11900_v38, %v16815_v13  ;;  %v3901_v33 = vmul.f32 %v11905_v11, %v3830_v43  ;;  %v11967_v8 = vmul.f32 %v11900_v38, %v16816_v29  ;;  %v16817_v21 = vsub.f32 %v16778_v20, %v11771_v3 }
 0x38b   :  { %v16818_v58 = vsub.f32 %v16779_v40, %v11771_v3  ;;  %v4028_v55 = vadd.f32 %v11934_v32, %v3957_v49  ;;  %v3969_v7 = vadd.f32 %v11934_v32, %v3898_v51  ;;  %v3970_v24 = vadd.f32 %v11934_v32, %v3899_v15 }
 0x38c   :  { %v11973_v13 = vmul.f32 %v11900_v38, %v16817_v21  ;;  %v3971_v43 = vadd.f32 %v11934_v32, %v3900_v37  ;;  %v3972_v29 = vadd.f32 %v11934_v32, %v3901_v33  ;;  %v16820_v20 = vsub.f32 %v16780_v63, %v11771_v3 }
 0x38d   :  { %v11979_v50 = vmul.f32 %v11900_v38, %v16818_v58  ;;  %v16822_v40 = vsub.f32 %v16781_v46, %v11771_v3  ;;  %v16823_v49 = vsub.f32 %v16782_v54, %v11771_v3  ;;  %v4092_v15 = vmax.f32 %v4028_v55, 0.0 }
 0x38e   :  { %v11990_v21 = vmul.f32 %v11900_v38, %v16820_v20  ;;  %v4033_v33 = vmax.f32 %v3969_v7, 0.0  ;;  %v4034_v37 = vmax.f32 %v3970_v24, 0.0  ;;  %v4036_v63 = vmax.f32 %v3972_v29, 0.0 }
 0x38f   :  { %16819 = vst [vmem:[#allocation58_spill] sm:$0xff] %v11979_v50  ;;  %v11996_v58 = vmul.f32 %v11900_v38, %v16822_v40  ;;  %v12002_v51 = vmul.f32 %v11900_v38, %v16823_v49  ;;  %v4035_v50 = vmax.f32 %v3971_v43, 0.0  ;;  %v16824_v20 = vsub.f32 %v16783_v31, %v11771_v3 }
 0x390   :  { %16821 = vst [vmem:[#allocation37_spill] sm:$0xff] %v11990_v21  ;;  %v16825_v46 = vsub.f32 %v16784_v23, %v11771_v3  ;;  %v16826_v54 = vsub.f32 %v16785_v45, %v11771_v3  ;;  %v7611_v7 = vpack.c.bf16 %v4092_v15, %v4092_v15  ;;  %v7552_v24 = vpack.c.bf16 %v4033_v33, %v4033_v33 }
 0x391   :  { %v12008_v21 = vmul.f32 %v11900_v38, %v16824_v20  ;;  %v7553_v43 = vpack.c.bf16 %v4034_v37, %v4034_v37  ;;  %v7554_v29 = vpack.c.bf16 %v4035_v50, %v4035_v50  ;;  %v7555_v31 = vpack.c.bf16 %v4036_v63, %v4036_v63  ;;  %v16833_v63 = vld [vmem:[#allocation93_spill] sm:$0xff] }
 0x392   :  { %v12014_v40 = vmul.f32 %v11900_v38, %v16825_v46  ;;  %v12020_v55 = vmul.f32 %v11900_v38, %v16826_v54  ;;  %v16827_v49 = vsub.f32 %v16786_v10, %v11771_v3  ;;  %v16828_v23 = vsub.f32 %v16787_v27, %v11771_v3  ;;  %4418 = vst.msk [vmem:[#allocation2 + $0xf4] sm:$0xf] %vm4095_vm4, %v7611_v7  ;;  %v16835_v7 = vld [vmem:[#allocation98_spill] sm:$0xff] }
 0x393   :  { %v16829_v45 = vsub.f32 %v16788_v35, %v11771_v3  ;;  %4359 = vst.msk [vmem:[#allocation2 + $0x8] sm:$0xf] %vm4095_vm4, %v7552_v24  ;;  %4360 = vst.msk [vmem:[#allocation2 + $0xc] sm:$0xf] %vm4095_vm4, %v7553_v43  ;;  %v16830_v27 = vsub.f32 %v16789_v22, %v11771_v3  ;;  %v16831_v35 = vsub.f32 %v16790_v26, %v11771_v3  ;;  %v16837_v43 = vld [vmem:[#allocation104_spill] sm:$0xff] }
 0x394   :  { %v12026_v20 = vmul.f32 %v11900_v38, %v16827_v49  ;;  %v12032_v46 = vmul.f32 %v11900_v38, %v16828_v23  ;;  %4361 = vst.msk [vmem:[#allocation2 + $0x10] sm:$0xf] %vm4095_vm4, %v7554_v29  ;;  %v16832_v33 = vsub.f32 %v16791_v16, %v11771_v3  ;;  %v16834_v54 = vsub.f32 %v16833_v63, %v11771_v3  ;;  %v16839_v49 = vld [vmem:[#allocation110_spill] sm:$0xff] }
 0x395   :  { %v12038_v15 = vmul.f32 %v11900_v38, %v16829_v45  ;;  %v12048_v10 = vmul.f32 %v11900_v38, %v16830_v27  ;;  %v12054_v50 = vmul.f32 %v11900_v38, %v16831_v35  ;;  %4362 = vst.msk [vmem:[#allocation2 + $0x14] sm:$0xf] %vm4095_vm4, %v7555_v31  ;;  %v16836_v26 = vsub.f32 %v16835_v7, %v11771_v3 }
 0x396   :  { %v12060_v37 = vmul.f32 %v11900_v38, %v16832_v33  ;;  %v12066_v22 = vmul.f32 %v11900_v38, %v16834_v54  ;;  %v16838_v16 = vsub.f32 %v16837_v43, %v11771_v3  ;;  %v16840_v23 = vsub.f32 %v16839_v49, %v11771_v3 }
 0x397   :  { %v12073_v24 = vmul.f32 %v11900_v38, %v16836_v26  ;;  %v16841_v31 = vsub.f32 %v16796_v6, %v11771_v3  ;;  %v16842_v35 = vsub.f32 %v16797_v60, %v11771_v3  ;;  %v16843_v63 = vsub.f32 %v16798_v9, %v11771_v3 }
 0x398   :  { %v12079_v29 = vmul.f32 %v11900_v38, %v16838_v16  ;;  %v12085_v45 = vmul.f32 %v11900_v38, %v16840_v23  ;;  %v16844_v7 = vsub.f32 %v16799_v25, %v11771_v3  ;;  %v16845_v26 = vsub.f32 %v16800_v52, %v11771_v3  ;;  %v16847_v16 = vld [vmem:[#allocation127_spill] sm:$0xff]  ;;  %v16849_v23 = vld [vmem:[#allocation130_spill] sm:$0xff] }
 0x399   :  { %v12091_v27 = vmul.f32 %v11900_v38, %v16841_v31  ;;  %v12097_v33 = vmul.f32 %v11900_v38, %v16842_v35  ;;  %v12103_v54 = vmul.f32 %v11900_v38, %v16843_v63  ;;  %v16846_v43 = vsub.f32 %v16801_v62, %v11771_v3  ;;  %v16851_v35 = vld [vmem:[#allocation123_spill] sm:$0xff] }
 0x39a   :  { %v12109_v6 = vmul.f32 %v11900_v38, %v16844_v7  ;;  %v12115_v60 = vmul.f32 %v11900_v38, %v16845_v26  ;;  %v16848_v49 = vsub.f32 %v16847_v16, %v11771_v3  ;;  %v16850_v31 = vsub.f32 %v16849_v23, %v11771_v3 }
 0x39b   :  { %v12121_v9 = vmul.f32 %v11900_v38, %v16846_v43  ;;  %v16852_v63 = vsub.f32 %v16851_v35, %v11771_v3  ;;  %v16853_v7 = vsub.f32 %v11043_v41, %v11771_v3  ;;  %v16854_v43 = vsub.f32 %v11118_v34, %v11771_v3 }
 0x39c   :  { %v12127_v25 = vmul.f32 %v11900_v38, %v16848_v49  ;;  %v12133_v52 = vmul.f32 %v11900_v38, %v16850_v31  ;;  %v16855_v49 = vsub.f32 %v11184_v30, %v11771_v3  ;;  %v16856_v31 = vsub.f32 %v11088_v5, %v11771_v3 }
 0x39d   :  { %v12139_v62 = vmul.f32 %v11900_v38, %v16852_v63  ;;  %v12145_v26 = vmul.f32 %v11900_v38, %v16853_v7  ;;  %v12151_v16 = vmul.f32 %v11900_v38, %v16854_v43  ;;  %v16857_v35 = vsub.f32 %v16803_v4, %v11771_v3 }
 0x39e   :  { %v12157_v23 = vmul.f32 %v11900_v38, %v16855_v49  ;;  %v12163_v41 = vmul.f32 %v11900_v38, %v16856_v31  ;;  %v16858_v63 = vsub.f32 %v16804_v36, %v11771_v3  ;;  %v16859_v7 = vsub.f32 %v16805_v18, %v11771_v3 }
 0x39f   :  { %v12169_v34 = vmul.f32 %v11900_v38, %v16857_v35  ;;  %v16860_v43 = vsub.f32 %v11198_v12, %v11771_v3  ;;  %v16861_v49 = vsub.f32 %v11265_v17, %v11771_v3  ;;  %v16863_v31 = vsub.f32 %v11357_v42, %v11771_v3  ;;  %v16864_v35 = vld [vmem:[#allocation148_spill] sm:$0xff] }
 0x3a0   :  { %v12175_v30 = vmul.f32 %v11900_v38, %v16858_v63  ;;  %v12181_v5 = vmul.f32 %v11900_v38, %v16859_v7  ;;  %v16865_v63 = vsub.f32 %v16864_v35, %v11771_v3  ;;  %v16866_v7 = vsub.f32 %v11310_v1, %v11771_v3 }
 0x3a1   :  { %v12187_v4 = vmul.f32 %v11900_v38, %v16860_v43  ;;  %v12193_v36 = vmul.f32 %v11900_v38, %v16861_v49  ;;  %v12199_v18 = vmul.f32 %v11900_v38, %v16863_v31  ;;  %v4423_v43 = vld [vmem:[#allocation2 + $0x8] sm:$0xf]  ;;  %v4424_v49 = vld [vmem:[#allocation2 + $0xc] sm:$0xf]  ;;  %v16868_v42 = vsub.f32 %v11385_v47, %v11771_v3 }
 0x3a2   :  { %v12205_v12 = vmul.f32 %v11900_v38, %v16865_v63  ;;  %v12211_v17 = vmul.f32 %v11900_v38, %v16866_v7  ;;  %v16870_v35 = vsub.f32 %v16806_v39, %v11771_v3  ;;  %v16871_v1 = vsub.f32 %v11530_v28, %v11771_v3 }
 0x3a3   :  { %16862 = vst [vmem:[#allocation56_spill] sm:$0xff] %v12193_v36  ;;  %v4425_v36 = vld [vmem:[#allocation2 + $0x10] sm:$0xf]  ;;  %v12217_v31 = vmul.f32 %v11900_v38, %v16868_v42  ;;  %v4426_v42 = vld [vmem:[#allocation2 + $0x14] sm:$0xf]  ;;  %v16874_v39 = vsub.f32 %v11493_v56, %v11771_v3  ;;  %v16875_v28 = vsub.f32 %v11566_v44, %v11771_v3  ;;  %v16878_v56 = vsub.f32 %v11545_v14, %v11771_v3 }
 0x3a4   :  { %16867 = vst [vmem:[#allocation7_spill] sm:$0xff] %v12211_v17  ;;  %v12223_v63 = vmul.f32 %v11900_v38, %v16870_v35  ;;  %v12229_v7 = vmul.f32 %v11900_v38, %v16871_v1  ;;  %v16872_v17 = vsub.f32 %v11428_v57, %v11771_v3  ;;  %v16876_v57 = vsub.f32 %v11615_v48, %v11771_v3 }
 0x3a5   :  { %16869 = vst [vmem:[#allocation62_spill] sm:$0xff] %v12217_v31  ;;  %v12237_v31 = vcombine.low %v4423_v43, %v4424_v49  ;;  %v12243_v35 = vmul.f32 %v11900_v38, %v16874_v39  ;;  %v12249_v1 = vmul.f32 %v11900_v38, %v16875_v28  ;;  %v12257_v43 = vcombine.low %v4425_v36, %v4426_v42 }
 0x3a6   :  { %v12235_v47 = vmul.f32 %v11900_v38, %v16872_v17  ;;  %v12255_v17 = vmul.f32 %v11900_v38, %v16876_v57  ;;  %v12263_v49 = vmul.f32 %v11900_v38, %v16878_v56  ;;  %v16879_v44 = vsub.f32 %v11581_v53, %v11771_v3 }
 0x3a7   :  { %16873 = vst [vmem:[#allocation49_spill] sm:$0xff] %v12237_v31  ;;  %16877 = vst [vmem:[#allocation61_spill] sm:$0xff] %v12257_v43  ;;  %v16880_v48 = vsub.f32 %v11648_v61, %v11771_v3  ;;  %v4666_v36 = vshll.u32 %v12237_v31, 16  ;;  %v4670_v42 = vshrl.u32 %v12237_v31, 16  ;;  %v16882_v14 = vsub.f32 %v11692_v19, %v11771_v3  ;;  %v16889_v31 = vld [vmem:[#allocation173_spill] sm:$0xff] }
 0x3a8   :  { %v12269_v39 = vmul.f32 %v11900_v38, %v16879_v44  ;;  %v16884_v53 = vsub.f32 %v11633_v0, %v11771_v3  ;;  %v4674_v61 = vshll.u32 %v12257_v43, 16  ;;  %v16886_v44 = vld [vmem:[#allocation161_spill] sm:$0xff]  ;;  %v16890_v19 = vsub.f32 %v16889_v31, %v11771_v3  ;;  %v16894_v43 = vld [vmem:[#allocation174_spill] sm:$0xff] }
 0x3a9   :  { %v12275_v28 = vmul.f32 %v11900_v38, %v16880_v48  ;;  %v12283_v57 = vmul.f32 %v11900_v38, %v16882_v14  ;;  %v16887_v48 = vsub.f32 %v16886_v44, %v11771_v3  ;;  %v16895_v44 = vsub.f32 %v16894_v43, %v11771_v3 }
 0x3aa   :  { %v12289_v56 = vmul.f32 %v11900_v38, %v16884_v53  ;;  %v12302_v14 = vmul.f32 %v11900_v38, %v16890_v19  ;;  %v3897_v19 = vmul.f32 %v11905_v11, %v11950_v2 }
 0x3ab   :  { %16881 = vst [vmem:[#allocation11_spill] sm:$0xff] %v12275_v28  ;;  %16883 = vst [vmem:[#allocation70_spill] sm:$0xff] %v12283_v57  ;;  %v12296_v28 = vmul.f32 %v11900_v38, %v16887_v48  ;;  %v16892_v57 = vld [vmem:[#allocation172_spill] sm:$0xff]  ;;  %v12316_v48 = vmul.f32 %v11900_v38, %v16895_v44 }
 0x3ac   :  { %16885 = vst [vmem:[#allocation65_spill] sm:$0xff] %v12289_v56  ;;  %16891 = vst [vmem:[#allocation74_spill] sm:$0xff] %v12302_v14  ;;  %v16893_v0 = vsub.f32 %v16892_v57, %v11771_v3  ;;  %v12310_v56 = vrot.slane %v4666_v36, 1  ;;  %v12322_v14 = vrot.slane %v4674_v61, 1  ;;  %v12326_v57 = vmul.f32 %v11905_v11, %v11956_v59  ;;  %v16899_v59 = vld [vmem:[#allocation37_spill] sm:$0xff] }
 0x3ad   :  { %16888 = vst [vmem:[#allocation67_spill] sm:$0xff] %v12296_v28  ;;  %v16896_v28 = vld [vmem:[#allocation54_spill] sm:$0xff]  ;;  %v12330_v36 = vmul.f32 %v11905_v11, %v11967_v8  ;;  %v3968_v2 = vadd.f32 %v11934_v32, %v3897_v19  ;;  %v12349_v8 = vmul.f32 %v11905_v11, %v11996_v58  ;;  %v12371_v58 = vmul.f32 %v11905_v11, %v12020_v55 }
 0x3ae   :  { %v12308_v53 = vmul.f32 %v11900_v38, %v16893_v0  ;;  %v3896_v31 = vmul.f32 %v11905_v11, %v16896_v28  ;;  %16897 = vst [vmem:[#allocation80_spill] sm:$0xff] %v12322_v14  ;;  %v12334_v38 = vmul.f32 %v11905_v11, %v11973_v13  ;;  %v4672_v3 = vor.u32 %v4670_v42, %v12310_v56  ;;  %v16898_v28 = vld [vmem:[#allocation58_spill] sm:$0xff] }
 0x3af   :  { %v12341_v61 = vmul.f32 %v11905_v11, %v16898_v28  ;;  %v12345_v0 = vmul.f32 %v11905_v11, %v16899_v59  ;;  %v12353_v13 = vmul.f32 %v11905_v11, %v12002_v51  ;;  %v12357_v42 = vmul.f32 %v11905_v11, %v12008_v21  ;;  %v16902_v59 = vld [vmem:[#allocation56_spill] sm:$0xff] }
 0x3b0   :  { %v3967_v43 = vadd.f32 %v11934_v32, %v3896_v31  ;;  %v12361_v44 = vsel %vm16900_vm8, %v4672_v3, %v12322_v14  ;;  %v4032_v19 = vmax.f32 %v3968_v2, 0.0  ;;  %v12365_v28 = vmul.f32 %v11905_v11, %v12014_v40  ;;  %vm16995_vm8 = vmmov %vm16989_vm0 }
 0x3b1   :  { %16901 = vst [vmem:[#allocation72_spill] sm:$0xff] %v12361_v44  ;;  %4920 = vrot.lane.b32.xlu1 %v12361_v44, %s7999_s21  ;;  %v12375_v21 = vmul.f32 %v11905_v11, %v12026_v20  ;;  %v12379_v51 = vmul.f32 %v11905_v11, %v12032_v46  ;;  %v12383_v3 = vmul.f32 %v11905_v11, %v12038_v15 }
 0x3b2   :  { %v4031_v31 = vmax.f32 %v3967_v43, 0.0  ;;  %v7551_v43 = vpack.c.bf16 %v4032_v19, %v4032_v19  ;;  %v12387_v2 = vmul.f32 %v11905_v11, %v12048_v10  ;;  %v12391_v55 = vmul.f32 %v11905_v11, %v12054_v50  ;;  %v16904_v19 = vld [vmem:[#allocation62_spill] sm:$0xff] }
 0x3b3   :  { %v12395_v20 = vmul.f32 %v11905_v11, %v12060_v37  ;;  %v12399_v46 = vmul.f32 %v11905_v11, %v12066_v22  ;;  %v12403_v15 = vmul.f32 %v11905_v11, %v12073_v24  ;;  %v12407_v10 = vmul.f32 %v11905_v11, %v12079_v29  ;;  %v16912_v14 = vld [vmem:[#allocation70_spill] sm:$0xff] }
 0x3b4   :  { %v7550_v40 = vpack.c.bf16 %v4031_v31, %v4031_v31  ;;  %4358 = vst.msk [vmem:[#allocation2 + $0x4] sm:$0xf] %vm4095_vm4, %v7551_v43  ;;  %v12413_v50 = vmul.f32 %v11905_v11, %v12085_v45  ;;  %v12417_v37 = vmul.f32 %v11905_v11, %v12091_v27  ;;  %v12421_v22 = vmul.f32 %v11905_v11, %v12097_v33  ;;  %v16903_v31 = vld [vmem:[#allocation7_spill] sm:$0xff] }
 0x3b5   :  { %v12425_v24 = vmul.f32 %v11905_v11, %v12103_v54  ;;  %v12429_v29 = vmul.f32 %v11905_v11, %v12109_v6  ;;  %v12433_v45 = vmul.f32 %v11905_v11, %v12115_v60  ;;  %v12437_v27 = vmul.f32 %v11905_v11, %v12121_v9 }
 0x3b6   :  { %4357 = vst.msk [vmem:[#allocation2] sm:$0xf] %vm4095_vm4, %v7550_v40  ;;  %v12441_v33 = vmul.f32 %v11905_v11, %v12127_v25  ;;  %v12445_v54 = vmul.f32 %v11905_v11, %v12133_v52  ;;  %v12449_v6 = vmul.f32 %v11905_v11, %v12139_v62  ;;  %v12453_v60 = vmul.f32 %v11905_v11, %v12145_v26 }
 0x3b7   :  { %v12457_v9 = vmul.f32 %v11905_v11, %v12151_v16  ;;  %v12461_v25 = vmul.f32 %v11905_v11, %v12157_v23  ;;  %v12465_v52 = vmul.f32 %v11905_v11, %v12163_v41  ;;  %v12469_v62 = vmul.f32 %v11905_v11, %v12169_v34 }
 0x3b8   :  { %v12473_v26 = vmul.f32 %v11905_v11, %v12175_v30  ;;  %v12477_v16 = vmul.f32 %v11905_v11, %v12181_v5  ;;  %v12481_v23 = vmul.f32 %v11905_v11, %v12187_v4  ;;  %v12485_v41 = vmul.f32 %v11905_v11, %v16902_v59 }
 0x3b9   :  { %v12489_v34 = vmul.f32 %v11905_v11, %v12199_v18  ;;  %v12493_v30 = vmul.f32 %v11905_v11, %v12205_v12  ;;  %v12497_v5 = vmul.f32 %v11905_v11, %v16903_v31  ;;  %v12501_v4 = vmul.f32 %v11905_v11, %v16904_v19 }
 0x3ba   :  { %v12505_v40 = vmul.f32 %v11905_v11, %v12223_v63  ;;  %v12509_v18 = vmul.f32 %v11905_v11, %v12229_v7  ;;  %v12513_v12 = vmul.f32 %v11905_v11, %v12235_v47  ;;  %v12517_v43 = vmul.f32 %v11905_v11, %v12243_v35  ;;  %v16910_v35 = vld [vmem:[#allocation11_spill] sm:$0xff] }
 0x3bb   :  { %v12521_v59 = vmul.f32 %v11905_v11, %v12249_v1  ;;  %v12523_v19 = vld [vmem:[#allocation2 + $0x4] sm:$0xf]  ;;  %v12527_v63 = vmul.f32 %v11905_v11, %v12255_v17  ;;  %v12531_v7 = vmul.f32 %v11905_v11, %v12263_v49  ;;  %v12535_v47 = vmul.f32 %v11905_v11, %v12269_v39  ;;  %v16914_v49 = vld [vmem:[#allocation67_spill] sm:$0xff]  ;;  %v16915_v39 = vld [vmem:[#allocation74_spill] sm:$0xff] }
 0x3bc   :  { %16906 = vst [vmem:[#allocation85_spill] sm:$0xff] %v12523_v19  ;;  %v12539_v44 = vmul.f32 %v11905_v11, %v16910_v35  ;;  %v16913_v17 = vld [vmem:[#allocation65_spill] sm:$0xff]  ;;  %v3973_v35 = vadd.f32 %v11934_v32, %v12326_v57 }
 0x3bd   :  { %16905 = vst [vmem:[#allocation77_spill] sm:$0xff] %v12521_v59  ;;  %v4421_v31 = vld [vmem:[#allocation2] sm:$0xf]  ;;  %16907 = vst [vmem:[#allocation92_spill] sm:$0xff] %v12527_v63  ;;  %v12546_v59 = vmul.f32 %v11905_v11, %v16912_v14  ;;  %v12550_v63 = vmul.f32 %v11905_v11, %v16913_v17  ;;  %v12566_v14 = vmul.f32 %v11905_v11, %v12316_v48 }
 0x3be   :  { %16908 = vst [vmem:[#allocation81_spill] sm:$0xff] %v12531_v7  ;;  %16909 = vst [vmem:[#allocation88_spill] sm:$0xff] %v12535_v47  ;;  %v12542_v1 = vcombine.low %v4421_v31, %v12523_v19  ;;  %v12554_v7 = vmul.f32 %v11905_v11, %v16914_v49  ;;  %v12558_v47 = vmul.f32 %v11905_v11, %v16915_v39 }
 0x3bf   :  { %v12562_v31 = vmul.f32 %v11905_v11, %v12308_v53  ;;  %16918 = vst [vmem:[#allocation106_spill] sm:$0xff] %v12566_v14  ;;  %v3974_v19 = vadd.f32 %v11934_v32, %v12330_v36  ;;  %v3975_v39 = vadd.f32 %v11934_v32, %v12334_v38  ;;  %v3976_v53 = vadd.f32 %v11934_v32, %v12341_v61 }
 0x3c0   :  { %16911 = vst [vmem:[#allocation95_spill] sm:$0xff] %v12542_v1  ;;  %16916 = vst [vmem:[#allocation100_spill] sm:$0xff] %v12558_v47  ;;  %v4659_v17 = vshrl.u32 %v12542_v1, 16  ;;  %v4661_v49 = vshll.u32 %v12542_v1, 16  ;;  %v12580_v11 = vadd.f32 %v11934_v32, %v12345_v0  ;;  %v12584_v48 = vadd.f32 %v11934_v32, %v12349_v8 }
 0x3c1   :  { %16917 = vst [vmem:[#allocation102_spill] sm:$0xff] %v12562_v31  ;;  %v4037_v31 = vmax.f32 %v3973_v35, 0.0  ;;  %v4038_v1 = vmax.f32 %v3974_v19, 0.0  ;;  %v4039_v14 = vmax.f32 %v3975_v39, 0.0  ;;  %v12588_v36 = vadd.f32 %v11934_v32, %v12353_v13 }
 0x3c2   :  { %16919 = vst [vmem:[#allocation115_spill] sm:$0xff] %v12584_v48  ;;  %v4663_v57 = vrot.slane %v4661_v49, 1  ;;  %v4040_v38 = vmax.f32 %v3976_v53, 0.0  ;;  %v12592_v61 = vadd.f32 %v11934_v32, %v12357_v42  ;;  %v12596_v0 = vadd.f32 %v11934_v32, %v12365_v28 }
 0x3c3   :  { %v7556_v47 = vpack.c.bf16 %v4037_v31, %v4037_v31  ;;  %v7557_v8 = vpack.c.bf16 %v4038_v1, %v4038_v1  ;;  %v7558_v48 = vpack.c.bf16 %v4039_v14, %v4039_v14  ;;  %v12600_v19 = vadd.f32 %v11934_v32, %v12371_v58 }
 0x3c4   :  { %v4664_v35 = vor.u32 %v4663_v57, %v4659_v17  ;;  %v7559_v49 = vpack.c.bf16 %v4040_v38, %v4040_v38  ;;  %v12605_v13 = vadd.f32 %v11934_v32, %v12375_v21  ;;  %v12609_v42 = vadd.f32 %v11934_v32, %v12379_v51 }
 0x3c5   :  { %4363 = vst.msk [vmem:[#allocation2 + $0x18] sm:$0xf] %vm4095_vm4, %v7556_v47  ;;  %v12613_v28 = vadd.f32 %v11934_v32, %v12383_v3  ;;  %4364 = vst.msk [vmem:[#allocation2 + $0x1c] sm:$0xf] %vm4095_vm4, %v7557_v8  ;;  %v12621_v58 = vadd.f32 %v11934_v32, %v12387_v2  ;;  %v12625_v21 = vadd.f32 %v11934_v32, %v12391_v55  ;;  %v16926_v53 = vld [vmem:[#allocation81_spill] sm:$0xff] }
 0x3c6   :  { %v4669_v1 = vsel %vm16920_vm11, %v4664_v35, %v12310_v56  ;;  %4365 = vst.msk [vmem:[#allocation2 + $0x20] sm:$0xf] %vm4095_vm4, %v7558_v48  ;;  %v12629_v51 = vadd.f32 %v11934_v32, %v12395_v20  ;;  %4366 = vst.msk [vmem:[#allocation2 + $0x24] sm:$0xf] %vm4095_vm4, %v7559_v49  ;;  %v12635_v56 = vadd.f32 %v11934_v32, %v12399_v46  ;;  %v16928_v48 = vld [vmem:[#allocation88_spill] sm:$0xff] }
 0x3c7   :  { %4918 = vrot.lane.b32.xlu0 %v4669_v1, %s7999_s21  ;;  %v12639_v3 = vadd.f32 %v11934_v32, %v12403_v15  ;;  %v12643_v2 = vadd.f32 %v11934_v32, %v12407_v10  ;;  %v12647_v55 = vadd.f32 %v11934_v32, %v12413_v50  ;;  %v12651_v20 = vadd.f32 %v11934_v32, %v12417_v37  ;;  %vm16996_vm11 = vmmov %vm16989_vm0 }
 0x3c8   :  { %v12655_v46 = vadd.f32 %v11934_v32, %v12421_v22  ;;  %v12659_v15 = vadd.f32 %v11934_v32, %v12425_v24  ;;  %v12663_v10 = vadd.f32 %v11934_v32, %v12429_v29  ;;  %v12667_v50 = vadd.f32 %v11934_v32, %v12433_v45 }
 0x3c9   :  { %v12671_v37 = vadd.f32 %v11934_v32, %v12437_v27  ;;  %v12675_v22 = vadd.f32 %v11934_v32, %v12441_v33  ;;  %v12679_v24 = vadd.f32 %v11934_v32, %v12445_v54  ;;  %v12683_v29 = vadd.f32 %v11934_v32, %v12449_v6 }
 0x3ca   :  { %v12687_v45 = vadd.f32 %v11934_v32, %v12453_v60  ;;  %v12691_v27 = vadd.f32 %v11934_v32, %v12457_v9  ;;  %v12695_v33 = vadd.f32 %v11934_v32, %v12461_v25  ;;  %v12699_v54 = vadd.f32 %v11934_v32, %v12465_v52 }
 0x3cb   :  { %v12703_v6 = vadd.f32 %v11934_v32, %v12469_v62  ;;  %v12707_v60 = vadd.f32 %v11934_v32, %v12473_v26  ;;  %v12711_v9 = vadd.f32 %v11934_v32, %v12477_v16  ;;  %v12715_v25 = vadd.f32 %v11934_v32, %v12481_v23 }
 0x3cc   :  { %v12719_v52 = vadd.f32 %v11934_v32, %v12485_v41  ;;  %v12723_v62 = vadd.f32 %v11934_v32, %v12489_v34  ;;  %v12727_v26 = vadd.f32 %v11934_v32, %v12493_v30  ;;  %v12729_v47 = vld [vmem:[#allocation2 + $0x18] sm:$0xff]   ;;  %v12733_v16 = vadd.f32 %v11934_v32, %v12497_v5 }
 0x3cd   :  { %16921 = vst [vmem:[#allocation121_spill] sm:$0xff] %v12729_v47  ;;  %v12737_v23 = vadd.f32 %v11934_v32, %v12501_v4  ;;  %v12741_v41 = vadd.f32 %v11934_v32, %v12505_v40  ;;  %v12745_v34 = vadd.f32 %v11934_v32, %v12509_v18  ;;  %v12747_v30 = vld [vmem:[#allocation2 + $0x20] sm:$0xff]   ;;  %v12751_v31 = vadd.f32 %v11934_v32, %v12513_v12 }
 0x3ce   :  { %16922 = vst [vmem:[#allocation112_spill] sm:$0xff] %v12747_v30  ;;  %v12755_v5 = vadd.f32 %v11934_v32, %v12517_v43  ;;  %v16923_v4 = vld [vmem:[#allocation77_spill] sm:$0xff]  ;;  %v16924_v40 = vld [vmem:[#allocation92_spill] sm:$0xff]  ;;  %v4682_v18 = vshll.u32 %v12729_v47, 16  ;;  %v4686_v39 = vshrl.u32 %v12729_v47, 16  ;;  %v12769_v12 = vadd.f32 %v11934_v32, %v16926_v53  ;;  %v16935_v53 = vld [vmem:[#allocation102_spill] sm:$0xff] }
 0x3cf   :  { %v12759_v14 = vadd.f32 %v11934_v32, %v16923_v4  ;;  %v12763_v17 = vadd.f32 %v11934_v32, %v16924_v40  ;;  %v12773_v43 = vadd.f32 %v11934_v32, %v16928_v48  ;;  %v4690_v57 = vshll.u32 %v12747_v30, 16  ;;  %v16933_v4 = vld [vmem:[#allocation100_spill] sm:$0xff] }
 0x3d0   :  { %16927 = vst [vmem:[#allocation133_spill] sm:$0xff] %v12769_v12  ;;  %v12778_v38 = vadd.f32 %v11934_v32, %v12539_v44  ;;  %v12782_v35 = vadd.f32 %v11934_v32, %v12546_v59  ;;  %v12786_v8 = vadd.f32 %v11934_v32, %v12550_v63  ;;  %v4684_v49 = vrot.slane %v4682_v18, 1  ;;  %v16938_v59 = vld [vmem:[#allocation106_spill] sm:$0xff]  ;;  %v16939_v63 = vld [vmem:[#allocation61_spill] sm:$0xff] }
 0x3d1   :  { %16925 = vst [vmem:[#allocation117_spill] sm:$0xff] %v12763_v17  ;;  %16929 = vst [vmem:[#allocation138_spill] sm:$0xff] %v12773_v43  ;;  %v12790_v1 = vadd.f32 %v11934_v32, %v12554_v7  ;;  %v12794_v40 = vadd.f32 %v11934_v32, %v16933_v4  ;;  %v12798_v44 = vadd.f32 %v11934_v32, %v16935_v53  ;;  %v12800_v48 = vrot.slane %v4690_v57, 1 }
 0x3d2   :  { %16930 = vst [vmem:[#allocation143_spill] sm:$0xff] %v12782_v35  ;;  %16931 = vst [vmem:[#allocation153_spill] sm:$0xff] %v12786_v8  ;;  %v12804_v47 = vadd.f32 %v11934_v32, %v16938_v59  ;;  %v4678_v18 = vshrl.u32 %v16939_v63, 16  ;;  %v4041_v30 = vmax.f32 %v12580_v11, 0.0  ;;  %v4688_v7 = vor.u32 %v4686_v39, %v4684_v49  ;;  %v16941_v35 = vld [vmem:[#allocation80_spill] sm:$0xff] }
 0x3d3   :  { %16932 = vst [vmem:[#allocation93_spill] sm:$0xff] %v12790_v1  ;;  %16934 = vst [vmem:[#allocation98_spill] sm:$0xff] %v12794_v40  ;;  %v16940_v1 = vld [vmem:[#allocation115_spill] sm:$0xff]  ;;  %v4043_v4 = vmax.f32 %v12588_v36, 0.0  ;;  %v4044_v40 = vmax.f32 %v12592_v61, 0.0  ;;  %v4045_v57 = vmax.f32 %v12596_v0, 0.0 }
 0x3d4   :  { %16936 = vst [vmem:[#allocation104_spill] sm:$0xff] %v12798_v44  ;;  %16937 = vst [vmem:[#allocation110_spill] sm:$0xff] %v12800_v48  ;;  %v4042_v8 = vmax.f32 %v16940_v1, 0.0  ;;  %v4680_v53 = vor.u32 %v4678_v18, %v16941_v35  ;;  %v4046_v44 = vmax.f32 %v12600_v19, 0.0  ;;  %v4047_v32 = vmax.f32 %v12605_v13, 0.0 }
 0x3d5   :  { %v12817_v59 = vsel %vm16942_vm1, %v4688_v7, %v12800_v48  ;;  %v4048_v11 = vmax.f32 %v12609_v42, 0.0  ;;  %v4049_v39 = vmax.f32 %v12613_v28, 0.0  ;;  %v4050_v36 = vmax.f32 %v12621_v58, 0.0  ;;  %vm16997_vm1 = vmmov %vm16989_vm0 }
 0x3d6   :  { %16943 = vst [vmem:[#allocation127_spill] sm:$0xff] %v12817_v59  ;;  %4924 = vrot.lane.b32.xlu1 %v12817_v59, %s7999_s21  ;;  %v12825_v61 = vsel %vm16944_vm14, %v4680_v53, %v4684_v49  ;;  %v4051_v0 = vmax.f32 %v12625_v21, 0.0  ;;  %v4052_v19 = vmax.f32 %v12629_v51, 0.0  ;;  %v4053_v13 = vmax.f32 %v12635_v56, 0.0  ;;  %vm16998_vm14 = vmmov %vm16989_vm0 }
 0x3d7   :  { %16945 = vst [vmem:[#allocation130_spill] sm:$0xff] %v12825_v61  ;;  %4922 = vrot.lane.b32.xlu0 %v12825_v61, %s7999_s21  ;;  %v4054_v42 = vmax.f32 %v12639_v3, 0.0  ;;  %v4055_v28 = vmax.f32 %v12643_v2, 0.0  ;;  %v4056_v58 = vmax.f32 %v12647_v55, 0.0  ;;  %v4057_v35 = vmax.f32 %v12651_v20, 0.0 }
 0x3d8   :  { %v4058_v49 = vmax.f32 %v12655_v46, 0.0  ;;  %v4059_v1 = vmax.f32 %v12659_v15, 0.0  ;;  %v4060_v21 = vmax.f32 %v12663_v10, 0.0  ;;  %v7560_v48 = vpack.c.bf16 %v4041_v30, %v4041_v30 }
 0x3d9   :  { %v16946_v56 = vld [vmem:[#allocation143_spill] sm:$0xff]  ;;  %v16947_v51 = vld [vmem:[#allocation153_spill] sm:$0xff]  ;;  %v7561_v3 = vpack.c.bf16 %v4042_v8, %v4042_v8  ;;  %v7562_v17 = vpack.c.bf16 %v4043_v4, %v4043_v4  ;;  %v7563_v2 = vpack.c.bf16 %v4044_v40, %v4044_v40  ;;  %v7564_v12 = vpack.c.bf16 %v4045_v57, %v4045_v57 }
 0x3da   :  { %v4088_v46 = vmax.f32 %v16946_v56, 0.0  ;;  %v4089_v15 = vmax.f32 %v16947_v51, 0.0  ;;  %v16948_v59 = vld [vmem:[#allocation93_spill] sm:$0xff]  ;;  %v16949_v61 = vld [vmem:[#allocation98_spill] sm:$0xff]  ;;  %v7565_v55 = vpack.c.bf16 %v4046_v44, %v4046_v44  ;;  %v7566_v43 = vpack.c.bf16 %v4047_v32, %v4047_v32  ;;  %4367 = vst.msk [vmem:[#allocation2 + $0x28] sm:$0xf] %vm4095_vm4, %v7560_v48 }
 0x3db   :  { %v16950_v63 = vld [vmem:[#allocation104_spill] sm:$0xff]  ;;  %v7567_v20 = vpack.c.bf16 %v4048_v11, %v4048_v11  ;;  %4368 = vst.msk [vmem:[#allocation2 + $0x2c] sm:$0xf] %vm4095_vm4, %v7561_v3  ;;  %4369 = vst.msk [vmem:[#allocation2 + $0x30] sm:$0xf] %vm4095_vm4, %v7562_v17  ;;  %v7568_v7 = vpack.c.bf16 %v4049_v39, %v4049_v39  ;;  %v7569_v53 = vpack.c.bf16 %v4050_v36, %v4050_v36  ;;  %v16953_v39 = vmax.f32 %v12675_v22, 0.0 }
 0x3dc   :  { %4370 = vst.msk [vmem:[#allocation2 + $0x34] sm:$0xf] %vm4095_vm4, %v7563_v2  ;;  %v7570_v10 = vpack.c.bf16 %v4051_v0, %v4051_v0  ;;  %v7571_v18 = vpack.c.bf16 %v4052_v19, %v4052_v19  ;;  %v7572_v30 = vpack.c.bf16 %v4053_v13, %v4053_v13  ;;  %v7573_v8 = vpack.c.bf16 %v4054_v42, %v4054_v42 }
 0x3dd   :  { %v7574_v4 = vpack.c.bf16 %v4055_v28, %v4055_v28  ;;  %v7575_v40 = vpack.c.bf16 %v4056_v58, %v4056_v58  ;;  %4371 = vst.msk [vmem:[#allocation2 + $0x38] sm:$0xf] %vm4095_vm4, %v7564_v12  ;;  %4372 = vst.msk [vmem:[#allocation2 + $0x3c] sm:$0xf] %vm4095_vm4, %v7565_v55  ;;  %v7576_v44 = vpack.c.bf16 %v4057_v35, %v4057_v35  ;;  %v16951_v12 = vmax.f32 %v12667_v50, 0.0 }
 0x3de   :  { %4373 = vst.msk [vmem:[#allocation2 + $0x40] sm:$0xf] %vm4095_vm4, %v7566_v43  ;;  %4374 = vst.msk [vmem:[#allocation2 + $0x44] sm:$0xf] %vm4095_vm4, %v7567_v20  ;;  %v7577_v17 = vpack.c.bf16 %v4058_v49, %v4058_v49  ;;  %v7578_v48 = vpack.c.bf16 %v4059_v1, %v4059_v1  ;;  %v7579_v57 = vpack.c.bf16 %v4060_v21, %v4060_v21  ;;  %v16952_v43 = vmax.f32 %v12671_v37, 0.0 }
 0x3df   :  { %4375 = vst.msk [vmem:[#allocation2 + $0x48] sm:$0xf] %vm4095_vm4, %v7568_v7  ;;  %4376 = vst.msk [vmem:[#allocation2 + $0x4c] sm:$0xf] %vm4095_vm4, %v7569_v53  ;;  %v7580_v32 = vpack.c.bf16 %v16951_v12, %v16951_v12  ;;  %v7582_v36 = vpack.c.bf16 %v16953_v39, %v16953_v39  ;;  %v16954_v0 = vmax.f32 %v12679_v24, 0.0  ;;  %v16955_v50 = vmax.f32 %v12683_v29, 0.0 }
 0x3e0   :  { %4377 = vst.msk [vmem:[#allocation2 + $0x50] sm:$0xf] %vm4095_vm4, %v7570_v10  ;;  %4378 = vst.msk [vmem:[#allocation2 + $0x54] sm:$0xf] %vm4095_vm4, %v7571_v18  ;;  %v7581_v11 = vpack.c.bf16 %v16952_v43, %v16952_v43  ;;  %v16956_v22 = vmax.f32 %v12687_v45, 0.0  ;;  %v16957_v24 = vmax.f32 %v12691_v27, 0.0  ;;  %v7607_v39 = vpack.c.bf16 %v4088_v46, %v4088_v46 }
 0x3e1   :  { %v7583_v19 = vpack.c.bf16 %v16954_v0, %v16954_v0  ;;  %4379 = vst.msk [vmem:[#allocation2 + $0x58] sm:$0xf] %vm4095_vm4, %v7572_v30  ;;  %4380 = vst.msk [vmem:[#allocation2 + $0x5c] sm:$0xf] %vm4095_vm4, %v7573_v8  ;;  %v7584_v37 = vpack.c.bf16 %v16955_v50, %v16955_v50  ;;  %v16958_v28 = vmax.f32 %v12695_v33, 0.0  ;;  %v16959_v29 = vmax.f32 %v12699_v54, 0.0 }
 0x3e2   :  { %4381 = vst.msk [vmem:[#allocation2 + $0x60] sm:$0xf] %vm4095_vm4, %v7574_v4  ;;  %4382 = vst.msk [vmem:[#allocation2 + $0x64] sm:$0xf] %vm4095_vm4, %v7575_v40  ;;  %v7585_v13 = vpack.c.bf16 %v16956_v22, %v16956_v22  ;;  %v7586_v42 = vpack.c.bf16 %v16957_v24, %v16957_v24  ;;  %v16960_v27 = vmax.f32 %v12703_v6, 0.0  ;;  %v16961_v33 = vmax.f32 %v12707_v60, 0.0 }
 0x3e3   :  { %v7587_v58 = vpack.c.bf16 %v16958_v28, %v16958_v28  ;;  %4383 = vst.msk [vmem:[#allocation2 + $0x68] sm:$0xf] %vm4095_vm4, %v7576_v44  ;;  %4384 = vst.msk [vmem:[#allocation2 + $0x6c] sm:$0xf] %vm4095_vm4, %v7577_v17  ;;  %v7588_v45 = vpack.c.bf16 %v16959_v29, %v16959_v29  ;;  %v16962_v1 = vmax.f32 %v12711_v9, 0.0  ;;  %v16963_v54 = vmax.f32 %v12715_v25, 0.0 }
 0x3e4   :  { %4385 = vst.msk [vmem:[#allocation2 + $0x70] sm:$0xf] %vm4095_vm4, %v7578_v48  ;;  %4386 = vst.msk [vmem:[#allocation2 + $0x74] sm:$0xf] %vm4095_vm4, %v7579_v57  ;;  %v7589_v35 = vpack.c.bf16 %v16960_v27, %v16960_v27  ;;  %v7590_v49 = vpack.c.bf16 %v16961_v33, %v16961_v33  ;;  %v16964_v60 = vmax.f32 %v12719_v52, 0.0  ;;  %v16965_v9 = vmax.f32 %v12723_v62, 0.0 }
 0x3e5   :  { %v7591_v21 = vpack.c.bf16 %v16962_v1, %v16962_v1  ;;  %4387 = vst.msk [vmem:[#allocation2 + $0x78] sm:$0xf] %vm4095_vm4, %v7580_v32  ;;  %4388 = vst.msk [vmem:[#allocation2 + $0x7c] sm:$0xf] %vm4095_vm4, %v7581_v11  ;;  %v7592_v6 = vpack.c.bf16 %v16963_v54, %v16963_v54  ;;  %v16966_v2 = vmax.f32 %v12727_v26, 0.0  ;;  %v16967_v25 = vmax.f32 %v12733_v16, 0.0 }
 0x3e6   :  { %4389 = vst.msk [vmem:[#allocation2 + $0x80] sm:$0xf] %vm4095_vm4, %v7582_v36  ;;  %4390 = vst.msk [vmem:[#allocation2 + $0x84] sm:$0xf] %vm4095_vm4, %v7583_v19  ;;  %v7593_v18 = vpack.c.bf16 %v16964_v60, %v16964_v60  ;;  %v7594_v3 = vpack.c.bf16 %v16965_v9, %v16965_v9  ;;  %v16968_v62 = vmax.f32 %v12737_v23, 0.0  ;;  %v16969_v26 = vmax.f32 %v12741_v41, 0.0 }
 0x3e7   :  { %v7595_v55 = vpack.c.bf16 %v16966_v2, %v16966_v2  ;;  %4391 = vst.msk [vmem:[#allocation2 + $0x88] sm:$0xf] %vm4095_vm4, %v7584_v37  ;;  %4392 = vst.msk [vmem:[#allocation2 + $0x8c] sm:$0xf] %vm4095_vm4, %v7585_v13  ;;  %v7596_v52 = vpack.c.bf16 %v16967_v25, %v16967_v25  ;;  %v16970_v7 = vmax.f32 %v12745_v34, 0.0  ;;  %v12964_v16 = vld [vmem:[#allocation2 + $0x28] sm:$0xff]   ;;  %v7608_v56 = vpack.c.bf16 %v4089_v15, %v4089_v15 }
 0x3e8   :  { %4393 = vst.msk [vmem:[#allocation2 + $0x90] sm:$0xf] %vm4095_vm4, %v7586_v42  ;;  %4394 = vst.msk [vmem:[#allocation2 + $0x94] sm:$0xf] %vm4095_vm4, %v7587_v58  ;;  %v7597_v20 = vpack.c.bf16 %v16968_v62, %v16968_v62  ;;  %v7598_v10 = vpack.c.bf16 %v16969_v26, %v16969_v26  ;;  %v12966_v23 = vld [vmem:[#allocation2 + $0x30] sm:$0xff]   ;;  %v16971_v41 = vmax.f32 %v12751_v31, 0.0 }
 0x3e9   :  { %v7599_v53 = vpack.c.bf16 %v16970_v7, %v16970_v7  ;;  %4395 = vst.msk [vmem:[#allocation2 + $0x98] sm:$0xf] %vm4095_vm4, %v7588_v45  ;;  %4396 = vst.msk [vmem:[#allocation2 + $0x9c] sm:$0xf] %vm4095_vm4, %v7589_v35  ;;  %v16972_v34 = vmax.f32 %v12755_v5, 0.0  ;;  %v16973_v4 = vmax.f32 %v12759_v14, 0.0 }
 0x3ea   :  { %4397 = vst.msk [vmem:[#allocation2 + $0xa0] sm:$0xf] %vm4095_vm4, %v7590_v49  ;;  %4398 = vst.msk [vmem:[#allocation2 + $0xa4] sm:$0xf] %vm4095_vm4, %v7591_v21  ;;  %v7600_v30 = vpack.c.bf16 %v16971_v41, %v16971_v41  ;;  %v16974_v44 = vld [vmem:[#allocation117_spill] sm:$0xff]  ;;  %v16978_v12 = vld [vmem:[#allocation138_spill] sm:$0xff] }
 0x3eb   :  { %v7601_v8 = vpack.c.bf16 %v16972_v34, %v16972_v34  ;;  %v7602_v40 = vpack.c.bf16 %v16973_v4, %v16973_v4  ;;  %v16975_v17 = vmax.f32 %v16974_v44, 0.0  ;;  %4399 = vst.msk [vmem:[#allocation2 + $0xa8] sm:$0xf] %vm4095_vm4, %v7592_v6  ;;  %4400 = vst.msk [vmem:[#allocation2 + $0xac] sm:$0xf] %vm4095_vm4, %v7593_v18  ;;  %v16976_v31 = vld [vmem:[#allocation133_spill] sm:$0xff] }
 0x3ec   :  { %4401 = vst.msk [vmem:[#allocation2 + $0xb0] sm:$0xf] %vm4095_vm4, %v7594_v3  ;;  %4402 = vst.msk [vmem:[#allocation2 + $0xb4] sm:$0xf] %vm4095_vm4, %v7595_v55  ;;  %v16977_v5 = vmax.f32 %v16976_v31, 0.0  ;;  %v16979_v14 = vmax.f32 %v16978_v12, 0.0 }
 0x3ed   :  { %v7603_v48 = vpack.c.bf16 %v16975_v17, %v16975_v17  ;;  %v16980_v43 = vmax.f32 %v12778_v38, 0.0  ;;  %4403 = vst.msk [vmem:[#allocation2 + $0xb8] sm:$0xf] %vm4095_vm4, %v7596_v52  ;;  %4404 = vst.msk [vmem:[#allocation2 + $0xbc] sm:$0xf] %vm4095_vm4, %v7597_v20  ;;  %v4698_v36 = vshll.u32 %v12964_v16, 16 }
 0x3ee   :  { %v7604_v57 = vpack.c.bf16 %v16977_v5, %v16977_v5  ;;  %v7605_v32 = vpack.c.bf16 %v16979_v14, %v16979_v14  ;;  %4405 = vst.msk [vmem:[#allocation2 + $0xc0] sm:$0xf] %vm4095_vm4, %v7598_v10  ;;  %4406 = vst.msk [vmem:[#allocation2 + $0xc4] sm:$0xf] %vm4095_vm4, %v7599_v53  ;;  %v4702_v0 = vshrl.u32 %v12964_v16, 16  ;;  %v4706_v38 = vshll.u32 %v12966_v23, 16 }
 0x3ef   :  { %v7606_v11 = vpack.c.bf16 %v16980_v43, %v16980_v43  ;;  %4407 = vst.msk [vmem:[#allocation2 + $0xc8] sm:$0xf] %vm4095_vm4, %v7600_v30  ;;  %4408 = vst.msk [vmem:[#allocation2 + $0xcc] sm:$0xf] %vm4095_vm4, %v7601_v8  ;;  %v13010_v46 = vld [vmem:[#allocation2 + $0x38] sm:$0xff]   ;;  %v16981_v19 = vmax.f32 %v16948_v59, 0.0 }
 0x3f0   :  { %4409 = vst.msk [vmem:[#allocation2 + $0xd0] sm:$0xf] %vm4095_vm4, %v7602_v40  ;;  %4410 = vst.msk [vmem:[#allocation2 + $0xd4] sm:$0xf] %vm4095_vm4, %v7603_v48  ;;  %v16982_v37 = vmax.f32 %v16949_v61, 0.0  ;;  %v16983_v15 = vmax.f32 %v16950_v63, 0.0 }
 0x3f1   :  { %v7609_v50 = vpack.c.bf16 %v16981_v19, %v16981_v19  ;;  %v16984_v13 = vmax.f32 %v12804_v47, 0.0  ;;  %4411 = vst.msk [vmem:[#allocation2 + $0xd8] sm:$0xf] %vm4095_vm4, %v7604_v57  ;;  %4412 = vst.msk [vmem:[#allocation2 + $0xdc] sm:$0xf] %vm4095_vm4, %v7605_v32  ;;  %v13028_v59 = vld [vmem:[#allocation2 + $0x40] sm:$0xff]  }
 0x3f2   :  { %v7610_v51 = vpack.c.bf16 %v16982_v37, %v16982_v37  ;;  %v7612_v22 = vpack.c.bf16 %v16983_v15, %v16983_v15  ;;  %4413 = vst.msk [vmem:[#allocation2 + $0xe0] sm:$0xf] %vm4095_vm4, %v7606_v11  ;;  %4414 = vst.msk [vmem:[#allocation2 + $0xe4] sm:$0xf] %vm4095_vm4, %v7607_v39  ;;  %v4700_v61 = vrot.slane %v4698_v36, 1  ;;  %v4708_v42 = vrot.slane %v4706_v38, 1 }
 0x3f3   :  { %v7613_v24 = vpack.c.bf16 %v16984_v13, %v16984_v13  ;;  %v16985_v28 = vld [vmem:[#allocation112_spill] sm:$0xff]  ;;  %4415 = vst.msk [vmem:[#allocation2 + $0xe8] sm:$0xf] %vm4095_vm4, %v7608_v56  ;;  %v4714_v47 = vshll.u32 %v13010_v46, 16  ;;  %4416 = vst.msk [vmem:[#allocation2 + $0xec] sm:$0xf] %vm4095_vm4, %v7609_v50 }
 0x3f4   :  { %v4694_v63 = vshrl.u32 %v16985_v28, 16  ;;  %4417 = vst.msk [vmem:[#allocation2 + $0xf0] sm:$0xf] %vm4095_vm4, %v7610_v51  ;;  %4419 = vst.msk [vmem:[#allocation2 + $0xf8] sm:$0xf] %vm4095_vm4, %v7612_v22  ;;  %v4722_v58 = vshll.u32 %v13028_v59, 16  ;;  %v4704_v27 = vor.u32 %v4702_v0, %v4700_v61 }
 0x3f5   :  { %4420 = vst.msk [vmem:[#allocation2 + $0xfc] sm:$0xf] %vm4095_vm4, %v7613_v24  ;;  %v4710_v29 = vshrl.u32 %v12966_v23, 16  ;;  %v13039_v45 = vld [vmem:[#allocation2 + $0x48] sm:$0xff]   ;;  %v4716_v49 = vrot.slane %v4714_v47, 1  ;;  %v4718_v1 = vshrl.u32 %v13010_v46, 16  ;;  %vm16994_vm4 = vmmov %vm16989_vm0 }
 0x3f6   :  { %v16986_v35 = vld [vmem:[#allocation110_spill] sm:$0xff]  ;;  %v13045_v54 = vld [vmem:[#allocation2 + $0x58] sm:$0xff]   ;;  %v4724_v6 = vrot.slane %v4722_v58, 1  ;;  %v4730_v18 = vshll.u32 %v13039_v45, 16  ;;  %v4726_v9 = vshrl.u32 %v13028_v59, 16  ;;  %v13049_v3 = vld [vmem:[#allocation2 + $0x60] sm:$0xff]   ;;  %v13052_v2 = vsel %vm16987_vm13, %v4704_v27, %v4708_v42 }
 0x3f7   :  { %v4696_v33 = vor.u32 %v4694_v63, %v16986_v35  ;;  %v13043_v21 = vld [vmem:[#allocation2 + $0x50] sm:$0xff]   ;;  %v4712_v60 = vor.u32 %v4710_v29, %v4708_v42  ;;  %v4720_v25 = vor.u32 %v4718_v1, %v4716_v49  ;;  %v13058_v62 = vld [vmem:[#allocation2 + $0x68] sm:$0xff]   ;;  %4928 = vrot.lane.b32.xlu1 %v13052_v2, %s7999_s21  ;;  %v4746_v26 = vshll.u32 %v13045_v54, 16  ;;  %v13082_v31 = vld [vmem:[#allocation2 + $0x78] sm:$0xff]  }
 0x3f8   :  { %v4738_v52 = vshll.u32 %v13043_v21, 16  ;;  %v4732_v20 = vrot.slane %v4730_v18, 1  ;;  %v4734_v10 = vshrl.u32 %v13039_v45, 16  ;;  %v4728_v30 = vor.u32 %v4726_v9, %v4724_v6  ;;  %v13072_v8 = vld [vmem:[#allocation2 + $0x70] sm:$0xff]   ;;  %v13084_v5 = vld [vmem:[#allocation2 + $0x80] sm:$0xff]   ;;  %v13094_v0 = vld [vmem:[#allocation2 + $0x88] sm:$0xff]  }
 0x3f9   :  { %v13055_v55 = vsel %vm16988_vm15, %v4696_v33, %v4700_v61  ;;  %v13067_v53 = vsel %vm16989_vm0, %v4720_v25, %v4724_v6  ;;  %v13070_v41 = vsel %vm16990_vm10, %v4712_v60, %v4716_v49  ;;  %v4748_v34 = vrot.slane %v4746_v26, 1  ;;  %v13103_v50 = vld [vmem:[#allocation2 + $0x90] sm:$0xff]   ;;  %v13111_v22 = vld [vmem:[#allocation2 + $0x98] sm:$0xff]   ;;  %v7913_v33 = vld [vmem:[#allocation2 + $0xa8] sm:$0xff]  }
 0x3fa   :  { %4926 = vrot.lane.b32.xlu0 %v13055_v55, %s7999_s21  ;;  %v4740_v7 = vrot.slane %v4738_v52, 1  ;;  %v4736_v4 = vor.u32 %v4734_v10, %v4732_v20  ;;  %v4750_v40 = vshrl.u32 %v13045_v54, 16  ;;  %v4754_v44 = vshll.u32 %v13049_v3, 16  ;;  %v13128_v18 = vld [vmem:[#allocation2 + $0xa0] sm:$0xff]   ;;  %v7914_v10 = vld [vmem:[#allocation2 + $0xb0] sm:$0xff]   ;;  %vm16999_vm13 = vmmov %vm16989_vm0 }
 0x3fb   :  { %v4762_v17 = vshll.u32 %v13058_v62, 16  ;;  %4932 = vrot.lane.b32.xlu1 %v13067_v53, %s7999_s21  ;;  %v4742_v48 = vshrl.u32 %v13043_v21, 16  ;;  %v13087_v57 = vsel %vm16991_vm9, %v4728_v30, %v4732_v20  ;;  %v4770_v32 = vshll.u32 %v13072_v8, 16  ;;  %vm17000_vm15 = vmmov %vm16989_vm0 }
 0x3fc   :  { %v4752_v12 = vor.u32 %v4750_v40, %v4748_v34  ;;  %v13091_v43 = vsel %vm16992_vm12, %v4736_v4, %v4740_v7  ;;  %v4756_v11 = vrot.slane %v4754_v44, 1  ;;  %v4778_v36 = vshll.u32 %v13082_v31, 16  ;;  %v7915_v44 = vld [vmem:[#allocation2 + $0xb8] sm:$0xff]   ;;  %vm17001_vm10 = vmmov %vm16989_vm0 }
 0x3fd   :  { %v4744_v14 = vor.u32 %v4742_v48, %v4740_v7  ;;  %v4764_v39 = vrot.slane %v4762_v17, 1  ;;  %v4766_v38 = vshrl.u32 %v13058_v62, 16  ;;  %v4758_v56 = vshrl.u32 %v13049_v3, 16  ;;  %vm17002_vm9 = vmmov %vm16989_vm0 }
 0x3fe   :  { %4930 = vrot.lane.b32.xlu0 %v13070_v41, %s7999_s21  ;;  %v4786_v19 = vshll.u32 %v13084_v5, 16  ;;  %v13106_v37 = vsel %vm16993_vm2, %v4752_v12, %v4756_v11  ;;  %v4772_v15 = vrot.slane %v4770_v32, 1  ;;  %v4780_v61 = vrot.slane %v4778_v36, 1  ;;  %vm17003_vm12 = vmmov %vm16989_vm0 }
 0x3ff   :  { %4936 = vrot.lane.b32.xlu1 %v13091_v43, %s7999_s21  ;;  %v13109_v51 = vsel %vm16994_vm4, %v4744_v14, %v4748_v34  ;;  %v4768_v13 = vor.u32 %v4766_v38, %v4764_v39  ;;  %v4760_v24 = vor.u32 %v4758_v56, %v4756_v11  ;;  %v4794_v42 = vshll.u32 %v13094_v0, 16  ;;  %vm17004_vm2 = vmmov %vm16989_vm0 }
 0x400   :  { %v4774_v63 = vshrl.u32 %v13072_v8, 16  ;;  %v4782_v47 = vshrl.u32 %v13082_v31, 16  ;;  %v4788_v58 = vrot.slane %v4786_v19, 1  ;;  %v4802_v29 = vshll.u32 %v13103_v50, 16  ;;  %vm17006_vm4 = vmmov %vm16989_vm0 }
 0x401   :  { %v4810_v35 = vshll.u32 %v13111_v22, 16  ;;  %v13123_v49 = vsel %vm16995_vm8, %v4768_v13, %v4772_v15  ;;  %v13126_v1 = vsel %vm16996_vm11, %v4760_v24, %v4764_v39  ;;  %v4796_v60 = vrot.slane %v4794_v42, 1  ;;  %v7916_v39 = vld [vmem:[#allocation2 + $0xc0] sm:$0xff]   ;;  %vm17008_vm8 = vmmov %vm16989_vm0 }
 0x402   :  { %4934 = vrot.lane.b32.xlu0 %v13087_v57, %s7999_s21  ;;  %v4776_v27 = vor.u32 %v4774_v63, %v4772_v15  ;;  %v4784_v6 = vor.u32 %v4782_v47, %v4780_v61  ;;  %v4790_v9 = vshrl.u32 %v13084_v5, 16  ;;  %v4798_v25 = vshrl.u32 %v13094_v0, 16  ;;  %v7917_v15 = vld [vmem:[#allocation2 + $0xc8] sm:$0xff]   ;;  %vm17010_vm11 = vmmov %vm16989_vm0 }
 0x403   :  { %4940 = vrot.lane.b32.xlu1 %v13106_v37, %s7999_s21  ;;  %v4804_v52 = vrot.slane %v4802_v29, 1  ;;  %v4812_v26 = vrot.slane %v4810_v35, 1  ;;  %v4826_v7 = vshll.u32 %v7913_v33, 16  ;;  %v4818_v40 = vshll.u32 %v13128_v18, 16  ;;  %v7919_v29 = vld [vmem:[#allocation2 + $0xd8] sm:$0xff]  }
 0x404   :  { %v4792_v20 = vor.u32 %v4790_v9, %v4788_v58  ;;  %v13137_v30 = vsel %vm16997_vm1, %v4784_v6, %v4788_v58  ;;  %v13140_v34 = vsel %vm16998_vm14, %v4776_v27, %v4780_v61  ;;  %v4800_v4 = vor.u32 %v4798_v25, %v4796_v60  ;;  %v7918_v58 = vld [vmem:[#allocation2 + $0xd0] sm:$0xff]   ;;  %vm17012_vm1 = vmmov %vm16989_vm0 }
 0x405   :  { %v4814_v17 = vshrl.u32 %v13111_v22, 16  ;;  %v4806_v48 = vshrl.u32 %v13103_v50, 16  ;;  %v4828_v11 = vrot.slane %v4826_v7, 1  ;;  %v4820_v38 = vrot.slane %v4818_v40, 1  ;;  %v7921_v7 = vld [vmem:[#allocation2 + $0xe8] sm:$0xff]   ;;  %vm17014_vm14 = vmmov %vm16989_vm0 }
 0x406   :  { %4938 = vrot.lane.b32.xlu0 %v13109_v51, %s7999_s21  ;;  %v13150_v12 = vsel %vm16999_vm13, %v4792_v20, %v4796_v60  ;;  %v13153_v36 = vsel %vm17000_vm15, %v4800_v4, %v4804_v52  ;;  %v4834_v56 = vshll.u32 %v7914_v10, 16  ;;  %v4842_v19 = vshll.u32 %v7915_v44, 16  ;;  %vm17016_vm13 = vmmov %vm16989_vm0 }
 0x407   :  { %4944 = vrot.lane.b32.xlu1 %v13123_v49, %s7999_s21  ;;  %v4816_v14 = vor.u32 %v4814_v17, %v4812_v26  ;;  %v4808_v32 = vor.u32 %v4806_v48, %v4804_v52  ;;  %v4830_v13 = vshrl.u32 %v7913_v33, 16  ;;  %v4822_v24 = vshrl.u32 %v13128_v18, 16  ;;  %vm17019_vm15 = vmmov %vm16989_vm0 }
 0x408   :  { %v4850_v47 = vshll.u32 %v7916_v39, 16  ;;  %v4836_v27 = vrot.slane %v4834_v56, 1  ;;  %v4844_v6 = vrot.slane %v4842_v19, 1  ;;  %v4858_v60 = vshll.u32 %v7917_v15, 16 }
 0x409   :  { %v13161_v61 = vsel %vm16989_vm0, %v4816_v14, %v4820_v38  ;;  %v13164_v42 = vsel %vm17001_vm10, %v4808_v32, %v4812_v26  ;;  %v4832_v63 = vor.u32 %v4830_v13, %v4828_v11  ;;  %v4824_v35 = vor.u32 %v4822_v24, %v4820_v38  ;;  %v7920_v14 = vld [vmem:[#allocation2 + $0xe0] sm:$0xff]   ;;  %vm17023_vm10 = vmmov %vm16989_vm0 }
 0x40a   :  { %4942 = vrot.lane.b32.xlu0 %v13126_v1, %s7999_s21  ;;  %v4846_v33 = vshrl.u32 %v7915_v44, 16  ;;  %v4838_v9 = vshrl.u32 %v7914_v10, 16  ;;  %v4852_v52 = vrot.slane %v4850_v47, 1  ;;  %v4866_v20 = vshll.u32 %v7918_v58, 16  ;;  %v7922_v47 = vld [vmem:[#allocation2 + $0xf0] sm:$0xff]  }
 0x40b   :  { %4948 = vrot.lane.b32.xlu1 %v13137_v30, %s7999_s21  ;;  %v13171_v25 = vsel %vm17002_vm9, %v4832_v63, %v4836_v27  ;;  %v4874_v26 = vshll.u32 %v7919_v29, 16  ;;  %v13174_v4 = vsel %vm17003_vm12, %v4824_v35, %v4828_v11  ;;  %v4860_v48 = vrot.slane %v4858_v60, 1 }
 0x40c   :  { %v4848_v40 = vor.u32 %v4846_v33, %v4844_v6  ;;  %v4840_v17 = vor.u32 %v4838_v9, %v4836_v27  ;;  %v4854_v10 = vshrl.u32 %v7916_v39, 16  ;;  %v4862_v44 = vshrl.u32 %v7917_v15, 16  ;;  %v7923_v27 = vld [vmem:[#allocation2 + $0xf8] sm:$0xff]  }
 0x40d   :  { %v4868_v32 = vrot.slane %v4866_v20, 1  ;;  %v4876_v56 = vrot.slane %v4874_v26, 1  ;;  %v4890_v19 = vshll.u32 %v7921_v7, 16  ;;  %v4882_v63 = vshll.u32 %v7920_v14, 16 }
 0x40e   :  { %4946 = vrot.lane.b32.xlu0 %v13140_v34, %s7999_s21  ;;  %v4856_v38 = vor.u32 %v4854_v10, %v4852_v52  ;;  %v13181_v13 = vsel %vm17004_vm2, %v4848_v40, %v4852_v52  ;;  %v13184_v11 = vsel %vm17006_vm4, %v4840_v17, %v4844_v6  ;;  %v4864_v24 = vor.u32 %v4862_v44, %v4860_v48  ;;  %v7924_v40 = vld [vmem:[#allocation2 + $0x100] ss:$0 sps:$4 sm:$0x11]  }
 0x40f   :  { %4952 = vrot.lane.b32.xlu1 %v13153_v36, %s7999_s21  ;;  %17005 = vst [vmem:[#allocation123_spill] sm:$0xff] %v13181_v13  ;;  %17007 = vst [vmem:[#allocation148_spill] sm:$0xff] %v13184_v11  ;;  %v4878_v39 = vshrl.u32 %v7919_v29, 16  ;;  %v4870_v15 = vshrl.u32 %v7918_v58, 16  ;;  %v4892_v9 = vrot.slane %v4890_v19, 1  ;;  %v4884_v52 = vrot.slane %v4882_v63, 1 }
 0x410   :  { %v13191_v35 = vsel %vm17008_vm8, %v4856_v38, %v4860_v48  ;;  %v13194_v6 = vsel %vm17010_vm11, %v4864_v24, %v4868_v32  ;;  %v4898_v20 = vshll.u32 %v7922_v47, 16  ;;  %v4906_v26 = vshll.u32 %v7923_v27, 16  ;;  %v4486_v24 = vld [vmem:[#allocation2] sm:$0xe] }
 0x411   :  { %17009 = vst [vmem:[#allocation161_spill] sm:$0xff] %v13191_v35  ;;  %v4880_v60 = vor.u32 %v4878_v39, %v4876_v56  ;;  %v4872_v33 = vor.u32 %v4870_v15, %v4868_v32  ;;  %17011 = vst [vmem:[#allocation173_spill] sm:$0xff] %v13194_v6  ;;  %v4894_v29 = vshrl.u32 %v7921_v7, 16  ;;  %v4886_v58 = vshrl.u32 %v7920_v14, 16  ;;  %v17018_v39 = vld [vmem:[#allocation85_spill] sm:$0xff] }
 0x412   :  { %4950 = vrot.lane.b32.xlu0 %v13150_v12, %s7999_s21  ;;  %v4900_v44 = vrot.slane %v4898_v20, 1  ;;  %v4908_v38 = vrot.slane %v4906_v26, 1  ;;  %v4914_v19 = vshll.u32 %v7924_v40, 16  ;;  %v4910_v7 = vshrl.u32 %v7923_v27, 16  ;;  %v17022_v27 = vld [vmem:[#allocation49_spill] sm:$0xff] }
 0x413   :  { %4956 = vrot.lane.b32.xlu1 %v13161_v61, %s7999_s21  ;;  %v13201_v17 = vsel %vm17012_vm1, %v4880_v60, %v4884_v52  ;;  %v13204_v48 = vsel %vm17014_vm14, %v4872_v33, %v4876_v56  ;;  %v4896_v10 = vor.u32 %v4894_v29, %v4892_v9  ;;  %v4888_v32 = vor.u32 %v4886_v58, %v4884_v52 }
 0x414   :  { %17013 = vst [vmem:[#allocation172_spill] sm:$0xff] %v13201_v17  ;;  %17015 = vst [vmem:[#allocation174_spill] sm:$0xff] %v13204_v48  ;;  %v4902_v14 = vshrl.u32 %v7922_v47, 16  ;;  %v7504_v56 = vcombine.low %v4486_v24, %v17018_v39  ;;  %v13217_v60 = vor.u32 %v4910_v7, %v4908_v38  ;;  %v4916_v33 = vrot.slane %v4914_v19, 1 }
 0x415   :  { %v13211_v63 = vsel %vm17016_vm13, %v4896_v10, %v4900_v44  ;;  %v13215_v15 = vsel %vm17019_vm15, %v4888_v32, %v4892_v9  ;;  %v4986_v47 = vrot.slane %v17022_v27, 1  ;;  %v17025_v9 = vld [vmem:[#allocation61_spill] sm:$0xff]  ;;  %vm17026_vm9 = vcmask 1046528  }
 0x416   :  { %4954 = vrot.lane.b32.xlu0 %v13164_v42, %s7999_s21  ;;  %17017 = vst [vmem:[#allocation54_spill] sm:$0xff] %v13211_v63  ;;  %17020 = vst [vmem:[#allocation58_spill] sm:$0xff] %v13215_v15  ;;  %v4904_v52 = vor.u32 %v4902_v14, %v4900_v44  ;;  %v4917_v20 = vsel %vm16989_vm0, %v13217_v60, %v4916_v33  ;;  %v4988_v29 = vrot.slane %v17025_v9, 1  ;;  %v4985_v58 = vrot.slane %v7504_v56, 1  ;;  %v17028_v44 = vld [vmem:[#allocation121_spill] sm:$0xff] }
 0x417   :  { %4960 = vrot.lane.b32.xlu1 %v13171_v25, %s7999_s21  ;;  %17021 = vst [vmem:[#allocation37_spill] sm:$0xff] %v13217_v60  ;;  %vm17027_vm12 = vmmov %vm17026_vm9  ;;  %v4990_v32 = vrot.slane %v17028_v44, 1  ;;  %v4992_v19 = vrot.slane %v16985_v28, 1  ;;  %v4994_v7 = vrot.slane %v12964_v16, 1  ;;  %v4996_v14 = vrot.slane %v12966_v23, 1 }
 0x418   :  { %v13227_v26 = vsel %vm17023_vm10, %v4904_v52, %v4908_v38  ;;  %v4989_v40 = vsel %vm17026_vm9, %v4986_v47, %v4988_v29  ;;  %v4987_v10 = vsel %vm17027_vm12, %v4985_v58, %v4986_v47  ;;  %vm17029_vm2 = vmmov %vm17026_vm9  ;;  %v4998_v39 = vrot.slane %v13010_v46, 1  ;;  %v7925_v56 = vld [vmem:[%s15804_s4 + $0x20] ss:$0 sps:$4 sm:$0xff]   ;;  %v7926_v58 = vld [vmem:[%s15804_s4 + $0x18] sm:$0xff]  }
 0x419   :  { %17024 = vst [vmem:[#allocation56_spill] sm:$0xff] %v13227_v26  ;;  %v4993_v38 = vsel %vm17029_vm2, %v4990_v32, %v4992_v19  ;;  %vm17030_vm4 = vmmov %vm17029_vm2  ;;  %v16199_v47 = vrot.slane %v13028_v59, 1  ;;  %vm17033_vm1 = vcmask 1043456  }
 0x41a   :  { %4958 = vrot.lane.b32.xlu0 %v13174_v4, %s7999_s21  ;;  %v4991_v24 = vsel %vm17030_vm4, %v4988_v29, %v4990_v32  ;;  %vm17031_vm8 = vmmov %vm17029_vm2  ;;  %7837 = vmatprep.subr.msk.bf16.mxu1 %vm17033_vm1, %v7925_v56 }
 0x41b   :  { %4964 = vrot.lane.b32.xlu1 %v13181_v13, %s7999_s21  ;;  %v13250_v33 = vsel %vm17031_vm8, %v4994_v7, %v4996_v14  ;;  %vm17032_vm11 = vmmov %vm17029_vm2  ;;  %vm17068_vm8 = vcmask 130048  }
 0x41c   :  { %v13253_v52 = vsel %vm17032_vm11, %v4992_v19, %v4994_v7  ;;  %vm17034_vm14 = vmmov %vm17033_vm1  ;;  %v4490_v19 = vld [vmem:[#allocation2 + $0x8] sm:$0xe]  ;;  %v7927_v7 = vld [vmem:[%s15804_s4 + $0x10] sm:$0xff]   ;;  %vm17070_vm1 = vcmask 392192  }
 0x41d   :  { %vm17035_vm13 = vmmov %vm17029_vm2 }
 0x41e   :  { %4962 = vrot.lane.b32.xlu0 %v13184_v11, %s7999_s21  ;;  %vm17036_vm15 = vmmov %vm17029_vm2 }
 0x41f   :  { %4968 = vrot.lane.b32.xlu1 %v13194_v6, %s7999_s21  ;;  %vm17039_vm0 = vmmov %vm17029_vm2 }
 0x420   :  { %vm17041_vm10 = vmmov %vm17039_vm0 }
 0x421   :  { %vm17055_vm9 = vmmov %vm17039_vm0 }
 0x422   :  { %4966 = vrot.lane.b32.xlu0 %v13191_v35, %s7999_s21  ;;  %vm17062_vm12 = vmmov %vm17039_vm0 }
 0x423   :  { %4972 = vrot.lane.b32.xlu1 %v13201_v17, %s7999_s21  ;;  %vm17065_vm2 = vmmov %vm17039_vm0  ;;  %v5008_v17 = vrot.slane %v13049_v3, 1 }
 0x424   :  { %vm17066_vm4 = vmmov %vm17039_vm0 }
 0x425   :  { %vm17069_vm11 = vmmov %vm17068_vm8 }
 0x426   :  { %4970 = vrot.lane.b32.xlu0 %v13204_v48, %s7999_s21 }
 0x427   :  { %4976 = vrot.lane.b32.xlu1 %v13211_v63, %s7999_s21 }
 0x42a   :  { %4974 = vrot.lane.b32.xlu0 %v13215_v15, %s7999_s21  ;;  %v5002_v15 = vrot.slane %v13039_v45, 1 }
 0x42b   :  { %4980 = vrot.lane.b32.xlu1 %v4917_v20, %s7999_s21  ;;  %v6171_v20 = vsel %vm17034_vm14, %v7925_v56, 0  ;;  %v7967_v56 = vld [vmem:[#allocation2 + $0xc] sm:$0xf]  ;;  %vm17071_vm14 = vmmov %vm17070_vm1 }
 0x42c   :  { %7763 = vmatpush3.bf16.msra.mxu1 %v6171_v20  ;;  %v7507_v20 = vcombine.low %v4490_v19, %v7967_v56  ;;  %v7929_v19 = vld [vmem:[%s15804_s4] sm:$0xff]  }
 0x42d   :  { %7764 = vmatprep.subr.bf16.mxu1 %v7926_v58 }
 0x42e   :  { %4978 = vrot.lane.b32.xlu0 %v13227_v26, %s7999_s21 }
 0x42f   :  { %5052 = vrot.lane.b32.xlu1 %v4989_v40, %s8000_s13  ;;  %v13268_v40 = vsel %vm17035_vm13, %v4998_v39, %v16199_v47  ;;  %v17037_v47 = vld [vmem:[#allocation130_spill] sm:$0xff]  ;;  %vm17072_vm13 = vcmask 457728  }
 0x430   :  { %7765 = vmatpush3.bf16.msra.mxu1 %v7926_v58  ;;  %v17038_v58 = vld [vmem:[#allocation72_spill] sm:$0xff] }
 0x431   :  { %7766 = vmatprep.subr.bf16.mxu1 %v7927_v7 }
 0x432   :  { %5050 = vrot.lane.b32.xlu0 %v4987_v10, %s8000_s13  ;;  %v13271_v10 = vsel %vm17036_vm15, %v4996_v14, %v4998_v39  ;;  %v7928_v14 = vld [vmem:[%s15804_s4 + $0x8] sm:$0xff]   ;;  %v5266_v39 = vrot.slane %v7507_v20, 1  ;;  %v7968_v20 = vld [vmem:[#allocation2 + $0x14] sm:$0xf]  ;;  %vm17073_vm15 = vmmov %vm17072_vm13 }
 0x433   :  { %5056 = vrot.lane.b32.xlu1 %v4993_v38, %s8000_s13 }
 0x434   :  { %7767 = vmatpush3.bf16.msra.mxu1 %v7927_v7  ;;  %v5267_v56 = vsel %vm17039_vm0, %v5266_v39, %v4988_v29  ;;  %v4494_v7 = vld [vmem:[#allocation2 + $0x10] sm:$0xe]  ;;  %vm17074_vm0 = vcmask 523264  }
 0x435   :  { %7768 = vmatprep.subr.bf16.mxu1 %v7928_v14  ;;  %v7510_v60 = vcombine.low %v4494_v7, %v7968_v20 }
 0x436   :  { %5054 = vrot.lane.b32.xlu0 %v4991_v24, %s8000_s13 }
 0x437   :  { %5060 = vrot.lane.b32.xlu1 %v13250_v33, %s8000_s13 }
 0x438   :  { %7769 = vmatpush3.bf16.msra.mxu1 %v7928_v14  ;;  %v17040_v14 = vld [vmem:[#allocation127_spill] sm:$0xff] }
 0x439   :  { %7770 = vmatprep.subr.bf16.mxu1 %v7929_v19 }
 0x43a   :  { %5058 = vrot.lane.b32.xlu0 %v13253_v52, %s8000_s13 }
 0x43b   :  { %5064 = vrot.lane.b32.xlu1 %v13268_v40, %s8000_s13 }
 0x43c   :  { %7771 = vmatpush3.bf16.msra.mxu1 %v7929_v19 }
 0x43e   :  { %5062 = vrot.lane.b32.xlu0 %v13271_v10, %s8000_s13 }
 0x43f   :  { %5121 = vrot.lane.b32.xlu1 %v17025_v9, %s8001_s16 }
 0x442   :  { %5119 = vrot.lane.b32.xlu0 %v17022_v27, %s8001_s16 }
 0x443   :  { %5201 = vrot.lane.b32.xlu1 %v17037_v47, %s8002_s22 }
 0x446   :  { %5199 = vrot.lane.b32.xlu0 %v17038_v58, %s8002_s22  ;;  %v5488_v58 = vrot.slane %v7510_v60, 1  ;;  %v13318_v60 = vpop.permute.xlu1 %4920 }
 0x447   :  { %5274 = vrot.lane.b32.xlu1 %v4991_v24, %s8003_s25 }
 0x448   :  { %v5489_v29 = vsel %vm17041_vm10, %v5488_v58, %v4990_v32  ;;  %v13320_v32 = vpop.permute.xlu0 %4918  ;;  %vm17075_vm10 = vmmov %vm17065_vm2 }
 0x44a   :  { %5272 = vrot.lane.b32.xlu0 %v5267_v56, %s8003_s25  ;;  %v13331_v24 = vpop.permute.xlu1 %4924 }
 0x44b   :  { %5343 = vrot.lane.b32.xlu1 %v17028_v44, %s8004_s28  ;;  %v13310_v44 = vld [vmem:[#allocation2 + $0x18] sm:$0xff]  }
 0x44e   :  { %5341 = vrot.lane.b32.xlu0 %v17025_v9, %s8004_s28 }
 0x44f   :  { %5423 = vrot.lane.b32.xlu1 %v17040_v14, %s8005_s1 }
 0x452   :  { %5421 = vrot.lane.b32.xlu0 %v17037_v47, %s8005_s1  ;;  %v13333_v47 = vpop.permute.xlu0 %4922 }
 0x453   :  { %5496 = vrot.lane.b32.xlu1 %v4993_v38, %s8006_s29 }
 0x456   :  { %5494 = vrot.lane.b32.xlu0 %v5489_v29, %s8006_s29 }
 0x457   :  { %5125 = vrot.lane.b32.xlu1 %v16985_v28, %s8001_s16  ;;  %v13327_v28 = vld [vmem:[#allocation2 + $0x20] sm:$0xff]  }
 0x45a   :  { %5123 = vrot.lane.b32.xlu0 %v13310_v44, %s8001_s16 }
 0x45b   :  { %5205 = vrot.lane.b32.xlu1 %v13055_v55, %s8002_s22 }
 0x45e   :  { %5203 = vrot.lane.b32.xlu0 %v17040_v14, %s8002_s22 }
 0x45f   :  { %5278 = vrot.lane.b32.xlu1 %v13253_v52, %s8003_s25 }
 0x462   :  { %5276 = vrot.lane.b32.xlu0 %v4993_v38, %s8003_s25 }
 0x463   :  { %5347 = vrot.lane.b32.xlu1 %v12964_v16, %s8004_s28 }
 0x466   :  { %5345 = vrot.lane.b32.xlu0 %v13327_v28, %s8004_s28 }
 0x467   :  { %5427 = vrot.lane.b32.xlu1 %v13052_v2, %s8005_s1 }
 0x469   :  { %v13339_v39 = vpop.permute.xlu1 %4928 }
 0x46a   :  { %5425 = vrot.lane.b32.xlu0 %v13055_v55, %s8005_s1 }
 0x46b   :  { %5500 = vrot.lane.b32.xlu1 %v13250_v33, %s8006_s29 }
 0x46c   :  { %v13341_v38 = vpop.permute.xlu0 %4926 }
 0x46d   :  { %v13347_v19 = vpop.permute.xlu1 %4932 }
 0x46e   :  { %5498 = vrot.lane.b32.xlu0 %v13253_v52, %s8006_s29 }
 0x46f   :  { %5129 = vrot.lane.b32.xlu1 %v12966_v23, %s8001_s16 }
 0x470   :  { %v13349_v56 = vpop.permute.xlu0 %4930 }
 0x471   :  { %v13355_v55 = vpop.permute.xlu1 %4936 }
 0x472   :  { %5127 = vrot.lane.b32.xlu0 %v12964_v16, %s8001_s16 }
 0x473   :  { %5209 = vrot.lane.b32.xlu1 %v13070_v41, %s8002_s22 }
 0x474   :  { %v13357_v7 = vpop.permute.xlu0 %4934 }
 0x475   :  { %v13363_v52 = vpop.permute.xlu1 %4940 }
 0x476   :  { %5207 = vrot.lane.b32.xlu0 %v13052_v2, %s8002_s22 }
 0x477   :  { %5282 = vrot.lane.b32.xlu1 %v13271_v10, %s8003_s25 }
 0x478   :  { %v13365_v20 = vpop.permute.xlu0 %4938 }
 0x479   :  { %v13371_v16 = vpop.permute.xlu1 %4944 }
 0x47a   :  { %5280 = vrot.lane.b32.xlu0 %v13250_v33, %s8003_s25  ;;  %17042 = vst [vmem:[#allocation7_spill] sm:$0xff] %v13371_v16 }
 0x47b   :  { %5351 = vrot.lane.b32.xlu1 %v13010_v46, %s8004_s28 }
 0x47c   :  { %v13373_v58 = vpop.permute.xlu0 %4942 }
 0x47d   :  { %17043 = vst [vmem:[#allocation62_spill] sm:$0xff] %v13373_v58  ;;  %v13379_v2 = vpop.permute.xlu1 %4948 }
 0x47e   :  { %5349 = vrot.lane.b32.xlu0 %v12966_v23, %s8004_s28  ;;  %17044 = vst [vmem:[#allocation11_spill] sm:$0xff] %v13379_v2  ;;  %v17067_v2 = vld [vmem:[#allocation95_spill] sm:$0xff] }
 0x47f   :  { %5431 = vrot.lane.b32.xlu1 %v13067_v53, %s8005_s1 }
 0x480   :  { %v13381_v14 = vpop.permute.xlu0 %4946 }
 0x481   :  { %17045 = vst [vmem:[#allocation70_spill] sm:$0xff] %v13381_v14  ;;  %v13387_v33 = vpop.permute.xlu1 %4952 }
 0x482   :  { %5429 = vrot.lane.b32.xlu0 %v13070_v41, %s8005_s1  ;;  %17046 = vst [vmem:[#allocation65_spill] sm:$0xff] %v13387_v33 }
 0x483   :  { %5504 = vrot.lane.b32.xlu1 %v13268_v40, %s8006_s29 }
 0x484   :  { %v13389_v29 = vpop.permute.xlu0 %4950 }
 0x485   :  { %17047 = vst [vmem:[#allocation67_spill] sm:$0xff] %v13389_v29  ;;  %v13395_v23 = vpop.permute.xlu1 %4956 }
 0x486   :  { %5502 = vrot.lane.b32.xlu0 %v13271_v10, %s8006_s29  ;;  %17048 = vst [vmem:[#allocation74_spill] sm:$0xff] %v13395_v23  ;;  %v17054_v23 = vrot.slane %v13028_v59, 1 }
 0x487   :  { %5133 = vrot.lane.b32.xlu1 %v13028_v59, %s8001_s16 }
 0x488   :  { %v13397_v26 = vpop.permute.xlu0 %4954 }
 0x489   :  { %17049 = vst [vmem:[#allocation77_spill] sm:$0xff] %v13397_v26  ;;  %v13403_v41 = vpop.permute.xlu1 %4960 }
 0x48a   :  { %5131 = vrot.lane.b32.xlu0 %v13010_v46, %s8001_s16  ;;  %17050 = vst [vmem:[#allocation92_spill] sm:$0xff] %v13403_v41  ;;  %v5003_v46 = vsel %vm17055_vm9, %v17054_v23, %v5002_v15  ;;  %v5004_v23 = vrot.slane %v13043_v21, 1  ;;  %vm17076_vm9 = vmmov %vm17074_vm0 }
 0x48b   :  { %5213 = vrot.lane.b32.xlu1 %v13087_v57, %s8002_s22 }
 0x48c   :  { %v13405_v63 = vpop.permute.xlu0 %4958 }
 0x48d   :  { %17051 = vst [vmem:[#allocation81_spill] sm:$0xff] %v13405_v63  ;;  %v13412_v10 = vpop.permute.xlu1 %4964 }
 0x48e   :  { %5211 = vrot.lane.b32.xlu0 %v13067_v53, %s8002_s22  ;;  %17052 = vst [vmem:[#allocation88_spill] sm:$0xff] %v13412_v10 }
 0x48f   :  { %5286 = vrot.lane.b32.xlu1 %v5003_v46, %s8003_s25 }
 0x490   :  { %v13414_v26 = vpop.permute.xlu0 %4962 }
 0x491   :  { %17053 = vst [vmem:[#allocation100_spill] sm:$0xff] %v13414_v26  ;;  %v13422_v63 = vpop.permute.xlu1 %4968 }
 0x492   :  { %5284 = vrot.lane.b32.xlu0 %v13268_v40, %s8003_s25  ;;  %17056 = vst [vmem:[#allocation102_spill] sm:$0xff] %v13422_v63  ;;  %v5005_v63 = vsel %vm17062_vm12, %v5002_v15, %v5004_v23  ;;  %vm17077_vm12 = vcmask 588800  }
 0x493   :  { %5355 = vrot.lane.b32.xlu1 %v13039_v45, %s8004_s28 }
 0x494   :  { %v13424_v41 = vpop.permute.xlu0 %4966 }
 0x495   :  { %17057 = vst [vmem:[#allocation106_spill] sm:$0xff] %v13424_v41  ;;  %v13430_v53 = vpop.permute.xlu1 %4972 }
 0x496   :  { %5353 = vrot.lane.b32.xlu0 %v13028_v59, %s8004_s28  ;;  %17058 = vst [vmem:[#allocation115_spill] sm:$0xff] %v13430_v53 }
 0x497   :  { %5435 = vrot.lane.b32.xlu1 %v13091_v43, %s8005_s1 }
 0x498   :  { %v13432_v26 = vpop.permute.xlu0 %4970 }
 0x499   :  { %17059 = vst [vmem:[#allocation80_spill] sm:$0xff] %v13432_v26  ;;  %v13439_v40 = vpop.permute.xlu1 %4976 }
 0x49a   :  { %5433 = vrot.lane.b32.xlu0 %v13087_v57, %s8005_s1  ;;  %17060 = vst [vmem:[#allocation143_spill] sm:$0xff] %v13439_v40 }
 0x49b   :  { %5508 = vrot.lane.b32.xlu1 %v5005_v63, %s8006_s29 }
 0x49c   :  { %v13441_v41 = vpop.permute.xlu0 %4974 }
 0x49d   :  { %17061 = vst [vmem:[#allocation153_spill] sm:$0xff] %v13441_v41  ;;  %v13446_v59 = vpop.permute.xlu1 %4980 }
 0x49e   :  { %5506 = vrot.lane.b32.xlu0 %v5003_v46, %s8006_s29  ;;  %17063 = vst [vmem:[#allocation93_spill] sm:$0xff] %v13446_v59  ;;  %v5006_v59 = vrot.slane %v13045_v54, 1 }
 0x49f   :  { %5068 = vrot.lane.b32.xlu1 %v5005_v63, %s8000_s13 }
 0x4a0   :  { %v13448_v26 = vpop.permute.xlu0 %4978  ;;  %v5007_v40 = vsel %vm17065_vm2, %v5004_v23, %v5006_v59  ;;  %v5009_v33 = vsel %vm17066_vm4, %v5006_v59, %v5008_v17  ;;  %v5559_v59 = vsel %vm2319_vm3, %v17067_v2, %v13320_v32  ;;  %v5010_v2 = vrot.slane %v13058_v62, 1  ;;  %vm17078_vm2 = vmmov %vm17077_vm12 }
 0x4a1   :  { %17064 = vst [vmem:[#allocation98_spill] sm:$0xff] %v13448_v26  ;;  %v5053_v53 = vpop.permute.xlu1 %5052 }
 0x4a2   :  { %5066 = vrot.lane.b32.xlu0 %v5003_v46, %s8000_s13 }
 0x4a3   :  { %5137 = vrot.lane.b32.xlu1 %v13043_v21, %s8001_s16 }
 0x4a4   :  { %v5051_v57 = vpop.permute.xlu0 %5050 }
 0x4a5   :  { %v13456_v15 = vpop.permute.xlu1 %5056 }
 0x4a6   :  { %5135 = vrot.lane.b32.xlu0 %v13039_v45, %s8001_s16 }
 0x4a7   :  { %5217 = vrot.lane.b32.xlu1 %v13109_v51, %s8002_s22 }
 0x4a8   :  { %v13458_v41 = vpop.permute.xlu0 %5054 }
 0x4a9   :  { %v13465_v46 = vpop.permute.xlu1 %5060 }
 0x4aa   :  { %5215 = vrot.lane.b32.xlu0 %v13091_v43, %s8002_s22 }
 0x4ab   :  { %5290 = vrot.lane.b32.xlu1 %v5007_v40, %s8003_s25 }
 0x4ac   :  { %v13467_v26 = vpop.permute.xlu0 %5058 }
 0x4ad   :  { %v13472_v45 = vpop.permute.xlu1 %5064 }
 0x4ae   :  { %5288 = vrot.lane.b32.xlu0 %v5005_v63, %s8003_s25 }
 0x4af   :  { %5359 = vrot.lane.b32.xlu1 %v13045_v54, %s8004_s28 }
 0x4b0   :  { %v13474_v10 = vpop.permute.xlu0 %5062 }
 0x4b1   :  { %v5122_v43 = vpop.permute.xlu1 %5121 }
 0x4b2   :  { %5357 = vrot.lane.b32.xlu0 %v13043_v21, %s8004_s28 }
 0x4b3   :  { %5439 = vrot.lane.b32.xlu1 %v13106_v37, %s8005_s1 }
 0x4b4   :  { %v5120_v29 = vpop.permute.xlu0 %5119 }
 0x4b5   :  { %v5202_v63 = vpop.permute.xlu1 %5201 }
 0x4b6   :  { %5437 = vrot.lane.b32.xlu0 %v13109_v51, %s8005_s1  ;;  %v5561_v51 = vsel %vm2319_vm3, %v17022_v27, %v13318_v60 }
 0x4b7   :  { %5512 = vrot.lane.b32.xlu1 %v5009_v33, %s8006_s29  ;;  %v5625_v35 = vsel %vm17068_vm8, %v5561_v51, %v5053_v53  ;;  %v5565_v51 = vsel %vm2319_vm3, %v13310_v44, %v13331_v24 }
 0x4b8   :  { %v5200_v23 = vpop.permute.xlu0 %5199  ;;  %v5689_v13 = vsel %vm2449_vm5, %v5625_v35, %v5122_v43  ;;  %v5011_v43 = vsel %vm17075_vm10, %v5008_v17, %v5010_v2  ;;  %vm17082_vm10 = vmmov %vm17074_vm0 }
 0x4b9   :  { %v5275_v48 = vpop.permute.xlu1 %5274  ;;  %v5753_v60 = vsel %vm2514_vm6, %v5689_v13, %v5202_v63 }
 0x4ba   :  { %5510 = vrot.lane.b32.xlu0 %v5007_v40, %s8006_s29  ;;  %v5817_v11 = vsel %vm2579_vm7, %v5753_v60, %v5275_v48 }
 0x4bb   :  { %5072 = vrot.lane.b32.xlu1 %v5009_v33, %s8000_s13 }
 0x4bc   :  { %v5273_v21 = vpop.permute.xlu0 %5272 }
 0x4bd   :  { %v5344_v6 = vpop.permute.xlu1 %5343 }
 0x4be   :  { %5070 = vrot.lane.b32.xlu0 %v5007_v40, %s8000_s13  ;;  %v5623_v40 = vsel %vm17069_vm11, %v5559_v59, %v5051_v57  ;;  %v5881_v35 = vsel %vm17070_vm1, %v5817_v11, %v5344_v6  ;;  %v5563_v59 = vsel %vm2319_vm3, %v17025_v9, %v13333_v47  ;;  %vm17079_vm11 = vmmov %vm17068_vm8 }
 0x4bf   :  { %5141 = vrot.lane.b32.xlu1 %v13049_v3, %s8001_s16  ;;  %v5687_v58 = vsel %vm2449_vm5, %v5623_v40, %v5120_v29  ;;  %v5627_v40 = vsel %vm17079_vm11, %v5563_v59, %v13458_v41  ;;  %vm17087_vm11 = vmmov %vm17068_vm8 }
 0x4c0   :  { %v5342_v14 = vpop.permute.xlu0 %5341  ;;  %v5751_v32 = vsel %vm2514_vm6, %v5687_v58, %v5200_v23 }
 0x4c1   :  { %v5424_v16 = vpop.permute.xlu1 %5423 }
 0x4c2   :  { %5139 = vrot.lane.b32.xlu0 %v13045_v54, %s8001_s16  ;;  %v5815_v54 = vsel %vm2579_vm7, %v5751_v32, %v5273_v21  ;;  %v5945_v13 = vsel %vm17072_vm13, %v5881_v35, %v5424_v16  ;;  %v5012_v16 = vrot.slane %v13072_v8, 1 }
 0x4c3   :  { %5221 = vrot.lane.b32.xlu1 %v13126_v1, %s8002_s22  ;;  %v5879_v29 = vsel %vm17071_vm14, %v5815_v54, %v5342_v14  ;;  %vm17080_vm14 = vmmov %vm17070_vm1 }
 0x4c4   :  { %v5422_v27 = vpop.permute.xlu0 %5421  ;;  %v5013_v23 = vsel %vm17066_vm4, %v5010_v2, %v5012_v16 }
 0x4c5   :  { %v5943_v58 = vsel %vm17073_vm15, %v5879_v29, %v5422_v27  ;;  %v5497_v53 = vpop.permute.xlu1 %5496  ;;  %vm17081_vm15 = vmmov %vm17072_vm13 }
 0x4c6   :  { %5219 = vrot.lane.b32.xlu0 %v13106_v37, %s8002_s22  ;;  %v6009_v48 = vsel %vm17074_vm0, %v5945_v13, %v5497_v53 }
 0x4c7   :  { %5294 = vrot.lane.b32.xlu1 %v5011_v43, %s8003_s25 }
 0x4c8   :  { %v5495_v57 = vpop.permute.xlu0 %5494 }
 0x4c9   :  { %v6007_v63 = vsel %vm17076_vm9, %v5943_v58, %v5495_v57  ;;  %v5126_v37 = vpop.permute.xlu1 %5125  ;;  %v5014_v57 = vrot.slane %v13082_v31, 1  ;;  %vm17083_vm9 = vmmov %vm17078_vm2 }
 0x4ca   :  { %5292 = vrot.lane.b32.xlu0 %v5009_v33, %s8003_s25  ;;  %7772 = vmatprep.mubr.msk.bf16.mxu1 %vm17077_vm12, %v6007_v63  ;;  %vm17084_vm12 = vmmov %vm17078_vm2 }
 0x4cb   :  { %7773 = vmatmul.mubr.msk.bf16.vlgmr.msra.gmra.mxu1 %vm17078_vm2, %v6009_v48  ;;  %5363 = vrot.lane.b32.xlu1 %v13058_v62, %s8004_s28  ;;  %vm17085_vm2 = vmmov %vm17066_vm4 }
 0x4cc   :  { %v5124_v11 = vpop.permute.xlu0 %5123  ;;  %vm17086_vm4 = vmmov %vm17085_vm2 }
 0x4cd   :  { %v5206_v6 = vpop.permute.xlu1 %5205  ;;  %v5691_v60 = vsel %vm2449_vm5, %v5627_v40, %v5124_v11 }
 0x4ce   :  { %5361 = vrot.lane.b32.xlu0 %v13049_v3, %s8004_s28 }
 0x4cf   :  { %5443 = vrot.lane.b32.xlu1 %v13123_v49, %s8005_s1 }
 0x4d0   :  { %v5204_v17 = vpop.permute.xlu0 %5203 }
 0x4d1   :  { %v5279_v14 = vpop.permute.xlu1 %5278  ;;  %v5755_v9 = vsel %vm2514_vm6, %v5691_v60, %v5204_v17 }
 0x4d2   :  { %5441 = vrot.lane.b32.xlu0 %v13126_v1, %s8005_s1  ;;  %v5629_v1 = vsel %vm17068_vm8, %v5565_v51, %v13456_v15 }
 0x4d3   :  { %5516 = vrot.lane.b32.xlu1 %v5013_v23, %s8006_s29  ;;  %v5693_v27 = vsel %vm2449_vm5, %v5629_v1, %v5126_v37 }
 0x4d4   :  { %v5277_v33 = vpop.permute.xlu0 %5276  ;;  %v5757_v24 = vsel %vm2514_vm6, %v5693_v27, %v5206_v6  ;;  %v5016_v6 = vrot.slane %v13084_v5, 1 }
 0x4d5   :  { %v5348_v21 = vpop.permute.xlu1 %5347  ;;  %v5821_v47 = vsel %vm2579_vm7, %v5757_v24, %v5279_v14  ;;  %v5819_v2 = vsel %vm2579_vm7, %v5755_v9, %v5277_v33  ;;  %v7971_v33 = vld [vmem:[#allocation2 + $0x28] sm:$0xff]  }
 0x4d6   :  { %5514 = vrot.lane.b32.xlu0 %v5011_v43, %s8006_s29  ;;  %v5885_v41 = vsel %vm17070_vm1, %v5821_v47, %v5348_v21  ;;  %v5017_v14 = vsel %vm17086_vm4, %v5014_v57, %v5016_v6  ;;  %vm17092_vm4 = vmmov %vm17068_vm8 }
 0x4d7   :  { %5076 = vrot.lane.b32.xlu1 %v5013_v23, %s8000_s13 }
 0x4d8   :  { %v5346_v3 = vpop.permute.xlu0 %5345 }
 0x4d9   :  { %v5428_v32 = vpop.permute.xlu1 %5427  ;;  %v5883_v15 = vsel %vm17080_vm14, %v5819_v2, %v5346_v3  ;;  %vm17088_vm14 = vmmov %vm17070_vm1 }
 0x4da   :  { %5074 = vrot.lane.b32.xlu0 %v5011_v43, %s8000_s13  ;;  %v5949_v54 = vsel %vm17072_vm13, %v5885_v41, %v5428_v32  ;;  %v5015_v43 = vsel %vm17085_vm2, %v5012_v16, %v5014_v57  ;;  %v5018_v41 = vrot.slane %v13094_v0, 1 }
 0x4db   :  { %5145 = vrot.lane.b32.xlu1 %v13072_v8, %s8001_s16 }
 0x4dc   :  { %v5426_v44 = vpop.permute.xlu0 %5425 }
 0x4dd   :  { %v5947_v35 = vsel %vm17081_vm15, %v5883_v15, %v5426_v44  ;;  %v5501_v29 = vpop.permute.xlu1 %5500  ;;  %vm17089_vm15 = vmmov %vm17072_vm13 }
 0x4de   :  { %5143 = vrot.lane.b32.xlu0 %v13058_v62, %s8001_s16  ;;  %v6013_v58 = vsel %vm17074_vm0, %v5949_v54, %v5501_v29 }
 0x4df   :  { %5225 = vrot.lane.b32.xlu1 %v13140_v34, %s8002_s22 }
 0x4e0   :  { %v5499_v13 = vpop.permute.xlu0 %5498 }
 0x4e1   :  { %v6011_v53 = vsel %vm17082_vm10, %v5947_v35, %v5499_v13  ;;  %v5130_v62 = vpop.permute.xlu1 %5129  ;;  %vm17090_vm10 = vmmov %vm17074_vm0  ;;  %v5019_v35 = vsel %vm17085_vm2, %v5016_v6, %v5018_v41 }
 0x4e2   :  { %5223 = vrot.lane.b32.xlu0 %v13123_v49, %s8002_s22  ;;  %7776 = vmatprep.mubr.msk.bf16.mxu1 %vm17083_vm9, %v6011_v53  ;;  %v7972_v53 = vld [vmem:[#allocation2 + $0x38] sm:$0xff]  }
 0x4e3   :  { %7777 = vmatmul.mubr.msk.bf16.gmra.mxu1 %vm17084_vm12, %v6013_v58  ;;  %5298 = vrot.lane.b32.xlu1 %v5015_v43, %s8003_s25  ;;  %vm17091_vm12 = vmmov %vm17083_vm9  ;;  %v5573_v57 = vsel %vm2319_vm3, %v7972_v53, %v13347_v19 }
 0x4e4   :  { %v5128_v48 = vpop.permute.xlu0 %5127 }
 0x4e5   :  { %v5210_v63 = vpop.permute.xlu1 %5209 }
 0x4e6   :  { %5296 = vrot.lane.b32.xlu0 %v5013_v23, %s8003_s25  ;;  %v5569_v23 = vsel %vm2319_vm3, %v7971_v33, %v13339_v39 }
 0x4e7   :  { %5367 = vrot.lane.b32.xlu1 %v13082_v31, %s8004_s28  ;;  %v5633_v21 = vsel %vm17068_vm8, %v5569_v23, %v13465_v46  ;;  %vm17093_vm8 = vmmov %vm17092_vm4 }
 0x4e8   :  { %v5208_v37 = vpop.permute.xlu0 %5207  ;;  %v5697_v3 = vsel %vm2449_vm5, %v5633_v21, %v5130_v62  ;;  %v7973_v62 = vld [vmem:[#allocation2 + $0x30] sm:$0xff]  }
 0x4e9   :  { %v5283_v49 = vpop.permute.xlu1 %5282  ;;  %v5761_v1 = vsel %vm2514_vm6, %v5697_v3, %v5210_v63  ;;  %v13661_v3 = vld [vmem:[#allocation2 + $0x88] sm:$0xff]  }
 0x4ea   :  { %5365 = vrot.lane.b32.xlu0 %v13072_v8, %s8004_s28  ;;  %v5567_v8 = vsel %vm2319_vm3, %v13327_v28, %v13341_v38  ;;  %v5825_v38 = vsel %vm2579_vm7, %v5761_v1, %v5283_v49 }
 0x4eb   :  { %5447 = vrot.lane.b32.xlu1 %v13137_v30, %s8005_s1 }
 0x4ec   :  { %v5281_v11 = vpop.permute.xlu0 %5280 }
 0x4ed   :  { %v5352_v17 = vpop.permute.xlu1 %5351 }
 0x4ee   :  { %5445 = vrot.lane.b32.xlu0 %v13140_v34, %s8005_s1  ;;  %v5631_v34 = vsel %vm17087_vm11, %v5567_v8, %v13467_v26  ;;  %v5889_v26 = vsel %vm17070_vm1, %v5825_v38, %v5352_v17  ;;  %vm17094_vm11 = vmmov %vm17085_vm2 }
 0x4ef   :  { %5520 = vrot.lane.b32.xlu1 %v5017_v14, %s8006_s29  ;;  %v5695_v51 = vsel %vm2449_vm5, %v5631_v34, %v5128_v48  ;;  %v5571_v48 = vsel %vm2319_vm3, %v7973_v62, %v13349_v56 }
 0x4f0   :  { %v5350_v16 = vpop.permute.xlu0 %5349  ;;  %v5759_v28 = vsel %vm2514_vm6, %v5695_v51, %v5208_v37 }
 0x4f1   :  { %v5432_v59 = vpop.permute.xlu1 %5431  ;;  %v5823_v40 = vsel %vm2579_vm7, %v5759_v28, %v5281_v11 }
 0x4f2   :  { %5518 = vrot.lane.b32.xlu0 %v5015_v43, %s8006_s29  ;;  %v5887_v46 = vsel %vm17088_vm14, %v5823_v40, %v5350_v16  ;;  %v5953_v27 = vsel %vm17072_vm13, %v5889_v26, %v5432_v59  ;;  %vm17095_vm14 = vmmov %vm17070_vm1  ;;  %v13673_v26 = vld [vmem:[#allocation2 + $0x98] sm:$0xff]  }
 0x4f3   :  { %5080 = vrot.lane.b32.xlu1 %v5017_v14, %s8000_s13 }
 0x4f4   :  { %v5430_v39 = vpop.permute.xlu0 %5429 }
 0x4f5   :  { %v5951_v60 = vsel %vm17089_vm15, %v5887_v46, %v5430_v39  ;;  %v5505_v32 = vpop.permute.xlu1 %5504  ;;  %vm17096_vm15 = vmmov %vm17072_vm13  ;;  %v5022_v39 = vrot.slane %v13111_v22, 1  ;;  %v13677_v22 = vld [vmem:[#allocation2 + $0x90] sm:$0xff]  }
 0x4f6   :  { %5078 = vrot.lane.b32.xlu0 %v5015_v43, %s8000_s13  ;;  %v6017_v24 = vsel %vm17074_vm0, %v5953_v27, %v5505_v32  ;;  %v5024_v27 = vrot.slane %v13128_v18, 1 }
 0x4f7   :  { %5149 = vrot.lane.b32.xlu1 %v13084_v5, %s8001_s16 }
 0x4f8   :  { %v5503_v44 = vpop.permute.xlu0 %5502 }
 0x4f9   :  { %v6015_v9 = vsel %vm17090_vm10, %v5951_v60, %v5503_v44  ;;  %v5134_v47 = vpop.permute.xlu1 %5133  ;;  %vm17097_vm10 = vmmov %vm17074_vm0  ;;  %v7977_v60 = vld [vmem:[#allocation2 + $0x48] sm:$0xff]   ;;  %v7978_v44 = vld [vmem:[#allocation2 + $0x40] sm:$0xff]  }
 0x4fa   :  { %5147 = vrot.lane.b32.xlu0 %v13082_v31, %s8001_s16  ;;  %7780 = vmatprep.mubr.msk.bf16.mxu1 %vm17083_vm9, %v6015_v9  ;;  %v5577_v32 = vsel %vm2319_vm3, %v7977_v60, %v13355_v55 }
 0x4fb   :  { %7781 = vmatmul.mubr.msk.bf16.gmra.mxu1 %vm17091_vm12, %v6017_v24  ;;  %5229 = vrot.lane.b32.xlu1 %v13150_v12, %s8002_s22  ;;  %vm17098_vm12 = vmmov %vm17083_vm9  ;;  %v5575_v24 = vsel %vm2319_vm3, %v7978_v44, %v13357_v7 }
 0x4fc   :  { %v5132_v2 = vpop.permute.xlu0 %5131 }
 0x4fd   :  { %v5214_v15 = vpop.permute.xlu1 %5213 }
 0x4fe   :  { %5227 = vrot.lane.b32.xlu0 %v13137_v30, %s8002_s22  ;;  %v5020_v30 = vrot.slane %v13103_v50, 1 }
 0x4ff   :  { %5302 = vrot.lane.b32.xlu1 %v5019_v35, %s8003_s25 }
 0x500   :  { %v5212_v54 = vpop.permute.xlu0 %5211  ;;  %v5021_v11 = vsel %vm17094_vm11, %v5018_v41, %v5020_v30  ;;  %v5023_v38 = vsel %vm17085_vm2, %v5020_v30, %v5022_v39  ;;  %vm17100_vm11 = vmmov %vm17085_vm2 }
 0x501   :  { %v5287_v31 = vpop.permute.xlu1 %5286 }
 0x502   :  { %5300 = vrot.lane.b32.xlu0 %v5017_v14, %s8003_s25 }
 0x503   :  { %5371 = vrot.lane.b32.xlu1 %v13094_v0, %s8004_s28  ;;  %v5635_v0 = vsel %vm17093_vm8, %v5571_v48, %v13474_v10  ;;  %vm17099_vm8 = vmmov %vm17092_vm4 }
 0x504   :  { %v5285_v29 = vpop.permute.xlu0 %5284  ;;  %v5699_v19 = vsel %vm2449_vm5, %v5635_v0, %v5132_v2  ;;  %v13711_v0 = vld [vmem:[#allocation2 + $0xa0] sm:$0xff]  }
 0x505   :  { %v5356_v13 = vpop.permute.xlu1 %5355  ;;  %v5763_v49 = vsel %vm2514_vm6, %v5699_v19, %v5212_v54  ;;  %v5025_v54 = vsel %vm17100_vm11, %v5022_v39, %v5024_v27  ;;  %vm17106_vm11 = vmmov %vm17085_vm2 }
 0x506   :  { %5369 = vrot.lane.b32.xlu0 %v13084_v5, %s8004_s28  ;;  %v5637_v5 = vsel %vm17092_vm4, %v5573_v57, %v13472_v45  ;;  %v5827_v6 = vsel %vm2579_vm7, %v5763_v49, %v5285_v29 }
 0x507   :  { %5451 = vrot.lane.b32.xlu1 %v13153_v36, %s8005_s1  ;;  %v5701_v43 = vsel %vm2449_vm5, %v5637_v5, %v5134_v47 }
 0x508   :  { %v5354_v58 = vpop.permute.xlu0 %5353  ;;  %v5765_v56 = vsel %vm2514_vm6, %v5701_v43, %v5214_v15 }
 0x509   :  { %v5436_v63 = vpop.permute.xlu1 %5435  ;;  %v5891_v45 = vsel %vm17095_vm14, %v5827_v6, %v5354_v58  ;;  %vm17101_vm14 = vmmov %vm17070_vm1 }
 0x50a   :  { %5449 = vrot.lane.b32.xlu0 %v13150_v12, %s8005_s1  ;;  %v5829_v12 = vsel %vm2579_vm7, %v5765_v56, %v5287_v31 }
 0x50b   :  { %5524 = vrot.lane.b32.xlu1 %v5021_v11, %s8006_s29  ;;  %v5893_v10 = vsel %vm17070_vm1, %v5829_v12, %v5356_v13 }
 0x50c   :  { %v5434_v37 = vpop.permute.xlu0 %5433  ;;  %v5957_v17 = vsel %vm17072_vm13, %v5893_v10, %v5436_v63  ;;  %v13717_v63 = vld [vmem:[#allocation2 + $0xa8] sm:$0xff]  }
 0x50d   :  { %v5955_v16 = vsel %vm17096_vm15, %v5891_v45, %v5434_v37  ;;  %v5509_v14 = vpop.permute.xlu1 %5508  ;;  %vm17102_vm15 = vmmov %vm17072_vm13  ;;  %v5026_v37 = vrot.slane %v13717_v63, 1 }
 0x50e   :  { %5522 = vrot.lane.b32.xlu0 %v5019_v35, %s8006_s29  ;;  %v6021_v23 = vsel %vm17074_vm0, %v5957_v17, %v5509_v14  ;;  %v13731_v17 = vld [vmem:[#allocation2 + $0xb0] sm:$0xff]  }
 0x50f   :  { %5084 = vrot.lane.b32.xlu1 %v5021_v11, %s8000_s13 }
 0x510   :  { %v5507_v33 = vpop.permute.xlu0 %5506 }
 0x511   :  { %v6019_v8 = vsel %vm17097_vm10, %v5955_v16, %v5507_v33  ;;  %v5069_v21 = vpop.permute.xlu1 %5068  ;;  %vm17103_vm10 = vmmov %vm17074_vm0  ;;  %v7982_v16 = vld [vmem:[#allocation2 + $0x58] sm:$0xff]   ;;  %v7983_v33 = vld [vmem:[#allocation2 + $0x50] sm:$0xff]  }
 0x512   :  { %5082 = vrot.lane.b32.xlu0 %v5019_v35, %s8000_s13  ;;  %7784 = vmatprep.mubr.msk.bf16.mxu1 %vm17083_vm9, %v6019_v8  ;;  %v5641_v9 = vsel %vm17092_vm4, %v5577_v32, %v5069_v21  ;;  %v5581_v14 = vsel %vm2319_vm3, %v7982_v16, %v13363_v52 }
 0x513   :  { %7785 = vmatmul.mubr.msk.bf16.gmra.mxu1 %vm17098_vm12, %v6021_v23  ;;  %5153 = vrot.lane.b32.xlu1 %v13103_v50, %s8001_s16  ;;  %vm17104_vm12 = vmmov %vm17083_vm9  ;;  %v5579_v23 = vsel %vm2319_vm3, %v7983_v33, %v13365_v20 }
 0x514   :  { %v5067_v34 = vpop.permute.xlu0 %5066 }
 0x515   :  { %v5138_v51 = vpop.permute.xlu1 %5137  ;;  %v5639_v47 = vsel %vm17099_vm8, %v5575_v24, %v5067_v34  ;;  %vm17105_vm8 = vmmov %vm17092_vm4 }
 0x516   :  { %5151 = vrot.lane.b32.xlu0 %v13661_v3, %s8001_s16  ;;  %v5705_v18 = vsel %vm2449_vm5, %v5641_v9, %v5138_v51 }
 0x517   :  { %5233 = vrot.lane.b32.xlu1 %v13164_v42, %s8002_s22 }
 0x518   :  { %v5136_v59 = vpop.permute.xlu0 %5135 }
 0x519   :  { %v5218_v1 = vpop.permute.xlu1 %5217  ;;  %v5703_v2 = vsel %vm2449_vm5, %v5639_v47, %v5136_v59 }
 0x51a   :  { %5231 = vrot.lane.b32.xlu0 %v13153_v36, %s8002_s22  ;;  %v5769_v15 = vsel %vm2514_vm6, %v5705_v18, %v5218_v1  ;;  %v13767_v18 = vld [vmem:[#allocation2 + $0xb8] sm:$0xff]  }
 0x51b   :  { %5306 = vrot.lane.b32.xlu1 %v5023_v38, %s8003_s25 }
 0x51c   :  { %v5216_v28 = vpop.permute.xlu0 %5215 }
 0x51d   :  { %v5291_v50 = vpop.permute.xlu1 %5290  ;;  %v5767_v7 = vsel %vm2514_vm6, %v5703_v2, %v5216_v28  ;;  %v5030_v2 = vrot.slane %v13767_v18, 1 }
 0x51e   :  { %5304 = vrot.lane.b32.xlu0 %v5021_v11, %s8003_s25  ;;  %v5833_v35 = vsel %vm2579_vm7, %v5769_v15, %v5291_v50  ;;  %v5027_v11 = vsel %vm17085_vm2, %v5024_v27, %v5026_v37 }
 0x51f   :  { %5375 = vrot.lane.b32.xlu1 %v13673_v26, %s8004_s28 }
 0x520   :  { %v5289_v40 = vpop.permute.xlu0 %5288 }
 0x521   :  { %v5360_v36 = vpop.permute.xlu1 %5359 }
 0x522   :  { %5373 = vrot.lane.b32.xlu0 %v13677_v22, %s8004_s28  ;;  %v5897_v31 = vsel %vm17070_vm1, %v5833_v35, %v5360_v36 }
 0x523   :  { %5455 = vrot.lane.b32.xlu1 %v13161_v61, %s8005_s1 }
 0x524   :  { %v5358_v46 = vpop.permute.xlu0 %5357 }
 0x525   :  { %v5440_v41 = vpop.permute.xlu1 %5439 }
 0x526   :  { %5453 = vrot.lane.b32.xlu0 %v13164_v42, %s8005_s1  ;;  %v5831_v42 = vsel %vm2579_vm7, %v5767_v7, %v5289_v40  ;;  %v5961_v13 = vsel %vm17072_vm13, %v5897_v31, %v5440_v41  ;;  %v17111_v41 = vld [vmem:[#allocation148_spill] sm:$0xff] }
 0x527   :  { %5528 = vrot.lane.b32.xlu1 %v5025_v54, %s8006_s29  ;;  %v5895_v29 = vsel %vm17101_vm14, %v5831_v42, %v5358_v46  ;;  %vm17107_vm14 = vmmov %vm17070_vm1 }
 0x528   :  { %v5438_v55 = vpop.permute.xlu0 %5437 }
 0x529   :  { %v5959_v58 = vsel %vm17102_vm15, %v5895_v29, %v5438_v55  ;;  %v5513_v30 = vpop.permute.xlu1 %5512  ;;  %vm17108_vm15 = vmmov %vm17072_vm13  ;;  %v13781_v29 = vld [vmem:[#allocation2 + $0xc0] sm:$0xff]  }
 0x52a   :  { %5526 = vrot.lane.b32.xlu0 %v5023_v38, %s8006_s29  ;;  %v6025_v57 = vsel %vm17074_vm0, %v5961_v13, %v5513_v30  ;;  %v7986_v13 = vld [vmem:[#allocation2 + $0x68] sm:$0xff]  }
 0x52b   :  { %5088 = vrot.lane.b32.xlu1 %v5025_v54, %s8000_s13 }
 0x52c   :  { %v5511_v53 = vpop.permute.xlu0 %5510 }
 0x52d   :  { %v6023_v62 = vsel %vm17103_vm10, %v5959_v58, %v5511_v53  ;;  %v5073_v48 = vpop.permute.xlu1 %5072  ;;  %vm17109_vm10 = vmmov %vm17074_vm0  ;;  %v17112_v58 = vld [vmem:[#allocation7_spill] sm:$0xff]  ;;  %v7987_v53 = vld [vmem:[#allocation2 + $0x60] sm:$0xff]  }
 0x52e   :  { %5086 = vrot.lane.b32.xlu0 %v5023_v38, %s8000_s13  ;;  %7788 = vmatprep.mubr.msk.bf16.mxu1 %vm17083_vm9, %v6023_v62  ;;  %v5645_v8 = vsel %vm17092_vm4, %v5581_v14, %v5073_v48  ;;  %v5585_v30 = vsel %vm2319_vm3, %v7986_v13, %v17112_v58  ;;  %v17114_v48 = vld [vmem:[#allocation123_spill] sm:$0xff] }
 0x52f   :  { %7789 = vmatmul.mubr.msk.bf16.gmra.mxu1 %vm17104_vm12, %v6025_v57  ;;  %5157 = vrot.lane.b32.xlu1 %v13711_v0, %s8001_s16  ;;  %vm17110_vm12 = vmmov %vm17083_vm9  ;;  %v17113_v57 = vld [vmem:[#allocation62_spill] sm:$0xff] }
 0x530   :  { %v5071_v5 = vpop.permute.xlu0 %5070  ;;  %v5583_v62 = vsel %vm2319_vm3, %v7987_v53, %v17113_v57 }
 0x531   :  { %v5142_v43 = vpop.permute.xlu1 %5141  ;;  %v5643_v21 = vsel %vm17105_vm8, %v5579_v23, %v5071_v5  ;;  %vm17115_vm8 = vmmov %vm17092_vm4 }
 0x532   :  { %5155 = vrot.lane.b32.xlu0 %v13673_v26, %s8001_s16  ;;  %v5709_v34 = vsel %vm2449_vm5, %v5645_v8, %v5142_v43 }
 0x533   :  { %5237 = vrot.lane.b32.xlu1 %v13174_v4, %s8002_s22 }
 0x534   :  { %v5140_v19 = vpop.permute.xlu0 %5139 }
 0x535   :  { %v5222_v56 = vpop.permute.xlu1 %5221  ;;  %v5707_v51 = vsel %vm2449_vm5, %v5643_v21, %v5140_v19 }
 0x536   :  { %5235 = vrot.lane.b32.xlu0 %v13161_v61, %s8002_s22  ;;  %v5028_v61 = vrot.slane %v13731_v17, 1  ;;  %v5773_v39 = vsel %vm2514_vm6, %v5709_v34, %v5222_v56 }
 0x537   :  { %5310 = vrot.lane.b32.xlu1 %v5027_v11, %s8003_s25 }
 0x538   :  { %v5220_v49 = vpop.permute.xlu0 %5219  ;;  %v5029_v1 = vsel %vm17106_vm11, %v5026_v37, %v5028_v61  ;;  %v5031_v7 = vsel %vm17085_vm2, %v5028_v61, %v5030_v2  ;;  %vm17116_vm11 = vmmov %vm17085_vm2 }
 0x539   :  { %v5295_v12 = vpop.permute.xlu1 %5294  ;;  %v5771_v20 = vsel %vm2514_vm6, %v5707_v51, %v5220_v49 }
 0x53a   :  { %5308 = vrot.lane.b32.xlu0 %v5025_v54, %s8003_s25  ;;  %v5837_v28 = vsel %vm2579_vm7, %v5773_v39, %v5295_v12 }
 0x53b   :  { %5379 = vrot.lane.b32.xlu1 %v13717_v63, %s8004_s28 }
 0x53c   :  { %v5293_v6 = vpop.permute.xlu0 %5292 }
 0x53d   :  { %v5364_v10 = vpop.permute.xlu1 %5363 }
 0x53e   :  { %5377 = vrot.lane.b32.xlu0 %v13711_v0, %s8004_s28  ;;  %v5901_v38 = vsel %vm17070_vm1, %v5837_v28, %v5364_v10  ;;  %v17121_v28 = vld [vmem:[#allocation161_spill] sm:$0xff] }
 0x53f   :  { %5459 = vrot.lane.b32.xlu1 %v13171_v25, %s8005_s1 }
 0x540   :  { %v5362_v45 = vpop.permute.xlu0 %5361 }
 0x541   :  { %v5444_v59 = vpop.permute.xlu1 %5443 }
 0x542   :  { %5457 = vrot.lane.b32.xlu0 %v13174_v4, %s8005_s1  ;;  %v5835_v4 = vsel %vm2579_vm7, %v5771_v20, %v5293_v6  ;;  %v5965_v40 = vsel %vm17072_vm13, %v5901_v38, %v5444_v59  ;;  %v13817_v20 = vld [vmem:[#allocation2 + $0xc8] sm:$0xff]  }
 0x543   :  { %5532 = vrot.lane.b32.xlu1 %v5029_v1, %s8006_s29  ;;  %v5899_v50 = vsel %vm17107_vm14, %v5835_v4, %v5362_v45  ;;  %vm17117_vm14 = vmmov %vm17070_vm1 }
 0x544   :  { %v5442_v52 = vpop.permute.xlu0 %5441 }
 0x545   :  { %v5963_v36 = vsel %vm17108_vm15, %v5899_v50, %v5442_v52  ;;  %v5517_v46 = vpop.permute.xlu1 %5516  ;;  %vm17118_vm15 = vmmov %vm17072_vm13 }
 0x546   :  { %5530 = vrot.lane.b32.xlu0 %v5027_v11, %s8006_s29  ;;  %v6029_v60 = vsel %vm17074_vm0, %v5965_v40, %v5517_v46 }
 0x547   :  { %5092 = vrot.lane.b32.xlu1 %v5029_v1, %s8000_s13 }
 0x548   :  { %v5515_v27 = vpop.permute.xlu0 %5514 }
 0x549   :  { %v6027_v32 = vsel %vm17109_vm10, %v5963_v36, %v5515_v27  ;;  %v5077_v44 = vpop.permute.xlu1 %5076  ;;  %vm17119_vm10 = vmmov %vm17074_vm0 }
 0x54a   :  { %5090 = vrot.lane.b32.xlu0 %v5027_v11, %s8000_s13  ;;  %7792 = vmatprep.mubr.msk.bf16.mxu1 %vm17083_vm9, %v6027_v32  ;;  %v5649_v5 = vsel %vm17092_vm4, %v5585_v30, %v5077_v44  ;;  %v7990_v44 = vld [vmem:[#allocation2 + $0x78] sm:$0xff]  }
 0x54b   :  { %7793 = vmatmul.mubr.msk.bf16.gmra.mxu1 %vm17110_vm12, %v6029_v60  ;;  %5161 = vrot.lane.b32.xlu1 %v13731_v17, %s8001_s16  ;;  %vm17120_vm12 = vmmov %vm17083_vm9  ;;  %v13831_v60 = vld [vmem:[#allocation2 + $0xd0] sm:$0xff]  }
 0x54c   :  { %v5075_v24 = vpop.permute.xlu0 %5074  ;;  %v5036_v32 = vrot.slane %v13831_v60, 1 }
 0x54d   :  { %v5146_v9 = vpop.permute.xlu1 %5145  ;;  %v5647_v43 = vsel %vm17115_vm8, %v5583_v62, %v5075_v24  ;;  %v17122_v24 = vld [vmem:[#allocation11_spill] sm:$0xff]  ;;  %vm17125_vm8 = vmmov %vm17092_vm4 }
 0x54e   :  { %5159 = vrot.lane.b32.xlu0 %v13717_v63, %s8001_s16  ;;  %v5713_v19 = vsel %vm2449_vm5, %v5649_v5, %v5146_v9  ;;  %v5589_v9 = vsel %vm2319_vm3, %v7990_v44, %v17122_v24 }
 0x54f   :  { %5241 = vrot.lane.b32.xlu1 %v17111_v41, %s8002_s22 }
 0x550   :  { %v5144_v47 = vpop.permute.xlu0 %5143 }
 0x551   :  { %v5226_v55 = vpop.permute.xlu1 %5225  ;;  %v5711_v37 = vsel %vm2449_vm5, %v5647_v43, %v5144_v47  ;;  %v7991_v47 = vld [vmem:[#allocation2 + $0x70] sm:$0xff]  }
 0x552   :  { %5239 = vrot.lane.b32.xlu0 %v13171_v25, %s8002_s22  ;;  %v5032_v25 = vrot.slane %v13781_v29, 1  ;;  %v5777_v11 = vsel %vm2514_vm6, %v5713_v19, %v5226_v55  ;;  %v17124_v55 = vld [vmem:[#allocation173_spill] sm:$0xff] }
 0x553   :  { %5314 = vrot.lane.b32.xlu1 %v5031_v7, %s8003_s25 }
 0x554   :  { %v5224_v15 = vpop.permute.xlu0 %5223  ;;  %v5033_v6 = vsel %vm17116_vm11, %v5030_v2, %v5032_v25  ;;  %v17123_v2 = vld [vmem:[#allocation70_spill] sm:$0xff]  ;;  %vm17126_vm11 = vmmov %vm17085_vm2 }
 0x555   :  { %v5299_v54 = vpop.permute.xlu1 %5298  ;;  %v5775_v12 = vsel %vm2514_vm6, %v5711_v37, %v5224_v15 }
 0x556   :  { %5312 = vrot.lane.b32.xlu0 %v5029_v1, %s8003_s25  ;;  %v5841_v10 = vsel %vm2579_vm7, %v5777_v11, %v5299_v54  ;;  %v5034_v1 = vrot.slane %v13817_v20, 1 }
 0x557   :  { %5383 = vrot.lane.b32.xlu1 %v13767_v18, %s8004_s28 }
 0x558   :  { %v5297_v35 = vpop.permute.xlu0 %5296  ;;  %v5035_v50 = vsel %vm17085_vm2, %v5032_v25, %v5034_v1  ;;  %v5037_v58 = vsel %vm17126_vm11, %v5034_v1, %v5036_v32  ;;  %v17133_v1 = vld [vmem:[#allocation172_spill] sm:$0xff]  ;;  %vm17136_vm11 = vmmov %vm17085_vm2 }
 0x559   :  { %v5368_v42 = vpop.permute.xlu1 %5367  ;;  %v5839_v45 = vsel %vm2579_vm7, %v5775_v12, %v5297_v35 }
 0x55a   :  { %5381 = vrot.lane.b32.xlu0 %v13731_v17, %s8004_s28  ;;  %v5905_v61 = vsel %vm17070_vm1, %v5841_v10, %v5368_v42  ;;  %v13867_v10 = vld [vmem:[#allocation2 + $0xd8] sm:$0xff]  }
 0x55b   :  { %5463 = vrot.lane.b32.xlu1 %v17114_v48, %s8005_s1 }
 0x55c   :  { %v5366_v31 = vpop.permute.xlu0 %5365 }
 0x55d   :  { %v5448_v56 = vpop.permute.xlu1 %5447  ;;  %v5903_v16 = vsel %vm17117_vm14, %v5839_v45, %v5366_v31  ;;  %vm17127_vm14 = vmmov %vm17070_vm1  ;;  %v5038_v45 = vrot.slane %v13867_v10, 1 }
 0x55e   :  { %5461 = vrot.lane.b32.xlu0 %v17111_v41, %s8005_s1  ;;  %v5969_v14 = vsel %vm17072_vm13, %v5905_v61, %v5448_v56  ;;  %v5587_v41 = vsel %vm2319_vm3, %v7991_v47, %v17123_v2  ;;  %v17131_v61 = vld [vmem:[#allocation174_spill] sm:$0xff] }
 0x55f   :  { %5536 = vrot.lane.b32.xlu1 %v5033_v6, %s8006_s29 }
 0x560   :  { %v5446_v49 = vpop.permute.xlu0 %5445 }
 0x561   :  { %v5967_v33 = vsel %vm17118_vm15, %v5903_v16, %v5446_v49  ;;  %v5521_v23 = vpop.permute.xlu1 %5520  ;;  %vm17128_vm15 = vmmov %vm17072_vm13 }
 0x562   :  { %5534 = vrot.lane.b32.xlu0 %v5031_v7, %s8006_s29  ;;  %v6033_v21 = vsel %vm17074_vm0, %v5969_v14, %v5521_v23 }
 0x563   :  { %5096 = vrot.lane.b32.xlu1 %v5033_v6, %s8000_s13 }
 0x564   :  { %v5519_v8 = vpop.permute.xlu0 %5518 }
 0x565   :  { %v6031_v34 = vsel %vm17119_vm10, %v5967_v33, %v5519_v8  ;;  %v5081_v51 = vpop.permute.xlu1 %5080  ;;  %vm17129_vm10 = vmmov %vm17074_vm0  ;;  %v5039_v33 = vsel %vm17085_vm2, %v5036_v32, %v5038_v45 }
 0x566   :  { %5094 = vrot.lane.b32.xlu0 %v5031_v7, %s8000_s13  ;;  %7796 = vmatprep.mubr.msk.bf16.mxu1 %vm17083_vm9, %v6031_v34  ;;  %v5653_v15 = vsel %vm17092_vm4, %v5589_v9, %v5081_v51  ;;  %v13881_v51 = vld [vmem:[#allocation2 + $0xe0] sm:$0xff]  }
 0x567   :  { %7797 = vmatmul.mubr.msk.bf16.gmra.mxu1 %vm17120_vm12, %v6033_v21  ;;  %5165 = vrot.lane.b32.xlu1 %v13781_v29, %s8001_s16  ;;  %vm17130_vm12 = vmmov %vm17083_vm9 }
 0x568   :  { %v5079_v59 = vpop.permute.xlu0 %5078 }
 0x569   :  { %v5150_v52 = vpop.permute.xlu1 %5149  ;;  %v5651_v7 = vsel %vm17125_vm8, %v5587_v41, %v5079_v59  ;;  %v5040_v59 = vrot.slane %v13881_v51, 1  ;;  %vm17135_vm8 = vmmov %vm17092_vm4 }
 0x56a   :  { %5163 = vrot.lane.b32.xlu0 %v13767_v18, %s8001_s16  ;;  %v5717_v54 = vsel %vm2449_vm5, %v5653_v15, %v5150_v52  ;;  %v17132_v52 = vld [vmem:[#allocation65_spill] sm:$0xff] }
 0x56b   :  { %5245 = vrot.lane.b32.xlu1 %v17121_v28, %s8002_s22  ;;  %v5041_v44 = vsel %vm17136_vm11, %v5038_v45, %v5040_v59  ;;  %v17143_v45 = vld [vmem:[#allocation54_spill] sm:$0xff]  ;;  %vm17146_vm11 = vmmov %vm17085_vm2 }
 0x56c   :  { %v5148_v39 = vpop.permute.xlu0 %5147 }
 0x56d   :  { %v5230_v4 = vpop.permute.xlu1 %5229  ;;  %v5715_v35 = vsel %vm2449_vm5, %v5651_v7, %v5148_v39  ;;  %v5593_v39 = vsel %vm2319_vm3, %v13661_v3, %v17132_v52 }
 0x56e   :  { %5243 = vrot.lane.b32.xlu0 %v17114_v48, %s8002_s22  ;;  %v5781_v25 = vsel %vm2514_vm6, %v5717_v54, %v5230_v4  ;;  %v17134_v4 = vld [vmem:[#allocation67_spill] sm:$0xff] }
 0x56f   :  { %5318 = vrot.lane.b32.xlu1 %v5035_v50, %s8003_s25 }
 0x570   :  { %v5228_v38 = vpop.permute.xlu0 %5227 }
 0x571   :  { %v5303_v40 = vpop.permute.xlu1 %5302  ;;  %v5779_v13 = vsel %vm2514_vm6, %v5715_v35, %v5228_v38 }
 0x572   :  { %5316 = vrot.lane.b32.xlu0 %v5033_v6, %s8003_s25  ;;  %v5845_v30 = vsel %vm2579_vm7, %v5781_v25, %v5303_v40 }
 0x573   :  { %5387 = vrot.lane.b32.xlu1 %v13817_v20, %s8004_s28 }
 0x574   :  { %v5301_v36 = vpop.permute.xlu0 %5300 }
 0x575   :  { %v5372_v46 = vpop.permute.xlu1 %5371  ;;  %v5843_v53 = vsel %vm2579_vm7, %v5779_v13, %v5301_v36 }
 0x576   :  { %5385 = vrot.lane.b32.xlu0 %v13781_v29, %s8004_s28  ;;  %v5909_v57 = vsel %vm17070_vm1, %v5845_v30, %v5372_v46  ;;  %v13918_v30 = vld [vmem:[#allocation2 + $0xe8] sm:$0xff]  }
 0x577   :  { %5467 = vrot.lane.b32.xlu1 %v17124_v55, %s8005_s1 }
 0x578   :  { %v5370_v27 = vpop.permute.xlu0 %5369 }
 0x579   :  { %v5452_v42 = vpop.permute.xlu1 %5451  ;;  %v5907_v62 = vsel %vm17127_vm14, %v5843_v53, %v5370_v27  ;;  %vm17137_vm14 = vmmov %vm17070_vm1  ;;  %v5042_v53 = vrot.slane %v13918_v30, 1 }
 0x57a   :  { %5465 = vrot.lane.b32.xlu0 %v17121_v28, %s8005_s1  ;;  %v5973_v48 = vsel %vm17072_vm13, %v5909_v57, %v5452_v42  ;;  %v7994_v28 = vld [vmem:[#allocation2 + $0x80] sm:$0xff]   ;;  %v17141_v57 = vld [vmem:[#allocation58_spill] sm:$0xff] }
 0x57b   :  { %5540 = vrot.lane.b32.xlu1 %v5037_v58, %s8006_s29  ;;  %v5591_v38 = vsel %vm2319_vm3, %v7994_v28, %v17134_v4 }
 0x57c   :  { %v5450_v31 = vpop.permute.xlu0 %5449 }
 0x57d   :  { %v5971_v5 = vsel %vm17128_vm15, %v5907_v62, %v5450_v31  ;;  %v5525_v43 = vpop.permute.xlu1 %5524  ;;  %vm17138_vm15 = vmmov %vm17072_vm13 }
 0x57e   :  { %5538 = vrot.lane.b32.xlu0 %v5035_v50, %s8006_s29  ;;  %v6037_v37 = vsel %vm17074_vm0, %v5973_v48, %v5525_v43 }
 0x57f   :  { %5100 = vrot.lane.b32.xlu1 %v5037_v58, %s8000_s13 }
 0x580   :  { %v5523_v19 = vpop.permute.xlu0 %5522 }
 0x581   :  { %v6035_v56 = vsel %vm17129_vm10, %v5971_v5, %v5523_v19  ;;  %v5085_v49 = vpop.permute.xlu1 %5084  ;;  %vm17139_vm10 = vmmov %vm17074_vm0  ;;  %v5043_v5 = vsel %vm17085_vm2, %v5040_v59, %v5042_v53 }
 0x582   :  { %5098 = vrot.lane.b32.xlu0 %v5035_v50, %s8000_s13  ;;  %7800 = vmatprep.mubr.msk.bf16.mxu1 %vm17083_vm9, %v6035_v56  ;;  %v5657_v50 = vsel %vm17092_vm4, %v5593_v39, %v5085_v49  ;;  %v13932_v49 = vld [vmem:[#allocation2 + $0xf0] sm:$0xff]  }
 0x583   :  { %7801 = vmatmul.mubr.msk.bf16.gmra.mxu1 %vm17130_vm12, %v6037_v37  ;;  %5169 = vrot.lane.b32.xlu1 %v13831_v60, %s8001_s16  ;;  %vm17140_vm12 = vmmov %vm17083_vm9 }
 0x584   :  { %v5083_v11 = vpop.permute.xlu0 %5082 }
 0x585   :  { %v5154_v12 = vpop.permute.xlu1 %5153  ;;  %v5655_v40 = vsel %vm17135_vm8, %v5591_v38, %v5083_v11  ;;  %v5044_v11 = vrot.slane %v13932_v49, 1  ;;  %vm17145_vm8 = vmmov %vm17092_vm4 }
 0x586   :  { %5167 = vrot.lane.b32.xlu0 %v13817_v20, %s8001_s16  ;;  %v5721_v36 = vsel %vm2449_vm5, %v5657_v50, %v5154_v12  ;;  %v17142_v12 = vld [vmem:[#allocation74_spill] sm:$0xff] }
 0x587   :  { %5249 = vrot.lane.b32.xlu1 %v17131_v61, %s8002_s22  ;;  %v5045_v59 = vsel %vm17146_vm11, %v5042_v53, %v5044_v11  ;;  %vm17156_vm11 = vmmov %vm17145_vm8 }
 0x588   :  { %v5152_v6 = vpop.permute.xlu0 %5151 }
 0x589   :  { %v5234_v16 = vpop.permute.xlu1 %5233  ;;  %v5719_v27 = vsel %vm2449_vm5, %v5655_v40, %v5152_v6  ;;  %v5597_v6 = vsel %vm2319_vm3, %v13673_v26, %v17142_v12 }
 0x58a   :  { %5247 = vrot.lane.b32.xlu0 %v17124_v55, %s8002_s22  ;;  %v5785_v3 = vsel %vm2514_vm6, %v5721_v36, %v5234_v16 }
 0x58b   :  { %5322 = vrot.lane.b32.xlu1 %v5039_v33, %s8003_s25 }
 0x58c   :  { %v5232_v14 = vpop.permute.xlu0 %5231 }
 0x58d   :  { %v5307_v23 = vpop.permute.xlu1 %5306  ;;  %v5783_v24 = vsel %vm2514_vm6, %v5719_v27, %v5232_v14 }
 0x58e   :  { %5320 = vrot.lane.b32.xlu0 %v5037_v58, %s8003_s25  ;;  %v5849_v9 = vsel %vm2579_vm7, %v5785_v3, %v5307_v23 }
 0x58f   :  { %5391 = vrot.lane.b32.xlu1 %v13867_v10, %s8004_s28 }
 0x590   :  { %v5305_v8 = vpop.permute.xlu0 %5304 }
 0x591   :  { %v5376_v21 = vpop.permute.xlu1 %5375  ;;  %v5847_v47 = vsel %vm2579_vm7, %v5783_v24, %v5305_v8  ;;  %v13970_v24 = vld [vmem:[#allocation2 + $0xf8] sm:$0xff]  }
 0x592   :  { %5389 = vrot.lane.b32.xlu0 %v13831_v60, %s8004_s28  ;;  %v5913_v2 = vsel %vm17070_vm1, %v5849_v9, %v5376_v21  ;;  %v5046_v9 = vrot.slane %v13970_v24, 1 }
 0x593   :  { %5471 = vrot.lane.b32.xlu1 %v17133_v1, %s8005_s1 }
 0x594   :  { %v5374_v34 = vpop.permute.xlu0 %5373 }
 0x595   :  { %v5456_v46 = vpop.permute.xlu1 %5455  ;;  %v5911_v41 = vsel %vm17137_vm14, %v5847_v47, %v5374_v34  ;;  %vm17147_vm14 = vmmov %vm17070_vm1  ;;  %v17151_v47 = vld [vmem:[#allocation56_spill] sm:$0xff] }
 0x596   :  { %5469 = vrot.lane.b32.xlu0 %v17131_v61, %s8005_s1  ;;  %v5977_v55 = vsel %vm17072_vm13, %v5913_v2, %v5456_v46  ;;  %v17144_v61 = vld [vmem:[#allocation77_spill] sm:$0xff] }
 0x597   :  { %5544 = vrot.lane.b32.xlu1 %v5041_v44, %s8006_s29  ;;  %v5595_v16 = vsel %vm2319_vm3, %v13677_v22, %v17144_v61  ;;  %v13977_v2 = vld [vmem:[#allocation2 + $0x100] sm:$0xff]  }
 0x598   :  { %v5454_v32 = vpop.permute.xlu0 %5453  ;;  %v13990_v53 = vrot.slane %v13977_v2, 1  ;;  %v7998_v61 = vld [vmem:[#allocation2 + $0x100] ss:$0 sps:$4 sm:$0x11]  }
 0x599   :  { %v5529_v15 = vpop.permute.xlu1 %5528  ;;  %v5975_v7 = vsel %vm17138_vm15, %v5911_v41, %v5454_v32  ;;  %vm17148_vm15 = vmmov %vm17072_vm13 }
 0x59a   :  { %5542 = vrot.lane.b32.xlu0 %v5039_v33, %s8006_s29  ;;  %v6041_v54 = vsel %vm17074_vm0, %v5977_v55, %v5529_v15  ;;  %v5047_v15 = vsel %vm17085_vm2, %v5044_v11, %v5046_v9 }
 0x59b   :  { %5104 = vrot.lane.b32.xlu1 %v5041_v44, %s8000_s13 }
 0x59c   :  { %v5527_v35 = vpop.permute.xlu0 %5526 }
 0x59d   :  { %v6039_v42 = vsel %vm17139_vm10, %v5975_v7, %v5527_v35  ;;  %v5089_v31 = vpop.permute.xlu1 %5088  ;;  %vm17149_vm10 = vmmov %vm17074_vm0  ;;  %v5187_v7 = vshll.u32 %v13977_v2, 16 }
 0x59e   :  { %5102 = vrot.lane.b32.xlu0 %v5039_v33, %s8000_s13  ;;  %7804 = vmatprep.mubr.msk.bf16.mxu1 %vm17083_vm9, %v6039_v42  ;;  %v5661_v14 = vsel %vm17092_vm4, %v5597_v6, %v5089_v31  ;;  %vm17153_vm4 = vsmask.f32 7424 }
 0x59f   :  { %7805 = vmatmul.mubr.msk.bf16.gmra.mxu1 %vm17140_vm12, %v6041_v54  ;;  %5173 = vrot.lane.b32.xlu1 %v13881_v51, %s8001_s16  ;;  %vm17150_vm12 = vmmov %vm17083_vm9  ;;  %v5189_v42 = vrot.slane %v5187_v7, 1 }
 0x5a0   :  { %v5087_v25 = vpop.permute.xlu0 %5086 }
 0x5a1   :  { %v5158_v13 = vpop.permute.xlu1 %5157  ;;  %v5659_v33 = vsel %vm17145_vm8, %v5595_v16, %v5087_v25  ;;  %v5048_v16 = vrot.slane %v7998_v61, 1 }
 0x5a2   :  { %5171 = vrot.lane.b32.xlu0 %v13867_v10, %s8001_s16  ;;  %v5725_v23 = vsel %vm2449_vm5, %v5661_v14, %v5158_v13  ;;  %v17152_v13 = vld [vmem:[#allocation37_spill] sm:$0xff] }
 0x5a3   :  { %5253 = vrot.lane.b32.xlu1 %v17141_v57, %s8002_s22 }
 0x5a4   :  { %v5156_v58 = vpop.permute.xlu0 %5155 }
 0x5a5   :  { %v5238_v62 = vpop.permute.xlu1 %5237  ;;  %v5723_v21 = vsel %vm2449_vm5, %v5659_v33, %v5156_v58  ;;  %v5190_v58 = vsel %vm17153_vm4, %v17152_v13, %v5189_v42 }
 0x5a6   :  { %5251 = vrot.lane.b32.xlu0 %v17133_v1, %s8002_s22  ;;  %v5789_v26 = vsel %vm2514_vm6, %v5725_v23, %v5238_v62 }
 0x5a7   :  { %5326 = vrot.lane.b32.xlu1 %v5043_v5, %s8003_s25 }
 0x5a8   :  { %v5236_v48 = vpop.permute.xlu0 %5235 }
 0x5a9   :  { %v5311_v43 = vpop.permute.xlu1 %5310  ;;  %v5787_v52 = vsel %vm2514_vm6, %v5723_v21, %v5236_v48  ;;  %v17155_v48 = vld [vmem:[#allocation81_spill] sm:$0xff] }
 0x5aa   :  { %5324 = vrot.lane.b32.xlu0 %v5041_v44, %s8003_s25  ;;  %v5853_v39 = vsel %vm2579_vm7, %v5789_v26, %v5311_v43 }
 0x5ab   :  { %5395 = vrot.lane.b32.xlu1 %v13918_v30, %s8004_s28 }
 0x5ac   :  { %v5309_v19 = vpop.permute.xlu0 %5308 }
 0x5ad   :  { %v5380_v37 = vpop.permute.xlu1 %5379  ;;  %v5851_v22 = vsel %vm2579_vm7, %v5787_v52, %v5309_v19  ;;  %v7931_v19 = vld [vmem:[#allocation2 + $0x108] ss:$0 sps:$4 sm:$0x11]  }
 0x5ae   :  { %5393 = vrot.lane.b32.xlu0 %v13881_v51, %s8004_s28  ;;  %v5917_v1 = vsel %vm17070_vm1, %v5853_v39, %v5380_v37  ;;  %vm17157_vm1 = vmmov %vm17085_vm2  ;;  %v5195_v21 = vshll.u32 %v7931_v19, 16  ;;  %vm17162_vm2 = vcmask 588800  }
 0x5af   :  { %5475 = vrot.lane.b32.xlu1 %v17143_v45, %s8005_s1  ;;  %vm17163_vm4 = vmmov %vm17162_vm2 }
 0x5b0   :  { %v5378_v56 = vpop.permute.xlu0 %5377 }
 0x5b1   :  { %v5460_v8 = vpop.permute.xlu1 %5459  ;;  %v5915_v28 = vsel %vm17147_vm14, %v5851_v22, %v5378_v56 }
 0x5b2   :  { %5473 = vrot.lane.b32.xlu0 %v17141_v57, %s8005_s1  ;;  %v5981_v4 = vsel %vm17072_vm13, %v5917_v1, %v5460_v8  ;;  %v17154_v57 = vld [vmem:[#allocation92_spill] sm:$0xff]  ;;  %v5191_v8 = vshrl.u32 %v13977_v2, 16  ;;  %vm17158_vm13 = vmmov %vm17147_vm14 }
 0x5b3   :  { %5548 = vrot.lane.b32.xlu1 %v5045_v59, %s8006_s29  ;;  %v5601_v62 = vsel %vm2319_vm3, %v13717_v63, %v17154_v57 }
 0x5b4   :  { %v5458_v34 = vpop.permute.xlu0 %5457 }
 0x5b5   :  { %v5533_v38 = vpop.permute.xlu1 %5532  ;;  %v5979_v50 = vsel %vm17148_vm15, %v5915_v28, %v5458_v34 }
 0x5b6   :  { %5546 = vrot.lane.b32.xlu0 %v5043_v5, %s8006_s29  ;;  %v6045_v40 = vsel %vm17074_vm0, %v5981_v4, %v5533_v38  ;;  %vm17159_vm0 = vmmov %vm17148_vm15  ;;  %v5193_v4 = vor.u32 %v5191_v8, %v5189_v42  ;;  %v5197_v38 = vrot.slane %v5195_v21, 1 }
 0x5b7   :  { %5108 = vrot.lane.b32.xlu1 %v5045_v59, %s8000_s13 }
 0x5b8   :  { %v5531_v36 = vpop.permute.xlu0 %5530 }
 0x5b9   :  { %v6043_v46 = vsel %vm17149_vm10, %v5979_v50, %v5531_v36  ;;  %v5093_v27 = vpop.permute.xlu1 %5092  ;;  %v7932_v50 = vld [vmem:[#allocation2 + $0x108] sm:$0xff]  }
 0x5ba   :  { %5106 = vrot.lane.b32.xlu0 %v5043_v5, %s8000_s13  ;;  %7808 = vmatprep.mubr.msk.bf16.mxu1 %vm17083_vm9, %v6043_v46  ;;  %v5599_v5 = vsel %vm2319_vm3, %v13711_v0, %v17155_v48  ;;  %v5665_v43 = vsel %vm17145_vm8, %v5601_v62, %v5093_v27  ;;  %vm17160_vm9 = vmmov %vm17157_vm1  ;;  %vm17164_vm8 = vsmask.f32 7424  ;;  %v5270_v27 = vrot.slane %v7931_v19, 1 }
 0x5bb   :  { %7809 = vmatmul.mubr.msk.bf16.gmra.mxu1 %vm17150_vm12, %v6045_v40  ;;  %5177 = vrot.lane.b32.xlu1 %v13932_v49, %s8001_s16  ;;  %v5049_v1 = vsel %vm17160_vm9, %v5046_v9, %v5048_v16  ;;  %vm17161_vm12 = vmmov %vm17149_vm10  ;;  %v5198_v46 = vsel %vm17164_vm8, %v5193_v4, %v5197_v38  ;;  %v5490_v57 = vrot.slane %v7932_v50, 1 }
 0x5bc   :  { %v5091_v3 = vpop.permute.xlu0 %5090 }
 0x5bd   :  { %v5162_v32 = vpop.permute.xlu1 %5161  ;;  %v5663_v37 = vsel %vm17156_vm11, %v5599_v5, %v5091_v3  ;;  %v7933_v3 = vld [vmem:[#allocation2 + $0x110] ss:$0 sps:$4 sm:$0x11]   ;;  %vm17165_vm11 = vmmov %vm17157_vm1 }
 0x5be   :  { %5175 = vrot.lane.b32.xlu0 %v13918_v30, %s8001_s16  ;;  %v5729_v56 = vsel %vm2449_vm5, %v5665_v43, %v5162_v32  ;;  %v5409_v32 = vshll.u32 %v7932_v50, 16  ;;  %v5492_v62 = vrot.slane %v7933_v3, 1  ;;  %v17168_v43 = vld [vmem:[#allocation88_spill] sm:$0xff] }
 0x5bf   :  { %5257 = vrot.lane.b32.xlu1 %v17151_v47, %s8002_s22  ;;  %v5605_v19 = vsel %vm2319_vm3, %v13767_v18, %v17168_v43 }
 0x5c0   :  { %v5160_v44 = vpop.permute.xlu0 %5159 }
 0x5c1   :  { %v5242_v41 = vpop.permute.xlu1 %5241  ;;  %v5727_v12 = vsel %vm2449_vm5, %v5663_v37, %v5160_v44  ;;  %v17169_v37 = vld [vmem:[#allocation100_spill] sm:$0xff] }
 0x5c2   :  { %5255 = vrot.lane.b32.xlu0 %v17143_v45, %s8002_s22  ;;  %v5793_v63 = vsel %vm2514_vm6, %v5729_v56, %v5242_v41  ;;  %v5269_v45 = vsel %vm17157_vm1, %v5046_v9, %v13990_v53  ;;  %v5411_v41 = vrot.slane %v5409_v32, 1  ;;  %vm17166_vm1 = vmmov %vm17164_vm8  ;;  %vm17178_vm8 = vcmask 523264  }
 0x5c3   :  { %5330 = vrot.lane.b32.xlu1 %v5047_v15, %s8003_s25 }
 0x5c4   :  { %v5240_v55 = vpop.permute.xlu0 %5239 }
 0x5c5   :  { %v5315_v54 = vpop.permute.xlu1 %5314  ;;  %v5791_v0 = vsel %vm2514_vm6, %v5727_v12, %v5240_v55  ;;  %v5413_v55 = vshrl.u32 %v7932_v50, 16 }
 0x5c6   :  { %5328 = vrot.lane.b32.xlu0 %v5045_v59, %s8003_s25  ;;  %v5857_v14 = vsel %vm2579_vm7, %v5793_v63, %v5315_v54 }
 0x5c7   :  { %5399 = vrot.lane.b32.xlu1 %v13970_v24, %s8004_s28 }
 0x5c8   :  { %v5313_v35 = vpop.permute.xlu0 %5312 }
 0x5c9   :  { %v5384_v31 = vpop.permute.xlu1 %5383  ;;  %v5855_v33 = vsel %vm2579_vm7, %v5791_v0, %v5313_v35  ;;  %v5415_v35 = vor.u32 %v5413_v55, %v5411_v41 }
 0x5ca   :  { %5397 = vrot.lane.b32.xlu0 %v13932_v49, %s8004_s28  ;;  %v5921_v23 = vsel %vm17147_vm14, %v5857_v14, %v5384_v31  ;;  %vm17167_vm14 = vmmov %vm17166_vm1 }
 0x5cb   :  { %5479 = vrot.lane.b32.xlu1 %v5190_v58, %s8005_s1 }
 0x5cc   :  { %v5382_v25 = vpop.permute.xlu0 %5381 }
 0x5cd   :  { %v5464_v11 = vpop.permute.xlu1 %5463  ;;  %v5919_v26 = vsel %vm17158_vm13, %v5855_v33, %v5382_v25  ;;  %vm17170_vm13 = vcmask 130048  }
 0x5ce   :  { %5477 = vrot.lane.b32.xlu0 %v17151_v47, %s8005_s1  ;;  %v5985_v34 = vsel %vm17148_vm15, %v5921_v23, %v5464_v11  ;;  %v5271_v47 = vsel %vm17165_vm11, %v13990_v53, %v5270_v27  ;;  %vm17171_vm15 = vmmov %vm17160_vm9 }
 0x5cf   :  { %5552 = vrot.lane.b32.xlu1 %v5269_v45, %s8006_s29  ;;  %v5493_v11 = vsel %vm17171_vm15, %v5490_v57, %v5492_v62  ;;  %vm17179_vm11 = vmmov %vm17178_vm8 }
 0x5d0   :  { %v5462_v6 = vpop.permute.xlu0 %5461 }
 0x5d1   :  { %v5537_v59 = vpop.permute.xlu1 %5536  ;;  %v5983_v52 = vsel %vm17159_vm0, %v5919_v26, %v5462_v6  ;;  %vm17172_vm0 = vmmov %vm17160_vm9  ;;  %vm17174_vm9 = vcmask 392192  }
 0x5d2   :  { %5550 = vrot.lane.b32.xlu0 %v5047_v15, %s8006_s29  ;;  %v6049_v39 = vsel %vm17149_vm10, %v5985_v34, %v5537_v59  ;;  %v5491_v12 = vsel %vm17172_vm0, %v13990_v53, %v5490_v57  ;;  %vm17173_vm10 = vmmov %vm17170_vm13 }
 0x5d3   :  { %5112 = vrot.lane.b32.xlu1 %v5049_v1, %s8000_s13  ;;  %vm17185_vm15 = vmmov %vm17173_vm10 }
 0x5d4   :  { %v5535_v22 = vpop.permute.xlu0 %5534  ;;  %vm17186_vm0 = vmmov %vm17174_vm9 }
 0x5d5   :  { %v6047_v28 = vsel %vm17161_vm12, %v5983_v52, %v5535_v22  ;;  %v5097_v40 = vpop.permute.xlu1 %5096  ;;  %vm17175_vm12 = vmmov %vm17174_vm9 }
 0x5d6   :  { %5110 = vrot.lane.b32.xlu0 %v5047_v15, %s8000_s13  ;;  %7812 = vmatprep.mubr.msk.bf16.mxu1 %vm17162_vm2, %v6047_v28  ;;  %v5417_v15 = vshll.u32 %v7933_v3, 16  ;;  %v5669_v56 = vsel %vm17170_vm13, %v5605_v19, %v5097_v40  ;;  %vm17176_vm2 = vcmask 457728   ;;  %v17183_v3 = vld [vmem:[#allocation106_spill] sm:$0xff]  ;;  %vm17184_vm13 = vmmov %vm17173_vm10 }
 0x5d7   :  { %7813 = vmatmul.mubr.msk.bf16.gmra.mxu1 %vm17163_vm4, %v6049_v39  ;;  %5181 = vrot.lane.b32.xlu1 %v13977_v2, %s8001_s16  ;;  %vm17177_vm4 = vmmov %vm17176_vm2  ;;  %v5607_v32 = vsel %vm2319_vm3, %v13781_v29, %v17183_v3 }
 0x5d8   :  { %v5095_v36 = vpop.permute.xlu0 %5094  ;;  %v5419_v42 = vrot.slane %v5417_v15, 1 }
 0x5d9   :  { %v5166_v44 = vpop.permute.xlu1 %5165 }
 0x5da   :  { %5179 = vrot.lane.b32.xlu0 %v13970_v24, %s8001_s16  ;;  %v5420_v13 = vsel %vm17166_vm1, %v5415_v35, %v5419_v42  ;;  %v5733_v6 = vsel %vm2449_vm5, %v5669_v56, %v5166_v44  ;;  %vm17180_vm1 = vcmask 588800  }
 0x5db   :  { %5261 = vrot.lane.b32.xlu1 %v5198_v46, %s8002_s22  ;;  %v17182_v46 = vld [vmem:[#allocation102_spill] sm:$0xff] }
 0x5dc   :  { %v5164_v9 = vpop.permute.xlu0 %5163  ;;  %v5609_v27 = vsel %vm2319_vm3, %v13817_v20, %v17182_v46 }
 0x5dd   :  { %v5246_v7 = vpop.permute.xlu1 %5245 }
 0x5de   :  { %5259 = vrot.lane.b32.xlu0 %v5190_v58, %s8002_s22  ;;  %v5412_v58 = vsel %vm17167_vm14, %v5193_v4, %v5411_v41  ;;  %v5797_v61 = vsel %vm2514_vm6, %v5733_v6, %v5246_v7  ;;  %vm17181_vm14 = vmmov %vm17180_vm1  ;;  %v17194_v6 = vld [vmem:[#allocation115_spill] sm:$0xff] }
 0x5df   :  { %5334 = vrot.lane.b32.xlu1 %v5271_v47, %s8003_s25 }
 0x5e0   :  { %v5244_v54 = vpop.permute.xlu0 %5243 }
 0x5e1   :  { %v5319_v31 = vpop.permute.xlu1 %5318 }
 0x5e2   :  { %5332 = vrot.lane.b32.xlu0 %v5269_v45, %s8003_s25 }
 0x5e3   :  { %5403 = vrot.lane.b32.xlu1 %v7932_v50, %s8004_s28 }
 0x5e4   :  { %v5317_v25 = vpop.permute.xlu0 %5316 }
 0x5e5   :  { %v5388_v48 = vpop.permute.xlu1 %5387 }
 0x5e6   :  { %5401 = vrot.lane.b32.xlu0 %v13977_v2, %s8004_s28  ;;  %v5603_v2 = vsel %vm2319_vm3, %v13731_v17, %v17169_v37  ;;  %v5861_v17 = vsel %vm2579_vm7, %v5797_v61, %v5319_v31 }
 0x5e7   :  { %5483 = vrot.lane.b32.xlu1 %v5420_v13, %s8005_s1  ;;  %v5667_v63 = vsel %vm17173_vm10, %v5603_v2, %v5095_v36  ;;  %v5925_v14 = vsel %vm17174_vm9, %v5861_v17, %v5388_v48  ;;  %vm17187_vm10 = vmmov %vm17186_vm0 }
 0x5e8   :  { %v5386_v5 = vpop.permute.xlu0 %5385  ;;  %v5731_v45 = vsel %vm2449_vm5, %v5667_v63, %v5164_v9  ;;  %vm17188_vm9 = vmmov %vm17176_vm2 }
 0x5e9   :  { %v5468_v18 = vpop.permute.xlu1 %5467  ;;  %v5795_v0 = vsel %vm2514_vm6, %v5731_v45, %v5244_v54  ;;  %v17195_v45 = vld [vmem:[#allocation80_spill] sm:$0xff] }
 0x5ea   :  { %5481 = vrot.lane.b32.xlu0 %v5412_v58, %s8005_s1  ;;  %v5859_v53 = vsel %vm2579_vm7, %v5795_v0, %v5317_v25  ;;  %v5989_v23 = vsel %vm17176_vm2, %v5925_v14, %v5468_v18  ;;  %v5613_v18 = vsel %vm2319_vm3, %v13867_v10, %v17194_v6  ;;  %v5611_v61 = vsel %vm2319_vm3, %v13831_v60, %v17195_v45 }
 0x5eb   :  { %5556 = vrot.lane.b32.xlu1 %v5493_v11, %s8006_s29  ;;  %v5923_v33 = vsel %vm17175_vm12, %v5859_v53, %v5386_v5  ;;  %vm17189_vm12 = vmmov %vm17176_vm2 }
 0x5ec   :  { %v5466_v16 = vpop.permute.xlu0 %5465  ;;  %vm17190_vm2 = vmmov %vm17178_vm8 }
 0x5ed   :  { %v5541_v8 = vpop.permute.xlu1 %5540  ;;  %v5987_v21 = vsel %vm17177_vm4, %v5923_v33, %v5466_v16  ;;  %vm17191_vm4 = vmmov %vm17190_vm2 }
 0x5ee   :  { %5554 = vrot.lane.b32.xlu0 %v5491_v12, %s8006_s29  ;;  %v6053_v26 = vsel %vm17178_vm8, %v5989_v23, %v5541_v8  ;;  %vm17192_vm8 = vmmov %vm17180_vm1 }
 0x5f0   :  { %v5539_v34 = vpop.permute.xlu0 %5538 }
 0x5f1   :  { %v6051_v59 = vsel %vm17179_vm11, %v5987_v21, %v5539_v34  ;;  %v5101_v52 = vpop.permute.xlu1 %5100  ;;  %vm17193_vm11 = vmmov %vm17180_vm1 }
 0x5f2   :  { %7816 = vmatprep.mubr.msk.bf16.mxu1 %vm17180_vm1, %v6051_v59  ;;  %v5673_v44 = vsel %vm17184_vm13, %v5609_v27, %v5101_v52  ;;  %vm17196_vm1 = vmmov %vm17184_vm13 }
 0x5f3   :  { %7817 = vmatmul.mubr.msk.bf16.gmra.mxu1 %vm17181_vm14, %v6053_v26  ;;  %vm17197_vm14 = vmmov %vm17196_vm1 }
 0x5f4   :  { %v5099_v39 = vpop.permute.xlu0 %5098  ;;  %vm17198_vm13 = vmmov %vm17186_vm0 }
 0x5f5   :  { %v5170_v22 = vpop.permute.xlu1 %5169  ;;  %v5671_v9 = vsel %vm17185_vm15, %v5607_v32, %v5099_v39  ;;  %vm17199_vm15 = vmmov %vm17186_vm0 }
 0x5f6   :  { %v5737_v47 = vsel %vm2449_vm5, %v5673_v44, %v5170_v22  ;;  %v17206_v44 = vld [vmem:[#allocation143_spill] sm:$0xff] }
 0x5f8   :  { %v5168_v1 = vpop.permute.xlu0 %5167 }
 0x5f9   :  { %v5250_v28 = vpop.permute.xlu1 %5249  ;;  %v5735_v55 = vsel %vm2449_vm5, %v5671_v9, %v5168_v1  ;;  %v5617_v9 = vsel %vm2319_vm3, %v13918_v30, %v17206_v44 }
 0x5fa   :  { %v5801_v15 = vsel %vm2514_vm6, %v5737_v47, %v5250_v28  ;;  %v17207_v47 = vld [vmem:[#allocation153_spill] sm:$0xff] }
 0x5fc   :  { %v5248_v4 = vpop.permute.xlu0 %5247 }
 0x5fd   :  { %v5323_v38 = vpop.permute.xlu1 %5322  ;;  %v5799_v54 = vsel %vm2514_vm6, %v5735_v55, %v5248_v4 }
 0x5fe   :  { %v5865_v20 = vsel %vm2579_vm7, %v5801_v15, %v5323_v38 }
 0x600   :  { %v5321_v50 = vpop.permute.xlu0 %5320 }
 0x601   :  { %v5392_v40 = vpop.permute.xlu1 %5391  ;;  %v5863_v35 = vsel %vm2579_vm7, %v5799_v54, %v5321_v50 }
 0x602   :  { %v5929_v29 = vsel %vm17186_vm0, %v5865_v20, %v5392_v40  ;;  %vm17200_vm0 = vmmov %vm17188_vm9 }
 0x604   :  { %v5390_v36 = vpop.permute.xlu0 %5389 }
 0x605   :  { %v5472_v41 = vpop.permute.xlu1 %5471  ;;  %v5927_v42 = vsel %vm17187_vm10, %v5863_v35, %v5390_v36  ;;  %vm17201_vm10 = vmmov %vm17200_vm0 }
 0x606   :  { %v5993_v31 = vsel %vm17188_vm9, %v5929_v29, %v5472_v41  ;;  %vm17202_vm9 = vmmov %vm17190_vm2  ;;  %v5615_v41 = vsel %vm2319_vm3, %v13881_v51, %v17207_v47  ;;  %v17231_v47 = vld [vmem:[#allocation18_spill] sm:$0xff] }
 0x608   :  { %v5470_v7 = vpop.permute.xlu0 %5469 }
 0x609   :  { %v5545_v25 = vpop.permute.xlu1 %5544  ;;  %v5991_v13 = vsel %vm17189_vm12, %v5927_v42, %v5470_v7  ;;  %vm17203_vm12 = vmmov %vm17190_vm2 }
 0x60a   :  { %v6057_v58 = vsel %vm17190_vm2, %v5993_v31, %v5545_v25  ;;  %vm17204_vm2 = vmmov %vm17192_vm8 }
 0x60c   :  { %v5543_v57 = vpop.permute.xlu0 %5542 }
 0x60d   :  { %v6055_v62 = vsel %vm17191_vm4, %v5991_v13, %v5543_v57  ;;  %v5105_v48 = vpop.permute.xlu1 %5104  ;;  %vm17205_vm4 = vmmov %vm17204_vm2 }
 0x60e   :  { %7820 = vmatprep.mubr.msk.bf16.mxu1 %vm17192_vm8, %v6055_v62  ;;  %v5677_v16 = vsel %vm17196_vm1, %v5613_v18, %v5105_v48  ;;  %vm17208_vm8 = vmmov %vm17196_vm1 }
 0x60f   :  { %7821 = vmatmul.mubr.msk.bf16.gmra.mxu1 %vm17193_vm11, %v6057_v58  ;;  %vm17209_vm11 = vmmov %vm17196_vm1 }
 0x610   :  { %v5103_v5 = vpop.permute.xlu0 %5102  ;;  %vm17210_vm1 = vmmov %vm17198_vm13 }
 0x611   :  { %v5174_v43 = vpop.permute.xlu1 %5173  ;;  %v5675_v0 = vsel %vm17197_vm14, %v5611_v61, %v5103_v5  ;;  %vm17211_vm14 = vmmov %vm17210_vm1  ;;  %v14133_v5 = vpop.f32.mrf.mxu1 }
 0x612   :  { %v5741_v17 = vsel %vm2449_vm5, %v5677_v16, %v5174_v43 }
 0x614   :  { %v5172_v19 = vpop.permute.xlu0 %5171 }
 0x615   :  { %v5254_v37 = vpop.permute.xlu1 %5253  ;;  %v5739_v14 = vsel %vm2449_vm5, %v5675_v0, %v5172_v19 }
 0x616   :  { %v5805_v33 = vsel %vm2514_vm6, %v5741_v17, %v5254_v37 }
 0x618   :  { %v5252_v2 = vpop.permute.xlu0 %5251 }
 0x619   :  { %v5327_v56 = vpop.permute.xlu1 %5326  ;;  %v5803_v8 = vsel %vm2514_vm6, %v5739_v14, %v5252_v2  ;;  %v14138_v2 = vpop.f32.mrf.mxu1  ;;  %v17218_v14 = vld [vmem:[#allocation93_spill] sm:$0xff] }
 0x61a   :  { %v5869_v10 = vsel %vm2579_vm7, %v5805_v33, %v5327_v56  ;;  %v5621_v33 = vsel %vm2319_vm3, %v13970_v24, %v17218_v14 }
 0x61c   :  { %v5325_v11 = vpop.permute.xlu0 %5324 }
 0x61d   :  { %v5396_v12 = vpop.permute.xlu1 %5395  ;;  %v5867_v21 = vsel %vm2579_vm7, %v5803_v8, %v5325_v11 }
 0x61e   :  { %v5933_v60 = vsel %vm17198_vm13, %v5869_v10, %v5396_v12  ;;  %vm17212_vm13 = vmmov %vm17200_vm0  ;;  %v14140_v12 = vpop.f32.mrf.mxu1 }
 0x620   :  { %v5394_v63 = vpop.permute.xlu0 %5393  ;;  %v14142_v18 = vpop.f32.mrf.mxu1 }
 0x621   :  { %v5476_v53 = vpop.permute.xlu1 %5475  ;;  %v5931_v26 = vsel %vm17199_vm15, %v5867_v21, %v5394_v63  ;;  %vm17213_vm15 = vmmov %vm17200_vm0 }
 0x622   :  { %v5997_v34 = vsel %vm17200_vm0, %v5933_v60, %v5476_v53  ;;  %vm17214_vm0 = vmmov %vm17202_vm9  ;;  %v14144_v45 = vpop.f32.mrf.mxu1 }
 0x624   :  { %v5474_v23 = vpop.permute.xlu0 %5473  ;;  %v14146_v0 = vpop.f32.mrf.mxu1 }
 0x625   :  { %v5549_v59 = vpop.permute.xlu1 %5548  ;;  %v5995_v52 = vsel %vm17201_vm10, %v5931_v26, %v5474_v23  ;;  %vm17215_vm10 = vmmov %vm17214_vm0  ;;  %v17219_v23 = vld [vmem:[#allocation98_spill] sm:$0xff] }
 0x626   :  { %v6061_v39 = vsel %vm17202_vm9, %v5997_v34, %v5549_v59  ;;  %vm17216_vm9 = vmmov %vm17204_vm2  ;;  %v5619_v8 = vsel %vm2319_vm3, %v13932_v49, %v17219_v23  ;;  %v14155_v21 = vpop.f32.mrf.mxu1  ;;  %v17242_v23 = vld [vmem:[#allocation12_spill] sm:$0xff] }
 0x628   :  { %v5547_v22 = vpop.permute.xlu0 %5546 }
 0x629   :  { %v6059_v1 = vsel %vm17203_vm12, %v5995_v52, %v5547_v22  ;;  %v5109_v28 = vpop.permute.xlu1 %5108  ;;  %vm17217_vm12 = vmmov %vm17204_vm2 }
 0x62a   :  { %7824 = vmatprep.mubr.msk.bf16.mxu1 %vm17204_vm2, %v6059_v1  ;;  %v5681_v55 = vsel %vm17208_vm8, %v5617_v9, %v5109_v28  ;;  %vm17220_vm2 = vmmov %vm17208_vm8  ;;  %v14165_v28 = vpop.f32.mrf.mxu1  ;;  %v17230_v9 = vld [vmem:[#allocation13_spill] sm:$0xff] }
 0x62b   :  { %7825 = vmatmul.mubr.msk.bf16.gmra.mxu1 %vm17205_vm4, %v6061_v39  ;;  %vm17221_vm4 = vmmov %vm17220_vm2 }
 0x62c   :  { %v5107_v4 = vpop.permute.xlu0 %5106  ;;  %vm17222_vm8 = vmmov %vm17210_vm1 }
 0x62d   :  { %v5178_v38 = vpop.permute.xlu1 %5177  ;;  %v5679_v15 = vsel %vm17209_vm11, %v5615_v41, %v5107_v4  ;;  %vm17223_vm11 = vmmov %vm17210_vm1  ;;  %v17232_v41 = vld [vmem:[#allocation9_spill] sm:$0xff] }
 0x62e   :  { %v5745_v7 = vsel %vm2449_vm5, %v5681_v55, %v5178_v38  ;;  %v17233_v55 = vld [vmem:[#allocation15_spill] sm:$0xff] }
 0x630   :  { %v5176_v50 = vpop.permute.xlu0 %5175 }
 0x631   :  { %v5258_v40 = vpop.permute.xlu1 %5257  ;;  %v5743_v20 = vsel %vm2449_vm5, %v5679_v15, %v5176_v50 }
 0x632   :  { %v5809_v35 = vsel %vm2514_vm6, %v5745_v7, %v5258_v40 }
 0x634   :  { %v5256_v36 = vpop.permute.xlu0 %5255 }
 0x635   :  { %v5331_v46 = vpop.permute.xlu1 %5330  ;;  %v5807_v42 = vsel %vm2514_vm6, %v5743_v20, %v5256_v36  ;;  %v17235_v20 = vld [vmem:[#allocation10_spill] sm:$0xff] }
 0x636   :  { %v5873_v30 = vsel %vm2579_vm7, %v5809_v35, %v5331_v46 }
 0x638   :  { %v5329_v27 = vpop.permute.xlu0 %5328 }
 0x639   :  { %v5400_v3 = vpop.permute.xlu1 %5399  ;;  %v5871_v31 = vsel %vm2579_vm7, %v5807_v42, %v5329_v27  ;;  %v14171_v27 = vpop.f32.mrf.mxu1  ;;  %v17236_v42 = vld [vmem:[#allocation3_spill] sm:$0xff] }
 0x63a   :  { %v5937_v51 = vsel %vm17210_vm1, %v5873_v30, %v5400_v3  ;;  %vm17224_vm1 = vmmov %vm17212_vm13  ;;  %v17237_v30 = vld [vmem:[#allocation16_spill] sm:$0xff] }
 0x63c   :  { %v5398_v32 = vpop.permute.xlu0 %5397 }
 0x63d   :  { %v5480_v54 = vpop.permute.xlu1 %5479  ;;  %v5935_v25 = vsel %vm17211_vm14, %v5871_v31, %v5398_v32  ;;  %vm17225_vm14 = vmmov %vm17224_vm1  ;;  %v14176_v32 = vpop.f32.mrf.mxu1 }
 0x63e   :  { %v6001_v13 = vsel %vm17212_vm13, %v5937_v51, %v5480_v54  ;;  %vm17228_vm13 = vmmov %vm17216_vm9  ;;  %v17234_v54 = vld [vmem:[#allocation6_spill] sm:$0xff] }
 0x63f   :  { %v14178_v44 = vpop.f32.mrf.mxu1 }
 0x640   :  { %v5478_v29 = vpop.permute.xlu0 %5477 }
 0x641   :  { %v5553_v58 = vpop.permute.xlu1 %5552  ;;  %v5999_v57 = vsel %vm17213_vm15, %v5935_v25, %v5478_v29  ;;  %vm989_vm15 = vcmp.lt.f32.partialorder %v17230_v9, 12.0  ;;  %v14184_v15 = vpop.f32.mrf.mxu1  ;;  %v17238_v25 = vld [vmem:[#allocation14_spill] sm:$0xff] }
 0x642   :  { %v6065_v62 = vsel %vm17214_vm0, %v6001_v13, %v5553_v58  ;;  %v17239_v13 = vld [vmem:[#allocation33_spill] sm:$0xff] }
 0x643   :  { %v14186_v7 = vpop.f32.mrf.mxu1 }
 0x644   :  { %v5551_v48 = vpop.permute.xlu0 %5550 }
 0x645   :  { %v6063_v43 = vsel %vm17215_vm10, %v5999_v57, %v5551_v48  ;;  %v5113_v19 = vpop.permute.xlu1 %5112  ;;  %vm988_vm10 = vcmp.lt.f32.partialorder %v17232_v41, 12.0  ;;  %v14194_v51 = vpop.f32.mrf.mxu1  ;;  %v17240_v48 = vld [vmem:[#allocation19_spill] sm:$0xff] }
 0x646   :  { %7828 = vmatprep.mubr.msk.bf16.mxu1 %vm17216_vm9, %v6063_v43  ;;  %v5685_v10 = vsel %vm17220_vm2, %v5621_v33, %v5113_v19  ;;  %v17241_v43 = vld [vmem:[#allocation51_spill] sm:$0xff] }
 0x647   :  { %7829 = vmatmul.mubr.msk.bf16.gmra.mxu1 %vm17217_vm12, %v6065_v62 }
 0x648   :  { %v5111_v37 = vpop.permute.xlu0 %5110 }
 0x649   :  { %v5182_v56 = vpop.permute.xlu1 %5181  ;;  %v5683_v60 = vsel %vm17221_vm4, %v5619_v8, %v5111_v37  ;;  %vm990_vm4 = vcmp.lt.f32.partialorder %v17234_v54, 12.0  ;;  %v17243_v8 = vld [vmem:[#allocation28_spill] sm:$0xff] }
 0x64a   :  { %v5749_v26 = vsel %vm2449_vm5, %v5685_v10, %v5182_v56  ;;  %v14204_v56 = vpop.f32.mrf.mxu1  ;;  %v17249_v54 = vld [vmem:[#allocation36_spill] sm:$0xff] }
 0x64c   :  { %v5180_v11 = vpop.permute.xlu0 %5179  ;;  %v14210_v14 = vpop.f32.mrf.mxu1 }
 0x64d   :  { %v5262_v63 = vpop.permute.xlu1 %5261  ;;  %v5747_v59 = vsel %vm2449_vm5, %v5683_v60, %v5180_v11  ;;  %vm17226_vm5 = vmmov %vm17214_vm0 }
 0x64e   :  { %v5813_v52 = vsel %vm2514_vm6, %v5749_v26, %v5262_v63 }
 0x650   :  { %v5260_v6 = vpop.permute.xlu0 %5259 }
 0x651   :  { %v5335_v61 = vpop.permute.xlu1 %5334  ;;  %v5811_v24 = vsel %vm2514_vm6, %v5747_v59, %v5260_v6  ;;  %vm17227_vm6 = vmmov %vm17214_vm0  ;;  %vm1053_vm0 = vcmp.lt.f32.partialorder %v17231_v47, 12.0  ;;  %v14216_v59 = vpop.f32.mrf.mxu1 }
 0x652   :  { %v5877_v22 = vsel %vm2579_vm7, %v5813_v52, %v5335_v61  ;;  %vm1117_vm12 = vmand %vm989_vm15, %vm1053_vm0  ;;  %vm1057_vm15 = vcmp.lt.f32.partialorder %v17241_v43, 12.0 }
 0x653   :  { %v6591_v35 = vsel %vm1117_vm12, %v14142_v18, 0.0  ;;  %vm1058_vm12 = vcmp.lt.f32.partialorder %v17243_v8, 12.0  ;;  %v14228_v9 = vpop.f32.mrf.mxu1 }
 0x654   :  { %v5333_v16 = vpop.permute.xlu0 %5332  ;;  %v6789_v31 = vmul.f32 %v6591_v35, %v6591_v35  ;;  %v6655_v57 = vsel %vm2319_vm3, %v6591_v35, 0.0 }
 0x655   :  { %v5404_v17 = vpop.permute.xlu1 %5403  ;;  %v5875_v49 = vsel %vm2579_vm7, %v5811_v24, %v5333_v16  ;;  %vm17229_vm7 = vmmov %vm17216_vm9  ;;  %vm1052_vm9 = vcmp.lt.f32.partialorder %v17233_v55, 12.0 }
 0x656   :  { %v5941_v1 = vsel %vm17222_vm8, %v5877_v22, %v5404_v17  ;;  %vm1116_vm2 = vmand %vm988_vm10, %vm1052_vm9  ;;  %vm1054_vm8 = vcmp.lt.f32.partialorder %v17235_v20, 12.0  ;;  %v6853_v37 = vsel %vm2319_vm3, %v6789_v31, 0.0  ;;  %vm994_vm9 = vcmp.lt.f32.partialorder %v17242_v23, 12.0 }
 0x657   :  { %v6590_v29 = vsel %vm1116_vm2, %v14138_v2, 0.0 }
 0x658   :  { %v5402_v53 = vpop.permute.xlu0 %5401  ;;  %v6788_v58 = vmul.f32 %v6590_v29, %v6590_v29  ;;  %v6654_v19 = vsel %vm2319_vm3, %v6590_v29, 0.0 }
 0x659   :  { %v5484_v34 = vpop.permute.xlu1 %5483  ;;  %v5939_v4 = vsel %vm17223_vm11, %v5875_v49, %v5402_v53  ;;  %vm1118_vm11 = vmand %vm990_vm4, %vm1054_vm8  ;;  %v6656_v11 = vadd.f32 %v6655_v57, %v6654_v19  ;;  %v17245_v49 = vld [vmem:[#allocation34_spill] sm:$0xff] }
 0x65a   :  { %v6005_v38 = vsel %vm17224_vm1, %v5941_v1, %v5484_v34  ;;  %vm991_vm1 = vcmp.lt.f32.partialorder %v17236_v42, 12.0  ;;  %v6592_v62 = vsel %vm1118_vm11, %v14133_v5, 0.0  ;;  %v6852_v6 = vsel %vm2319_vm3, %v6788_v58, 0.0  ;;  %vm1122_vm4 = vmand %vm994_vm9, %vm1058_vm12 }
 0x65b   :  { %v6790_v63 = vmul.f32 %v6592_v62, %v6592_v62  ;;  %v6854_v16 = vadd.f32 %v6853_v37, %v6852_v6  ;;  %v6657_v53 = vsel %vm2319_vm3, %v6592_v62, 0.0  ;;  %vm1059_vm8 = vcmp.lt.f32.partialorder %v17245_v49, 12.0  ;;  %v17250_v62 = vld [vmem:[#allocation21_spill] sm:$0xff] }
 0x65c   :  { %v5482_v39 = vpop.permute.xlu0 %5481  ;;  %v6658_v33 = vadd.f32 %v6657_v53, %v6656_v11  ;;  %v6596_v47 = vsel %vm1122_vm4, %v14144_v45, 0.0  ;;  %v17253_v53 = vld [vmem:[#allocation31_spill] sm:$0xff] }
 0x65d   :  { %v5557_v50 = vpop.permute.xlu1 %5556  ;;  %v6003_v40 = vsel %vm17225_vm14, %v5939_v4, %v5482_v39  ;;  %vm1055_vm14 = vcmp.lt.f32.partialorder %v17237_v30, 12.0  ;;  %v6855_v60 = vsel %vm2319_vm3, %v6790_v63, 0.0  ;;  %v17244_v39 = vld [vmem:[#allocation17_spill] sm:$0xff]  ;;  %v6794_v42 = vmul.f32 %v6596_v47, %v6596_v47  ;;  %v14235_v30 = vpop.f32.mrf.mxu1 }
 0x65e   :  { %v6069_v36 = vsel %vm17226_vm5, %v6005_v38, %v5557_v50  ;;  %vm992_vm5 = vcmp.lt.f32.partialorder %v17238_v25, 12.0  ;;  %v6856_v52 = vadd.f32 %v6855_v60, %v6854_v16  ;;  %vm995_vm2 = vcmp.lt.f32.partialorder %v17244_v39, 12.0  ;;  %v17246_v38 = vld [vmem:[#allocation20_spill] sm:$0xff]  ;;  %v17247_v50 = vld [vmem:[#allocation27_spill] sm:$0xff]  ;;  %v17255_v60 = vld [vmem:[#allocation38_spill] sm:$0xff] }
 0x65f   :  { %vm996_vm11 = vcmp.lt.f32.partialorder %v17246_v38, 12.0  ;;  %v6665_v58 = vsel %vm2319_vm3, %v6596_v47, 0.0  ;;  %v6863_v19 = vsel %vm2319_vm3, %v6794_v42, 0.0  ;;  %v14244_v63 = vpop.f32.mrf.mxu1  ;;  %vm1063_vm12 = vcmp.lt.f32.partialorder %v17253_v53, 12.0  ;;  %v17256_v39 = vld [vmem:[#allocation29_spill] sm:$0xff]  ;;  %v17264_v53 = vld [vmem:[#allocation24_spill] sm:$0xff] }
 0x660   :  { %v5555_v46 = vpop.permute.xlu0 %5554  ;;  %vm1064_vm4 = vcmp.lt.f32.partialorder %v17255_v60, 12.0 }
 0x661   :  { %v6067_v3 = vsel %vm17227_vm6, %v6003_v40, %v5555_v46  ;;  %vm1056_vm6 = vcmp.lt.f32.partialorder %v17239_v13, 12.0  ;;  %v14250_v23 = vpop.f32.mrf.mxu1 }
 0x662   :  { %7832 = vmatprep.mubr.msk.bf16.mxu1 %vm17228_vm13, %v6067_v3  ;;  %vm1119_vm13 = vmand %vm991_vm1, %vm1055_vm14  ;;  %vm1060_vm1 = vcmp.lt.f32.partialorder %v17247_v50, 12.0  ;;  %v17248_v3 = vld [vmem:[#allocation25_spill] sm:$0xff] }
 0x663   :  { %7833 = vmatmul.mubr.msk.bf16.gmra.mxu1 %vm17229_vm7, %v6069_v36  ;;  %vm993_vm7 = vcmp.lt.f32.partialorder %v17240_v48, 12.0  ;;  %vm1120_vm0 = vmand %vm992_vm5, %vm1056_vm6  ;;  %v6593_v61 = vsel %vm1119_vm13, %v14140_v12, 0.0  ;;  %vm997_vm14 = vcmp.lt.f32.partialorder %v17248_v3, 12.0  ;;  %vm1061_vm6 = vcmp.lt.f32.partialorder %v17249_v54, 12.0  ;;  %v17251_v48 = vld [vmem:[#allocation22_spill] sm:$0xff]  ;;  %v14263_v38 = vpop.f32.mrf.mxu1 }
 0x664   :  { %vm1121_vm10 = vmand %vm993_vm7, %vm1057_vm15  ;;  %v6594_v17 = vsel %vm1120_vm0, %v14146_v0, 0.0  ;;  %v6791_v26 = vmul.f32 %v6593_v61, %v6593_v61  ;;  %v6659_v24 = vsel %vm2319_vm3, %v6593_v61, 0.0  ;;  %vm998_vm15 = vcmp.lt.f32.partialorder %v17250_v62, 12.0  ;;  %v17252_v61 = vld [vmem:[#allocation5_spill] sm:$0xff] }
 0x665   :  { %v6595_v10 = vsel %vm1121_vm10, %v14165_v28, 0.0  ;;  %v6792_v34 = vmul.f32 %v6594_v17, %v6594_v17  ;;  %v6661_v22 = vsel %vm2319_vm3, %v6594_v17, 0.0  ;;  %v6660_v4 = vadd.f32 %v6659_v24, %v6658_v33  ;;  %vm1123_vm5 = vmand %vm995_vm2, %vm1059_vm8 }
 0x666   :  { %v6793_v1 = vmul.f32 %v6595_v10, %v6595_v10  ;;  %v6857_v40 = vsel %vm2319_vm3, %v6791_v26, 0.0  ;;  %v6663_v46 = vsel %vm2319_vm3, %v6595_v10, 0.0  ;;  %vm1124_vm13 = vmand %vm996_vm11, %vm1060_vm1  ;;  %v6597_v31 = vsel %vm1123_vm5, %v14155_v21, 0.0  ;;  %v17254_v10 = vld [vmem:[#allocation52_spill] sm:$0xff] }
 0x667   :  { %v6859_v36 = vsel %vm2319_vm3, %v6792_v34, 0.0  ;;  %v6662_v41 = vadd.f32 %v6661_v22, %v6660_v4  ;;  %v6858_v55 = vadd.f32 %v6857_v40, %v6856_v52  ;;  %vm1125_vm7 = vmand %vm997_vm14, %vm1061_vm6  ;;  %v6598_v13 = vsel %vm1124_vm13, %v14176_v32, 0.0 }
 0x668   :  { %v6861_v20 = vsel %vm2319_vm3, %v6793_v1, 0.0  ;;  %vm1062_vm0 = vcmp.lt.f32.partialorder %v17251_v48, 12.0  ;;  %v6599_v43 = vsel %vm1125_vm7, %v14184_v15, 0.0  ;;  %v6795_v37 = vmul.f32 %v6597_v31, %v6597_v31  ;;  %v17257_v1 = vld [vmem:[#allocation42_spill] sm:$0xff]  ;;  %v17261_v48 = vld [vmem:[#allocation4_spill] sm:$0xff] }
 0x669   :  { %v6860_v35 = vadd.f32 %v6859_v36, %v6858_v55  ;;  %v6664_v29 = vadd.f32 %v6663_v46, %v6662_v41  ;;  %v6796_v11 = vmul.f32 %v6598_v13, %v6598_v13  ;;  %vm999_vm10 = vcmp.lt.f32.partialorder %v17252_v61, 12.0  ;;  %vm1126_vm9 = vmand %vm998_vm15, %vm1062_vm0  ;;  %v14268_v55 = vpop.f32.mrf.mxu1 }
 0x66a   :  { %v6667_v16 = vsel %vm2319_vm3, %v6597_v31, 0.0  ;;  %v6669_v17 = vsel %vm2319_vm3, %v6598_v13, 0.0  ;;  %v6797_v33 = vmul.f32 %v6599_v43, %v6599_v43  ;;  %vm1000_vm2 = vcmp.lt.f32.partialorder %v17254_v10, 12.0  ;;  %vm1127_vm11 = vmand %vm999_vm10, %vm1063_vm12 }
 0x66b   :  { %v6862_v25 = vadd.f32 %v6861_v20, %v6860_v35  ;;  %v6666_v57 = vadd.f32 %v6665_v58, %v6664_v29  ;;  %v6865_v26 = vsel %vm2319_vm3, %v6795_v37, 0.0  ;;  %v6867_v34 = vsel %vm2319_vm3, %v6796_v11, 0.0  ;;  %vm1128_vm14 = vmand %vm1000_vm2, %vm1064_vm4  ;;  %v17258_v20 = vld [vmem:[#allocation35_spill] sm:$0xff]  ;;  %v17260_v58 = vld [vmem:[#allocation53_spill] sm:$0xff] }
 0x66c   :  { %v6671_v52 = vsel %vm2319_vm3, %v6599_v43, 0.0  ;;  %vm1001_vm8 = vcmp.lt.f32.partialorder %v17256_v39, 12.0  ;;  %v6600_v24 = vsel %vm1126_vm9, %v14171_v27, 0.0  ;;  %vm1065_vm1 = vcmp.lt.f32.partialorder %v17257_v1, 12.0  ;;  %v17259_v35 = vld [vmem:[#allocation23_spill] sm:$0xff]  ;;  %v17262_v11 = vld [vmem:[#allocation32_spill] sm:$0xff] }
 0x66d   :  { %v6864_v6 = vadd.f32 %v6863_v19, %v6862_v25  ;;  %v6668_v8 = vadd.f32 %v6667_v16, %v6666_v57  ;;  %v6869_v4 = vsel %vm2319_vm3, %v6797_v33, 0.0  ;;  %v6798_v36 = vmul.f32 %v6600_v24, %v6600_v24  ;;  %vm1129_vm5 = vmand %vm1001_vm8, %vm1065_vm1  ;;  %v14278_v19 = vpop.f32.mrf.mxu1 }
 0x66e   :  { %v6601_v46 = vsel %vm1127_vm11, %v14178_v44, 0.0  ;;  %v6602_v47 = vsel %vm1128_vm14, %v14194_v51, 0.0  ;;  %v6673_v41 = vsel %vm2319_vm3, %v6600_v24, 0.0  ;;  %vm1002_vm6 = vcmp.lt.f32.partialorder %v17258_v20, 12.0 }
 0x66f   :  { %v6670_v22 = vadd.f32 %v6669_v17, %v6668_v8  ;;  %v6866_v49 = vadd.f32 %v6865_v26, %v6864_v6  ;;  %vm1066_vm13 = vcmp.lt.f32.partialorder %v17259_v35, 12.0  ;;  %v6603_v29 = vsel %vm1129_vm5, %v14210_v14, 0.0  ;;  %v17263_v6 = vld [vmem:[#allocation57_spill] sm:$0xff]  ;;  %v14286_v33 = vpop.f32.mrf.mxu1 }
 0x670   :  { %v6871_v42 = vsel %vm2319_vm3, %v6798_v36, 0.0  ;;  %v6799_v31 = vmul.f32 %v6601_v46, %v6601_v46  ;;  %v6800_v25 = vmul.f32 %v6602_v47, %v6602_v47  ;;  %vm1003_vm7 = vcmp.lt.f32.partialorder %v17260_v58, 12.0  ;;  %vm1130_vm15 = vmand %vm1002_vm6, %vm1066_vm13  ;;  %v17265_v26 = vld [vmem:[#allocation45_spill] sm:$0xff]  ;;  %v17266_v36 = vld [vmem:[#allocation26_spill] sm:$0xff] }
 0x671   :  { %v6868_v50 = vadd.f32 %v6867_v34, %v6866_v49  ;;  %v6672_v40 = vadd.f32 %v6671_v52, %v6670_v22  ;;  %v6675_v57 = vsel %vm2319_vm3, %v6601_v46, 0.0  ;;  %v6677_v62 = vsel %vm2319_vm3, %v6602_v47, 0.0  ;;  %v14293_v22 = vpop.f32.mrf.mxu1  ;;  %v17267_v46 = vld [vmem:[#allocation43_spill] sm:$0xff] }
 0x672   :  { %vm1067_vm0 = vcmp.lt.f32.partialorder %v17261_v48, 12.0  ;;  %v6801_v43 = vmul.f32 %v6603_v29, %v6603_v29  ;;  %vm1004_vm10 = vcmp.lt.f32.partialorder %v17262_v11, 12.0  ;;  %vm1068_vm9 = vcmp.lt.f32.partialorder %v17263_v6, 12.0  ;;  %v17272_v11 = vld [vmem:[#allocation41_spill] sm:$0xff] }
 0x673   :  { %v6870_v3 = vadd.f32 %v6869_v4, %v6868_v50  ;;  %v6674_v54 = vadd.f32 %v6673_v41, %v6672_v40  ;;  %v6873_v61 = vsel %vm2319_vm3, %v6799_v31, 0.0  ;;  %v6875_v16 = vsel %vm2319_vm3, %v6800_v25, 0.0  ;;  %vm1131_vm2 = vmand %vm1003_vm7, %vm1067_vm0  ;;  %v14302_v20 = vpop.f32.mrf.mxu1  ;;  %v17269_v25 = vld [vmem:[#allocation44_spill] sm:$0xff] }
 0x674   :  { %v6679_v17 = vsel %vm2319_vm3, %v6603_v29, 0.0  ;;  %vm1005_vm12 = vcmp.lt.f32.partialorder %v17264_v53, 12.0  ;;  %v6604_v8 = vsel %vm1130_vm15, %v14186_v7, 0.0  ;;  %vm1069_vm4 = vcmp.lt.f32.partialorder %v17265_v26, 12.0  ;;  %vm1132_vm8 = vmand %vm1004_vm10, %vm1068_vm9  ;;  %v17268_v29 = vld [vmem:[#allocation55_spill] sm:$0xff] }
 0x675   :  { %v6872_v13 = vadd.f32 %v6871_v42, %v6870_v3  ;;  %v6676_v37 = vadd.f32 %v6675_v57, %v6674_v54  ;;  %v6877_v34 = vsel %vm2319_vm3, %v6801_v43, 0.0  ;;  %v6802_v24 = vmul.f32 %v6604_v8, %v6604_v8  ;;  %vm1133_vm11 = vmand %vm1005_vm12, %vm1069_vm4  ;;  %v17270_v57 = vld [vmem:[#allocation39_spill] sm:$0xff]  ;;  %v14314_v6 = vpop.f32.mrf.mxu1 }
 0x676   :  { %v6605_v49 = vsel %vm1131_vm2, %v14204_v56, 0.0  ;;  %v6606_v4 = vsel %vm1132_vm8, %v14228_v9, 0.0  ;;  %v6681_v50 = vsel %vm2319_vm3, %v6604_v8, 0.0  ;;  %vm1006_vm1 = vcmp.lt.f32.partialorder %v17266_v36, 12.0  ;;  %v17273_v53 = vld [vmem:[#allocation59_spill] sm:$0xff] }
 0x677   :  { %v6678_v10 = vadd.f32 %v6677_v62, %v6676_v37  ;;  %v6874_v60 = vadd.f32 %v6873_v61, %v6872_v13  ;;  %vm1070_vm14 = vcmp.lt.f32.partialorder %v17267_v46, 12.0  ;;  %v6607_v3 = vsel %vm1133_vm11, %v14244_v63, 0.0  ;;  %v17271_v62 = vld [vmem:[#allocation47_spill] sm:$0xff] }
 0x678   :  { %v6879_v47 = vsel %vm2319_vm3, %v6802_v24, 0.0  ;;  %v6803_v41 = vmul.f32 %v6605_v49, %v6605_v49  ;;  %v6804_v54 = vmul.f32 %v6606_v4, %v6606_v4  ;;  %vm1007_vm5 = vcmp.lt.f32.partialorder %v17268_v29, 12.0  ;;  %vm1134_vm6 = vmand %vm1006_vm1, %vm1070_vm14 }
 0x679   :  { %v6876_v52 = vadd.f32 %v6875_v16, %v6874_v60  ;;  %v6680_v39 = vadd.f32 %v6679_v17, %v6678_v10  ;;  %v6683_v42 = vsel %vm2319_vm3, %v6605_v49, 0.0  ;;  %v6685_v31 = vsel %vm2319_vm3, %v6606_v4, 0.0  ;;  %v14321_v10 = vpop.f32.mrf.mxu1 }
 0x67a   :  { %vm1071_vm13 = vcmp.lt.f32.partialorder %v17269_v25, 12.0  ;;  %v6805_v13 = vmul.f32 %v6607_v3, %v6607_v3  ;;  %vm1008_vm7 = vcmp.lt.f32.partialorder %v17270_v57, 12.0  ;;  %vm1072_vm15 = vcmp.lt.f32.partialorder %v17271_v62, 12.0  ;;  %v17279_v57 = vld [vmem:[#allocation8_spill] sm:$0xff] }
 0x67b   :  { %v6878_v1 = vadd.f32 %v6877_v34, %v6876_v52  ;;  %v6682_v40 = vadd.f32 %v6681_v50, %v6680_v39  ;;  %v6881_v48 = vsel %vm2319_vm3, %v6803_v41, 0.0  ;;  %v6883_v43 = vsel %vm2319_vm3, %v6804_v54, 0.0  ;;  %vm1135_vm10 = vmand %vm1007_vm5, %vm1071_vm13  ;;  %v17274_v50 = vld [vmem:[#allocation30_spill] sm:$0xff]  ;;  %v17276_v54 = vld [vmem:[#allocation40_spill] sm:$0xff] }
 0x67c   :  { %v6687_v37 = vsel %vm2319_vm3, %v6607_v3, 0.0  ;;  %vm1009_vm0 = vcmp.lt.f32.partialorder %v17272_v11, 12.0  ;;  %v6608_v61 = vsel %vm1134_vm6, %v14216_v59, 0.0  ;;  %vm1073_vm9 = vcmp.lt.f32.partialorder %v17273_v53, 12.0  ;;  %vm1136_vm12 = vmand %vm1008_vm7, %vm1072_vm15 }
 0x67d   :  { %v6880_v35 = vadd.f32 %v6879_v47, %v6878_v1  ;;  %v6684_v58 = vadd.f32 %v6683_v42, %v6682_v40  ;;  %v6885_v8 = vsel %vm2319_vm3, %v6805_v13, 0.0  ;;  %v6806_v34 = vmul.f32 %v6608_v61, %v6608_v61  ;;  %vm1137_vm2 = vmand %vm1009_vm0, %vm1073_vm9  ;;  %v14326_v1 = vpop.f32.mrf.mxu1  ;;  %v17275_v40 = vld [vmem:[#allocation46_spill] sm:$0xff]  ;;  %v17277_v42 = vld [vmem:[#allocation48_spill] sm:$0xff] }
 0x67e   :  { %v6609_v52 = vsel %vm1135_vm10, %v14235_v30, 0.0  ;;  %v6610_v24 = vsel %vm1136_vm12, %v14263_v38, 0.0  ;;  %v6689_v49 = vsel %vm2319_vm3, %v6608_v61, 0.0  ;;  %vm1010_vm4 = vcmp.lt.f32.partialorder %v17274_v50, 12.0 }
 0x67f   :  { %v6686_v16 = vadd.f32 %v6685_v31, %v6684_v58  ;;  %v6882_v17 = vadd.f32 %v6881_v48, %v6880_v35  ;;  %vm1074_vm8 = vcmp.lt.f32.partialorder %v17275_v40, 12.0  ;;  %v6611_v36 = vsel %vm1137_vm2, %v14278_v19, 0.0  ;;  %v14336_v25 = vpop.f32.mrf.mxu1  ;;  %v17278_v58 = vld [vmem:[#allocation60_spill] sm:$0xff]  ;;  %v17282_v40 = vld [vmem:[#allocation50_spill] sm:$0xff] }
 0x680   :  { %v6887_v46 = vsel %vm2319_vm3, %v6806_v34, 0.0  ;;  %v6807_v3 = vmul.f32 %v6609_v52, %v6609_v52  ;;  %v6808_v47 = vmul.f32 %v6610_v24, %v6610_v24  ;;  %vm1011_vm11 = vcmp.lt.f32.partialorder %v17276_v54, 12.0  ;;  %vm1138_vm1 = vmand %vm1010_vm4, %vm1074_vm8 }
 0x681   :  { %v6884_v60 = vadd.f32 %v6883_v43, %v6882_v17  ;;  %v6688_v26 = vadd.f32 %v6687_v37, %v6686_v16  ;;  %v6691_v35 = vsel %vm2319_vm3, %v6609_v52, 0.0  ;;  %v6693_v29 = vsel %vm2319_vm3, %v6610_v24, 0.0  ;;  %v17280_v37 = vld [vmem:[#allocation66_spill] sm:$0xff]  ;;  %v17281_v17 = vld [vmem:[#allocation71_spill] sm:$0xff] }
 0x682   :  { %vm1075_vm14 = vcmp.lt.f32.partialorder %v17277_v42, 12.0  ;;  %v6809_v31 = vmul.f32 %v6611_v36, %v6611_v36  ;;  %vm1012_vm5 = vcmp.lt.f32.partialorder %v17278_v58, 12.0  ;;  %vm1076_vm6 = vcmp.lt.f32.partialorder %v17279_v57, 12.0 }
 0x683   :  { %v6886_v39 = vadd.f32 %v6885_v8, %v6884_v60  ;;  %v6690_v4 = vadd.f32 %v6689_v49, %v6688_v26  ;;  %v6889_v62 = vsel %vm2319_vm3, %v6807_v3, 0.0  ;;  %v6891_v48 = vsel %vm2319_vm3, %v6808_v47, 0.0  ;;  %vm1139_vm7 = vmand %vm1011_vm11, %vm1075_vm14  ;;  %v14349_v8 = vpop.f32.mrf.mxu1 }
 0x684   :  { %v6695_v43 = vsel %vm2319_vm3, %v6611_v36, 0.0  ;;  %vm1013_vm13 = vcmp.lt.f32.partialorder %v17280_v37, 12.0  ;;  %v6612_v11 = vsel %vm1138_vm1, %v14250_v23, 0.0  ;;  %vm1077_vm15 = vcmp.lt.f32.partialorder %v17281_v17, 12.0  ;;  %vm1140_vm0 = vmand %vm1012_vm5, %vm1076_vm6  ;;  %v17283_v36 = vld [vmem:[#allocation64_spill] sm:$0xff] }
 0x685   :  { %v6888_v41 = vadd.f32 %v6887_v46, %v6886_v39  ;;  %v6692_v13 = vadd.f32 %v6691_v35, %v6690_v4  ;;  %v6893_v53 = vsel %vm2319_vm3, %v6809_v31, 0.0  ;;  %v6810_v34 = vmul.f32 %v6612_v11, %v6612_v11  ;;  %vm1141_vm10 = vmand %vm1013_vm13, %vm1077_vm15  ;;  %v14351_v52 = vpop.f32.mrf.mxu1 }
 0x686   :  { %v6613_v39 = vsel %vm1139_vm7, %v14268_v55, 0.0  ;;  %v6614_v49 = vsel %vm1140_vm0, %v14293_v22, 0.0  ;;  %v6697_v4 = vsel %vm2319_vm3, %v6612_v11, 0.0  ;;  %vm1014_vm9 = vcmp.lt.f32.partialorder %v17282_v40, 12.0 }
 0x687   :  { %v6694_v61 = vadd.f32 %v6693_v29, %v6692_v13  ;;  %v6890_v16 = vadd.f32 %v6889_v62, %v6888_v41  ;;  %vm1078_vm12 = vcmp.lt.f32.partialorder %v17283_v36, 12.0  ;;  %v6615_v46 = vsel %vm1141_vm10, %v14314_v6, 0.0  ;;  %v14360_v54 = vpop.f32.mrf.mxu1  ;;  %v17284_v29 = vld [vmem:[#allocation63_spill] sm:$0xff]  ;;  %v17285_v13 = vld [vmem:[#allocation68_spill] sm:$0xff]  ;;  %v17286_v62 = vld [vmem:[#allocation73_spill] sm:$0xff] }
 0x688   :  { %v6895_v3 = vsel %vm2319_vm3, %v6810_v34, 0.0  ;;  %v6811_v47 = vmul.f32 %v6613_v39, %v6613_v39  ;;  %v6812_v41 = vmul.f32 %v6614_v49, %v6614_v49  ;;  %vm1015_vm2 = vcmp.lt.f32.partialorder %v17284_v29, 12.0  ;;  %vm1142_vm4 = vmand %vm1014_vm9, %vm1078_vm12 }
 0x689   :  { %v6892_v60 = vadd.f32 %v6891_v48, %v6890_v16  ;;  %v6696_v26 = vadd.f32 %v6695_v43, %v6694_v61  ;;  %v6699_v42 = vsel %vm2319_vm3, %v6613_v39, 0.0  ;;  %v6701_v31 = vsel %vm2319_vm3, %v6614_v49, 0.0  ;;  %v17287_v48 = vld [vmem:[#allocation78_spill] sm:$0xff]  ;;  %v17288_v61 = vld [vmem:[#allocation79_spill] sm:$0xff]  ;;  %v14372_v16 = vpop.f32.mrf.mxu1 }
 0x68a   :  { %vm1079_vm8 = vcmp.lt.f32.partialorder %v17285_v13, 12.0  ;;  %v6813_v58 = vmul.f32 %v6615_v46, %v6615_v46  ;;  %vm1016_vm11 = vcmp.lt.f32.partialorder %v17286_v62, 12.0  ;;  %vm1080_vm1 = vcmp.lt.f32.partialorder %v17287_v48, 12.0 }
 0x68b   :  { %v6894_v24 = vadd.f32 %v6893_v53, %v6892_v60  ;;  %v6698_v50 = vadd.f32 %v6697_v4, %v6696_v26  ;;  %v6897_v43 = vsel %vm2319_vm3, %v6811_v47, 0.0  ;;  %v6899_v37 = vsel %vm2319_vm3, %v6812_v41, 0.0  ;;  %vm1143_vm5 = vmand %vm1015_vm2, %vm1079_vm8  ;;  %v17289_v26 = vld [vmem:[#allocation86_spill] sm:$0xff]  ;;  %v14379_v4 = vpop.f32.mrf.mxu1  ;;  %v17291_v41 = vld [vmem:[#allocation69_spill] sm:$0xff] }
 0x68c   :  { %v6703_v11 = vsel %vm2319_vm3, %v6615_v46, 0.0  ;;  %vm1017_vm14 = vcmp.lt.f32.partialorder %v17288_v61, 12.0  ;;  %v6616_v17 = vsel %vm1142_vm4, %v14286_v33, 0.0  ;;  %vm1081_vm6 = vcmp.lt.f32.partialorder %v17289_v26, 12.0  ;;  %vm1144_vm13 = vmand %vm1016_vm11, %vm1080_vm1 }
 0x68d   :  { %v6896_v35 = vadd.f32 %v6895_v3, %v6894_v24  ;;  %v6700_v57 = vadd.f32 %v6699_v42, %v6698_v50  ;;  %v6901_v34 = vsel %vm2319_vm3, %v6813_v58, 0.0  ;;  %v6814_v49 = vmul.f32 %v6616_v17, %v6616_v17  ;;  %vm1145_vm7 = vmand %vm1017_vm14, %vm1081_vm6  ;;  %v14384_v3 = vpop.f32.mrf.mxu1 }
 0x68e   :  { %v6617_v50 = vsel %vm1143_vm5, %v14302_v20, 0.0  ;;  %v6618_v36 = vsel %vm1144_vm13, %v14326_v1, 0.0  ;;  %v6705_v46 = vsel %vm2319_vm3, %v6616_v17, 0.0  ;;  %17290 = vst [vmem:[#allocation104_spill] sm:$0xff] %v14384_v3  ;;  %vm1018_vm15 = vcmp.lt.f32.partialorder %v17291_v41, 12.0  ;;  %v17295_v17 = vld [vmem:[#allocation84_spill] sm:$0xff] }
 0x68f   :  { %v6702_v53 = vadd.f32 %v6701_v31, %v6700_v57  ;;  %v6898_v60 = vadd.f32 %v6897_v43, %v6896_v35  ;;  %v17292_v35 = vld [vmem:[#allocation75_spill] sm:$0xff]  ;;  %v6619_v29 = vsel %vm1145_vm7, %v14349_v8, 0.0  ;;  %v6903_v42 = vsel %vm2319_vm3, %v6814_v49, 0.0  ;;  %v17293_v57 = vld [vmem:[#allocation76_spill] sm:$0xff] }
 0x690   :  { %vm1082_vm0 = vcmp.lt.f32.partialorder %v17292_v35, 12.0  ;;  %v6815_v31 = vmul.f32 %v6617_v50, %v6617_v50  ;;  %v6816_v13 = vmul.f32 %v6618_v36, %v6618_v36  ;;  %vm1019_vm10 = vcmp.lt.f32.partialorder %v17293_v57, 12.0  ;;  %v17294_v43 = vld [vmem:[#allocation83_spill] sm:$0xff] }
 0x691   :  { %v6900_v39 = vadd.f32 %v6899_v37, %v6898_v60  ;;  %v6704_v24 = vadd.f32 %v6703_v11, %v6702_v53  ;;  %v6707_v62 = vsel %vm2319_vm3, %v6617_v50, 0.0  ;;  %vm1146_vm9 = vmand %vm1018_vm15, %vm1082_vm0  ;;  %v6709_v48 = vsel %vm2319_vm3, %v6618_v36, 0.0  ;;  %v14394_v11 = vpop.f32.mrf.mxu1  ;;  %v17296_v53 = vld [vmem:[#allocation90_spill] sm:$0xff] }
 0x692   :  { %vm1083_vm12 = vcmp.lt.f32.partialorder %v17294_v43, 12.0  ;;  %v6817_v37 = vmul.f32 %v6619_v29, %v6619_v29  ;;  %vm1020_vm2 = vcmp.lt.f32.partialorder %v17295_v17, 12.0  ;;  %vm1084_vm4 = vcmp.lt.f32.partialorder %v17296_v53, 12.0 }
 0x693   :  { %v6902_v40 = vadd.f32 %v6901_v34, %v6900_v39  ;;  %v6706_v47 = vadd.f32 %v6705_v46, %v6704_v24  ;;  %v6905_v60 = vsel %vm2319_vm3, %v6815_v31, 0.0  ;;  %v6907_v26 = vsel %vm2319_vm3, %v6816_v13, 0.0  ;;  %v17297_v39 = vld [vmem:[#allocation91_spill] sm:$0xff]  ;;  %vm1147_vm11 = vmand %vm1019_vm10, %vm1083_vm12  ;;  %v14407_v46 = vpop.f32.mrf.mxu1 }
 0x694   :  { %v6711_v34 = vsel %vm2319_vm3, %v6619_v29, 0.0  ;;  %vm1021_vm8 = vcmp.lt.f32.partialorder %v17297_v39, 12.0  ;;  %v6620_v24 = vsel %vm1146_vm9, %v14321_v10, 0.0  ;;  %v6909_v36 = vsel %vm2319_vm3, %v6817_v37, 0.0  ;;  %vm1148_vm14 = vmand %vm1020_vm2, %vm1084_vm4  ;;  %17299 = vst [vmem:[#allocation117_spill] sm:$0xff] %v14407_v46 }
 0x695   :  { %v6904_v58 = vadd.f32 %v6903_v42, %v6902_v40  ;;  %v6708_v61 = vadd.f32 %v6707_v62, %v6706_v47  ;;  %v17298_v40 = vld [vmem:[#allocation96_spill] sm:$0xff]  ;;  %v6818_v35 = vmul.f32 %v6620_v24, %v6620_v24  ;;  %v6621_v29 = vsel %vm1147_vm11, %v14336_v25, 0.0  ;;  %v17300_v62 = vld [vmem:[#allocation82_spill] sm:$0xff] }
 0x696   :  { %vm1085_vm1 = vcmp.lt.f32.partialorder %v17298_v40, 12.0  ;;  %v6622_v31 = vsel %vm1148_vm14, %v14360_v54, 0.0  ;;  %v6713_v13 = vsel %vm2319_vm3, %v6620_v24, 0.0  ;;  %vm1022_vm6 = vcmp.lt.f32.partialorder %v17300_v62, 12.0  ;;  %v17303_v24 = vld [vmem:[#allocation94_spill] sm:$0xff]  ;;  %v17304_v40 = vld [vmem:[#allocation99_spill] sm:$0xff] }
 0x697   :  { %v6710_v49 = vadd.f32 %v6709_v48, %v6708_v61  ;;  %v6906_v50 = vadd.f32 %v6905_v60, %v6904_v58  ;;  %vm1149_vm5 = vmand %vm1021_vm8, %vm1085_vm1  ;;  %v14412_v58 = vpop.f32.mrf.mxu1  ;;  %v17301_v48 = vld [vmem:[#allocation89_spill] sm:$0xff]  ;;  %v6911_v37 = vsel %vm2319_vm3, %v6818_v35, 0.0  ;;  %v6819_v61 = vmul.f32 %v6621_v29, %v6621_v29 }
 0x698   :  { %vm1086_vm13 = vcmp.lt.f32.partialorder %v17301_v48, 12.0  ;;  %v6623_v43 = vsel %vm1149_vm5, %v14379_v4, 0.0  ;;  %v6820_v17 = vmul.f32 %v6622_v31, %v6622_v31  ;;  %v6717_v39 = vsel %vm2319_vm3, %v6622_v31, 0.0 }
 0x699   :  { %v6908_v47 = vadd.f32 %v6907_v26, %v6906_v50  ;;  %v6712_v41 = vadd.f32 %v6711_v34, %v6710_v49  ;;  %v14418_v53 = vpop.f32.mrf.mxu1  ;;  %v17302_v26 = vld [vmem:[#allocation87_spill] sm:$0xff]  ;;  %v6715_v34 = vsel %vm2319_vm3, %v6621_v29, 0.0  ;;  %vm1150_vm15 = vmand %vm1022_vm6, %vm1086_vm13  ;;  %vm1087_vm0 = vcmp.lt.f32.partialorder %v17303_v24, 12.0 }
 0x69a   :  { %vm1023_vm7 = vcmp.lt.f32.partialorder %v17302_v26, 12.0  ;;  %v6821_v49 = vmul.f32 %v6623_v43, %v6623_v43  ;;  %vm1024_vm10 = vcmp.lt.f32.partialorder %v17304_v40, 12.0  ;;  %v6719_v35 = vsel %vm2319_vm3, %v6623_v43, 0.0  ;;  %v17311_v40 = vld [vmem:[#allocation103_spill] sm:$0xff] }
 0x69b   :  { %v6910_v42 = vadd.f32 %v6909_v36, %v6908_v47  ;;  %v6714_v57 = vadd.f32 %v6713_v13, %v6712_v41  ;;  %v17305_v36 = vld [vmem:[#allocation107_spill] sm:$0xff]  ;;  %v6913_v47 = vsel %vm2319_vm3, %v6819_v61, 0.0  ;;  %v6915_v41 = vsel %vm2319_vm3, %v6820_v17, 0.0  ;;  %v14430_v29 = vpop.f32.mrf.mxu1  ;;  %vm1151_vm2 = vmand %vm1023_vm7, %vm1087_vm0 }
 0x69c   :  { %vm1088_vm9 = vcmp.lt.f32.partialorder %v17305_v36, 12.0  ;;  %17307 = vst [vmem:[#allocation133_spill] sm:$0xff] %v14430_v29  ;;  %v6624_v31 = vsel %vm1150_vm15, %v14351_v52, 0.0  ;;  %v6917_v48 = vsel %vm2319_vm3, %v6821_v49, 0.0  ;;  %vm1090_vm14 = vcmp.lt.f32.partialorder %v17311_v40, 12.0 }
 0x69d   :  { %v6912_v60 = vadd.f32 %v6911_v37, %v6910_v42  ;;  %v6716_v50 = vadd.f32 %v6715_v34, %v6714_v57  ;;  %v17306_v42 = vld [vmem:[#allocation105_spill] sm:$0xff]  ;;  %v17308_v57 = vld [vmem:[#allocation111_spill] sm:$0xff]  ;;  %vm1152_vm8 = vmand %vm1024_vm10, %vm1088_vm9  ;;  %v6822_v17 = vmul.f32 %v6624_v31, %v6624_v31  ;;  %v14437_v43 = vpop.f32.mrf.mxu1  ;;  %v6625_v34 = vsel %vm1151_vm2, %v14372_v16, 0.0 }
 0x69e   :  { %vm1025_vm12 = vcmp.lt.f32.partialorder %v17306_v42, 12.0  ;;  %vm1089_vm4 = vcmp.lt.f32.partialorder %v17308_v57, 12.0  ;;  %17309 = vst [vmem:[#allocation138_spill] sm:$0xff] %v14437_v43  ;;  %v17314_v57 = vld [vmem:[#allocation108_spill] sm:$0xff] }
 0x69f   :  { %v6718_v13 = vadd.f32 %v6717_v39, %v6716_v50  ;;  %v6914_v62 = vadd.f32 %v6913_v47, %v6912_v60  ;;  %vm1153_vm11 = vmand %vm1025_vm12, %vm1089_vm4  ;;  %v6626_v39 = vsel %vm1152_vm8, %v14394_v11, 0.0  ;;  %v6721_v60 = vsel %vm2319_vm3, %v6624_v31, 0.0  ;;  %v17310_v50 = vld [vmem:[#allocation97_spill] sm:$0xff] }
 0x6a0   :  { %vm1026_vm1 = vcmp.lt.f32.partialorder %v17310_v50, 12.0  ;;  %v6627_v49 = vsel %vm1153_vm11, %v14412_v58, 0.0  ;;  %v6919_v36 = vsel %vm2319_vm3, %v6822_v17, 0.0  ;;  %v6823_v47 = vmul.f32 %v6625_v34, %v6625_v34  ;;  %v17316_v17 = vld [vmem:[#allocation119_spill] sm:$0xff] }
 0x6a1   :  { %v6916_v37 = vadd.f32 %v6915_v41, %v6914_v62  ;;  %v6720_v61 = vadd.f32 %v6719_v35, %v6718_v13  ;;  %v6824_v41 = vmul.f32 %v6626_v39, %v6626_v39  ;;  %v14446_v35 = vpop.f32.mrf.mxu1  ;;  %v17313_v13 = vld [vmem:[#allocation101_spill] sm:$0xff]  ;;  %v6723_v62 = vsel %vm2319_vm3, %v6625_v34, 0.0  ;;  %vm1154_vm6 = vmand %vm1026_vm1, %vm1090_vm14  ;;  %v17317_v34 = vld [vmem:[#allocation118_spill] sm:$0xff] }
 0x6a2   :  { %17312 = vst [vmem:[#allocation112_spill] sm:$0xff] %v14446_v35  ;;  %vm1027_vm5 = vcmp.lt.f32.partialorder %v17313_v13, 12.0  ;;  %v6725_v31 = vsel %vm2319_vm3, %v6626_v39, 0.0  ;;  %vm1091_vm13 = vcmp.lt.f32.partialorder %v17314_v57, 12.0  ;;  %vm1092_vm15 = vcmp.lt.f32.partialorder %v17316_v17, 12.0 }
 0x6a3   :  { %v6918_v24 = vadd.f32 %v6917_v48, %v6916_v37  ;;  %v6722_v26 = vadd.f32 %v6721_v60, %v6720_v61  ;;  %v6825_v48 = vmul.f32 %v6627_v49, %v6627_v49  ;;  %v17315_v60 = vld [vmem:[#allocation113_spill] sm:$0xff]  ;;  %v6921_v50 = vsel %vm2319_vm3, %v6823_v47, 0.0  ;;  %vm1155_vm10 = vmand %vm1027_vm5, %vm1091_vm13 }
 0x6a4   :  { %vm1028_vm7 = vcmp.lt.f32.partialorder %v17315_v60, 12.0  ;;  %v6727_v40 = vsel %vm2319_vm3, %v6627_v49, 0.0  ;;  %vm1029_vm0 = vcmp.lt.f32.partialorder %v17317_v34, 12.0  ;;  %v6628_v39 = vsel %vm1154_vm6, %v14384_v3, 0.0 }
 0x6a5   :  { %v6920_v42 = vadd.f32 %v6919_v36, %v6918_v24  ;;  %v6724_v61 = vadd.f32 %v6723_v62, %v6722_v26  ;;  %v6923_v24 = vsel %vm2319_vm3, %v6824_v41, 0.0  ;;  %v17318_v26 = vld [vmem:[#allocation125_spill] sm:$0xff]  ;;  %v6925_v62 = vsel %vm2319_vm3, %v6825_v48, 0.0  ;;  %vm1156_vm12 = vmand %vm1028_vm7, %vm1092_vm15  ;;  %v17322_v48 = vld [vmem:[#allocation114_spill] sm:$0xff] }
 0x6a6   :  { %vm1093_vm9 = vcmp.lt.f32.partialorder %v17318_v26, 12.0  ;;  %v6826_v17 = vmul.f32 %v6628_v39, %v6628_v39  ;;  %v6629_v49 = vsel %vm1155_vm10, %v14407_v46, 0.0  ;;  %vm1094_vm8 = vcmp.lt.f32.partialorder %v17322_v48, 12.0  ;;  %v17323_v46 = vld [vmem:[#allocation116_spill] sm:$0xff]  ;;  %v17326_v48 = vld [vmem:[#allocation122_spill] sm:$0xff] }
 0x6a7   :  { %v6726_v36 = vadd.f32 %v6725_v31, %v6724_v61  ;;  %v6922_v57 = vadd.f32 %v6921_v50, %v6920_v42  ;;  %vm1157_vm2 = vmand %vm1029_vm0, %vm1093_vm9  ;;  %v6630_v31 = vsel %vm1156_vm12, %v14430_v29, 0.0  ;;  %v6729_v42 = vsel %vm2319_vm3, %v6628_v39, 0.0  ;;  %v17321_v50 = vld [vmem:[#allocation109_spill] sm:$0xff] }
 0x6a8   :  { %vm1030_vm4 = vcmp.lt.f32.partialorder %v17321_v50, 12.0  ;;  %v6631_v26 = vsel %vm1157_vm2, %v14446_v35, 0.0  ;;  %vm1031_vm11 = vcmp.lt.f32.partialorder %v17323_v46, 12.0  ;;  %v6733_v39 = vsel %vm2319_vm3, %v6630_v31, 0.0  ;;  %v17327_v35 = vld [vmem:[#allocation129_spill] sm:$0xff] }
 0x6a9   :  { %v6924_v47 = vadd.f32 %v6923_v24, %v6922_v57  ;;  %v6728_v41 = vadd.f32 %v6727_v40, %v6726_v36  ;;  %v6927_v24 = vsel %vm2319_vm3, %v6826_v17, 0.0  ;;  %v6827_v40 = vmul.f32 %v6629_v49, %v6629_v49  ;;  %vm1158_vm1 = vmand %vm1030_vm4, %vm1094_vm8 }
 0x6aa   :  { %v6828_v36 = vmul.f32 %v6630_v31, %v6630_v31  ;;  %vm1032_vm5 = vcmp.lt.f32.partialorder %v17326_v48, 12.0  ;;  %vm1096_vm6 = vcmp.lt.f32.partialorder %v17327_v35, 12.0  ;;  %v6632_v31 = vsel %vm1158_vm1, %v14418_v53, 0.0 }
 0x6ab   :  { %v6926_v34 = vadd.f32 %v6925_v62, %v6924_v47  ;;  %v6730_v61 = vadd.f32 %v6729_v42, %v6728_v41  ;;  %v6731_v62 = vsel %vm2319_vm3, %v6629_v49, 0.0  ;;  %v17324_v47 = vld [vmem:[#allocation124_spill] sm:$0xff]  ;;  %v6829_v41 = vmul.f32 %v6631_v26, %v6631_v26  ;;  %vm1160_vm0 = vmand %vm1032_vm5, %vm1096_vm6 }
 0x6ac   :  { %vm1095_vm14 = vcmp.lt.f32.partialorder %v17324_v47, 12.0  ;;  %v6929_v17 = vsel %vm2319_vm3, %v6827_v40, 0.0  ;;  %v17328_v49 = vld [vmem:[#allocation132_spill] sm:$0xff] }
 0x6ad   :  { %v6928_v57 = vadd.f32 %v6927_v24, %v6926_v34  ;;  %v6732_v50 = vadd.f32 %v6731_v62, %v6730_v61  ;;  %v6931_v34 = vsel %vm2319_vm3, %v6828_v36, 0.0  ;;  %v6735_v24 = vsel %vm2319_vm3, %v6631_v26, 0.0  ;;  %vm1159_vm7 = vmand %vm1031_vm11, %vm1095_vm14  ;;  %v17330_v61 = vld [vmem:[#allocation134_spill] sm:$0xff] }
 0x6ae   :  { %vm1033_vm13 = vcmp.lt.f32.partialorder %v17328_v49, 12.0  ;;  %vm1097_vm15 = vcmp.lt.f32.partialorder %v17330_v61, 12.0  ;;  %v6933_v35 = vsel %vm2319_vm3, %v6829_v41, 0.0  ;;  %v6830_v62 = vmul.f32 %v6632_v31, %v6632_v31 }
 0x6af   :  { %v6734_v47 = vadd.f32 %v6733_v39, %v6732_v50  ;;  %v6930_v3 = vadd.f32 %v6929_v17, %v6928_v57  ;;  %vm1161_vm10 = vmand %vm1033_vm13, %vm1097_vm15  ;;  %v6633_v48 = vsel %vm1159_vm7, %v14437_v43, 0.0  ;;  %v6737_v57 = vsel %vm2319_vm3, %v6632_v31, 0.0  ;;  %v17332_v50 = vld [vmem:[#allocation120_spill] sm:$0xff]  ;;  %v17335_v43 = vld [vmem:[#allocation126_spill] sm:$0xff] }
 0x6b0   :  { %vm1034_vm9 = vcmp.lt.f32.partialorder %v17332_v50, 12.0  ;;  %v17333_v17 = vld [vmem:[#allocation128_spill] sm:$0xff]  ;;  %vm1035_vm2 = vcmp.lt.f32.partialorder %v17335_v43, 12.0 }
 0x6b1   :  { %v6932_v40 = vadd.f32 %v6931_v34, %v6930_v3  ;;  %v6736_v36 = vadd.f32 %v6735_v24, %v6734_v47  ;;  %vm1098_vm12 = vcmp.lt.f32.partialorder %v17333_v17, 12.0  ;;  %v6935_v3 = vsel %vm2319_vm3, %v6830_v62, 0.0  ;;  %v17337_v50 = vld [vmem:[#allocation136_spill] sm:$0xff] }
 0x6b2   :  { %v6831_v34 = vmul.f32 %v6633_v48, %v6633_v48  ;;  %vm1162_vm4 = vmand %vm1034_vm9, %vm1098_vm12  ;;  %vm1036_vm11 = vcmp.lt.f32.partialorder %v17337_v50, 12.0  ;;  %v17338_v17 = vld [vmem:[#allocation140_spill] sm:$0xff] }
 0x6b3   :  { %v14452_v37 = vpop.f32.mrf.mxu1  ;;  %v6934_v49 = vadd.f32 %v6933_v35, %v6932_v40  ;;  %v6738_v46 = vadd.f32 %v6737_v57, %v6736_v36  ;;  %v6739_v35 = vsel %vm2319_vm3, %v6633_v48, 0.0  ;;  %v17336_v40 = vld [vmem:[#allocation131_spill] sm:$0xff]  ;;  %vm1100_vm1 = vcmp.lt.f32.partialorder %v17338_v17, 12.0 }
 0x6b4   :  { %vm1099_vm8 = vcmp.lt.f32.partialorder %v17336_v40, 12.0  ;;  %v6937_v62 = vsel %vm2319_vm3, %v6831_v34, 0.0  ;;  %vm1164_vm13 = vmand %vm1036_vm11, %vm1100_vm1 }
 0x6b5   :  { %v14465_v60 = vpop.f32.mrf.mxu1  ;;  %v6936_v61 = vadd.f32 %v6935_v3, %v6934_v49  ;;  %v6740_v57 = vadd.f32 %v6739_v35, %v6738_v46  ;;  %v17339_v3 = vld [vmem:[#allocation142_spill] sm:$0xff]  ;;  %vm1163_vm5 = vmand %vm1035_vm2, %vm1099_vm8 }
 0x6b6   :  { %17319 = vst [vmem:[#allocation110_spill] sm:$0xff] %v14465_v60  ;;  %v6634_v39 = vsel %vm1160_vm0, %v14465_v60, 0.0  ;;  %vm1037_vm14 = vcmp.lt.f32.partialorder %v17339_v3, 12.0  ;;  %v17341_v46 = vld [vmem:[#allocation146_spill] sm:$0xff] }
 0x6b7   :  { %v14470_v13 = vpop.f32.mrf.mxu1  ;;  %v6832_v24 = vmul.f32 %v6634_v39, %v6634_v39  ;;  %v6741_v31 = vsel %vm2319_vm3, %v6634_v39, 0.0  ;;  %v6636_v39 = vsel %vm1162_vm4, %v14452_v37, 0.0  ;;  %v6938_v40 = vadd.f32 %v6937_v62, %v6936_v61  ;;  %v17344_v62 = vld [vmem:[#allocation135_spill] sm:$0xff] }
 0x6b8   :  { %17320 = vst [vmem:[#allocation85_spill] sm:$0xff] %v14470_v13  ;;  %v6742_v60 = vadd.f32 %v6741_v31, %v6740_v57  ;;  %vm1101_vm6 = vcmp.lt.f32.partialorder %v17341_v46, 12.0  ;;  %v6834_v50 = vmul.f32 %v6636_v39, %v6636_v39  ;;  %v6637_v17 = vsel %vm1163_vm5, %v14470_v13, 0.0  ;;  %v17346_v13 = vld [vmem:[#allocation137_spill] sm:$0xff] }
 0x6b9   :  { %v14480_v42 = vpop.f32.mrf.mxu1  ;;  %vm1165_vm7 = vmand %vm1037_vm14, %vm1101_vm6  ;;  %v6745_v61 = vsel %vm2319_vm3, %v6636_v39, 0.0  ;;  %vm1038_vm15 = vcmp.lt.f32.partialorder %v17344_v62, 12.0 }
 0x6ba   :  { %17325 = vst [vmem:[#allocation49_spill] sm:$0xff] %v14480_v42  ;;  %v6635_v41 = vsel %vm1161_vm10, %v14480_v42, 0.0  ;;  %v6939_v42 = vsel %vm2319_vm3, %v6832_v24, 0.0  ;;  %vm1039_vm10 = vcmp.lt.f32.partialorder %v17346_v13, 12.0 }
 0x6bb   :  { %v6833_v36 = vmul.f32 %v6635_v41, %v6635_v41  ;;  %v6743_v49 = vsel %vm2319_vm3, %v6635_v41, 0.0  ;;  %v6940_v24 = vadd.f32 %v6939_v42, %v6938_v40  ;;  %v6835_v42 = vmul.f32 %v6637_v17, %v6637_v17 }
 0x6bc   :  { %v6744_v41 = vadd.f32 %v6743_v49, %v6742_v60  ;;  %v6943_v60 = vsel %vm2319_vm3, %v6834_v50, 0.0 }
 0x6bd   :  { %v6941_v35 = vsel %vm2319_vm3, %v6833_v36, 0.0  ;;  %v17345_v36 = vld [vmem:[#allocation139_spill] sm:$0xff]  ;;  %v6945_v50 = vsel %vm2319_vm3, %v6835_v42, 0.0 }
 0x6be   :  { %v6942_v3 = vadd.f32 %v6941_v35, %v6940_v24  ;;  %v6746_v57 = vadd.f32 %v6745_v61, %v6744_v41  ;;  %vm1102_vm0 = vcmp.lt.f32.partialorder %v17345_v36, 12.0  ;;  %v6747_v35 = vsel %vm2319_vm3, %v6637_v17, 0.0  ;;  %v17347_v24 = vld [vmem:[#allocation141_spill] sm:$0xff]  ;;  %v17351_v17 = vld [vmem:[#allocation151_spill] sm:$0xff] }
 0x6bf   :  { %vm1166_vm9 = vmand %vm1038_vm15, %vm1102_vm0  ;;  %vm1103_vm12 = vcmp.lt.f32.partialorder %v17347_v24, 12.0  ;;  %v17349_v36 = vld [vmem:[#allocation145_spill] sm:$0xff]  ;;  %vm1041_vm8 = vcmp.lt.f32.partialorder %v17351_v17, 12.0 }
 0x6c0   :  { %v6944_v40 = vadd.f32 %v6943_v60, %v6942_v3  ;;  %v6748_v62 = vadd.f32 %v6747_v35, %v6746_v57  ;;  %vm1040_vm2 = vcmp.lt.f32.partialorder %v17349_v36, 12.0  ;;  %vm1167_vm11 = vmand %vm1039_vm10, %vm1103_vm12  ;;  %v17352_v57 = vld [vmem:[#allocation154_spill] sm:$0xff] }
 0x6c1   :  { %vm1105_vm1 = vcmp.lt.f32.partialorder %v17352_v57, 12.0 }
 0x6c2   :  { %v6946_v24 = vadd.f32 %v6945_v50, %v6944_v40  ;;  %vm1169_vm5 = vmand %vm1041_vm8, %vm1105_vm1  ;;  %v17355_v50 = vld [vmem:[#allocation144_spill] sm:$0xff] }
 0x6c3   :  { %vm1042_vm6 = vcmp.lt.f32.partialorder %v17355_v50, 12.0  ;;  %v17360_v50 = vld [vmem:[#allocation155_spill] sm:$0xff] }
 0x6c4   :  { %vm1044_vm10 = vcmp.lt.f32.partialorder %v17360_v50, 12.0 }
 0x6cf   :  { %v14488_v29 = vpop.f32.mrf.mxu1 }
 0x6d0   :  { %17329 = vst [vmem:[#allocation61_spill] sm:$0xff] %v14488_v29 }
 0x6d1   :  { %v14495_v26 = vpop.f32.mrf.mxu1 }
 0x6d2   :  { %17331 = vst [vmem:[#allocation121_spill] sm:$0xff] %v14495_v26  ;;  %v6638_v31 = vsel %vm1164_vm13, %v14495_v26, 0.0 }
 0x6d3   :  { %v14504_v47 = vpop.f32.mrf.mxu1  ;;  %v6836_v49 = vmul.f32 %v6638_v31, %v6638_v31  ;;  %v6749_v39 = vsel %vm2319_vm3, %v6638_v31, 0.0  ;;  %v6640_v31 = vsel %vm1166_vm9, %v14488_v29, 0.0 }
 0x6d4   :  { %17334 = vst [vmem:[#allocation130_spill] sm:$0xff] %v14504_v47  ;;  %v6750_v26 = vadd.f32 %v6749_v39, %v6748_v62  ;;  %v6838_v36 = vmul.f32 %v6640_v31, %v6640_v31  ;;  %v6641_v17 = vsel %vm1167_vm11, %v14504_v47, 0.0  ;;  %v6753_v13 = vsel %vm2319_vm3, %v6640_v31, 0.0  ;;  %v17358_v47 = vld [vmem:[#allocation147_spill] sm:$0xff] }
 0x6d5   :  { %v14516_v48 = vpop.f32.mrf.mxu1  ;;  %v6947_v3 = vsel %vm2319_vm3, %v6836_v49, 0.0 }
 0x6d6   :  { %17340 = vst [vmem:[#allocation72_spill] sm:$0xff] %v14516_v48  ;;  %v6639_v46 = vsel %vm1165_vm7, %v14516_v48, 0.0  ;;  %v17350_v48 = vld [vmem:[#allocation150_spill] sm:$0xff]  ;;  %v6948_v42 = vadd.f32 %v6947_v3, %v6946_v24  ;;  %v6839_v3 = vmul.f32 %v6641_v17, %v6641_v17  ;;  %vm1043_vm7 = vcmp.lt.f32.partialorder %v17358_v47, 12.0 }
 0x6d7   :  { %v6837_v41 = vmul.f32 %v6639_v46, %v6639_v46  ;;  %vm1104_vm4 = vcmp.lt.f32.partialorder %v17350_v48, 12.0  ;;  %v6751_v60 = vsel %vm2319_vm3, %v6639_v46, 0.0 }
 0x6d8   :  { %vm1168_vm14 = vmand %vm1040_vm2, %vm1104_vm4  ;;  %v6752_v49 = vadd.f32 %v6751_v60, %v6750_v26  ;;  %v6951_v26 = vsel %vm2319_vm3, %v6838_v36, 0.0  ;;  %v6953_v36 = vsel %vm2319_vm3, %v6839_v3, 0.0 }
 0x6d9   :  { %v6949_v35 = vsel %vm2319_vm3, %v6837_v41, 0.0  ;;  %v17356_v41 = vld [vmem:[#allocation149_spill] sm:$0xff] }
 0x6da   :  { %v6950_v39 = vadd.f32 %v6949_v35, %v6948_v42  ;;  %v6754_v62 = vadd.f32 %v6753_v13, %v6752_v49  ;;  %vm1106_vm13 = vcmp.lt.f32.partialorder %v17356_v41, 12.0  ;;  %v6755_v35 = vsel %vm2319_vm3, %v6641_v17, 0.0  ;;  %v17359_v42 = vld [vmem:[#allocation152_spill] sm:$0xff]  ;;  %v17361_v41 = vld [vmem:[#allocation158_spill] sm:$0xff] }
 0x6db   :  { %vm1170_vm15 = vmand %vm1042_vm6, %vm1106_vm13  ;;  %vm1107_vm0 = vcmp.lt.f32.partialorder %v17359_v42, 12.0  ;;  %vm1108_vm9 = vcmp.lt.f32.partialorder %v17361_v41, 12.0  ;;  %v17363_v17 = vld [vmem:[#allocation156_spill] sm:$0xff] }
 0x6dc   :  { %v6952_v29 = vadd.f32 %v6951_v26, %v6950_v39  ;;  %v6756_v13 = vadd.f32 %v6755_v35, %v6754_v62  ;;  %vm1045_vm12 = vcmp.lt.f32.partialorder %v17363_v17, 12.0  ;;  %vm1171_vm2 = vmand %vm1043_vm7, %vm1107_vm0  ;;  %v17364_v62 = vld [vmem:[#allocation160_spill] sm:$0xff] }
 0x6dd   :  { %vm1109_vm4 = vcmp.lt.f32.partialorder %v17364_v62, 12.0  ;;  %vm1172_vm8 = vmand %vm1044_vm10, %vm1108_vm9 }
 0x6de   :  { %v6954_v42 = vadd.f32 %v6953_v36, %v6952_v29  ;;  %vm1173_vm11 = vmand %vm1045_vm12, %vm1109_vm4  ;;  %v17367_v36 = vld [vmem:[#allocation162_spill] sm:$0xff] }
 0x6eb   :  { %v14523_v34 = vpop.f32.mrf.mxu1 }
 0x6ec   :  { %17342 = vst [vmem:[#allocation127_spill] sm:$0xff] %v14523_v34 }
 0x6ed   :  { %v14528_v43 = vpop.f32.mrf.mxu1 }
 0x6ee   :  { %17343 = vst [vmem:[#allocation95_spill] sm:$0xff] %v14528_v43  ;;  %v6642_v40 = vsel %vm1168_vm14, %v14528_v43, 0.0  ;;  %vm1110_vm14 = vcmp.lt.f32.partialorder %v17367_v36, 12.0 }
 0x6ef   :  { %v14538_v61 = vpop.f32.mrf.mxu1  ;;  %v6840_v60 = vmul.f32 %v6642_v40, %v6642_v40  ;;  %v6757_v31 = vsel %vm2319_vm3, %v6642_v40, 0.0  ;;  %v6644_v40 = vsel %vm1170_vm15, %v14523_v34, 0.0 }
 0x6f0   :  { %17348 = vst [vmem:[#allocation148_spill] sm:$0xff] %v14538_v61  ;;  %v6758_v43 = vadd.f32 %v6757_v31, %v6756_v13  ;;  %v6842_v50 = vmul.f32 %v6644_v40, %v6644_v40  ;;  %v6645_v41 = vsel %vm1171_vm2, %v14538_v61, 0.0  ;;  %v6761_v29 = vsel %vm2319_vm3, %v6644_v40, 0.0  ;;  %v17366_v13 = vld [vmem:[#allocation157_spill] sm:$0xff]  ;;  %v17368_v40 = vld [vmem:[#allocation159_spill] sm:$0xff] }
 0x6f1   :  { %v14551_v48 = vpop.f32.mrf.mxu1  ;;  %vm1046_vm1 = vcmp.lt.f32.partialorder %v17366_v13, 12.0  ;;  %v6763_v62 = vsel %vm2319_vm3, %v6645_v41, 0.0  ;;  %vm1047_vm6 = vcmp.lt.f32.partialorder %v17368_v40, 12.0 }
 0x6f2   :  { %17353 = vst [vmem:[#allocation7_spill] sm:$0xff] %v14551_v48  ;;  %v6643_v57 = vsel %vm1169_vm5, %v14551_v48, 0.0  ;;  %v6955_v48 = vsel %vm2319_vm3, %v6840_v60, 0.0  ;;  %vm1174_vm5 = vmand %vm1046_vm1, %vm1110_vm14 }
 0x6f3   :  { %v6841_v49 = vmul.f32 %v6643_v57, %v6643_v57  ;;  %v6759_v39 = vsel %vm2319_vm3, %v6643_v57, 0.0  ;;  %v6956_v3 = vadd.f32 %v6955_v48, %v6954_v42  ;;  %v6843_v48 = vmul.f32 %v6645_v41, %v6645_v41 }
 0x6f4   :  { %v6760_v60 = vadd.f32 %v6759_v39, %v6758_v43  ;;  %v6959_v43 = vsel %vm2319_vm3, %v6842_v50, 0.0 }
 0x6f5   :  { %v6957_v35 = vsel %vm2319_vm3, %v6841_v49, 0.0 }
 0x6f6   :  { %v6958_v17 = vadd.f32 %v6957_v35, %v6956_v3  ;;  %v6762_v47 = vadd.f32 %v6761_v29, %v6760_v60  ;;  %v17369_v60 = vld [vmem:[#allocation165_spill] sm:$0xff]  ;;  %v6961_v29 = vsel %vm2319_vm3, %v6843_v48, 0.0 }
 0x6f7   :  { %vm1111_vm13 = vcmp.lt.f32.partialorder %v17369_v60, 12.0 }
 0x6f8   :  { %v6960_v42 = vadd.f32 %v6959_v43, %v6958_v17  ;;  %vm1175_vm7 = vmand %vm1047_vm6, %vm1111_vm13 }
 0x6fa   :  { %v6962_v43 = vadd.f32 %v6961_v29, %v6960_v42 }
 0x707   :  { %v14553_v46 = vpop.f32.mrf.mxu1 }
 0x708   :  { %17354 = vst [vmem:[#allocation62_spill] sm:$0xff] %v14553_v46  ;;  %v6648_v36 = vsel %vm1174_vm5, %v14553_v46, 0.0 }
 0x709   :  { %v14562_v24 = vpop.f32.mrf.mxu1  ;;  %v6846_v40 = vmul.f32 %v6648_v36, %v6648_v36 }
 0x70a   :  { %17357 = vst [vmem:[#allocation123_spill] sm:$0xff] %v14562_v24  ;;  %v6646_v31 = vsel %vm1172_vm8, %v14562_v24, 0.0  ;;  %v6764_v24 = vadd.f32 %v6763_v62, %v6762_v47  ;;  %v17370_v47 = vld [vmem:[#allocation163_spill] sm:$0xff]  ;;  %v17371_v62 = vld [vmem:[#allocation168_spill] sm:$0xff] }
 0x70b   :  { %v14573_v26 = vpop.f32.mrf.mxu1  ;;  %v6844_v39 = vmul.f32 %v6646_v31, %v6646_v31  ;;  %v6765_v35 = vsel %vm2319_vm3, %v6646_v31, 0.0  ;;  %vm1048_vm15 = vcmp.lt.f32.partialorder %v17370_v47, 12.0  ;;  %vm1112_vm0 = vcmp.lt.f32.partialorder %v17371_v62, 12.0 }
 0x70c   :  { %17362 = vst [vmem:[#allocation161_spill] sm:$0xff] %v14573_v26  ;;  %v6766_v17 = vadd.f32 %v6765_v35, %v6764_v24  ;;  %v6649_v48 = vsel %vm1175_vm7, %v14573_v26, 0.0  ;;  %v6769_v24 = vsel %vm2319_vm3, %v6648_v36, 0.0  ;;  %vm1176_vm12 = vmand %vm1048_vm15, %vm1112_vm0  ;;  %v17375_v35 = vld [vmem:[#allocation166_spill] sm:$0xff] }
 0x70d   :  { %v14581_v57 = vpop.f32.mrf.mxu1  ;;  %v6963_v13 = vsel %vm2319_vm3, %v6844_v39, 0.0  ;;  %v17372_v39 = vld [vmem:[#allocation164_spill] sm:$0xff]  ;;  %vm1051_vm2 = vcmp.lt.f32.partialorder %v17375_v35, 12.0  ;;  %v6771_v47 = vsel %vm2319_vm3, %v6649_v48, 0.0 }
 0x70e   :  { %17365 = vst [vmem:[#allocation11_spill] sm:$0xff] %v14581_v57  ;;  %v6647_v49 = vsel %vm1173_vm11, %v14581_v57, 0.0  ;;  %v6964_v31 = vadd.f32 %v6963_v13, %v6962_v43  ;;  %vm1050_vm10 = vcmp.lt.f32.partialorder %v17372_v39, 12.0  ;;  %v17377_v13 = vld [vmem:[#allocation167_spill] sm:$0xff]  ;;  %v6847_v43 = vmul.f32 %v6649_v48, %v6649_v48 }
 0x70f   :  { %v6845_v3 = vmul.f32 %v6647_v49, %v6647_v49  ;;  %v6767_v50 = vsel %vm2319_vm3, %v6647_v49, 0.0  ;;  %v17373_v49 = vld [vmem:[#allocation169_spill] sm:$0xff]  ;;  %vm1049_vm8 = vcmp.lt.f32.partialorder %v17377_v13, 12.0 }
 0x710   :  { %v6768_v57 = vadd.f32 %v6767_v50, %v6766_v17  ;;  %vm1114_vm9 = vcmp.lt.f32.partialorder %v17373_v49, 12.0  ;;  %v17378_v50 = vld [vmem:[#allocation171_spill] sm:$0xff]  ;;  %v6967_v17 = vsel %vm2319_vm3, %v6846_v40, 0.0  ;;  %v6969_v40 = vsel %vm2319_vm3, %v6847_v43, 0.0 }
 0x711   :  { %v6965_v41 = vsel %vm2319_vm3, %v6845_v3, 0.0  ;;  %v17376_v3 = vld [vmem:[#allocation170_spill] sm:$0xff]  ;;  %vm1113_vm11 = vcmp.lt.f32.partialorder %v17378_v50, 12.0  ;;  %vm1178_vm1 = vmand %vm1050_vm10, %vm1114_vm9 }
 0x712   :  { %v6966_v60 = vadd.f32 %v6965_v41, %v6964_v31  ;;  %vm1115_vm4 = vcmp.lt.f32.partialorder %v17376_v3, 12.0  ;;  %v6770_v29 = vadd.f32 %v6769_v24, %v6768_v57  ;;  %vm1177_vm5 = vmand %vm1049_vm8, %vm1113_vm11 }
 0x713   :  { %vm1179_vm14 = vmand %vm1051_vm2, %vm1115_vm4 }
 0x714   :  { %v6968_v31 = vadd.f32 %v6967_v17, %v6966_v60  ;;  %v6772_v24 = vadd.f32 %v6771_v47, %v6770_v29 }
 0x716   :  { %v6970_v13 = vadd.f32 %v6969_v40, %v6968_v31 }
 0x723   :  { %v14605_v42 = vpop.f32.mrf.mxu1 }
 0x724   :  { %17374 = vst [vmem:[#allocation70_spill] sm:$0xff] %v14605_v42  ;;  %v6652_v49 = vsel %vm1178_vm1, %v14605_v42, 0.0 }
 0x725   :  { %v14612_v41 = vpop.f32.mrf.mxu1  ;;  %v6850_v17 = vmul.f32 %v6652_v49, %v6652_v49  ;;  %v6777_v29 = vsel %vm2319_vm3, %v6652_v49, 0.0 }
 0x726   :  { %17379 = vst [vmem:[#allocation173_spill] sm:$0xff] %v14612_v41  ;;  %v6650_v36 = vsel %vm1176_vm12, %v14612_v41, 0.0 }
 0x727   :  { %v6773_v62 = vsel %vm2319_vm3, %v6650_v36, 0.0  ;;  %v6848_v39 = vmul.f32 %v6650_v36, %v6650_v36  ;;  %v14617_v57 = vpop.f32.mrf.mxu1 }
 0x728   :  { %17380 = vst [vmem:[#allocation174_spill] sm:$0xff] %v14617_v57  ;;  %v6774_v60 = vadd.f32 %v6773_v62, %v6772_v24  ;;  %v6653_v50 = vsel %vm1179_vm14, %v14617_v57, 0.0  ;;  %v6975_v62 = vsel %vm2319_vm3, %v6850_v17, 0.0 }
 0x729   :  { %v6971_v35 = vsel %vm2319_vm3, %v6848_v39, 0.0  ;;  %v14622_v3 = vpop.f32.mrf.mxu1  ;;  %v6851_v47 = vmul.f32 %v6653_v50, %v6653_v50  ;;  %v6779_v31 = vsel %vm2319_vm3, %v6653_v50, 0.0 }
 0x72a   :  { %17381 = vst [vmem:[#allocation65_spill] sm:$0xff] %v14622_v3  ;;  %v6651_v48 = vsel %vm1177_vm5, %v14622_v3, 0.0  ;;  %v6972_v26 = vadd.f32 %v6971_v35, %v6970_v13 }
 0x72b   :  { %v6775_v36 = vsel %vm2319_vm3, %v6651_v48, 0.0  ;;  %v6849_v41 = vmul.f32 %v6651_v48, %v6651_v48  ;;  %v6977_v57 = vsel %vm2319_vm3, %v6851_v47, 0.0 }
 0x72c   :  { %v6776_v46 = vadd.f32 %v6775_v36, %v6774_v60 }
 0x72d   :  { %v6973_v43 = vsel %vm2319_vm3, %v6849_v41, 0.0 }
 0x72e   :  { %v6778_v39 = vadd.f32 %v6777_v29, %v6776_v46  ;;  %v6974_v42 = vadd.f32 %v6973_v43, %v6972_v26 }
 0x730   :  { %v6780_v24 = vadd.f32 %v6779_v31, %v6778_v39  ;;  %v6976_v40 = vadd.f32 %v6975_v62, %v6974_v42  ;;  %v17399_v62 = vld [vmem:[#allocation11_spill] sm:$0xff]  ;;  %v17405_v31 = vld [vmem:[#allocation174_spill] sm:$0xff] }
 0x732   :  { %v6781_v3 = vrot.slane %v6780_v24, 4  ;;  %v6978_v61 = vadd.f32 %v6977_v57, %v6976_v40  ;;  %v17403_v40 = vld [vmem:[#allocation65_spill] sm:$0xff] }
 0x734   :  { %v6782_v48 = vadd.f32 %v6781_v3, %v6780_v24  ;;  %v6979_v35 = vrot.slane %v6978_v61, 4  ;;  %v17402_v3 = vld [vmem:[#allocation173_spill] sm:$0xff]  ;;  %v17404_v24 = vld [vmem:[#allocation70_spill] sm:$0xff] }
 0x736   :  { %v6783_v60 = vrot.slane %v6782_v48, 2  ;;  %v6980_v13 = vadd.f32 %v6979_v35, %v6978_v61 }
 0x738   :  { %v6784_v49 = vadd.f32 %v6783_v60, %v6782_v48  ;;  %v6981_v36 = vrot.slane %v6980_v13, 2 }
 0x73a   :  { %v6785_v34 = vrot.slane %v6784_v49, 1  ;;  %v6982_v41 = vadd.f32 %v6981_v36, %v6980_v13  ;;  %v17395_v36 = vld [vmem:[#allocation7_spill] sm:$0xff] }
 0x73c   :  { %v6786_v46 = vadd.f32 %v6785_v34, %v6784_v49  ;;  %v6983_v26 = vrot.slane %v6982_v41, 1  ;;  %v17389_v49 = vld [vmem:[#allocation85_spill] sm:$0xff] }
 0x73d   :  { %v17401_v34 = vld [vmem:[#allocation161_spill] sm:$0xff] }
 0x73e   :  { %v14632_v29 = vmul.f32 0.0034722222, %v6786_v46  ;;  %v6984_v17 = vadd.f32 %v6983_v26, %v6982_v41  ;;  %v17382_v26 = vld [vmem:[#allocation104_spill] sm:$0xff]  ;;  %v17387_v46 = vld [vmem:[#allocation110_spill] sm:$0xff]  ;;  %v17388_v41 = vld [vmem:[#allocation49_spill] sm:$0xff] }
 0x740   :  { %v6985_v50 = vmul.f32 0.0034722222, %v6984_v17  ;;  %v6986_v42 = vmul.f32 %v14632_v29, %v14632_v29  ;;  %v17383_v17 = vld [vmem:[#allocation117_spill] sm:$0xff]  ;;  %v17406_v35 = vsub.f32 %v14138_v2, %v14632_v29  ;;  %v17407_v48 = vsub.f32 %v14142_v18, %v14632_v29 }
 0x741   :  { %v17408_v57 = vsub.f32 %v14133_v5, %v14632_v29  ;;  %v17409_v60 = vsub.f32 %v14140_v12, %v14632_v29 }
 0x742   :  { %v6987_v47 = vsub.f32 %v6985_v50, %v6986_v42  ;;  %v17384_v50 = vld [vmem:[#allocation133_spill] sm:$0xff]  ;;  %v17385_v42 = vld [vmem:[#allocation112_spill] sm:$0xff] }
 0x744   :  { %v7052_v39 = vadd.f32 1e-05, %v6987_v47 }
 0x746   :  { %7936 = vrsqrt.f32 %v7052_v39  ;;  %v17386_v39 = vld [vmem:[#allocation138_spill] sm:$0xff] }
 0x753   :  { %v14756_v13 = vpop.eup %7936 }
 0x754   :  { %v14770_v43 = vmul.f32 %v14756_v13, %v17406_v35  ;;  %v14776_v61 = vmul.f32 %v14756_v13, %v17407_v48  ;;  %v14782_v47 = vmul.f32 %v14756_v13, %v17408_v57  ;;  %v14788_v2 = vmul.f32 %v14756_v13, %v17409_v60 }
 0x755   :  { %v17410_v35 = vsub.f32 %v14146_v0, %v14632_v29  ;;  %v17411_v48 = vsub.f32 %v14165_v28, %v14632_v29  ;;  %v17412_v57 = vsub.f32 %v14144_v45, %v14632_v29  ;;  %v17413_v60 = vsub.f32 %v14155_v21, %v14632_v29 }
 0x757   :  { %v14794_v18 = vmul.f32 %v14756_v13, %v17410_v35  ;;  %v14800_v5 = vmul.f32 %v14756_v13, %v17411_v48  ;;  %v14806_v12 = vmul.f32 %v14756_v13, %v17412_v57  ;;  %v14812_v0 = vmul.f32 %v14756_v13, %v17413_v60 }
 0x758   :  { %v17414_v35 = vsub.f32 %v14176_v32, %v14632_v29  ;;  %v17415_v48 = vsub.f32 %v14184_v15, %v14632_v29  ;;  %v17416_v57 = vsub.f32 %v14171_v27, %v14632_v29  ;;  %v17417_v60 = vsub.f32 %v14178_v44, %v14632_v29 }
 0x75a   :  { %v14818_v28 = vmul.f32 %v14756_v13, %v17414_v35  ;;  %v14824_v45 = vmul.f32 %v14756_v13, %v17415_v48  ;;  %v14830_v21 = vmul.f32 %v14756_v13, %v17416_v57  ;;  %v14836_v32 = vmul.f32 %v14756_v13, %v17417_v60 }
 0x75b   :  { %v17418_v35 = vsub.f32 %v14194_v51, %v14632_v29  ;;  %v17419_v48 = vsub.f32 %v14210_v14, %v14632_v29  ;;  %v17420_v57 = vsub.f32 %v14186_v7, %v14632_v29  ;;  %v17421_v60 = vsub.f32 %v14204_v56, %v14632_v29 }
 0x75d   :  { %v14842_v15 = vmul.f32 %v14756_v13, %v17418_v35  ;;  %v14848_v27 = vmul.f32 %v14756_v13, %v17419_v48  ;;  %v14854_v44 = vmul.f32 %v14756_v13, %v17420_v57  ;;  %v14860_v51 = vmul.f32 %v14756_v13, %v17421_v60 }
 0x75e   :  { %v17422_v35 = vsub.f32 %v14228_v9, %v14632_v29  ;;  %v17423_v48 = vsub.f32 %v14244_v63, %v14632_v29  ;;  %v17424_v57 = vsub.f32 %v14216_v59, %v14632_v29  ;;  %v17425_v60 = vsub.f32 %v14235_v30, %v14632_v29 }
 0x760   :  { %v14866_v14 = vmul.f32 %v14756_v13, %v17422_v35  ;;  %v14872_v7 = vmul.f32 %v14756_v13, %v17423_v48  ;;  %v14878_v56 = vmul.f32 %v14756_v13, %v17424_v57  ;;  %v14884_v9 = vmul.f32 %v14756_v13, %v17425_v60 }
 0x761   :  { %v17426_v35 = vsub.f32 %v14263_v38, %v14632_v29  ;;  %v17427_v48 = vsub.f32 %v14278_v19, %v14632_v29  ;;  %v17428_v57 = vsub.f32 %v14250_v23, %v14632_v29  ;;  %v17429_v60 = vsub.f32 %v14268_v55, %v14632_v29 }
 0x763   :  { %v14890_v63 = vmul.f32 %v14756_v13, %v17426_v35  ;;  %v14896_v59 = vmul.f32 %v14756_v13, %v17427_v48  ;;  %v14902_v30 = vmul.f32 %v14756_v13, %v17428_v57  ;;  %v14908_v38 = vmul.f32 %v14756_v13, %v17429_v60 }
 0x764   :  { %v17430_v35 = vsub.f32 %v14293_v22, %v14632_v29  ;;  %v17431_v48 = vsub.f32 %v14314_v6, %v14632_v29  ;;  %v17432_v57 = vsub.f32 %v14286_v33, %v14632_v29  ;;  %v17433_v60 = vsub.f32 %v14302_v20, %v14632_v29 }
 0x766   :  { %v14914_v19 = vmul.f32 %v14756_v13, %v17430_v35  ;;  %v14920_v23 = vmul.f32 %v14756_v13, %v17431_v48  ;;  %v14926_v55 = vmul.f32 %v14756_v13, %v17432_v57  ;;  %v14932_v22 = vmul.f32 %v14756_v13, %v17433_v60 }
 0x767   :  { %v17434_v35 = vsub.f32 %v14326_v1, %v14632_v29  ;;  %v17435_v48 = vsub.f32 %v14349_v8, %v14632_v29  ;;  %v17436_v57 = vsub.f32 %v14321_v10, %v14632_v29  ;;  %v17437_v60 = vsub.f32 %v14336_v25, %v14632_v29 }
 0x769   :  { %v14938_v6 = vmul.f32 %v14756_v13, %v17434_v35  ;;  %v14944_v33 = vmul.f32 %v14756_v13, %v17435_v48  ;;  %v14950_v20 = vmul.f32 %v14756_v13, %v17436_v57  ;;  %v14956_v1 = vmul.f32 %v14756_v13, %v17437_v60 }
 0x76a   :  { %v17438_v35 = vsub.f32 %v14360_v54, %v14632_v29  ;;  %v17439_v48 = vsub.f32 %v14379_v4, %v14632_v29  ;;  %v17440_v57 = vsub.f32 %v14351_v52, %v14632_v29  ;;  %v17441_v60 = vsub.f32 %v14372_v16, %v14632_v29 }
 0x76c   :  { %v14962_v8 = vmul.f32 %v14756_v13, %v17438_v35  ;;  %v14968_v10 = vmul.f32 %v14756_v13, %v17439_v48  ;;  %v14974_v25 = vmul.f32 %v14756_v13, %v17440_v57  ;;  %v14980_v54 = vmul.f32 %v14756_v13, %v17441_v60 }
 0x76d   :  { %v17442_v35 = vsub.f32 %v14394_v11, %v14632_v29  ;;  %v17443_v48 = vsub.f32 %v14412_v58, %v14632_v29  ;;  %v17444_v57 = vsub.f32 %v17382_v26, %v14632_v29  ;;  %v17445_v60 = vsub.f32 %v17383_v17, %v14632_v29 }
 0x76f   :  { %v14986_v4 = vmul.f32 %v14756_v13, %v17442_v35  ;;  %v14992_v52 = vmul.f32 %v14756_v13, %v17443_v48  ;;  %v14998_v16 = vmul.f32 %v14756_v13, %v17444_v57  ;;  %v15004_v11 = vmul.f32 %v14756_v13, %v17445_v60 }
 0x770   :  { %v17446_v35 = vsub.f32 %v17384_v50, %v14632_v29  ;;  %v17447_v48 = vsub.f32 %v17385_v42, %v14632_v29  ;;  %v17448_v57 = vsub.f32 %v14418_v53, %v14632_v29  ;;  %v17449_v60 = vsub.f32 %v17386_v39, %v14632_v29 }
 0x772   :  { %v15010_v58 = vmul.f32 %v14756_v13, %v17446_v35  ;;  %v15016_v26 = vmul.f32 %v14756_v13, %v17447_v48  ;;  %v15022_v17 = vmul.f32 %v14756_v13, %v17448_v57  ;;  %v15028_v50 = vmul.f32 %v14756_v13, %v17449_v60 }
 0x773   :  { %v17450_v35 = vsub.f32 %v17387_v46, %v14632_v29  ;;  %v17452_v48 = vsub.f32 %v17388_v41, %v14632_v29  ;;  %v17454_v57 = vsub.f32 %v14452_v37, %v14632_v29  ;;  %v17456_v60 = vsub.f32 %v17389_v49, %v14632_v29 }
 0x775   :  { %v15034_v42 = vmul.f32 %v14756_v13, %v17450_v35  ;;  %v15040_v53 = vmul.f32 %v14756_v13, %v17452_v48  ;;  %v15046_v39 = vmul.f32 %v14756_v13, %v17454_v57  ;;  %v15052_v46 = vmul.f32 %v14756_v13, %v17456_v60  ;;  %v17458_v35 = vld [vmem:[#allocation121_spill] sm:$0xff]  ;;  %v17461_v48 = vld [vmem:[#allocation72_spill] sm:$0xff]  ;;  %v17466_v60 = vld [vmem:[#allocation130_spill] sm:$0xff] }
 0x776   :  { %v17463_v57 = vld [vmem:[#allocation61_spill] sm:$0xff] }
 0x777   :  { %17451 = vst [vmem:[#allocation172_spill] sm:$0xff] %v15034_v42  ;;  %17453 = vst [vmem:[#allocation67_spill] sm:$0xff] %v15040_v53  ;;  %v17459_v42 = vsub.f32 %v17458_v35, %v14632_v29  ;;  %v17462_v53 = vsub.f32 %v17461_v48, %v14632_v29 }
 0x778   :  { %17455 = vst [vmem:[#allocation58_spill] sm:$0xff] %v15046_v39  ;;  %17457 = vst [vmem:[#allocation74_spill] sm:$0xff] %v15052_v46  ;;  %v17464_v39 = vsub.f32 %v17463_v57, %v14632_v29  ;;  %v17467_v46 = vsub.f32 %v17466_v60, %v14632_v29 }
 0x779   :  { %v15058_v41 = vmul.f32 %v14756_v13, %v17459_v42  ;;  %v15064_v37 = vmul.f32 %v14756_v13, %v17462_v53  ;;  %v17469_v42 = vld [vmem:[#allocation95_spill] sm:$0xff]  ;;  %v17471_v53 = vsub.f32 %v17395_v36, %v14632_v29 }
 0x77a   :  { %v15070_v49 = vmul.f32 %v14756_v13, %v17464_v39  ;;  %v15076_v35 = vmul.f32 %v14756_v13, %v17467_v46  ;;  %v17473_v39 = vld [vmem:[#allocation127_spill] sm:$0xff]  ;;  %v17476_v46 = vld [vmem:[#allocation148_spill] sm:$0xff] }
 0x77b   :  { %17460 = vst [vmem:[#allocation54_spill] sm:$0xff] %v15058_v41  ;;  %v17470_v41 = vsub.f32 %v17469_v42, %v14632_v29  ;;  %v15088_v57 = vmul.f32 %v14756_v13, %v17471_v53  ;;  %v17479_v36 = vld [vmem:[#allocation123_spill] sm:$0xff] }
 0x77c   :  { %17465 = vst [vmem:[#allocation77_spill] sm:$0xff] %v15070_v49  ;;  %17468 = vst [vmem:[#allocation56_spill] sm:$0xff] %v15076_v35  ;;  %v17474_v49 = vsub.f32 %v17473_v39, %v14632_v29  ;;  %v17477_v35 = vsub.f32 %v17476_v46, %v14632_v29  ;;  %v17480_v53 = vsub.f32 %v17479_v36, %v14632_v29  ;;  %v17482_v46 = vld [vmem:[#allocation62_spill] sm:$0xff] }
 0x77d   :  { %v15082_v48 = vmul.f32 %v14756_v13, %v17470_v41  ;;  %17472 = vst [vmem:[#allocation37_spill] sm:$0xff] %v15088_v57  ;;  %v15105_v41 = vld [vmem:[%s15805_s5] ss:$0 sm:$0xff] }
 0x77e   :  { %v15094_v60 = vmul.f32 %v14756_v13, %v17474_v49  ;;  %v15100_v42 = vmul.f32 %v14756_v13, %v17477_v35  ;;  %v15111_v57 = vmul.f32 %v14756_v13, %v17480_v53  ;;  %v17481_v49 = vsub.f32 %v17399_v62, %v14632_v29 }
 0x77f   :  { %v17483_v35 = vsub.f32 %v17482_v46, %v14632_v29  ;;  %v17485_v53 = vsub.f32 %v17402_v3, %v14632_v29 }
 0x780   :  { %17475 = vst [vmem:[#allocation92_spill] sm:$0xff] %v15094_v60  ;;  %17478 = vst [vmem:[#allocation81_spill] sm:$0xff] %v15100_v42  ;;  %v15117_v39 = vmul.f32 %v14756_v13, %v17481_v49  ;;  %v17484_v60 = vsub.f32 %v17401_v34, %v14632_v29  ;;  %v17486_v49 = vsub.f32 %v17403_v40, %v14632_v29 }
 0x781   :  { %v15123_v42 = vmul.f32 %v14756_v13, %v17483_v35  ;;  %v15135_v62 = vmul.f32 %v14756_v13, %v17485_v53  ;;  %v17487_v35 = vsub.f32 %v17404_v24, %v14632_v29  ;;  %v15157_v53 = vmul.f32 %v15105_v41, %v14770_v43 }
 0x782   :  { %v15129_v36 = vmul.f32 %v14756_v13, %v17484_v60  ;;  %v15141_v46 = vmul.f32 %v14756_v13, %v17486_v49  ;;  %v17488_v60 = vsub.f32 %v17405_v31, %v14632_v29  ;;  %v15161_v40 = vmul.f32 %v15105_v41, %v14776_v61 }
 0x783   :  { %v15147_v34 = vmul.f32 %v14756_v13, %v17487_v35  ;;  %v15165_v24 = vmul.f32 %v15105_v41, %v14782_v47  ;;  %v15169_v49 = vmul.f32 %v15105_v41, %v14788_v2  ;;  %v15173_v29 = vmul.f32 %v15105_v41, %v14794_v18  ;;  %v17494_v35 = vld [vmem:[#allocation58_spill] sm:$0xff] }
 0x784   :  { %v15153_v3 = vmul.f32 %v14756_v13, %v17488_v60  ;;  %v15177_v43 = vmul.f32 %v15105_v41, %v14800_v5  ;;  %v15181_v61 = vmul.f32 %v15105_v41, %v14806_v12  ;;  %v15185_v31 = vmul.f32 %v15105_v41, %v14812_v0  ;;  %v17495_v60 = vld [vmem:[#allocation74_spill] sm:$0xff] }
 0x785   :  { %v15189_v13 = vmul.f32 %v15105_v41, %v14818_v28  ;;  %v15193_v47 = vmul.f32 %v15105_v41, %v14824_v45  ;;  %v15197_v2 = vmul.f32 %v15105_v41, %v14830_v21  ;;  %v15201_v18 = vmul.f32 %v15105_v41, %v14836_v32 }
 0x786   :  { %v15205_v5 = vmul.f32 %v15105_v41, %v14842_v15  ;;  %v15209_v12 = vmul.f32 %v15105_v41, %v14848_v27  ;;  %v15213_v0 = vmul.f32 %v15105_v41, %v14854_v44  ;;  %v15217_v28 = vmul.f32 %v15105_v41, %v14860_v51 }
 0x787   :  { %v15221_v45 = vmul.f32 %v15105_v41, %v14866_v14  ;;  %v15225_v21 = vmul.f32 %v15105_v41, %v14872_v7  ;;  %v15229_v32 = vmul.f32 %v15105_v41, %v14878_v56  ;;  %v15233_v15 = vmul.f32 %v15105_v41, %v14884_v9 }
 0x788   :  { %v15237_v27 = vmul.f32 %v15105_v41, %v14890_v63  ;;  %v15241_v44 = vmul.f32 %v15105_v41, %v14896_v59  ;;  %v15245_v51 = vmul.f32 %v15105_v41, %v14902_v30  ;;  %v15249_v14 = vmul.f32 %v15105_v41, %v14908_v38 }
 0x789   :  { %v15253_v7 = vmul.f32 %v15105_v41, %v14914_v19  ;;  %v15257_v56 = vmul.f32 %v15105_v41, %v14920_v23  ;;  %v15261_v9 = vmul.f32 %v15105_v41, %v14926_v55  ;;  %v15265_v63 = vmul.f32 %v15105_v41, %v14932_v22 }
 0x78a   :  { %v15269_v59 = vmul.f32 %v15105_v41, %v14938_v6  ;;  %v15273_v30 = vmul.f32 %v15105_v41, %v14944_v33  ;;  %v15277_v38 = vmul.f32 %v15105_v41, %v14950_v20  ;;  %v15281_v19 = vmul.f32 %v15105_v41, %v14956_v1 }
 0x78b   :  { %v15285_v23 = vmul.f32 %v15105_v41, %v14962_v8  ;;  %v15289_v55 = vmul.f32 %v15105_v41, %v14968_v10  ;;  %v15293_v22 = vmul.f32 %v15105_v41, %v14974_v25  ;;  %v15297_v6 = vmul.f32 %v15105_v41, %v14980_v54 }
 0x78c   :  { %v15301_v33 = vmul.f32 %v15105_v41, %v14986_v4  ;;  %v15305_v20 = vmul.f32 %v15105_v41, %v14992_v52  ;;  %v15309_v1 = vmul.f32 %v15105_v41, %v14998_v16  ;;  %v15313_v8 = vmul.f32 %v15105_v41, %v15004_v11  ;;  %v17490_v52 = vld [vmem:[#allocation172_spill] sm:$0xff]  ;;  %v17492_v11 = vld [vmem:[#allocation67_spill] sm:$0xff] }
 0x78d   :  { %v15317_v10 = vmul.f32 %v15105_v41, %v15010_v58  ;;  %v15321_v25 = vmul.f32 %v15105_v41, %v15016_v26  ;;  %v15325_v54 = vmul.f32 %v15105_v41, %v15022_v17  ;;  %v15329_v4 = vmul.f32 %v15105_v41, %v15028_v50 }
 0x78e   :  { %v15333_v16 = vmul.f32 %v15105_v41, %v17490_v52  ;;  %v15337_v58 = vmul.f32 %v15105_v41, %v17492_v11  ;;  %v15341_v26 = vmul.f32 %v15105_v41, %v17494_v35  ;;  %v15345_v17 = vmul.f32 %v15105_v41, %v17495_v60 }
 0x78f   :  { %17489 = vst [vmem:[#allocation88_spill] sm:$0xff] %v15325_v54  ;;  %v17497_v54 = vld [vmem:[#allocation54_spill] sm:$0xff]  ;;  %v15353_v52 = vmul.f32 %v15105_v41, %v15064_v37  ;;  %v15365_v60 = vmul.f32 %v15105_v41, %v15082_v48  ;;  %v15386_v48 = vmul.f32 %v15105_v41, %v15111_v57  ;;  %v15406_v57 = vmul.f32 %v15105_v41, %v15141_v46 }
 0x790   :  { %17491 = vst [vmem:[#allocation100_spill] sm:$0xff] %v15333_v16  ;;  %17493 = vst [vmem:[#allocation102_spill] sm:$0xff] %v15337_v58  ;;  %v15349_v50 = vmul.f32 %v15105_v41, %v17497_v54  ;;  %v17500_v16 = vld [vmem:[#allocation77_spill] sm:$0xff]  ;;  %v17501_v58 = vld [vmem:[#allocation56_spill] sm:$0xff] }
 0x791   :  { %17496 = vst [vmem:[#allocation106_spill] sm:$0xff] %v15345_v17  ;;  %17499 = vst [vmem:[#allocation80_spill] sm:$0xff] %v15353_v52  ;;  %v15357_v11 = vmul.f32 %v15105_v41, %v17500_v16  ;;  %v15361_v35 = vmul.f32 %v15105_v41, %v17501_v58  ;;  %v17502_v17 = vld [vmem:[#allocation37_spill] sm:$0xff]  ;;  %v15382_v58 = vld [vmem:[%s15806_s6] ss:$0 sm:$0xff] }
 0x792   :  { %17498 = vst [vmem:[#allocation115_spill] sm:$0xff] %v15349_v50  ;;  %v15369_v54 = vmul.f32 %v15105_v41, %v17502_v17  ;;  %v17503_v50 = vld [vmem:[#allocation92_spill] sm:$0xff]  ;;  %v17504_v52 = vld [vmem:[#allocation81_spill] sm:$0xff]  ;;  %v15390_v17 = vmul.f32 %v15105_v41, %v15117_v39  ;;  %v15410_v39 = vmul.f32 %v15105_v41, %v15147_v34  ;;  %v7199_v46 = vadd.f32 %v15382_v58, %v15169_v49 }
 0x793   :  { %v15373_v37 = vmul.f32 %v15105_v41, %v17503_v50  ;;  %v15377_v16 = vmul.f32 %v15105_v41, %v17504_v52  ;;  %v15394_v50 = vmul.f32 %v15105_v41, %v15123_v42  ;;  %v15398_v52 = vmul.f32 %v15105_v41, %v15129_v36 }
 0x794   :  { %17507 = vst [vmem:[#allocation93_spill] sm:$0xff] %v15410_v39  ;;  %v15414_v42 = vmul.f32 %v15105_v41, %v15153_v3  ;;  %v7196_v36 = vadd.f32 %v15382_v58, %v15157_v53  ;;  %v7200_v34 = vadd.f32 %v15382_v58, %v15173_v29  ;;  %v7201_v39 = vadd.f32 %v15382_v58, %v15177_v43 }
 0x795   :  { %17505 = vst [vmem:[#allocation143_spill] sm:$0xff] %v15377_v16  ;;  %17506 = vst [vmem:[#allocation153_spill] sm:$0xff] %v15398_v52  ;;  %v15402_v16 = vmul.f32 %v15105_v41, %v15135_v62  ;;  %v7197_v52 = vadd.f32 %v15382_v58, %v15161_v40  ;;  %v7198_v62 = vadd.f32 %v15382_v58, %v15165_v24 }
 0x796   :  { %v7202_v41 = vadd.f32 %v15382_v58, %v15181_v61  ;;  %v7203_v3 = vadd.f32 %v15382_v58, %v15185_v31  ;;  %v7204_v53 = vadd.f32 %v15382_v58, %v15189_v13  ;;  %v7205_v40 = vadd.f32 %v15382_v58, %v15193_v47  ;;  %7260 = vst.msk [vmem:[%s15807_s7] sm:$0xff] %vm2319_vm3, %v7196_v36 }
 0x797   :  { %v7206_v24 = vadd.f32 %v15382_v58, %v15197_v2  ;;  %v7207_v49 = vadd.f32 %v15382_v58, %v15201_v18  ;;  %7261 = vst.msk [vmem:[%s15807_s7 + $0x8] sm:$0xff] %vm2319_vm3, %v7197_v52  ;;  %7262 = vst.msk [vmem:[%s15807_s7 + $0x10] sm:$0xff] %vm2319_vm3, %v7198_v62  ;;  %v7208_v29 = vadd.f32 %v15382_v58, %v15205_v5 }
 0x798   :  { %7263 = vst.msk [vmem:[%s15807_s7 + $0x18] sm:$0xff] %vm2319_vm3, %v7199_v46  ;;  %v7209_v43 = vadd.f32 %v15382_v58, %v15209_v12  ;;  %v7210_v61 = vadd.f32 %v15382_v58, %v15213_v0  ;;  %v7211_v31 = vadd.f32 %v15382_v58, %v15217_v28  ;;  %7264 = vst.msk [vmem:[%s15807_s7 + $0x20] sm:$0xff] %vm2319_vm3, %v7200_v34  ;;  %v17513_v36 = vld [vmem:[#allocation80_spill] sm:$0xff] }
 0x799   :  { %7265 = vst.msk [vmem:[%s15807_s7 + $0x28] sm:$0xff] %vm2319_vm3, %v7201_v39  ;;  %7266 = vst.msk [vmem:[%s15807_s7 + $0x30] sm:$0xff] %vm2319_vm3, %v7202_v41  ;;  %v7212_v13 = vadd.f32 %v15382_v58, %v15221_v45  ;;  %v7213_v47 = vadd.f32 %v15382_v58, %v15225_v21  ;;  %v7214_v2 = vadd.f32 %v15382_v58, %v15229_v32 }
 0x79a   :  { %7267 = vst.msk [vmem:[%s15807_s7 + $0x38] sm:$0xff] %vm2319_vm3, %v7203_v3  ;;  %v7215_v18 = vadd.f32 %v15382_v58, %v15233_v15  ;;  %7268 = vst.msk [vmem:[%s15807_s7 + $0x40] sm:$0xff] %vm2319_vm3, %v7204_v53  ;;  %v7216_v5 = vadd.f32 %v15382_v58, %v15237_v27  ;;  %v7217_v12 = vadd.f32 %v15382_v58, %v15241_v44 }
 0x79b   :  { %7269 = vst.msk [vmem:[%s15807_s7 + $0x48] sm:$0xff] %vm2319_vm3, %v7205_v40  ;;  %7270 = vst.msk [vmem:[%s15807_s7 + $0x50] sm:$0xff] %vm2319_vm3, %v7206_v24  ;;  %v7218_v0 = vadd.f32 %v15382_v58, %v15245_v51  ;;  %v7219_v28 = vadd.f32 %v15382_v58, %v15249_v14  ;;  %v7220_v45 = vadd.f32 %v15382_v58, %v15253_v7 }
 0x79c   :  { %7271 = vst.msk [vmem:[%s15807_s7 + $0x58] sm:$0xff] %vm2319_vm3, %v7207_v49  ;;  %7272 = vst.msk [vmem:[%s15807_s7 + $0x60] sm:$0xff] %vm2319_vm3, %v7208_v29  ;;  %v7221_v21 = vadd.f32 %v15382_v58, %v15257_v56  ;;  %v7222_v32 = vadd.f32 %v15382_v58, %v15261_v9  ;;  %v7223_v15 = vadd.f32 %v15382_v58, %v15265_v63  ;;  %v17514_v3 = vld [vmem:[#allocation143_spill] sm:$0xff]  ;;  %v17515_v40 = vld [vmem:[#allocation153_spill] sm:$0xff] }
 0x79d   :  { %7273 = vst.msk [vmem:[%s15807_s7 + $0x68] sm:$0xff] %vm2319_vm3, %v7209_v43  ;;  %7274 = vst.msk [vmem:[%s15807_s7 + $0x70] sm:$0xff] %vm2319_vm3, %v7210_v61  ;;  %v7224_v27 = vadd.f32 %v15382_v58, %v15269_v59  ;;  %v7225_v44 = vadd.f32 %v15382_v58, %v15273_v30  ;;  %v7226_v51 = vadd.f32 %v15382_v58, %v15277_v38 }
 0x79e   :  { %7275 = vst.msk [vmem:[%s15807_s7 + $0x78] sm:$0xff] %vm2319_vm3, %v7211_v31  ;;  %7276 = vst.msk [vmem:[%s15807_s7 + $0x80] sm:$0xff] %vm2319_vm3, %v7212_v13  ;;  %v7227_v14 = vadd.f32 %v15382_v58, %v15281_v19  ;;  %v7228_v7 = vadd.f32 %v15382_v58, %v15285_v23  ;;  %v7229_v56 = vadd.f32 %v15382_v58, %v15289_v55 }
 0x79f   :  { %7277 = vst.msk [vmem:[%s15807_s7 + $0x88] sm:$0xff] %vm2319_vm3, %v7213_v47  ;;  %7278 = vst.msk [vmem:[%s15807_s7 + $0x90] sm:$0xff] %vm2319_vm3, %v7214_v2  ;;  %v7230_v9 = vadd.f32 %v15382_v58, %v15293_v22  ;;  %v7231_v63 = vadd.f32 %v15382_v58, %v15297_v6  ;;  %v7232_v59 = vadd.f32 %v15382_v58, %v15301_v33  ;;  %v17508_v22 = vld [vmem:[#allocation88_spill] sm:$0xff] }
 0x7a0   :  { %7279 = vst.msk [vmem:[%s15807_s7 + $0x98] sm:$0xff] %vm2319_vm3, %v7215_v18  ;;  %7280 = vst.msk [vmem:[%s15807_s7 + $0xa0] sm:$0xff] %vm2319_vm3, %v7216_v5  ;;  %v7233_v30 = vadd.f32 %v15382_v58, %v15305_v20  ;;  %v7234_v38 = vadd.f32 %v15382_v58, %v15309_v1  ;;  %v7235_v19 = vadd.f32 %v15382_v58, %v15313_v8  ;;  %v17509_v20 = vld [vmem:[#allocation100_spill] sm:$0xff]  ;;  %v17510_v8 = vld [vmem:[#allocation102_spill] sm:$0xff] }
 0x7a1   :  { %7281 = vst.msk [vmem:[%s15807_s7 + $0xa8] sm:$0xff] %vm2319_vm3, %v7217_v12  ;;  %7282 = vst.msk [vmem:[%s15807_s7 + $0xb0] sm:$0xff] %vm2319_vm3, %v7218_v0  ;;  %v7236_v23 = vadd.f32 %v15382_v58, %v15317_v10  ;;  %v7237_v55 = vadd.f32 %v15382_v58, %v15321_v25  ;;  %v7238_v6 = vadd.f32 %v15382_v58, %v17508_v22 }
 0x7a2   :  { %7283 = vst.msk [vmem:[%s15807_s7 + $0xb8] sm:$0xff] %vm2319_vm3, %v7219_v28  ;;  %7284 = vst.msk [vmem:[%s15807_s7 + $0xc0] sm:$0xff] %vm2319_vm3, %v7220_v45  ;;  %v7239_v33 = vadd.f32 %v15382_v58, %v15329_v4  ;;  %v7240_v1 = vadd.f32 %v15382_v58, %v17509_v20  ;;  %v7241_v10 = vadd.f32 %v15382_v58, %v17510_v8  ;;  %v17511_v4 = vld [vmem:[#allocation106_spill] sm:$0xff] }
 0x7a3   :  { %7285 = vst.msk [vmem:[%s15807_s7 + $0xc8] sm:$0xff] %vm2319_vm3, %v7221_v21  ;;  %7286 = vst.msk [vmem:[%s15807_s7 + $0xd0] sm:$0xff] %vm2319_vm3, %v7222_v32  ;;  %v7242_v25 = vadd.f32 %v15382_v58, %v15341_v26  ;;  %v7243_v52 = vadd.f32 %v15382_v58, %v17511_v4  ;;  %v17512_v26 = vld [vmem:[#allocation115_spill] sm:$0xff]  ;;  %v7245_v62 = vadd.f32 %v15382_v58, %v17513_v36 }
 0x7a4   :  { %7287 = vst.msk [vmem:[%s15807_s7 + $0xd8] sm:$0xff] %vm2319_vm3, %v7223_v15  ;;  %7288 = vst.msk [vmem:[%s15807_s7 + $0xe0] sm:$0xff] %vm2319_vm3, %v7224_v27  ;;  %v7244_v39 = vadd.f32 %v15382_v58, %v17512_v26  ;;  %v7246_v46 = vadd.f32 %v15382_v58, %v15357_v11  ;;  %v7247_v34 = vadd.f32 %v15382_v58, %v15361_v35 }
 0x7a5   :  { %7289 = vst.msk [vmem:[%s15807_s7 + $0xe8] sm:$0xff] %vm2319_vm3, %v7225_v44  ;;  %7290 = vst.msk [vmem:[%s15807_s7 + $0xf0] sm:$0xff] %vm2319_vm3, %v7226_v51  ;;  %v7248_v11 = vadd.f32 %v15382_v58, %v15365_v60  ;;  %v7249_v35 = vadd.f32 %v15382_v58, %v15369_v54  ;;  %v7250_v41 = vadd.f32 %v15382_v58, %v15373_v37 }
 0x7a6   :  { %7291 = vst.msk [vmem:[%s15807_s7 + $0xf8] sm:$0xff] %vm2319_vm3, %v7227_v14  ;;  %7292 = vst.msk [vmem:[%s15807_s7 + $0x100] sm:$0xff] %vm2319_vm3, %v7228_v7  ;;  %v7251_v53 = vadd.f32 %v15382_v58, %v17514_v3  ;;  %v7252_v60 = vadd.f32 %v15382_v58, %v15386_v48  ;;  %v7253_v54 = vadd.f32 %v15382_v58, %v15390_v17 }
 0x7a7   :  { %7293 = vst.msk [vmem:[%s15807_s7 + $0x108] sm:$0xff] %vm2319_vm3, %v7229_v56  ;;  %7294 = vst.msk [vmem:[%s15807_s7 + $0x110] sm:$0xff] %vm2319_vm3, %v7230_v9  ;;  %v7254_v37 = vadd.f32 %v15382_v58, %v15394_v50  ;;  %v7255_v24 = vadd.f32 %v15382_v58, %v17515_v40  ;;  %v7256_v48 = vadd.f32 %v15382_v58, %v15402_v16  ;;  %v17516_v50 = vld [vmem:[#allocation93_spill] sm:$0xff] }
 0x7a8   :  { %7295 = vst.msk [vmem:[%s15807_s7 + $0x118] sm:$0xff] %vm2319_vm3, %v7231_v63  ;;  %7296 = vst.msk [vmem:[%s15807_s7 + $0x120] sm:$0xff] %vm2319_vm3, %v7232_v59  ;;  %v7257_v17 = vadd.f32 %v15382_v58, %v15406_v57  ;;  %v7258_v49 = vadd.f32 %v15382_v58, %v17516_v50  ;;  %v7259_v29 = vadd.f32 %v15382_v58, %v15414_v42 }
 0x7a9   :  { %7297 = vst.msk [vmem:[%s15807_s7 + $0x128] sm:$0xff] %vm2319_vm3, %v7233_v30  ;;  %7298 = vst.msk [vmem:[%s15807_s7 + $0x130] sm:$0xff] %vm2319_vm3, %v7234_v38 }
 0x7aa   :  { %7299 = vst.msk [vmem:[%s15807_s7 + $0x138] sm:$0xff] %vm2319_vm3, %v7235_v19  ;;  %7300 = vst.msk [vmem:[%s15807_s7 + $0x140] sm:$0xff] %vm2319_vm3, %v7236_v23 }
 0x7ab   :  { %7301 = vst.msk [vmem:[%s15807_s7 + $0x148] sm:$0xff] %vm2319_vm3, %v7237_v55  ;;  %7302 = vst.msk [vmem:[%s15807_s7 + $0x150] sm:$0xff] %vm2319_vm3, %v7238_v6 }
 0x7ac   :  { %7303 = vst.msk [vmem:[%s15807_s7 + $0x158] sm:$0xff] %vm2319_vm3, %v7239_v33  ;;  %7304 = vst.msk [vmem:[%s15807_s7 + $0x160] sm:$0xff] %vm2319_vm3, %v7240_v1 }
 0x7ad   :  { %7305 = vst.msk [vmem:[%s15807_s7 + $0x168] sm:$0xff] %vm2319_vm3, %v7241_v10  ;;  %7306 = vst.msk [vmem:[%s15807_s7 + $0x170] sm:$0xff] %vm2319_vm3, %v7242_v25 }
 0x7ae   :  { %7307 = vst.msk [vmem:[%s15807_s7 + $0x178] sm:$0xff] %vm2319_vm3, %v7243_v52  ;;  %7308 = vst.msk [vmem:[%s15807_s7 + $0x180] sm:$0xff] %vm2319_vm3, %v7244_v39 }
 0x7af   :  { %7309 = vst.msk [vmem:[%s15807_s7 + $0x188] sm:$0xff] %vm2319_vm3, %v7245_v62  ;;  %7310 = vst.msk [vmem:[%s15807_s7 + $0x190] sm:$0xff] %vm2319_vm3, %v7246_v46 }
 0x7b0   :  { %7311 = vst.msk [vmem:[%s15807_s7 + $0x198] sm:$0xff] %vm2319_vm3, %v7247_v34  ;;  %7312 = vst.msk [vmem:[%s15807_s7 + $0x1a0] sm:$0xff] %vm2319_vm3, %v7248_v11 }
 0x7b1   :  { %7313 = vst.msk [vmem:[%s15807_s7 + $0x1a8] sm:$0xff] %vm2319_vm3, %v7249_v35  ;;  %7314 = vst.msk [vmem:[%s15807_s7 + $0x1b0] sm:$0xff] %vm2319_vm3, %v7250_v41 }
 0x7b2   :  { %7315 = vst.msk [vmem:[%s15807_s7 + $0x1b8] sm:$0xff] %vm2319_vm3, %v7251_v53  ;;  %7316 = vst.msk [vmem:[%s15807_s7 + $0x1c0] sm:$0xff] %vm2319_vm3, %v7252_v60 }
 0x7b3   :  { %7317 = vst.msk [vmem:[%s15807_s7 + $0x1c8] sm:$0xff] %vm2319_vm3, %v7253_v54  ;;  %7318 = vst.msk [vmem:[%s15807_s7 + $0x1d0] sm:$0xff] %vm2319_vm3, %v7254_v37 }
 0x7b4   :  { %7319 = vst.msk [vmem:[%s15807_s7 + $0x1d8] sm:$0xff] %vm2319_vm3, %v7255_v24  ;;  %7320 = vst.msk [vmem:[%s15807_s7 + $0x1e0] sm:$0xff] %vm2319_vm3, %v7256_v48 }
 0x7b5   :  { %7321 = vst.msk [vmem:[%s15807_s7 + $0x1e8] sm:$0xff] %vm2319_vm3, %v7257_v17  ;;  %7322 = vst.msk [vmem:[%s15807_s7 + $0x1f0] sm:$0xff] %vm2319_vm3, %v7258_v49 }
 0x7b6   :  { %7323 = vst.msk [vmem:[%s15807_s7 + $0x1f8] sm:$0xff] %vm2319_vm3, %v7259_v29 }

</bundles_post_ra>
